<compile_context>
chip_gen: v6e
topology: v6e:2x2x1
jax: 0.10.0
libtpu: 0.0.40
codegen_flags: <defaults>
</compile_context>

<pallas_src>
import functools

import jax
import jax.numpy as jnp
from jax import lax
from jax.experimental import pallas as pl
from jax.experimental.pallas import tpu as pltpu


def _round_up(x, m):
    return ((x + m - 1) // m) * m


def _vmem_limit_bytes():
    # Generation-aware scoped-VMEM ceiling: ~3/4 of physical, capped at 96 MiB.
    # v5e/v6e (128 MiB physical) -> 96 MiB; v7x (64 MiB physical) -> 48 MiB.
    try:
        cap = int(pltpu.get_tpu_info().vmem_capacity_bytes)
    except Exception:
        cap = 64 * 1024 * 1024
    return int(min(cap * 3 // 4, 96 * 1024 * 1024))


def _nearest_resize_mask(mask, out_hw):
    """torch F.interpolate(mode='nearest'): src = floor(dst * in / out).
    Tiny gather left to XLA (replaces the old one-hot-matmul Pallas kernel,
    which was <1% MXU-filled and cost an extra HBM round trip per layer)."""
    B, R, Hm, Wm = mask.shape
    Hf, Wf = out_hw
    if (Hf, Wf) == (Hm, Wm):
        return mask
    hi = jnp.minimum(jnp.arange(Hf) * Hm // Hf, Hm - 1)
    wi = jnp.minimum(jnp.arange(Wf) * Wm // Wf, Wm - 1)
    return mask[:, :, hi, :][:, :, :, wi]


# ---------------------------------------------------------------------------
# Fused masked-gram + MSE kernel.
# grid = (B, n_k):  batch axis "parallel" (megacore), HW contraction axis
# "arbitrary" (last).  Per-region A-matrix and mask-sum partials live in VMEM
# scratch; the (B,R,C,C) gram stacks never touch HBM.
# ---------------------------------------------------------------------------
def _region_gram_mse_kernel(x_ref, y_ref, m_ref, o_ref, gacc_ref, macc_ref, *,
                            eps, c_true):
    # x_ref/y_ref: (1, Cp, tk) bf16    m_ref: (1, R, tk) f32
    # o_ref: (1, 1, 1) f32
    # gacc_ref: (R, Cp, Cp) f32        macc_ref: (R, 1) f32
    k = pl.program_id(1)
    R = m_ref.shape[1]

    @pl.when(k == 0)
    def _init():
        gacc_ref[...] = jnp.zeros_like(gacc_ref)
        macc_ref[...] = jnp.zeros_like(macc_ref)

    # Elementwise path in f32 (v5e has no bf16 VALU); MXU inputs are bf16.
    x = x_ref[0].astype(jnp.float32)                       # (Cp, tk)
    y = y_ref[0].astype(jnp.float32)
    p = x + y                                              # (x*m + y*m) = (x+y)*m
    q = x - y                                              # (x*m - y*m) = (x-y)*m
    macc_ref[...] += jnp.sum(m_ref[0], axis=1, keepdims=True)   # (R, 1)

    nt = (((1,), (1,)), ((), ()))    # contract last dims -> MXU trans_b matmul
    for r in range(R):               # static unroll over regions
        mr = m_ref[0, pl.ds(r, 1), :]                      # (1, tk)
        pm = (p * mr).astype(jnp.bfloat16)
        qm = (q * mr).astype(jnp.bfloat16)
        # A_r = (xm+ym)(xm-ym)^T : ONE matmul per region instead of two grams.
        # TODO(synk): numerics degrade if x ~= y (cancellation in q); forward
        # loss tolerance (~1e-3 rel here) is fine, revisit if reused for grads.
        gacc_ref[r] += lax.dot_general(pm, qm, nt,
                                       preferred_element_type=jnp.float32)

    @pl.when(k == pl.num_programs(1) - 1)
    def _finalize():
        acc = jnp.zeros((1, 1), jnp.float32)
        for r in range(R):
            a = gacc_ref[r]                                # (Cp, Cp)
            at = jnp.transpose(a)                          # XLU, off the MXU path
            # A = S + K (S = gx-gy symmetric, K antisym) =>
            # ||gx-gy||_F^2 = 0.5 * (sum(A*A) + sum(A*A^T))
            t = a * a + a * at
            fro2 = 0.5 * jnp.sum(jnp.sum(t, axis=1, keepdims=True),
                                 axis=0, keepdims=True)    # (1, 1)
            msum = macc_ref[pl.ds(r, 1), :]                # (1, 1)
            inv = pl.reciprocal(c_true * (msum + eps), approx=True)
            acc = acc + fro2 * inv * inv
        o_ref[...] = jnp.reshape(acc, (1, 1, 1))


def masked_gram_mse_sum(x, y, m, *, c_true, eps, max_tk=2048):
    """Per batch element: sum_r ||Gx_r - Gy_r||_F^2 with
    G_r = (F*m_r)(F*m_r)^T / (c_true*(sum m_r + eps)).
    x, y: (B, Cp, HWp) bf16 (zero-padded); m: (B, R, HWp) f32."""
    B, Cp, HWp = x.shape
    R = m.shape[1]
    if HWp <= max_tk:
        tk, nk = HWp, 1
    else:
        assert HWp % max_tk == 0, "HW must be padded to a multiple of max_tk"
        tk, nk = max_tk, HWp // max_tk

    kernel = functools.partial(_region_gram_mse_kernel, eps=eps,
                               c_true=float(c_true))
    return pl.pallas_call(
        kernel,
        out_shape=jax.ShapeDtypeStruct((B, 1, 1), jnp.float32),
        grid_spec=pltpu.PrefetchScalarGridSpec(
            num_scalar_prefetch=0,
            grid=(B, nk),
            in_specs=[
                pl.BlockSpec((1, Cp, tk), lambda b, k: (b, 0, k)),
                pl.BlockSpec((1, Cp, tk), lambda b, k: (b, 0, k)),
                pl.BlockSpec((1, R, tk), lambda b, k: (b, 0, k)),
            ],
            out_specs=pl.BlockSpec((1, 1, 1), lambda b, k: (b, 0, 0)),
            scratch_shapes=[
                pltpu.VMEM((R, Cp, Cp), jnp.float32),   # per-region A accumulators
                pltpu.VMEM((R, 1), jnp.float32),        # per-region mask sums
            ],
        ),
        compiler_params=pltpu.CompilerParams(
            # TODO(synk): for B==1 (or odd B) on v7x, add a second parallel axis
            # (split regions across cores) so both TensorCores stay busy.
            dimension_semantics=("parallel", "arbitrary"),
            vmem_limit_bytes=_vmem_limit_bytes(),
        ),
    )(x, y, m)


# ---------------------------------------------------------------------------
# RegionStyleLoss.forward
# ---------------------------------------------------------------------------
def region_style_loss(x_feats, y_feats, mask, *, reg_num=None, eps=1e-8,
                      max_tk=2048):
    """x_feats / y_feats: lists of NCHW feature maps; mask: (B, reg_num, Hm, Wm).
    Only features [2:] contribute, exactly like the torch module."""
    if reg_num is None:
        reg_num = mask.shape[1]
    mask = mask[:, :reg_num]
    loss = jnp.zeros((), jnp.float32)
    for xf, yf in zip(x_feats[2:], y_feats[2:]):
        B, C, H, W = xf.shape
        HW = H * W
        tmp_mask = _nearest_resize_mask(mask, (H, W)).astype(jnp.float32)
        m2 = jnp.reshape(tmp_mask, (B, reg_num, HW))
        # bf16 features halve HBM->VMEM traffic; MXU accumulates in f32.
        x2 = jnp.reshape(xf, (B, C, HW)).astype(jnp.bfloat16)
        y2 = jnp.reshape(yf, (B, C, HW)).astype(jnp.bfloat16)  # detach() is a forward no-op
        # Pad channels to a multiple of 128 (lane-aligned grams, clean square
        # transposes, better MXU fill) and HW to a multiple of the K tile.
        # Zero feature rows / zero mask columns contribute nothing to the sums.
        Cp = _round_up(C, 128)
        HWp = HW if HW <= max_tk else _round_up(HW, max_tk)
        if Cp != C:
            x2 = jnp.pad(x2, ((0, 0), (0, Cp - C), (0, 0)))
            y2 = jnp.pad(y2, ((0, 0), (0, Cp - C), (0, 0)))
        if HWp != HW:
            x2 = jnp.pad(x2, ((0, 0), (0, 0), (0, HWp - HW)))
            y2 = jnp.pad(y2, ((0, 0), (0, 0), (0, HWp - HW)))
            m2 = jnp.pad(m2, ((0, 0), (0, 0), (0, HWp - HW)))
        per_b = masked_gram_mse_sum(x2, y2, m2, c_true=C, eps=eps, max_tk=max_tk)
        loss = loss + jnp.sum(per_b) / (B * reg_num * C * C)   # nn.MSELoss mean
    return loss


# ---------------------------------------------------------------------------
# Pure-JAX f32 reference (mirrors the torch module) for the correctness check.
# ---------------------------------------------------------------------------
def _reference_region_style_loss(x_feats, y_feats, mask, reg_num, eps):
    mask = mask[:, :reg_num].astype(jnp.float32)
    Hm, Wm = mask.shape[2], mask.shape[3]
    loss = jnp.zeros((), jnp.float32)
    for xf, yf in zip(x_feats[2:], y_feats[2:]):
        B, C, H, W = xf.shape
        hi = jnp.minimum(jnp.arange(H) * Hm // H, Hm - 1)
        wi = jnp.minimum(jnp.arange(W) * Wm // W, Wm - 1)
        tm = mask[:, :, hi, :][:, :, :, wi]
        m2 = tm.reshape(B, reg_num, H * W)
        x2 = xf.reshape(B, C, H * W).astype(jnp.float32)
        y2 = yf.reshape(B, C, H * W).astype(jnp.float32)

        def grams(f2):
            fm = f2[:, None, :, :] * m2[:, :, None, :]             # (B, R, C, HW)
            g = jnp.einsum("brck,brdk->brcd", fm, fm)
            denom = C * (jnp.sum(m2, axis=-1) + eps)               # (B, R)
            return g / denom[:, :, None, None]

        gx, gy = grams(x2), grams(y2)
        loss = loss + jnp.mean((gx - gy) ** 2)
    return loss


if __name__ == "__main__":
    key = jax.random.PRNGKey(0)
    kx, ky, km = jax.random.split(key, 3)

    B, reg_num = 2, 4
    # Small stand-ins for the 5 VGG feature maps (only the last 3 are used).
    feat_shapes = [(B, 8, 32, 32), (B, 16, 16, 16),
                   (B, 32, 16, 16), (B, 64, 8, 8), (B, 64, 4, 4)]
    xkeys = jax.random.split(kx, len(feat_shapes))
    ykeys = jax.random.split(ky, len(feat_shapes))
    x_feats = [jax.random.normal(k, s, jnp.float32) for k, s in zip(xkeys, feat_shapes)]
    y_feats = [jax.random.normal(k, s, jnp.float32) for k, s in zip(ykeys, feat_shapes)]

    # Region mask: one-hot region labels -> (B, reg_num, 16, 16)
    labels = jax.random.randint(km, (B, 16, 16), 0, reg_num)
    mask = jnp.transpose(jax.nn.one_hot(labels, reg_num, dtype=jnp.float32),
                         (0, 3, 1, 2))

    # max_tk=128 so the largest layer (HW=256) exercises the K-tiled
    # accumulate/finalize path even at these toy shapes.
    loss_fn = jax.jit(functools.partial(region_style_loss, reg_num=reg_num,
                                        eps=1e-8, max_tk=128))
    loss = jax.block_until_ready(loss_fn(x_feats, y_feats, mask))

    ref = jax.block_until_ready(
        _reference_region_style_loss(x_feats, y_feats, mask, reg_num, 1e-8))

    assert loss.shape == ()
    assert bool(jnp.isfinite(loss))
    # bf16 MXU inputs + (xm+ym)(xm-ym)^T rewrite + approx reciprocal change
    # numerics at the ~1e-3 relative level; 5e-2 relative leaves headroom.
    assert abs(float(loss) - float(ref)) <= 5e-2 * abs(float(ref)) + 1e-5, (loss, ref)
    print("KERNEL_OK")
</pallas_src>

<mosaic_0001>
module attributes {stable_mosaic.version = 11 : i64} {
  func.func @_region_gram_mse_kernel(%arg0: i32, %arg1: i32, %arg2: memref<1x128x128xbf16, #tpu.memory_space<vmem>>, %arg3: memref<1x128x128xbf16, #tpu.memory_space<vmem>>, %arg4: memref<1x4x128xf32, #tpu.memory_space<vmem>>, %arg5: memref<1x1x1xf32, #tpu.memory_space<vmem>>, %arg6: memref<4x128x128xf32, #tpu.memory_space<vmem>>, %arg7: memref<4x1xf32, #tpu.memory_space<vmem>>) attributes {dimension_semantics = [#tpu.dimension_semantics<parallel>, #tpu.dimension_semantics<arbitrary>], iteration_bounds = array<i64: 2, 2>, scalar_prefetch = 0 : i64, scratch_operands = 2 : i64, tpu.core_type = #tpu.core_type<tc>, window_params = [{transform_indices = @transform_0, window_bounds = array<i64: 1, 128, 128>}, {transform_indices = @transform_1, window_bounds = array<i64: 1, 128, 128>}, {transform_indices = @transform_2, window_bounds = array<i64: 1, 4, 128>}, {transform_indices = @transform_3, window_bounds = array<i64: 1, 1, 1>}]} {
    %c0_i32 = arith.constant 0 : i32
    %0 = arith.cmpi eq, %arg1, %c0_i32 : i32
    %1 = arith.extui %0 : i1 to i32
    %c0_i32_0 = arith.constant 0 : i32
    %2 = arith.cmpi ne, %1, %c0_i32_0 : i32
    scf.if %2 {
      %cst_51 = arith.constant 0.000000e+00 : f32
      %81 = vector.broadcast %cst_51 : f32 to vector<4x128x128xf32>
      %c0_52 = arith.constant 0 : index
      %c0_53 = arith.constant 0 : index
      %c0_54 = arith.constant 0 : index
      %82 = vector.load %arg6[%c0_52, %c0_53, %c0_54] : memref<4x128x128xf32, #tpu.memory_space<vmem>>, vector<4x128x128xf32>
      tpu.vector_store %arg6[%c0_52, %c0_53, %c0_54], %81 {strides = array<i32>} : memref<4x128x128xf32, #tpu.memory_space<vmem>>, vector<4x128x128xf32>,
      %cst_55 = arith.constant 0.000000e+00 : f32
      %83 = vector.broadcast %cst_55 : f32 to vector<4x1xf32>
      %c0_56 = arith.constant 0 : index
      %c0_57 = arith.constant 0 : index
      %84 = vector.load %arg7[%c0_56, %c0_57] : memref<4x1xf32, #tpu.memory_space<vmem>>, vector<4x1xf32>
      tpu.vector_store %arg7[%c0_56, %c0_57], %83 {strides = array<i32>} : memref<4x1xf32, #tpu.memory_space<vmem>>, vector<4x1xf32>,
    } else {
    }
    %c0 = arith.constant 0 : index
    %c0_1 = arith.constant 0 : index
    %c0_2 = arith.constant 0 : index
    %3 = vector.load %arg2[%c0, %c0_1, %c0_2] : memref<1x128x128xbf16, #tpu.memory_space<vmem>>, vector<1x128x128xbf16>
    %4 = vector.shape_cast %3 : vector<1x128x128xbf16> to vector<128x128xbf16>
    %5 = arith.extf %4 : vector<128x128xbf16> to vector<128x128xf32>
    %c0_3 = arith.constant 0 : index
    %c0_4 = arith.constant 0 : index
    %c0_5 = arith.constant 0 : index
    %6 = vector.load %arg3[%c0_3, %c0_4, %c0_5] : memref<1x128x128xbf16, #tpu.memory_space<vmem>>, vector<1x128x128xbf16>
    %7 = vector.shape_cast %6 : vector<1x128x128xbf16> to vector<128x128xbf16>
    %8 = arith.extf %7 : vector<128x128xbf16> to vector<128x128xf32>
    %9 = arith.addf %5, %8 : vector<128x128xf32>
    %10 = arith.subf %5, %8 : vector<128x128xf32>
    %c0_6 = arith.constant 0 : index
    %c0_7 = arith.constant 0 : index
    %11 = vector.load %arg7[%c0_6, %c0_7] : memref<4x1xf32, #tpu.memory_space<vmem>>, vector<4x1xf32>
    %c0_8 = arith.constant 0 : index
    %c0_9 = arith.constant 0 : index
    %c0_10 = arith.constant 0 : index
    %12 = vector.load %arg4[%c0_8, %c0_9, %c0_10] : memref<1x4x128xf32, #tpu.memory_space<vmem>>, vector<1x4x128xf32>
    %13 = vector.shape_cast %12 : vector<1x4x128xf32> to vector<4x128xf32>
    %cst = arith.constant dense<0.000000e+00> : vector<4xf32>
    %14 = vector.multi_reduction <add>, %13, %cst [1] : vector<4x128xf32> to vector<4xf32>
    %15 = vector.shape_cast %14 : vector<4xf32> to vector<4x1xf32>
    %16 = arith.addf %11, %15 : vector<4x1xf32>
    %c0_11 = arith.constant 0 : index
    %c0_12 = arith.constant 0 : index
    %17 = vector.load %arg7[%c0_11, %c0_12] : memref<4x1xf32, #tpu.memory_space<vmem>>, vector<4x1xf32>
    tpu.vector_store %arg7[%c0_11, %c0_12], %16 {strides = array<i32>} : memref<4x1xf32, #tpu.memory_space<vmem>>, vector<4x1xf32>,
    %c0_13 = arith.constant 0 : index
    %c0_14 = arith.constant 0 : index
    %c0_15 = arith.constant 0 : index
    %18 = vector.load %arg4[%c0_13, %c0_14, %c0_15] : memref<1x4x128xf32, #tpu.memory_space<vmem>>, vector<1x1x128xf32>
    %19 = vector.shape_cast %18 : vector<1x1x128xf32> to vector<1x128xf32>
    %20 = vector.broadcast %19 : vector<1x128xf32> to vector<128x128xf32>
    %21 = arith.mulf %9, %20 : vector<128x128xf32>
    %22 = arith.truncf %21 : vector<128x128xf32> to vector<128x128xbf16>
    %23 = vector.broadcast %19 : vector<1x128xf32> to vector<128x128xf32>
    %24 = arith.mulf %10, %23 : vector<128x128xf32>
    %25 = arith.truncf %24 : vector<128x128xf32> to vector<128x128xbf16>
    %c0_16 = arith.constant 0 : index
    %c0_17 = arith.constant 0 : index
    %c0_18 = arith.constant 0 : index
    %26 = vector.load %arg6[%c0_16, %c0_17, %c0_18] : memref<4x128x128xf32, #tpu.memory_space<vmem>>, vector<1x128x128xf32>
    %27 = vector.shape_cast %26 : vector<1x128x128xf32> to vector<128x128xf32>
    %cst_19 = arith.constant dense<0.000000e+00> : vector<128x128xf32>
    %28 = tpu.matmul %22, %25, %cst_19 {dimension_numbers = #tpu.dot_dimension_numbers<[1], [1], [0], [0], [0, 0, 1, 0], [], []>} : vector<128x128xbf16>, vector<128x128xbf16>, vector<128x128xf32> -> vector<128x128xf32>
    %29 = arith.addf %27, %28 : vector<128x128xf32>
    %c0_20 = arith.constant 0 : index
    %c0_21 = arith.constant 0 : index
    %c0_22 = arith.constant 0 : index
    %30 = vector.load %arg6[%c0_20, %c0_21, %c0_22] : memref<4x128x128xf32, #tpu.memory_space<vmem>>, vector<1x128x128xf32>
    %31 = vector.shape_cast %30 : vector<1x128x128xf32> to vector<128x128xf32>
    %32 = vector.shape_cast %29 : vector<128x128xf32> to vector<1x128x128xf32>
    tpu.vector_store %arg6[%c0_20, %c0_21, %c0_22], %32 {strides = array<i32>} : memref<4x128x128xf32, #tpu.memory_space<vmem>>, vector<1x128x128xf32>,
    %c0_23 = arith.constant 0 : index
    %c1 = arith.constant 1 : index
    %c0_24 = arith.constant 0 : index
    %33 = vector.load %arg4[%c0_23, %c1, %c0_24] : memref<1x4x128xf32, #tpu.memory_space<vmem>>, vector<1x1x128xf32>
    %34 = vector.shape_cast %33 : vector<1x1x128xf32> to vector<1x128xf32>
    %35 = vector.broadcast %34 : vector<1x128xf32> to vector<128x128xf32>
    %36 = arith.mulf %9, %35 : vector<128x128xf32>
    %37 = arith.truncf %36 : vector<128x128xf32> to vector<128x128xbf16>
    %38 = vector.broadcast %34 : vector<1x128xf32> to vector<128x128xf32>
    %39 = arith.mulf %10, %38 : vector<128x128xf32>
    %40 = arith.truncf %39 : vector<128x128xf32> to vector<128x128xbf16>
    %c1_25 = arith.constant 1 : index
    %c0_26 = arith.constant 0 : index
    %c0_27 = arith.constant 0 : index
    %41 = vector.load %arg6[%c1_25, %c0_26, %c0_27] : memref<4x128x128xf32, #tpu.memory_space<vmem>>, vector<1x128x128xf32>
    %42 = vector.shape_cast %41 : vector<1x128x128xf32> to vector<128x128xf32>
    %cst_28 = arith.constant dense<0.000000e+00> : vector<128x128xf32>
    %43 = tpu.matmul %37, %40, %cst_28 {dimension_numbers = #tpu.dot_dimension_numbers<[1], [1], [0], [0], [0, 0, 1, 0], [], []>} : vector<128x128xbf16>, vector<128x128xbf16>, vector<128x128xf32> -> vector<128x128xf32>
    %44 = arith.addf %42, %43 : vector<128x128xf32>
    %c1_29 = arith.constant 1 : index
    %c0_30 = arith.constant 0 : index
    %c0_31 = arith.constant 0 : index
    %45 = vector.load %arg6[%c1_29, %c0_30, %c0_31] : memref<4x128x128xf32, #tpu.memory_space<vmem>>, vector<1x128x128xf32>
    %46 = vector.shape_cast %45 : vector<1x128x128xf32> to vector<128x128xf32>
    %47 = vector.shape_cast %44 : vector<128x128xf32> to vector<1x128x128xf32>
    tpu.vector_store %arg6[%c1_29, %c0_30, %c0_31], %47 {strides = array<i32>} : memref<4x128x128xf32, #tpu.memory_space<vmem>>, vector<1x128x128xf32>,
    %c0_32 = arith.constant 0 : index
    %c2 = arith.constant 2 : index
    %c0_33 = arith.constant 0 : index
    %48 = vector.load %arg4[%c0_32, %c2, %c0_33] : memref<1x4x128xf32, #tpu.memory_space<vmem>>, vector<1x1x128xf32>
    %49 = vector.shape_cast %48 : vector<1x1x128xf32> to vector<1x128xf32>
    %50 = vector.broadcast %49 : vector<1x128xf32> to vector<128x128xf32>
    %51 = arith.mulf %9, %50 : vector<128x128xf32>
    %52 = arith.truncf %51 : vector<128x128xf32> to vector<128x128xbf16>
    %53 = vector.broadcast %49 : vector<1x128xf32> to vector<128x128xf32>
    %54 = arith.mulf %10, %53 : vector<128x128xf32>
    %55 = arith.truncf %54 : vector<128x128xf32> to vector<128x128xbf16>
    %c2_34 = arith.constant 2 : index
    %c0_35 = arith.constant 0 : index
    %c0_36 = arith.constant 0 : index
    %56 = vector.load %arg6[%c2_34, %c0_35, %c0_36] : memref<4x128x128xf32, #tpu.memory_space<vmem>>, vector<1x128x128xf32>
    %57 = vector.shape_cast %56 : vector<1x128x128xf32> to vector<128x128xf32>
    %cst_37 = arith.constant dense<0.000000e+00> : vector<128x128xf32>
    %58 = tpu.matmul %52, %55, %cst_37 {dimension_numbers = #tpu.dot_dimension_numbers<[1], [1], [0], [0], [0, 0, 1, 0], [], []>} : vector<128x128xbf16>, vector<128x128xbf16>, vector<128x128xf32> -> vector<128x128xf32>
    %59 = arith.addf %57, %58 : vector<128x128xf32>
    %c2_38 = arith.constant 2 : index
    %c0_39 = arith.constant 0 : index
    %c0_40 = arith.constant 0 : index
    %60 = vector.load %arg6[%c2_38, %c0_39, %c0_40] : memref<4x128x128xf32, #tpu.memory_space<vmem>>, vector<1x128x128xf32>
    %61 = vector.shape_cast %60 : vector<1x128x128xf32> to vector<128x128xf32>
    %62 = vector.shape_cast %59 : vector<128x128xf32> to vector<1x128x128xf32>
    tpu.vector_store %arg6[%c2_38, %c0_39, %c0_40], %62 {strides = array<i32>} : memref<4x128x128xf32, #tpu.memory_space<vmem>>, vector<1x128x128xf32>,
    %c0_41 = arith.constant 0 : index
    %c3 = arith.constant 3 : index
    %c0_42 = arith.constant 0 : index
    %63 = vector.load %arg4[%c0_41, %c3, %c0_42] : memref<1x4x128xf32, #tpu.memory_space<vmem>>, vector<1x1x128xf32>
    %64 = vector.shape_cast %63 : vector<1x1x128xf32> to vector<1x128xf32>
    %65 = vector.broadcast %64 : vector<1x128xf32> to vector<128x128xf32>
    %66 = arith.mulf %9, %65 : vector<128x128xf32>
    %67 = arith.truncf %66 : vector<128x128xf32> to vector<128x128xbf16>
    %68 = vector.broadcast %64 : vector<1x128xf32> to vector<128x128xf32>
    %69 = arith.mulf %10, %68 : vector<128x128xf32>
    %70 = arith.truncf %69 : vector<128x128xf32> to vector<128x128xbf16>
    %c3_43 = arith.constant 3 : index
    %c0_44 = arith.constant 0 : index
    %c0_45 = arith.constant 0 : index
    %71 = vector.load %arg6[%c3_43, %c0_44, %c0_45] : memref<4x128x128xf32, #tpu.memory_space<vmem>>, vector<1x128x128xf32>
    %72 = vector.shape_cast %71 : vector<1x128x128xf32> to vector<128x128xf32>
    %cst_46 = arith.constant dense<0.000000e+00> : vector<128x128xf32>
    %73 = tpu.matmul %67, %70, %cst_46 {dimension_numbers = #tpu.dot_dimension_numbers<[1], [1], [0], [0], [0, 0, 1, 0], [], []>} : vector<128x128xbf16>, vector<128x128xbf16>, vector<128x128xf32> -> vector<128x128xf32>
    %74 = arith.addf %72, %73 : vector<128x128xf32>
    %c3_47 = arith.constant 3 : index
    %c0_48 = arith.constant 0 : index
    %c0_49 = arith.constant 0 : index
    %75 = vector.load %arg6[%c3_47, %c0_48, %c0_49] : memref<4x128x128xf32, #tpu.memory_space<vmem>>, vector<1x128x128xf32>
    %76 = vector.shape_cast %75 : vector<1x128x128xf32> to vector<128x128xf32>
    %77 = vector.shape_cast %74 : vector<128x128xf32> to vector<1x128x128xf32>
    tpu.vector_store %arg6[%c3_47, %c0_48, %c0_49], %77 {strides = array<i32>} : memref<4x128x128xf32, #tpu.memory_space<vmem>>, vector<1x128x128xf32>,
    %c1_i32 = arith.constant 1 : i32
    %78 = arith.cmpi eq, %arg1, %c1_i32 : i32
    %79 = arith.extui %78 : i1 to i32
    %c0_i32_50 = arith.constant 0 : i32
    %80 = arith.cmpi ne, %79, %c0_i32_50 : i32
    scf.if %80 {
      %cst_51 = arith.constant 0.000000e+00 : f32
      %81 = vector.broadcast %cst_51 : f32 to vector<1x1xf32>
      %c0_52 = arith.constant 0 : index
      %c0_53 = arith.constant 0 : index
      %c0_54 = arith.constant 0 : index
      %82 = vector.load %arg6[%c0_52, %c0_53, %c0_54] : memref<4x128x128xf32, #tpu.memory_space<vmem>>, vector<1x128x128xf32>
      %83 = vector.shape_cast %82 : vector<1x128x128xf32> to vector<128x128xf32>
      %84 = tpu.transpose %83, [1, 0] : vector<128x128xf32> -> vector<128x128xf32>
      %85 = arith.mulf %83, %83 : vector<128x128xf32>
      %86 = arith.mulf %83, %84 : vector<128x128xf32>
      %87 = arith.addf %85, %86 : vector<128x128xf32>
      %cst_55 = arith.constant dense<0.000000e+00> : vector<128xf32>
      %88 = vector.multi_reduction <add>, %87, %cst_55 [1] : vector<128x128xf32> to vector<128xf32>
      %89 = vector.shape_cast %88 : vector<128xf32> to vector<128x1xf32>
      %cst_56 = arith.constant dense<0.000000e+00> : vector<1xf32>
      %90 = vector.multi_reduction <add>, %89, %cst_56 [0] : vector<128x1xf32> to vector<1xf32>
      %91 = vector.shape_cast %90 : vector<1xf32> to vector<1x1xf32>
      %cst_57 = arith.constant 5.000000e-01 : f32
      %92 = vector.broadcast %cst_57 : f32 to vector<1x1xf32>
      %93 = arith.mulf %92, %91 : vector<1x1xf32>
      %c0_58 = arith.constant 0 : index
      %c0_59 = arith.constant 0 : index
      %94 = vector.load %arg7[%c0_58, %c0_59] : memref<4x1xf32, #tpu.memory_space<vmem>>, vector<1x1xf32>
      %cst_60 = arith.constant 9.99999993E-9 : f32
      %95 = vector.broadcast %cst_60 : f32 to vector<1x1xf32>
      %96 = arith.addf %94, %95 : vector<1x1xf32>
      %cst_61 = arith.constant 3.200000e+01 : f32
      %97 = vector.broadcast %cst_61 : f32 to vector<1x1xf32>
      %98 = arith.mulf %97, %96 : vector<1x1xf32>
      %99 = tpu.reciprocal %98 {approx = true} : vector<1x1xf32> -> vector<1x1xf32>
      %100 = arith.mulf %93, %99 : vector<1x1xf32>
      %101 = arith.mulf %100, %99 : vector<1x1xf32>
      %102 = arith.addf %81, %101 : vector<1x1xf32>
      %c1_62 = arith.constant 1 : index
      %c0_63 = arith.constant 0 : index
      %c0_64 = arith.constant 0 : index
      %103 = vector.load %arg6[%c1_62, %c0_63, %c0_64] : memref<4x128x128xf32, #tpu.memory_space<vmem>>, vector<1x128x128xf32>
      %104 = vector.shape_cast %103 : vector<1x128x128xf32> to vector<128x128xf32>
      %105 = tpu.transpose %104, [1, 0] : vector<128x128xf32> -> vector<128x128xf32>
      %106 = arith.mulf %104, %104 : vector<128x128xf32>
      %107 = arith.mulf %104, %105 : vector<128x128xf32>
      %108 = arith.addf %106, %107 : vector<128x128xf32>
      %cst_65 = arith.constant dense<0.000000e+00> : vector<128xf32>
      %109 = vector.multi_reduction <add>, %108, %cst_65 [1] : vector<128x128xf32> to vector<128xf32>
      %110 = vector.shape_cast %109 : vector<128xf32> to vector<128x1xf32>
      %cst_66 = arith.constant dense<0.000000e+00> : vector<1xf32>
      %111 = vector.multi_reduction <add>, %110, %cst_66 [0] : vector<128x1xf32> to vector<1xf32>
      %112 = vector.shape_cast %111 : vector<1xf32> to vector<1x1xf32>
      %cst_67 = arith.constant 5.000000e-01 : f32
      %113 = vector.broadcast %cst_67 : f32 to vector<1x1xf32>
      %114 = arith.mulf %113, %112 : vector<1x1xf32>
      %c1_68 = arith.constant 1 : index
      %c0_69 = arith.constant 0 : index
      %115 = vector.load %arg7[%c1_68, %c0_69] : memref<4x1xf32, #tpu.memory_space<vmem>>, vector<1x1xf32>
      %cst_70 = arith.constant 9.99999993E-9 : f32
      %116 = vector.broadcast %cst_70 : f32 to vector<1x1xf32>
      %117 = arith.addf %115, %116 : vector<1x1xf32>
      %cst_71 = arith.constant 3.200000e+01 : f32
      %118 = vector.broadcast %cst_71 : f32 to vector<1x1xf32>
      %119 = arith.mulf %118, %117 : vector<1x1xf32>
      %120 = tpu.reciprocal %119 {approx = true} : vector<1x1xf32> -> vector<1x1xf32>
      %121 = arith.mulf %114, %120 : vector<1x1xf32>
      %122 = arith.mulf %121, %120 : vector<1x1xf32>
      %123 = arith.addf %102, %122 : vector<1x1xf32>
      %c2_72 = arith.constant 2 : index
      %c0_73 = arith.constant 0 : index
      %c0_74 = arith.constant 0 : index
      %124 = vector.load %arg6[%c2_72, %c0_73, %c0_74] : memref<4x128x128xf32, #tpu.memory_space<vmem>>, vector<1x128x128xf32>
      %125 = vector.shape_cast %124 : vector<1x128x128xf32> to vector<128x128xf32>
      %126 = tpu.transpose %125, [1, 0] : vector<128x128xf32> -> vector<128x128xf32>
      %127 = arith.mulf %125, %125 : vector<128x128xf32>
      %128 = arith.mulf %125, %126 : vector<128x128xf32>
      %129 = arith.addf %127, %128 : vector<128x128xf32>
      %cst_75 = arith.constant dense<0.000000e+00> : vector<128xf32>
      %130 = vector.multi_reduction <add>, %129, %cst_75 [1] : vector<128x128xf32> to vector<128xf32>
      %131 = vector.shape_cast %130 : vector<128xf32> to vector<128x1xf32>
      %cst_76 = arith.constant dense<0.000000e+00> : vector<1xf32>
      %132 = vector.multi_reduction <add>, %131, %cst_76 [0] : vector<128x1xf32> to vector<1xf32>
      %133 = vector.shape_cast %132 : vector<1xf32> to vector<1x1xf32>
      %cst_77 = arith.constant 5.000000e-01 : f32
      %134 = vector.broadcast %cst_77 : f32 to vector<1x1xf32>
      %135 = arith.mulf %134, %133 : vector<1x1xf32>
      %c2_78 = arith.constant 2 : index
      %c0_79 = arith.constant 0 : index
      %136 = vector.load %arg7[%c2_78, %c0_79] : memref<4x1xf32, #tpu.memory_space<vmem>>, vector<1x1xf32>
      %cst_80 = arith.constant 9.99999993E-9 : f32
      %137 = vector.broadcast %cst_80 : f32 to vector<1x1xf32>
      %138 = arith.addf %136, %137 : vector<1x1xf32>
      %cst_81 = arith.constant 3.200000e+01 : f32
      %139 = vector.broadcast %cst_81 : f32 to vector<1x1xf32>
      %140 = arith.mulf %139, %138 : vector<1x1xf32>
      %141 = tpu.reciprocal %140 {approx = true} : vector<1x1xf32> -> vector<1x1xf32>
      %142 = arith.mulf %135, %141 : vector<1x1xf32>
      %143 = arith.mulf %142, %141 : vector<1x1xf32>
      %144 = arith.addf %123, %143 : vector<1x1xf32>
      %c3_82 = arith.constant 3 : index
      %c0_83 = arith.constant 0 : index
      %c0_84 = arith.constant 0 : index
      %145 = vector.load %arg6[%c3_82, %c0_83, %c0_84] : memref<4x128x128xf32, #tpu.memory_space<vmem>>, vector<1x128x128xf32>
      %146 = vector.shape_cast %145 : vector<1x128x128xf32> to vector<128x128xf32>
      %147 = tpu.transpose %146, [1, 0] : vector<128x128xf32> -> vector<128x128xf32>
      %148 = arith.mulf %146, %146 : vector<128x128xf32>
      %149 = arith.mulf %146, %147 : vector<128x128xf32>
      %150 = arith.addf %148, %149 : vector<128x128xf32>
      %cst_85 = arith.constant dense<0.000000e+00> : vector<128xf32>
      %151 = vector.multi_reduction <add>, %150, %cst_85 [1] : vector<128x128xf32> to vector<128xf32>
      %152 = vector.shape_cast %151 : vector<128xf32> to vector<128x1xf32>
      %cst_86 = arith.constant dense<0.000000e+00> : vector<1xf32>
      %153 = vector.multi_reduction <add>, %152, %cst_86 [0] : vector<128x1xf32> to vector<1xf32>
      %154 = vector.shape_cast %153 : vector<1xf32> to vector<1x1xf32>
      %cst_87 = arith.constant 5.000000e-01 : f32
      %155 = vector.broadcast %cst_87 : f32 to vector<1x1xf32>
      %156 = arith.mulf %155, %154 : vector<1x1xf32>
      %c3_88 = arith.constant 3 : index
      %c0_89 = arith.constant 0 : index
      %157 = vector.load %arg7[%c3_88, %c0_89] : memref<4x1xf32, #tpu.memory_space<vmem>>, vector<1x1xf32>
      %cst_90 = arith.constant 9.99999993E-9 : f32
      %158 = vector.broadcast %cst_90 : f32 to vector<1x1xf32>
      %159 = arith.addf %157, %158 : vector<1x1xf32>
      %cst_91 = arith.constant 3.200000e+01 : f32
      %160 = vector.broadcast %cst_91 : f32 to vector<1x1xf32>
      %161 = arith.mulf %160, %159 : vector<1x1xf32>
      %162 = tpu.reciprocal %161 {approx = true} : vector<1x1xf32> -> vector<1x1xf32>
      %163 = arith.mulf %156, %162 : vector<1x1xf32>
      %164 = arith.mulf %163, %162 : vector<1x1xf32>
      %165 = arith.addf %144, %164 : vector<1x1xf32>
      %166 = vector.shape_cast %165 : vector<1x1xf32> to vector<1x1x1xf32>
      %c0_92 = arith.constant 0 : index
      %c0_93 = arith.constant 0 : index
      %c0_94 = arith.constant 0 : index
      %167 = vector.load %arg5[%c0_92, %c0_93, %c0_94] : memref<1x1x1xf32, #tpu.memory_space<vmem>>, vector<1x1x1xf32>
      tpu.vector_store %arg5[%c0_92, %c0_93, %c0_94], %166 {strides = array<i32>} : memref<1x1x1xf32, #tpu.memory_space<vmem>>, vector<1x1x1xf32>,
    } else {
    }
    return
  }
  func.func @transform_0(%arg0: i32, %arg1: i32) -> (i32, i32, i32) {
    %c0_i32 = arith.constant 0 : i32
    %c0_i32_0 = arith.constant 0 : i32
    return %arg0, %c0_i32, %arg1 : i32, i32, i32
  }
  func.func @transform_1(%arg0: i32, %arg1: i32) -> (i32, i32, i32) {
    %c0_i32 = arith.constant 0 : i32
    %c0_i32_0 = arith.constant 0 : i32
    return %arg0, %c0_i32, %arg1 : i32, i32, i32
  }
  func.func @transform_2(%arg0: i32, %arg1: i32) -> (i32, i32, i32) {
    %c0_i32 = arith.constant 0 : i32
    %c0_i32_0 = arith.constant 0 : i32
    return %arg0, %c0_i32, %arg1 : i32, i32, i32
  }
  func.func @transform_3(%arg0: i32, %arg1: i32) -> (i32, i32, i32) {
    %c0_i32 = arith.constant 0 : i32
    %c0_i32_0 = arith.constant 0 : i32
    %c0_i32_1 = arith.constant 0 : i32
    return %arg0, %c0_i32, %c0_i32_0 : i32, i32, i32
  }
}

module attributes {stable_mosaic.version = 11 : i64} {
  func.func @_region_gram_mse_kernel(%arg0: i32, %arg1: i32, %arg2: memref<1x128x64xbf16, #tpu.memory_space<vmem>>, %arg3: memref<1x128x64xbf16, #tpu.memory_space<vmem>>, %arg4: memref<1x4x64xf32, #tpu.memory_space<vmem>>, %arg5: memref<1x1x1xf32, #tpu.memory_space<vmem>>, %arg6: memref<4x128x128xf32, #tpu.memory_space<vmem>>, %arg7: memref<4x1xf32, #tpu.memory_space<vmem>>) attributes {dimension_semantics = [#tpu.dimension_semantics<parallel>, #tpu.dimension_semantics<arbitrary>], iteration_bounds = array<i64: 2, 1>, scalar_prefetch = 0 : i64, scratch_operands = 2 : i64, tpu.core_type = #tpu.core_type<tc>, window_params = [{transform_indices = @transform_0, window_bounds = array<i64: 1, 128, 64>}, {transform_indices = @transform_1, window_bounds = array<i64: 1, 128, 64>}, {transform_indices = @transform_2, window_bounds = array<i64: 1, 4, 64>}, {transform_indices = @transform_3, window_bounds = array<i64: 1, 1, 1>}]} {
    %c0_i32 = arith.constant 0 : i32
    %0 = arith.cmpi eq, %arg1, %c0_i32 : i32
    %1 = arith.extui %0 : i1 to i32
    %c0_i32_0 = arith.constant 0 : i32
    %2 = arith.cmpi ne, %1, %c0_i32_0 : i32
    scf.if %2 {
      %cst_52 = arith.constant 0.000000e+00 : f32
      %81 = vector.broadcast %cst_52 : f32 to vector<4x128x128xf32>
      %c0_53 = arith.constant 0 : index
      %c0_54 = arith.constant 0 : index
      %c0_55 = arith.constant 0 : index
      %82 = vector.load %arg6[%c0_53, %c0_54, %c0_55] : memref<4x128x128xf32, #tpu.memory_space<vmem>>, vector<4x128x128xf32>
      tpu.vector_store %arg6[%c0_53, %c0_54, %c0_55], %81 {strides = array<i32>} : memref<4x128x128xf32, #tpu.memory_space<vmem>>, vector<4x128x128xf32>,
      %cst_56 = arith.constant 0.000000e+00 : f32
      %83 = vector.broadcast %cst_56 : f32 to vector<4x1xf32>
      %c0_57 = arith.constant 0 : index
      %c0_58 = arith.constant 0 : index
      %84 = vector.load %arg7[%c0_57, %c0_58] : memref<4x1xf32, #tpu.memory_space<vmem>>, vector<4x1xf32>
      tpu.vector_store %arg7[%c0_57, %c0_58], %83 {strides = array<i32>} : memref<4x1xf32, #tpu.memory_space<vmem>>, vector<4x1xf32>,
    } else {
    }
    %c0 = arith.constant 0 : index
    %c0_1 = arith.constant 0 : index
    %c0_2 = arith.constant 0 : index
    %3 = vector.load %arg2[%c0, %c0_1, %c0_2] : memref<1x128x64xbf16, #tpu.memory_space<vmem>>, vector<1x128x64xbf16>
    %4 = vector.shape_cast %3 : vector<1x128x64xbf16> to vector<128x64xbf16>
    %5 = arith.extf %4 : vector<128x64xbf16> to vector<128x64xf32>
    %c0_3 = arith.constant 0 : index
    %c0_4 = arith.constant 0 : index
    %c0_5 = arith.constant 0 : index
    %6 = vector.load %arg3[%c0_3, %c0_4, %c0_5] : memref<1x128x64xbf16, #tpu.memory_space<vmem>>, vector<1x128x64xbf16>
    %7 = vector.shape_cast %6 : vector<1x128x64xbf16> to vector<128x64xbf16>
    %8 = arith.extf %7 : vector<128x64xbf16> to vector<128x64xf32>
    %9 = arith.addf %5, %8 : vector<128x64xf32>
    %10 = arith.subf %5, %8 : vector<128x64xf32>
    %c0_6 = arith.constant 0 : index
    %c0_7 = arith.constant 0 : index
    %11 = vector.load %arg7[%c0_6, %c0_7] : memref<4x1xf32, #tpu.memory_space<vmem>>, vector<4x1xf32>
    %c0_8 = arith.constant 0 : index
    %c0_9 = arith.constant 0 : index
    %c0_10 = arith.constant 0 : index
    %12 = vector.load %arg4[%c0_8, %c0_9, %c0_10] : memref<1x4x64xf32, #tpu.memory_space<vmem>>, vector<1x4x64xf32>
    %13 = vector.shape_cast %12 : vector<1x4x64xf32> to vector<4x64xf32>
    %cst = arith.constant dense<0.000000e+00> : vector<4xf32>
    %14 = vector.multi_reduction <add>, %13, %cst [1] : vector<4x64xf32> to vector<4xf32>
    %15 = vector.shape_cast %14 : vector<4xf32> to vector<4x1xf32>
    %16 = arith.addf %11, %15 : vector<4x1xf32>
    %c0_11 = arith.constant 0 : index
    %c0_12 = arith.constant 0 : index
    %17 = vector.load %arg7[%c0_11, %c0_12] : memref<4x1xf32, #tpu.memory_space<vmem>>, vector<4x1xf32>
    tpu.vector_store %arg7[%c0_11, %c0_12], %16 {strides = array<i32>} : memref<4x1xf32, #tpu.memory_space<vmem>>, vector<4x1xf32>,
    %c0_13 = arith.constant 0 : index
    %c0_14 = arith.constant 0 : index
    %c0_15 = arith.constant 0 : index
    %18 = vector.load %arg4[%c0_13, %c0_14, %c0_15] : memref<1x4x64xf32, #tpu.memory_space<vmem>>, vector<1x1x64xf32>
    %19 = vector.shape_cast %18 : vector<1x1x64xf32> to vector<1x64xf32>
    %20 = vector.broadcast %19 : vector<1x64xf32> to vector<128x64xf32>
    %21 = arith.mulf %9, %20 : vector<128x64xf32>
    %22 = arith.truncf %21 : vector<128x64xf32> to vector<128x64xbf16>
    %23 = vector.broadcast %19 : vector<1x64xf32> to vector<128x64xf32>
    %24 = arith.mulf %10, %23 : vector<128x64xf32>
    %25 = arith.truncf %24 : vector<128x64xf32> to vector<128x64xbf16>
    %c0_16 = arith.constant 0 : index
    %c0_17 = arith.constant 0 : index
    %c0_18 = arith.constant 0 : index
    %26 = vector.load %arg6[%c0_16, %c0_17, %c0_18] : memref<4x128x128xf32, #tpu.memory_space<vmem>>, vector<1x128x128xf32>
    %27 = vector.shape_cast %26 : vector<1x128x128xf32> to vector<128x128xf32>
    %cst_19 = arith.constant dense<0.000000e+00> : vector<128x128xf32>
    %28 = tpu.matmul %22, %25, %cst_19 {dimension_numbers = #tpu.dot_dimension_numbers<[1], [1], [0], [0], [0, 0, 1, 0], [], []>} : vector<128x64xbf16>, vector<128x64xbf16>, vector<128x128xf32> -> vector<128x128xf32>
    %29 = arith.addf %27, %28 : vector<128x128xf32>
    %c0_20 = arith.constant 0 : index
    %c0_21 = arith.constant 0 : index
    %c0_22 = arith.constant 0 : index
    %30 = vector.load %arg6[%c0_20, %c0_21, %c0_22] : memref<4x128x128xf32, #tpu.memory_space<vmem>>, vector<1x128x128xf32>
    %31 = vector.shape_cast %30 : vector<1x128x128xf32> to vector<128x128xf32>
    %32 = vector.shape_cast %29 : vector<128x128xf32> to vector<1x128x128xf32>
    tpu.vector_store %arg6[%c0_20, %c0_21, %c0_22], %32 {strides = array<i32>} : memref<4x128x128xf32, #tpu.memory_space<vmem>>, vector<1x128x128xf32>,
    %c0_23 = arith.constant 0 : index
    %c1 = arith.constant 1 : index
    %c0_24 = arith.constant 0 : index
    %33 = vector.load %arg4[%c0_23, %c1, %c0_24] : memref<1x4x64xf32, #tpu.memory_space<vmem>>, vector<1x1x64xf32>
    %34 = vector.shape_cast %33 : vector<1x1x64xf32> to vector<1x64xf32>
    %35 = vector.broadcast %34 : vector<1x64xf32> to vector<128x64xf32>
    %36 = arith.mulf %9, %35 : vector<128x64xf32>
    %37 = arith.truncf %36 : vector<128x64xf32> to vector<128x64xbf16>
    %38 = vector.broadcast %34 : vector<1x64xf32> to vector<128x64xf32>
    %39 = arith.mulf %10, %38 : vector<128x64xf32>
    %40 = arith.truncf %39 : vector<128x64xf32> to vector<128x64xbf16>
    %c1_25 = arith.constant 1 : index
    %c0_26 = arith.constant 0 : index
    %c0_27 = arith.constant 0 : index
    %41 = vector.load %arg6[%c1_25, %c0_26, %c0_27] : memref<4x128x128xf32, #tpu.memory_space<vmem>>, vector<1x128x128xf32>
    %42 = vector.shape_cast %41 : vector<1x128x128xf32> to vector<128x128xf32>
    %cst_28 = arith.constant dense<0.000000e+00> : vector<128x128xf32>
    %43 = tpu.matmul %37, %40, %cst_28 {dimension_numbers = #tpu.dot_dimension_numbers<[1], [1], [0], [0], [0, 0, 1, 0], [], []>} : vector<128x64xbf16>, vector<128x64xbf16>, vector<128x128xf32> -> vector<128x128xf32>
    %44 = arith.addf %42, %43 : vector<128x128xf32>
    %c1_29 = arith.constant 1 : index
    %c0_30 = arith.constant 0 : index
    %c0_31 = arith.constant 0 : index
    %45 = vector.load %arg6[%c1_29, %c0_30, %c0_31] : memref<4x128x128xf32, #tpu.memory_space<vmem>>, vector<1x128x128xf32>
    %46 = vector.shape_cast %45 : vector<1x128x128xf32> to vector<128x128xf32>
    %47 = vector.shape_cast %44 : vector<128x128xf32> to vector<1x128x128xf32>
    tpu.vector_store %arg6[%c1_29, %c0_30, %c0_31], %47 {strides = array<i32>} : memref<4x128x128xf32, #tpu.memory_space<vmem>>, vector<1x128x128xf32>,
    %c0_32 = arith.constant 0 : index
    %c2 = arith.constant 2 : index
    %c0_33 = arith.constant 0 : index
    %48 = vector.load %arg4[%c0_32, %c2, %c0_33] : memref<1x4x64xf32, #tpu.memory_space<vmem>>, vector<1x1x64xf32>
    %49 = vector.shape_cast %48 : vector<1x1x64xf32> to vector<1x64xf32>
    %50 = vector.broadcast %49 : vector<1x64xf32> to vector<128x64xf32>
    %51 = arith.mulf %9, %50 : vector<128x64xf32>
    %52 = arith.truncf %51 : vector<128x64xf32> to vector<128x64xbf16>
    %53 = vector.broadcast %49 : vector<1x64xf32> to vector<128x64xf32>
    %54 = arith.mulf %10, %53 : vector<128x64xf32>
    %55 = arith.truncf %54 : vector<128x64xf32> to vector<128x64xbf16>
    %c2_34 = arith.constant 2 : index
    %c0_35 = arith.constant 0 : index
    %c0_36 = arith.constant 0 : index
    %56 = vector.load %arg6[%c2_34, %c0_35, %c0_36] : memref<4x128x128xf32, #tpu.memory_space<vmem>>, vector<1x128x128xf32>
    %57 = vector.shape_cast %56 : vector<1x128x128xf32> to vector<128x128xf32>
    %cst_37 = arith.constant dense<0.000000e+00> : vector<128x128xf32>
    %58 = tpu.matmul %52, %55, %cst_37 {dimension_numbers = #tpu.dot_dimension_numbers<[1], [1], [0], [0], [0, 0, 1, 0], [], []>} : vector<128x64xbf16>, vector<128x64xbf16>, vector<128x128xf32> -> vector<128x128xf32>
    %59 = arith.addf %57, %58 : vector<128x128xf32>
    %c2_38 = arith.constant 2 : index
    %c0_39 = arith.constant 0 : index
    %c0_40 = arith.constant 0 : index
    %60 = vector.load %arg6[%c2_38, %c0_39, %c0_40] : memref<4x128x128xf32, #tpu.memory_space<vmem>>, vector<1x128x128xf32>
    %61 = vector.shape_cast %60 : vector<1x128x128xf32> to vector<128x128xf32>
    %62 = vector.shape_cast %59 : vector<128x128xf32> to vector<1x128x128xf32>
    tpu.vector_store %arg6[%c2_38, %c0_39, %c0_40], %62 {strides = array<i32>} : memref<4x128x128xf32, #tpu.memory_space<vmem>>, vector<1x128x128xf32>,
    %c0_41 = arith.constant 0 : index
    %c3 = arith.constant 3 : index
    %c0_42 = arith.constant 0 : index
    %63 = vector.load %arg4[%c0_41, %c3, %c0_42] : memref<1x4x64xf32, #tpu.memory_space<vmem>>, vector<1x1x64xf32>
    %64 = vector.shape_cast %63 : vector<1x1x64xf32> to vector<1x64xf32>
    %65 = vector.broadcast %64 : vector<1x64xf32> to vector<128x64xf32>
    %66 = arith.mulf %9, %65 : vector<128x64xf32>
    %67 = arith.truncf %66 : vector<128x64xf32> to vector<128x64xbf16>
    %68 = vector.broadcast %64 : vector<1x64xf32> to vector<128x64xf32>
    %69 = arith.mulf %10, %68 : vector<128x64xf32>
    %70 = arith.truncf %69 : vector<128x64xf32> to vector<128x64xbf16>
    %c3_43 = arith.constant 3 : index
    %c0_44 = arith.constant 0 : index
    %c0_45 = arith.constant 0 : index
    %71 = vector.load %arg6[%c3_43, %c0_44, %c0_45] : memref<4x128x128xf32, #tpu.memory_space<vmem>>, vector<1x128x128xf32>
    %72 = vector.shape_cast %71 : vector<1x128x128xf32> to vector<128x128xf32>
    %cst_46 = arith.constant dense<0.000000e+00> : vector<128x128xf32>
    %73 = tpu.matmul %67, %70, %cst_46 {dimension_numbers = #tpu.dot_dimension_numbers<[1], [1], [0], [0], [0, 0, 1, 0], [], []>} : vector<128x64xbf16>, vector<128x64xbf16>, vector<128x128xf32> -> vector<128x128xf32>
    %74 = arith.addf %72, %73 : vector<128x128xf32>
    %c3_47 = arith.constant 3 : index
    %c0_48 = arith.constant 0 : index
    %c0_49 = arith.constant 0 : index
    %75 = vector.load %arg6[%c3_47, %c0_48, %c0_49] : memref<4x128x128xf32, #tpu.memory_space<vmem>>, vector<1x128x128xf32>
    %76 = vector.shape_cast %75 : vector<1x128x128xf32> to vector<128x128xf32>
    %77 = vector.shape_cast %74 : vector<128x128xf32> to vector<1x128x128xf32>
    tpu.vector_store %arg6[%c3_47, %c0_48, %c0_49], %77 {strides = array<i32>} : memref<4x128x128xf32, #tpu.memory_space<vmem>>, vector<1x128x128xf32>,
    %c0_i32_50 = arith.constant 0 : i32
    %78 = arith.cmpi eq, %arg1, %c0_i32_50 : i32
    %79 = arith.extui %78 : i1 to i32
    %c0_i32_51 = arith.constant 0 : i32
    %80 = arith.cmpi ne, %79, %c0_i32_51 : i32
    scf.if %80 {
      %cst_52 = arith.constant 0.000000e+00 : f32
      %81 = vector.broadcast %cst_52 : f32 to vector<1x1xf32>
      %c0_53 = arith.constant 0 : index
      %c0_54 = arith.constant 0 : index
      %c0_55 = arith.constant 0 : index
      %82 = vector.load %arg6[%c0_53, %c0_54, %c0_55] : memref<4x128x128xf32, #tpu.memory_space<vmem>>, vector<1x128x128xf32>
      %83 = vector.shape_cast %82 : vector<1x128x128xf32> to vector<128x128xf32>
      %84 = tpu.transpose %83, [1, 0] : vector<128x128xf32> -> vector<128x128xf32>
      %85 = arith.mulf %83, %83 : vector<128x128xf32>
      %86 = arith.mulf %83, %84 : vector<128x128xf32>
      %87 = arith.addf %85, %86 : vector<128x128xf32>
      %cst_56 = arith.constant dense<0.000000e+00> : vector<128xf32>
      %88 = vector.multi_reduction <add>, %87, %cst_56 [1] : vector<128x128xf32> to vector<128xf32>
      %89 = vector.shape_cast %88 : vector<128xf32> to vector<128x1xf32>
      %cst_57 = arith.constant dense<0.000000e+00> : vector<1xf32>
      %90 = vector.multi_reduction <add>, %89, %cst_57 [0] : vector<128x1xf32> to vector<1xf32>
      %91 = vector.shape_cast %90 : vector<1xf32> to vector<1x1xf32>
      %cst_58 = arith.constant 5.000000e-01 : f32
      %92 = vector.broadcast %cst_58 : f32 to vector<1x1xf32>
      %93 = arith.mulf %92, %91 : vector<1x1xf32>
      %c0_59 = arith.constant 0 : index
      %c0_60 = arith.constant 0 : index
      %94 = vector.load %arg7[%c0_59, %c0_60] : memref<4x1xf32, #tpu.memory_space<vmem>>, vector<1x1xf32>
      %cst_61 = arith.constant 9.99999993E-9 : f32
      %95 = vector.broadcast %cst_61 : f32 to vector<1x1xf32>
      %96 = arith.addf %94, %95 : vector<1x1xf32>
      %cst_62 = arith.constant 6.400000e+01 : f32
      %97 = vector.broadcast %cst_62 : f32 to vector<1x1xf32>
      %98 = arith.mulf %97, %96 : vector<1x1xf32>
      %99 = tpu.reciprocal %98 {approx = true} : vector<1x1xf32> -> vector<1x1xf32>
      %100 = arith.mulf %93, %99 : vector<1x1xf32>
      %101 = arith.mulf %100, %99 : vector<1x1xf32>
      %102 = arith.addf %81, %101 : vector<1x1xf32>
      %c1_63 = arith.constant 1 : index
      %c0_64 = arith.constant 0 : index
      %c0_65 = arith.constant 0 : index
      %103 = vector.load %arg6[%c1_63, %c0_64, %c0_65] : memref<4x128x128xf32, #tpu.memory_space<vmem>>, vector<1x128x128xf32>
      %104 = vector.shape_cast %103 : vector<1x128x128xf32> to vector<128x128xf32>
      %105 = tpu.transpose %104, [1, 0] : vector<128x128xf32> -> vector<128x128xf32>
      %106 = arith.mulf %104, %104 : vector<128x128xf32>
      %107 = arith.mulf %104, %105 : vector<128x128xf32>
      %108 = arith.addf %106, %107 : vector<128x128xf32>
      %cst_66 = arith.constant dense<0.000000e+00> : vector<128xf32>
      %109 = vector.multi_reduction <add>, %108, %cst_66 [1] : vector<128x128xf32> to vector<128xf32>
      %110 = vector.shape_cast %109 : vector<128xf32> to vector<128x1xf32>
      %cst_67 = arith.constant dense<0.000000e+00> : vector<1xf32>
      %111 = vector.multi_reduction <add>, %110, %cst_67 [0] : vector<128x1xf32> to vector<1xf32>
      %112 = vector.shape_cast %111 : vector<1xf32> to vector<1x1xf32>
      %cst_68 = arith.constant 5.000000e-01 : f32
      %113 = vector.broadcast %cst_68 : f32 to vector<1x1xf32>
      %114 = arith.mulf %113, %112 : vector<1x1xf32>
      %c1_69 = arith.constant 1 : index
      %c0_70 = arith.constant 0 : index
      %115 = vector.load %arg7[%c1_69, %c0_70] : memref<4x1xf32, #tpu.memory_space<vmem>>, vector<1x1xf32>
      %cst_71 = arith.constant 9.99999993E-9 : f32
      %116 = vector.broadcast %cst_71 : f32 to vector<1x1xf32>
      %117 = arith.addf %115, %116 : vector<1x1xf32>
      %cst_72 = arith.constant 6.400000e+01 : f32
      %118 = vector.broadcast %cst_72 : f32 to vector<1x1xf32>
      %119 = arith.mulf %118, %117 : vector<1x1xf32>
      %120 = tpu.reciprocal %119 {approx = true} : vector<1x1xf32> -> vector<1x1xf32>
      %121 = arith.mulf %114, %120 : vector<1x1xf32>
      %122 = arith.mulf %121, %120 : vector<1x1xf32>
      %123 = arith.addf %102, %122 : vector<1x1xf32>
      %c2_73 = arith.constant 2 : index
      %c0_74 = arith.constant 0 : index
      %c0_75 = arith.constant 0 : index
      %124 = vector.load %arg6[%c2_73, %c0_74, %c0_75] : memref<4x128x128xf32, #tpu.memory_space<vmem>>, vector<1x128x128xf32>
      %125 = vector.shape_cast %124 : vector<1x128x128xf32> to vector<128x128xf32>
      %126 = tpu.transpose %125, [1, 0] : vector<128x128xf32> -> vector<128x128xf32>
      %127 = arith.mulf %125, %125 : vector<128x128xf32>
      %128 = arith.mulf %125, %126 : vector<128x128xf32>
      %129 = arith.addf %127, %128 : vector<128x128xf32>
      %cst_76 = arith.constant dense<0.000000e+00> : vector<128xf32>
      %130 = vector.multi_reduction <add>, %129, %cst_76 [1] : vector<128x128xf32> to vector<128xf32>
      %131 = vector.shape_cast %130 : vector<128xf32> to vector<128x1xf32>
      %cst_77 = arith.constant dense<0.000000e+00> : vector<1xf32>
      %132 = vector.multi_reduction <add>, %131, %cst_77 [0] : vector<128x1xf32> to vector<1xf32>
      %133 = vector.shape_cast %132 : vector<1xf32> to vector<1x1xf32>
      %cst_78 = arith.constant 5.000000e-01 : f32
      %134 = vector.broadcast %cst_78 : f32 to vector<1x1xf32>
      %135 = arith.mulf %134, %133 : vector<1x1xf32>
      %c2_79 = arith.constant 2 : index
      %c0_80 = arith.constant 0 : index
      %136 = vector.load %arg7[%c2_79, %c0_80] : memref<4x1xf32, #tpu.memory_space<vmem>>, vector<1x1xf32>
      %cst_81 = arith.constant 9.99999993E-9 : f32
      %137 = vector.broadcast %cst_81 : f32 to vector<1x1xf32>
      %138 = arith.addf %136, %137 : vector<1x1xf32>
      %cst_82 = arith.constant 6.400000e+01 : f32
      %139 = vector.broadcast %cst_82 : f32 to vector<1x1xf32>
      %140 = arith.mulf %139, %138 : vector<1x1xf32>
      %141 = tpu.reciprocal %140 {approx = true} : vector<1x1xf32> -> vector<1x1xf32>
      %142 = arith.mulf %135, %141 : vector<1x1xf32>
      %143 = arith.mulf %142, %141 : vector<1x1xf32>
      %144 = arith.addf %123, %143 : vector<1x1xf32>
      %c3_83 = arith.constant 3 : index
      %c0_84 = arith.constant 0 : index
      %c0_85 = arith.constant 0 : index
      %145 = vector.load %arg6[%c3_83, %c0_84, %c0_85] : memref<4x128x128xf32, #tpu.memory_space<vmem>>, vector<1x128x128xf32>
      %146 = vector.shape_cast %145 : vector<1x128x128xf32> to vector<128x128xf32>
      %147 = tpu.transpose %146, [1, 0] : vector<128x128xf32> -> vector<128x128xf32>
      %148 = arith.mulf %146, %146 : vector<128x128xf32>
      %149 = arith.mulf %146, %147 : vector<128x128xf32>
      %150 = arith.addf %148, %149 : vector<128x128xf32>
      %cst_86 = arith.constant dense<0.000000e+00> : vector<128xf32>
      %151 = vector.multi_reduction <add>, %150, %cst_86 [1] : vector<128x128xf32> to vector<128xf32>
      %152 = vector.shape_cast %151 : vector<128xf32> to vector<128x1xf32>
      %cst_87 = arith.constant dense<0.000000e+00> : vector<1xf32>
      %153 = vector.multi_reduction <add>, %152, %cst_87 [0] : vector<128x1xf32> to vector<1xf32>
      %154 = vector.shape_cast %153 : vector<1xf32> to vector<1x1xf32>
      %cst_88 = arith.constant 5.000000e-01 : f32
      %155 = vector.broadcast %cst_88 : f32 to vector<1x1xf32>
      %156 = arith.mulf %155, %154 : vector<1x1xf32>
      %c3_89 = arith.constant 3 : index
      %c0_90 = arith.constant 0 : index
      %157 = vector.load %arg7[%c3_89, %c0_90] : memref<4x1xf32, #tpu.memory_space<vmem>>, vector<1x1xf32>
      %cst_91 = arith.constant 9.99999993E-9 : f32
      %158 = vector.broadcast %cst_91 : f32 to vector<1x1xf32>
      %159 = arith.addf %157, %158 : vector<1x1xf32>
      %cst_92 = arith.constant 6.400000e+01 : f32
      %160 = vector.broadcast %cst_92 : f32 to vector<1x1xf32>
      %161 = arith.mulf %160, %159 : vector<1x1xf32>
      %162 = tpu.reciprocal %161 {approx = true} : vector<1x1xf32> -> vector<1x1xf32>
      %163 = arith.mulf %156, %162 : vector<1x1xf32>
      %164 = arith.mulf %163, %162 : vector<1x1xf32>
      %165 = arith.addf %144, %164 : vector<1x1xf32>
      %166 = vector.shape_cast %165 : vector<1x1xf32> to vector<1x1x1xf32>
      %c0_93 = arith.constant 0 : index
      %c0_94 = arith.constant 0 : index
      %c0_95 = arith.constant 0 : index
      %167 = vector.load %arg5[%c0_93, %c0_94, %c0_95] : memref<1x1x1xf32, #tpu.memory_space<vmem>>, vector<1x1x1xf32>
      tpu.vector_store %arg5[%c0_93, %c0_94, %c0_95], %166 {strides = array<i32>} : memref<1x1x1xf32, #tpu.memory_space<vmem>>, vector<1x1x1xf32>,
    } else {
    }
    return
  }
  func.func @transform_0(%arg0: i32, %arg1: i32) -> (i32, i32, i32) {
    %c0_i32 = arith.constant 0 : i32
    %c0_i32_0 = arith.constant 0 : i32
    return %arg0, %c0_i32, %arg1 : i32, i32, i32
  }
  func.func @transform_1(%arg0: i32, %arg1: i32) -> (i32, i32, i32) {
    %c0_i32 = arith.constant 0 : i32
    %c0_i32_0 = arith.constant 0 : i32
    return %arg0, %c0_i32, %arg1 : i32, i32, i32
  }
  func.func @transform_2(%arg0: i32, %arg1: i32) -> (i32, i32, i32) {
    %c0_i32 = arith.constant 0 : i32
    %c0_i32_0 = arith.constant 0 : i32
    return %arg0, %c0_i32, %arg1 : i32, i32, i32
  }
  func.func @transform_3(%arg0: i32, %arg1: i32) -> (i32, i32, i32) {
    %c0_i32 = arith.constant 0 : i32
    %c0_i32_0 = arith.constant 0 : i32
    %c0_i32_1 = arith.constant 0 : i32
    return %arg0, %c0_i32, %c0_i32_0 : i32, i32, i32
  }
}

module attributes {stable_mosaic.version = 11 : i64} {
  func.func @_region_gram_mse_kernel(%arg0: i32, %arg1: i32, %arg2: memref<1x128x16xbf16, #tpu.memory_space<vmem>>, %arg3: memref<1x128x16xbf16, #tpu.memory_space<vmem>>, %arg4: memref<1x4x16xf32, #tpu.memory_space<vmem>>, %arg5: memref<1x1x1xf32, #tpu.memory_space<vmem>>, %arg6: memref<4x128x128xf32, #tpu.memory_space<vmem>>, %arg7: memref<4x1xf32, #tpu.memory_space<vmem>>) attributes {dimension_semantics = [#tpu.dimension_semantics<parallel>, #tpu.dimension_semantics<arbitrary>], iteration_bounds = array<i64: 2, 1>, scalar_prefetch = 0 : i64, scratch_operands = 2 : i64, tpu.core_type = #tpu.core_type<tc>, window_params = [{transform_indices = @transform_0, window_bounds = array<i64: 1, 128, 16>}, {transform_indices = @transform_1, window_bounds = array<i64: 1, 128, 16>}, {transform_indices = @transform_2, window_bounds = array<i64: 1, 4, 16>}, {transform_indices = @transform_3, window_bounds = array<i64: 1, 1, 1>}]} {
    %c0_i32 = arith.constant 0 : i32
    %0 = arith.cmpi eq, %arg1, %c0_i32 : i32
    %1 = arith.extui %0 : i1 to i32
    %c0_i32_0 = arith.constant 0 : i32
    %2 = arith.cmpi ne, %1, %c0_i32_0 : i32
    scf.if %2 {
      %cst_52 = arith.constant 0.000000e+00 : f32
      %81 = vector.broadcast %cst_52 : f32 to vector<4x128x128xf32>
      %c0_53 = arith.constant 0 : index
      %c0_54 = arith.constant 0 : index
      %c0_55 = arith.constant 0 : index
      %82 = vector.load %arg6[%c0_53, %c0_54, %c0_55] : memref<4x128x128xf32, #tpu.memory_space<vmem>>, vector<4x128x128xf32>
      tpu.vector_store %arg6[%c0_53, %c0_54, %c0_55], %81 {strides = array<i32>} : memref<4x128x128xf32, #tpu.memory_space<vmem>>, vector<4x128x128xf32>,
      %cst_56 = arith.constant 0.000000e+00 : f32
      %83 = vector.broadcast %cst_56 : f32 to vector<4x1xf32>
      %c0_57 = arith.constant 0 : index
      %c0_58 = arith.constant 0 : index
      %84 = vector.load %arg7[%c0_57, %c0_58] : memref<4x1xf32, #tpu.memory_space<vmem>>, vector<4x1xf32>
      tpu.vector_store %arg7[%c0_57, %c0_58], %83 {strides = array<i32>} : memref<4x1xf32, #tpu.memory_space<vmem>>, vector<4x1xf32>,
    } else {
    }
    %c0 = arith.constant 0 : index
    %c0_1 = arith.constant 0 : index
    %c0_2 = arith.constant 0 : index
    %3 = vector.load %arg2[%c0, %c0_1, %c0_2] : memref<1x128x16xbf16, #tpu.memory_space<vmem>>, vector<1x128x16xbf16>
    %4 = vector.shape_cast %3 : vector<1x128x16xbf16> to vector<128x16xbf16>
    %5 = arith.extf %4 : vector<128x16xbf16> to vector<128x16xf32>
    %c0_3 = arith.constant 0 : index
    %c0_4 = arith.constant 0 : index
    %c0_5 = arith.constant 0 : index
    %6 = vector.load %arg3[%c0_3, %c0_4, %c0_5] : memref<1x128x16xbf16, #tpu.memory_space<vmem>>, vector<1x128x16xbf16>
    %7 = vector.shape_cast %6 : vector<1x128x16xbf16> to vector<128x16xbf16>
    %8 = arith.extf %7 : vector<128x16xbf16> to vector<128x16xf32>
    %9 = arith.addf %5, %8 : vector<128x16xf32>
    %10 = arith.subf %5, %8 : vector<128x16xf32>
    %c0_6 = arith.constant 0 : index
    %c0_7 = arith.constant 0 : index
    %11 = vector.load %arg7[%c0_6, %c0_7] : memref<4x1xf32, #tpu.memory_space<vmem>>, vector<4x1xf32>
    %c0_8 = arith.constant 0 : index
    %c0_9 = arith.constant 0 : index
    %c0_10 = arith.constant 0 : index
    %12 = vector.load %arg4[%c0_8, %c0_9, %c0_10] : memref<1x4x16xf32, #tpu.memory_space<vmem>>, vector<1x4x16xf32>
    %13 = vector.shape_cast %12 : vector<1x4x16xf32> to vector<4x16xf32>
    %cst = arith.constant dense<0.000000e+00> : vector<4xf32>
    %14 = vector.multi_reduction <add>, %13, %cst [1] : vector<4x16xf32> to vector<4xf32>
    %15 = vector.shape_cast %14 : vector<4xf32> to vector<4x1xf32>
    %16 = arith.addf %11, %15 : vector<4x1xf32>
    %c0_11 = arith.constant 0 : index
    %c0_12 = arith.constant 0 : index
    %17 = vector.load %arg7[%c0_11, %c0_12] : memref<4x1xf32, #tpu.memory_space<vmem>>, vector<4x1xf32>
    tpu.vector_store %arg7[%c0_11, %c0_12], %16 {strides = array<i32>} : memref<4x1xf32, #tpu.memory_space<vmem>>, vector<4x1xf32>,
    %c0_13 = arith.constant 0 : index
    %c0_14 = arith.constant 0 : index
    %c0_15 = arith.constant 0 : index
    %18 = vector.load %arg4[%c0_13, %c0_14, %c0_15] : memref<1x4x16xf32, #tpu.memory_space<vmem>>, vector<1x1x16xf32>
    %19 = vector.shape_cast %18 : vector<1x1x16xf32> to vector<1x16xf32>
    %20 = vector.broadcast %19 : vector<1x16xf32> to vector<128x16xf32>
    %21 = arith.mulf %9, %20 : vector<128x16xf32>
    %22 = arith.truncf %21 : vector<128x16xf32> to vector<128x16xbf16>
    %23 = vector.broadcast %19 : vector<1x16xf32> to vector<128x16xf32>
    %24 = arith.mulf %10, %23 : vector<128x16xf32>
    %25 = arith.truncf %24 : vector<128x16xf32> to vector<128x16xbf16>
    %c0_16 = arith.constant 0 : index
    %c0_17 = arith.constant 0 : index
    %c0_18 = arith.constant 0 : index
    %26 = vector.load %arg6[%c0_16, %c0_17, %c0_18] : memref<4x128x128xf32, #tpu.memory_space<vmem>>, vector<1x128x128xf32>
    %27 = vector.shape_cast %26 : vector<1x128x128xf32> to vector<128x128xf32>
    %cst_19 = arith.constant dense<0.000000e+00> : vector<128x128xf32>
    %28 = tpu.matmul %22, %25, %cst_19 {dimension_numbers = #tpu.dot_dimension_numbers<[1], [1], [0], [0], [0, 0, 1, 0], [], []>} : vector<128x16xbf16>, vector<128x16xbf16>, vector<128x128xf32> -> vector<128x128xf32>
    %29 = arith.addf %27, %28 : vector<128x128xf32>
    %c0_20 = arith.constant 0 : index
    %c0_21 = arith.constant 0 : index
    %c0_22 = arith.constant 0 : index
    %30 = vector.load %arg6[%c0_20, %c0_21, %c0_22] : memref<4x128x128xf32, #tpu.memory_space<vmem>>, vector<1x128x128xf32>
    %31 = vector.shape_cast %30 : vector<1x128x128xf32> to vector<128x128xf32>
    %32 = vector.shape_cast %29 : vector<128x128xf32> to vector<1x128x128xf32>
    tpu.vector_store %arg6[%c0_20, %c0_21, %c0_22], %32 {strides = array<i32>} : memref<4x128x128xf32, #tpu.memory_space<vmem>>, vector<1x128x128xf32>,
    %c0_23 = arith.constant 0 : index
    %c1 = arith.constant 1 : index
    %c0_24 = arith.constant 0 : index
    %33 = vector.load %arg4[%c0_23, %c1, %c0_24] : memref<1x4x16xf32, #tpu.memory_space<vmem>>, vector<1x1x16xf32>
    %34 = vector.shape_cast %33 : vector<1x1x16xf32> to vector<1x16xf32>
    %35 = vector.broadcast %34 : vector<1x16xf32> to vector<128x16xf32>
    %36 = arith.mulf %9, %35 : vector<128x16xf32>
    %37 = arith.truncf %36 : vector<128x16xf32> to vector<128x16xbf16>
    %38 = vector.broadcast %34 : vector<1x16xf32> to vector<128x16xf32>
    %39 = arith.mulf %10, %38 : vector<128x16xf32>
    %40 = arith.truncf %39 : vector<128x16xf32> to vector<128x16xbf16>
    %c1_25 = arith.constant 1 : index
    %c0_26 = arith.constant 0 : index
    %c0_27 = arith.constant 0 : index
    %41 = vector.load %arg6[%c1_25, %c0_26, %c0_27] : memref<4x128x128xf32, #tpu.memory_space<vmem>>, vector<1x128x128xf32>
    %42 = vector.shape_cast %41 : vector<1x128x128xf32> to vector<128x128xf32>
    %cst_28 = arith.constant dense<0.000000e+00> : vector<128x128xf32>
    %43 = tpu.matmul %37, %40, %cst_28 {dimension_numbers = #tpu.dot_dimension_numbers<[1], [1], [0], [0], [0, 0, 1, 0], [], []>} : vector<128x16xbf16>, vector<128x16xbf16>, vector<128x128xf32> -> vector<128x128xf32>
    %44 = arith.addf %42, %43 : vector<128x128xf32>
    %c1_29 = arith.constant 1 : index
    %c0_30 = arith.constant 0 : index
    %c0_31 = arith.constant 0 : index
    %45 = vector.load %arg6[%c1_29, %c0_30, %c0_31] : memref<4x128x128xf32, #tpu.memory_space<vmem>>, vector<1x128x128xf32>
    %46 = vector.shape_cast %45 : vector<1x128x128xf32> to vector<128x128xf32>
    %47 = vector.shape_cast %44 : vector<128x128xf32> to vector<1x128x128xf32>
    tpu.vector_store %arg6[%c1_29, %c0_30, %c0_31], %47 {strides = array<i32>} : memref<4x128x128xf32, #tpu.memory_space<vmem>>, vector<1x128x128xf32>,
    %c0_32 = arith.constant 0 : index
    %c2 = arith.constant 2 : index
    %c0_33 = arith.constant 0 : index
    %48 = vector.load %arg4[%c0_32, %c2, %c0_33] : memref<1x4x16xf32, #tpu.memory_space<vmem>>, vector<1x1x16xf32>
    %49 = vector.shape_cast %48 : vector<1x1x16xf32> to vector<1x16xf32>
    %50 = vector.broadcast %49 : vector<1x16xf32> to vector<128x16xf32>
    %51 = arith.mulf %9, %50 : vector<128x16xf32>
    %52 = arith.truncf %51 : vector<128x16xf32> to vector<128x16xbf16>
    %53 = vector.broadcast %49 : vector<1x16xf32> to vector<128x16xf32>
    %54 = arith.mulf %10, %53 : vector<128x16xf32>
    %55 = arith.truncf %54 : vector<128x16xf32> to vector<128x16xbf16>
    %c2_34 = arith.constant 2 : index
    %c0_35 = arith.constant 0 : index
    %c0_36 = arith.constant 0 : index
    %56 = vector.load %arg6[%c2_34, %c0_35, %c0_36] : memref<4x128x128xf32, #tpu.memory_space<vmem>>, vector<1x128x128xf32>
    %57 = vector.shape_cast %56 : vector<1x128x128xf32> to vector<128x128xf32>
    %cst_37 = arith.constant dense<0.000000e+00> : vector<128x128xf32>
    %58 = tpu.matmul %52, %55, %cst_37 {dimension_numbers = #tpu.dot_dimension_numbers<[1], [1], [0], [0], [0, 0, 1, 0], [], []>} : vector<128x16xbf16>, vector<128x16xbf16>, vector<128x128xf32> -> vector<128x128xf32>
    %59 = arith.addf %57, %58 : vector<128x128xf32>
    %c2_38 = arith.constant 2 : index
    %c0_39 = arith.constant 0 : index
    %c0_40 = arith.constant 0 : index
    %60 = vector.load %arg6[%c2_38, %c0_39, %c0_40] : memref<4x128x128xf32, #tpu.memory_space<vmem>>, vector<1x128x128xf32>
    %61 = vector.shape_cast %60 : vector<1x128x128xf32> to vector<128x128xf32>
    %62 = vector.shape_cast %59 : vector<128x128xf32> to vector<1x128x128xf32>
    tpu.vector_store %arg6[%c2_38, %c0_39, %c0_40], %62 {strides = array<i32>} : memref<4x128x128xf32, #tpu.memory_space<vmem>>, vector<1x128x128xf32>,
    %c0_41 = arith.constant 0 : index
    %c3 = arith.constant 3 : index
    %c0_42 = arith.constant 0 : index
    %63 = vector.load %arg4[%c0_41, %c3, %c0_42] : memref<1x4x16xf32, #tpu.memory_space<vmem>>, vector<1x1x16xf32>
    %64 = vector.shape_cast %63 : vector<1x1x16xf32> to vector<1x16xf32>
    %65 = vector.broadcast %64 : vector<1x16xf32> to vector<128x16xf32>
    %66 = arith.mulf %9, %65 : vector<128x16xf32>
    %67 = arith.truncf %66 : vector<128x16xf32> to vector<128x16xbf16>
    %68 = vector.broadcast %64 : vector<1x16xf32> to vector<128x16xf32>
    %69 = arith.mulf %10, %68 : vector<128x16xf32>
    %70 = arith.truncf %69 : vector<128x16xf32> to vector<128x16xbf16>
    %c3_43 = arith.constant 3 : index
    %c0_44 = arith.constant 0 : index
    %c0_45 = arith.constant 0 : index
    %71 = vector.load %arg6[%c3_43, %c0_44, %c0_45] : memref<4x128x128xf32, #tpu.memory_space<vmem>>, vector<1x128x128xf32>
    %72 = vector.shape_cast %71 : vector<1x128x128xf32> to vector<128x128xf32>
    %cst_46 = arith.constant dense<0.000000e+00> : vector<128x128xf32>
    %73 = tpu.matmul %67, %70, %cst_46 {dimension_numbers = #tpu.dot_dimension_numbers<[1], [1], [0], [0], [0, 0, 1, 0], [], []>} : vector<128x16xbf16>, vector<128x16xbf16>, vector<128x128xf32> -> vector<128x128xf32>
    %74 = arith.addf %72, %73 : vector<128x128xf32>
    %c3_47 = arith.constant 3 : index
    %c0_48 = arith.constant 0 : index
    %c0_49 = arith.constant 0 : index
    %75 = vector.load %arg6[%c3_47, %c0_48, %c0_49] : memref<4x128x128xf32, #tpu.memory_space<vmem>>, vector<1x128x128xf32>
    %76 = vector.shape_cast %75 : vector<1x128x128xf32> to vector<128x128xf32>
    %77 = vector.shape_cast %74 : vector<128x128xf32> to vector<1x128x128xf32>
    tpu.vector_store %arg6[%c3_47, %c0_48, %c0_49], %77 {strides = array<i32>} : memref<4x128x128xf32, #tpu.memory_space<vmem>>, vector<1x128x128xf32>,
    %c0_i32_50 = arith.constant 0 : i32
    %78 = arith.cmpi eq, %arg1, %c0_i32_50 : i32
    %79 = arith.extui %78 : i1 to i32
    %c0_i32_51 = arith.constant 0 : i32
    %80 = arith.cmpi ne, %79, %c0_i32_51 : i32
    scf.if %80 {
      %cst_52 = arith.constant 0.000000e+00 : f32
      %81 = vector.broadcast %cst_52 : f32 to vector<1x1xf32>
      %c0_53 = arith.constant 0 : index
      %c0_54 = arith.constant 0 : index
      %c0_55 = arith.constant 0 : index
      %82 = vector.load %arg6[%c0_53, %c0_54, %c0_55] : memref<4x128x128xf32, #tpu.memory_space<vmem>>, vector<1x128x128xf32>
      %83 = vector.shape_cast %82 : vector<1x128x128xf32> to vector<128x128xf32>
      %84 = tpu.transpose %83, [1, 0] : vector<128x128xf32> -> vector<128x128xf32>
      %85 = arith.mulf %83, %83 : vector<128x128xf32>
      %86 = arith.mulf %83, %84 : vector<128x128xf32>
      %87 = arith.addf %85, %86 : vector<128x128xf32>
      %cst_56 = arith.constant dense<0.000000e+00> : vector<128xf32>
      %88 = vector.multi_reduction <add>, %87, %cst_56 [1] : vector<128x128xf32> to vector<128xf32>
      %89 = vector.shape_cast %88 : vector<128xf32> to vector<128x1xf32>
      %cst_57 = arith.constant dense<0.000000e+00> : vector<1xf32>
      %90 = vector.multi_reduction <add>, %89, %cst_57 [0] : vector<128x1xf32> to vector<1xf32>
      %91 = vector.shape_cast %90 : vector<1xf32> to vector<1x1xf32>
      %cst_58 = arith.constant 5.000000e-01 : f32
      %92 = vector.broadcast %cst_58 : f32 to vector<1x1xf32>
      %93 = arith.mulf %92, %91 : vector<1x1xf32>
      %c0_59 = arith.constant 0 : index
      %c0_60 = arith.constant 0 : index
      %94 = vector.load %arg7[%c0_59, %c0_60] : memref<4x1xf32, #tpu.memory_space<vmem>>, vector<1x1xf32>
      %cst_61 = arith.constant 9.99999993E-9 : f32
      %95 = vector.broadcast %cst_61 : f32 to vector<1x1xf32>
      %96 = arith.addf %94, %95 : vector<1x1xf32>
      %cst_62 = arith.constant 6.400000e+01 : f32
      %97 = vector.broadcast %cst_62 : f32 to vector<1x1xf32>
      %98 = arith.mulf %97, %96 : vector<1x1xf32>
      %99 = tpu.reciprocal %98 {approx = true} : vector<1x1xf32> -> vector<1x1xf32>
      %100 = arith.mulf %93, %99 : vector<1x1xf32>
      %101 = arith.mulf %100, %99 : vector<1x1xf32>
      %102 = arith.addf %81, %101 : vector<1x1xf32>
      %c1_63 = arith.constant 1 : index
      %c0_64 = arith.constant 0 : index
      %c0_65 = arith.constant 0 : index
      %103 = vector.load %arg6[%c1_63, %c0_64, %c0_65] : memref<4x128x128xf32, #tpu.memory_space<vmem>>, vector<1x128x128xf32>
      %104 = vector.shape_cast %103 : vector<1x128x128xf32> to vector<128x128xf32>
      %105 = tpu.transpose %104, [1, 0] : vector<128x128xf32> -> vector<128x128xf32>
      %106 = arith.mulf %104, %104 : vector<128x128xf32>
      %107 = arith.mulf %104, %105 : vector<128x128xf32>
      %108 = arith.addf %106, %107 : vector<128x128xf32>
      %cst_66 = arith.constant dense<0.000000e+00> : vector<128xf32>
      %109 = vector.multi_reduction <add>, %108, %cst_66 [1] : vector<128x128xf32> to vector<128xf32>
      %110 = vector.shape_cast %109 : vector<128xf32> to vector<128x1xf32>
      %cst_67 = arith.constant dense<0.000000e+00> : vector<1xf32>
      %111 = vector.multi_reduction <add>, %110, %cst_67 [0] : vector<128x1xf32> to vector<1xf32>
      %112 = vector.shape_cast %111 : vector<1xf32> to vector<1x1xf32>
      %cst_68 = arith.constant 5.000000e-01 : f32
      %113 = vector.broadcast %cst_68 : f32 to vector<1x1xf32>
      %114 = arith.mulf %113, %112 : vector<1x1xf32>
      %c1_69 = arith.constant 1 : index
      %c0_70 = arith.constant 0 : index
      %115 = vector.load %arg7[%c1_69, %c0_70] : memref<4x1xf32, #tpu.memory_space<vmem>>, vector<1x1xf32>
      %cst_71 = arith.constant 9.99999993E-9 : f32
      %116 = vector.broadcast %cst_71 : f32 to vector<1x1xf32>
      %117 = arith.addf %115, %116 : vector<1x1xf32>
      %cst_72 = arith.constant 6.400000e+01 : f32
      %118 = vector.broadcast %cst_72 : f32 to vector<1x1xf32>
      %119 = arith.mulf %118, %117 : vector<1x1xf32>
      %120 = tpu.reciprocal %119 {approx = true} : vector<1x1xf32> -> vector<1x1xf32>
      %121 = arith.mulf %114, %120 : vector<1x1xf32>
      %122 = arith.mulf %121, %120 : vector<1x1xf32>
      %123 = arith.addf %102, %122 : vector<1x1xf32>
      %c2_73 = arith.constant 2 : index
      %c0_74 = arith.constant 0 : index
      %c0_75 = arith.constant 0 : index
      %124 = vector.load %arg6[%c2_73, %c0_74, %c0_75] : memref<4x128x128xf32, #tpu.memory_space<vmem>>, vector<1x128x128xf32>
      %125 = vector.shape_cast %124 : vector<1x128x128xf32> to vector<128x128xf32>
      %126 = tpu.transpose %125, [1, 0] : vector<128x128xf32> -> vector<128x128xf32>
      %127 = arith.mulf %125, %125 : vector<128x128xf32>
      %128 = arith.mulf %125, %126 : vector<128x128xf32>
      %129 = arith.addf %127, %128 : vector<128x128xf32>
      %cst_76 = arith.constant dense<0.000000e+00> : vector<128xf32>
      %130 = vector.multi_reduction <add>, %129, %cst_76 [1] : vector<128x128xf32> to vector<128xf32>
      %131 = vector.shape_cast %130 : vector<128xf32> to vector<128x1xf32>
      %cst_77 = arith.constant dense<0.000000e+00> : vector<1xf32>
      %132 = vector.multi_reduction <add>, %131, %cst_77 [0] : vector<128x1xf32> to vector<1xf32>
      %133 = vector.shape_cast %132 : vector<1xf32> to vector<1x1xf32>
      %cst_78 = arith.constant 5.000000e-01 : f32
      %134 = vector.broadcast %cst_78 : f32 to vector<1x1xf32>
      %135 = arith.mulf %134, %133 : vector<1x1xf32>
      %c2_79 = arith.constant 2 : index
      %c0_80 = arith.constant 0 : index
      %136 = vector.load %arg7[%c2_79, %c0_80] : memref<4x1xf32, #tpu.memory_space<vmem>>, vector<1x1xf32>
      %cst_81 = arith.constant 9.99999993E-9 : f32
      %137 = vector.broadcast %cst_81 : f32 to vector<1x1xf32>
      %138 = arith.addf %136, %137 : vector<1x1xf32>
      %cst_82 = arith.constant 6.400000e+01 : f32
      %139 = vector.broadcast %cst_82 : f32 to vector<1x1xf32>
      %140 = arith.mulf %139, %138 : vector<1x1xf32>
      %141 = tpu.reciprocal %140 {approx = true} : vector<1x1xf32> -> vector<1x1xf32>
      %142 = arith.mulf %135, %141 : vector<1x1xf32>
      %143 = arith.mulf %142, %141 : vector<1x1xf32>
      %144 = arith.addf %123, %143 : vector<1x1xf32>
      %c3_83 = arith.constant 3 : index
      %c0_84 = arith.constant 0 : index
      %c0_85 = arith.constant 0 : index
      %145 = vector.load %arg6[%c3_83, %c0_84, %c0_85] : memref<4x128x128xf32, #tpu.memory_space<vmem>>, vector<1x128x128xf32>
      %146 = vector.shape_cast %145 : vector<1x128x128xf32> to vector<128x128xf32>
      %147 = tpu.transpose %146, [1, 0] : vector<128x128xf32> -> vector<128x128xf32>
      %148 = arith.mulf %146, %146 : vector<128x128xf32>
      %149 = arith.mulf %146, %147 : vector<128x128xf32>
      %150 = arith.addf %148, %149 : vector<128x128xf32>
      %cst_86 = arith.constant dense<0.000000e+00> : vector<128xf32>
      %151 = vector.multi_reduction <add>, %150, %cst_86 [1] : vector<128x128xf32> to vector<128xf32>
      %152 = vector.shape_cast %151 : vector<128xf32> to vector<128x1xf32>
      %cst_87 = arith.constant dense<0.000000e+00> : vector<1xf32>
      %153 = vector.multi_reduction <add>, %152, %cst_87 [0] : vector<128x1xf32> to vector<1xf32>
      %154 = vector.shape_cast %153 : vector<1xf32> to vector<1x1xf32>
      %cst_88 = arith.constant 5.000000e-01 : f32
      %155 = vector.broadcast %cst_88 : f32 to vector<1x1xf32>
      %156 = arith.mulf %155, %154 : vector<1x1xf32>
      %c3_89 = arith.constant 3 : index
      %c0_90 = arith.constant 0 : index
      %157 = vector.load %arg7[%c3_89, %c0_90] : memref<4x1xf32, #tpu.memory_space<vmem>>, vector<1x1xf32>
      %cst_91 = arith.constant 9.99999993E-9 : f32
      %158 = vector.broadcast %cst_91 : f32 to vector<1x1xf32>
      %159 = arith.addf %157, %158 : vector<1x1xf32>
      %cst_92 = arith.constant 6.400000e+01 : f32
      %160 = vector.broadcast %cst_92 : f32 to vector<1x1xf32>
      %161 = arith.mulf %160, %159 : vector<1x1xf32>
      %162 = tpu.reciprocal %161 {approx = true} : vector<1x1xf32> -> vector<1x1xf32>
      %163 = arith.mulf %156, %162 : vector<1x1xf32>
      %164 = arith.mulf %163, %162 : vector<1x1xf32>
      %165 = arith.addf %144, %164 : vector<1x1xf32>
      %166 = vector.shape_cast %165 : vector<1x1xf32> to vector<1x1x1xf32>
      %c0_93 = arith.constant 0 : index
      %c0_94 = arith.constant 0 : index
      %c0_95 = arith.constant 0 : index
      %167 = vector.load %arg5[%c0_93, %c0_94, %c0_95] : memref<1x1x1xf32, #tpu.memory_space<vmem>>, vector<1x1x1xf32>
      tpu.vector_store %arg5[%c0_93, %c0_94, %c0_95], %166 {strides = array<i32>} : memref<1x1x1xf32, #tpu.memory_space<vmem>>, vector<1x1x1xf32>,
    } else {
    }
    return
  }
  func.func @transform_0(%arg0: i32, %arg1: i32) -> (i32, i32, i32) {
    %c0_i32 = arith.constant 0 : i32
    %c0_i32_0 = arith.constant 0 : i32
    return %arg0, %c0_i32, %arg1 : i32, i32, i32
  }
  func.func @transform_1(%arg0: i32, %arg1: i32) -> (i32, i32, i32) {
    %c0_i32 = arith.constant 0 : i32
    %c0_i32_0 = arith.constant 0 : i32
    return %arg0, %c0_i32, %arg1 : i32, i32, i32
  }
  func.func @transform_2(%arg0: i32, %arg1: i32) -> (i32, i32, i32) {
    %c0_i32 = arith.constant 0 : i32
    %c0_i32_0 = arith.constant 0 : i32
    return %arg0, %c0_i32, %arg1 : i32, i32, i32
  }
  func.func @transform_3(%arg0: i32, %arg1: i32) -> (i32, i32, i32) {
    %c0_i32 = arith.constant 0 : i32
    %c0_i32_0 = arith.constant 0 : i32
    %c0_i32_1 = arith.constant 0 : i32
    return %arg0, %c0_i32, %c0_i32_0 : i32, i32, i32
  }
}

</mosaic_0001>

<bundles_post_ra>
// kernel: region_style_loss.3
= control target key start
LH: loop header
LB: loop body
LE: loop exit
PB: predicated region body
PF: predicated region fallthrough
CT: control target
= control target key end

     0   :  { %s2588_s12 = smov 0   ;;  %s2590_s13 = smov 0   ;;  %s4047_s0 = inlined_call_operand.vmem [shape: bf16[2,128,256], index: 0, kind: input, shape index: {}]   ;;  %s4048_s1 = inlined_call_operand.vmem [shape: bf16[2,128,256], index: 1, kind: input, shape index: {}]   ;;  %s4049_s2 = inlined_call_operand.vmem [shape: f32[2,4,256], index: 2, kind: input, shape index: {}]   ;;  %s4050_s3 = inlined_call_operand.vmem [shape: f32[2,1,1], index: 3, kind: output, shape index: {}]  }
   0x1   :  { %s2592_s14 = smov 0   ;;  %s2594_s15 = smov 0  }
   0x2   :  { %s2596_s16 = smov 0   ;;  %s2598_s17 = smov 0  }
   0x3   :  { %s2600_s18 = smov 0  }
   0x4 LB: > { %s22_s19 = sadd.s32 1, %s2557_s16  ;;  %s25_s20 = sadd.s32 1, %s2561_s17  ;;  %s2565_s18 = sphi %s2600_s18, %s13_s18   ;;  %s2561_s17 = sphi %s2598_s17, %s4276_s17   ;;  %s2557_s16 = sphi %s2596_s16, %s4275_s16   ;;  %s2553_s15 = sphi %s2594_s15, %s4274_s15   ;;  %s2549_s14 = sphi %s2592_s14, %s4273_s14   ;;  %s2545_s13 = sphi %s2590_s13, %s4272_s13   ;;  %s2541_s12 = sphi %s2588_s12, %s4271_s12  }
   0x5   : > { %p23_p0 = scmp.ge.s32.totalorder %s22_s19, 2  ;;  %p41_p1 = scmp.ne.s32.totalorder %s2545_s13, %s2541_s12 }
   0x6   : > { %p42_p2 = scmp.eq.s32.totalorder %s2565_s18, 0  ;;  %s34_s25 = sadd.s32 1, %s2545_s13 }
   0x7   : > { %s4278_s19 = smov (%p23_p0, %s22_s19), 0  ;;  %s4280_s20 = smov (!%p23_p0, %s25_s20), %s2561_s17 }
   0x8   : > { %p2631_p3 = por %p42_p2, %p41_p1  ;;  %p27_p4 = scmp.ge.s32.totalorder %s4280_s20, 2 }
   0x9   : > { %s30_s22 = ssub.s32 %s2557_s16, %s4278_s19  ;;  %p2156_p6 = scmp.ge.s32.totalorder %s2565_s18, 4 }
   0xa   : > { %s4282_s20 = smov (%p27_p4, %s4280_s20), 0 }
   0xb   : > { %s29_s23 = ssub.s32 %s2561_s17, %s4282_s20  ;;  %149 = sbr.rel (%p2156_p6) target bundleno = 48 (0x30), region = 16 }
   0xc   : > { %s31_s24 = sor.u32 %s30_s22, %s29_s23 }
   0xd   : > { %p32_p5 = scmp.eq.s32.totalorder %s31_s24, 0 }
   0xf   : > { %s2643_s26 = scalar_select %p32_p5, %s2545_s13, %s34_s25  }
  0x10   : > { %152 = sbr.rel (!%p2631_p3) target bundleno = 32 (0x20), region = 20  ;;  %s154_s27 = sand.u32 (%p2631_p3), 1, %s2545_s13  }
  0x11   : > { %s2158_s28 = sshll.u32 (%p2631_p3), %s2561_s17, 5  ;;  %s2157_s29 = sshll.u32 (%p2631_p3), %s154_s27, 6 }
  0x12   : > { %s158_s30 = sadd.s32 (%p2631_p3), %s2557_s16, %s2158_s28  ;;  %s156_s8 = scalar_lea.vmem (%p2631_p3), [#allocation4], %s2157_s29 }
  0x13   : > { %s2159_s4 = sshll.u32 (%p2631_p3), %s158_s30, 2 }
  0x14   : > { %s2654_s7 = scalar_lea.vmem (%p2631_p3), %s4047_s0, %s2159_s4 }
  0x15   : > { %v177_v0 = vld [vmem:[%s2654_s7] sm:$0xf]  ;;  %v179_v1 = vld [vmem:[%s2654_s7 + $0x8] sm:$0xf]  ;;  %v181_v2 = vld [vmem:[%s2654_s7 + $0x10] sm:$0xf] }
  0x16   : > { %178 = vst [vmem:[%s156_s8] sm:$0xf] %v177_v0  ;;  %180 = vst [vmem:[%s156_s8 + $0x4] sm:$0xf] %v179_v1  ;;  %v183_v3 = vld [vmem:[%s2654_s7 + $0x18] sm:$0xf] }
  0x17   : > { %182 = vst [vmem:[%s156_s8 + $0x8] sm:$0xf] %v181_v2  ;;  %v185_v4 = vld [vmem:[%s2654_s7 + $0x20] sm:$0xf]  ;;  %v187_v5 = vld [vmem:[%s2654_s7 + $0x28] sm:$0xf] }
  0x18   : > { %184 = vst [vmem:[%s156_s8 + $0xc] sm:$0xf] %v183_v3  ;;  %186 = vst [vmem:[%s156_s8 + $0x10] sm:$0xf] %v185_v4  ;;  %v189_v6 = vld [vmem:[%s2654_s7 + $0x30] sm:$0xf] }
  0x19   : > { %188 = vst [vmem:[%s156_s8 + $0x14] sm:$0xf] %v187_v5  ;;  %v191_v7 = vld [vmem:[%s2654_s7 + $0x38] sm:$0xf]  ;;  %v193_v8 = vld [vmem:[%s2654_s7 + $0x40] sm:$0xf] }
  0x1a   : > { %190 = vst [vmem:[%s156_s8 + $0x18] sm:$0xf] %v189_v6  ;;  %192 = vst [vmem:[%s156_s8 + $0x1c] sm:$0xf] %v191_v7  ;;  %v195_v9 = vld [vmem:[%s2654_s7 + $0x48] sm:$0xf] }
  0x1b   : > { %194 = vst [vmem:[%s156_s8 + $0x20] sm:$0xf] %v193_v8  ;;  %v197_v10 = vld [vmem:[%s2654_s7 + $0x50] sm:$0xf]  ;;  %v199_v11 = vld [vmem:[%s2654_s7 + $0x58] sm:$0xf] }
  0x1c   : > { %196 = vst [vmem:[%s156_s8 + $0x24] sm:$0xf] %v195_v9  ;;  %198 = vst [vmem:[%s156_s8 + $0x28] sm:$0xf] %v197_v10  ;;  %v201_v12 = vld [vmem:[%s2654_s7 + $0x60] sm:$0xf] }
  0x1d   : > { %200 = vst [vmem:[%s156_s8 + $0x2c] sm:$0xf] %v199_v11  ;;  %v203_v13 = vld [vmem:[%s2654_s7 + $0x68] sm:$0xf]  ;;  %v205_v14 = vld [vmem:[%s2654_s7 + $0x70] sm:$0xf] }
  0x1e   : > { %202 = vst [vmem:[%s156_s8 + $0x30] sm:$0xf] %v201_v12  ;;  %204 = vst [vmem:[%s156_s8 + $0x34] sm:$0xf] %v203_v13  ;;  %v207_v15 = vld [vmem:[%s2654_s7 + $0x78] sm:$0xf] }
  0x1f   : > { %206 = vst [vmem:[%s156_s8 + $0x38] sm:$0xf] %v205_v14  ;;  %208 = vst [vmem:[%s156_s8 + $0x3c] sm:$0xf] %v207_v15 }
  0x20 PF: > { %264 = sbr.rel (!%p2631_p3) target bundleno = 48 (0x30), region = 61  ;;  %s266_s9 = sand.u32 (%p2631_p3), 1, %s2545_s13  }
  0x21   : > { %s2161_s10 = sshll.u32 (%p2631_p3), %s2561_s17, 5  ;;  %s2160_s11 = sshll.u32 (%p2631_p3), %s266_s9, 6 }
  0x22   : > { %s270_s22 = sadd.s32 (%p2631_p3), %s2557_s16, %s2161_s10  ;;  %s268_s21 = scalar_lea.vmem (%p2631_p3), [#allocation5], %s2160_s11 }
  0x23   : > { %s2162_s23 = sshll.u32 (%p2631_p3), %s270_s22, 2 }
  0x24   : > { %s2680_s27 = scalar_lea.vmem (%p2631_p3), %s4048_s1, %s2162_s23 }
  0x25   : > { %v289_v16 = vld [vmem:[%s2680_s27] sm:$0xf]  ;;  %v291_v17 = vld [vmem:[%s2680_s27 + $0x8] sm:$0xf]  ;;  %v293_v18 = vld [vmem:[%s2680_s27 + $0x10] sm:$0xf] }
  0x26   : > { %290 = vst [vmem:[%s268_s21] sm:$0xf] %v289_v16  ;;  %292 = vst [vmem:[%s268_s21 + $0x4] sm:$0xf] %v291_v17  ;;  %v295_v19 = vld [vmem:[%s2680_s27 + $0x18] sm:$0xf] }
  0x27   : > { %294 = vst [vmem:[%s268_s21 + $0x8] sm:$0xf] %v293_v18  ;;  %v297_v20 = vld [vmem:[%s2680_s27 + $0x20] sm:$0xf]  ;;  %v299_v21 = vld [vmem:[%s2680_s27 + $0x28] sm:$0xf] }
  0x28   : > { %296 = vst [vmem:[%s268_s21 + $0xc] sm:$0xf] %v295_v19  ;;  %298 = vst [vmem:[%s268_s21 + $0x10] sm:$0xf] %v297_v20  ;;  %v301_v22 = vld [vmem:[%s2680_s27 + $0x30] sm:$0xf] }
  0x29   : > { %300 = vst [vmem:[%s268_s21 + $0x14] sm:$0xf] %v299_v21  ;;  %v303_v23 = vld [vmem:[%s2680_s27 + $0x38] sm:$0xf]  ;;  %v305_v24 = vld [vmem:[%s2680_s27 + $0x40] sm:$0xf] }
  0x2a   : > { %302 = vst [vmem:[%s268_s21 + $0x18] sm:$0xf] %v301_v22  ;;  %304 = vst [vmem:[%s268_s21 + $0x1c] sm:$0xf] %v303_v23  ;;  %v307_v25 = vld [vmem:[%s2680_s27 + $0x48] sm:$0xf] }
  0x2b   : > { %306 = vst [vmem:[%s268_s21 + $0x20] sm:$0xf] %v305_v24  ;;  %v309_v26 = vld [vmem:[%s2680_s27 + $0x50] sm:$0xf]  ;;  %v311_v27 = vld [vmem:[%s2680_s27 + $0x58] sm:$0xf] }
  0x2c   : > { %308 = vst [vmem:[%s268_s21 + $0x24] sm:$0xf] %v307_v25  ;;  %310 = vst [vmem:[%s268_s21 + $0x28] sm:$0xf] %v309_v26  ;;  %v313_v28 = vld [vmem:[%s2680_s27 + $0x60] sm:$0xf] }
  0x2d   : > { %312 = vst [vmem:[%s268_s21 + $0x2c] sm:$0xf] %v311_v27  ;;  %v315_v29 = vld [vmem:[%s2680_s27 + $0x68] sm:$0xf]  ;;  %v317_v30 = vld [vmem:[%s2680_s27 + $0x70] sm:$0xf] }
  0x2e   : > { %314 = vst [vmem:[%s268_s21 + $0x30] sm:$0xf] %v313_v28  ;;  %316 = vst [vmem:[%s268_s21 + $0x34] sm:$0xf] %v315_v29  ;;  %v319_v31 = vld [vmem:[%s2680_s27 + $0x78] sm:$0xf] }
  0x2f   : > { %318 = vst [vmem:[%s268_s21 + $0x38] sm:$0xf] %v317_v30  ;;  %320 = vst [vmem:[%s268_s21 + $0x3c] sm:$0xf] %v319_v31 }
  0x30 PF: > { %p2163_p7 = scmp.ge.s32.totalorder %s2565_s18, 1  ;;  %p386_p8 = scmp.lt.s32.totalorder %s2565_s18, 5 }
  0x32   : > { %p387_p9 = pnand %p2163_p7, %p386_p8 }
  0x34   : > { %390 = sbr.rel (%p387_p9) target bundleno = 987 (0x3db), region = 106 }
  0x39   : > { %s393_s28 = sand.u32 1, %s2541_s12   ;;  %p433_p10 = scmp.lt.s32.totalorder %s2553_s15, 1 }
  0x3a   : > { %s2164_s29 = sshll.u32 %s393_s28, 6  ;;  %p435_p11 = scmp.lt.s32.totalorder %s2549_s14, 1 }
  0x3b   : > { %s4284_s15 = smov (!%p433_p10, %s2553_s15), 1  ;;  %s2717_s12 = scalar_lea.vmem [#allocation4], %s2164_s29 }
  0x3c   : > { %s436_s30 = scalar_select %p435_p11, %s2549_s14, 1 }
  0x3d   : > { %s2166_s4 = sshll.u32 %s4284_s15, 1  ;;  %s443_s7 = scalar_lea.vmem %s4050_s3, %s4284_s15 }
  0x3e   : > { %s438_s8 = sadd.s32 %s2166_s4, %s436_s30  ;;  %s2719_s23 = scalar_lea.vmem [#allocation5], %s2164_s29 }
  0x3f   : > { %s2167_s9 = sshll.u32 %s438_s8, 2  ;;  %p2168_p12 = scmp.ne.s32.totalorder %s2549_s14, 0 }
  0x40   : > { %s2715_s22 = scalar_lea.vmem %s4049_s2, %s2167_s9 }
  0x41   : > { %448 = sbr.rel (%p2168_p12) target bundleno = 104 (0x68), region = 118 }
  0x46   : > { %vm513_vm0 = vcmask 3072   ;;  %v2567_v32 = vmov 0.0  }
  0x47   : > { %449 = vst [vmem:[#allocation2 + $0xb0] sm:$0xff] %v2567_v32  ;;  %450 = vst [vmem:[#allocation2 + $0x1b0] sm:$0xff] %v2567_v32 }
  0x48   : > { %451 = vst [vmem:[#allocation2 + $0xd8] sm:$0xff] %v2567_v32  ;;  %452 = vst [vmem:[#allocation2 + $0x18] sm:$0xff] %v2567_v32 }
  0x49   : > { %453 = vst [vmem:[#allocation2 + $0x50] sm:$0xff] %v2567_v32  ;;  %454 = vst [vmem:[#allocation2 + $0x168] sm:$0xff] %v2567_v32 }
  0x4a   : > { %455 = vst [vmem:[#allocation2 + $0x130] sm:$0xff] %v2567_v32  ;;  %456 = vst [vmem:[#allocation2 + $0x48] sm:$0xff] %v2567_v32 }
  0x4b   : > { %457 = vst [vmem:[#allocation2 + $0x180] sm:$0xff] %v2567_v32  ;;  %458 = vst [vmem:[#allocation2 + $0x110] sm:$0xff] %v2567_v32 }
  0x4c   : > { %459 = vst [vmem:[#allocation2 + $0x118] sm:$0xff] %v2567_v32  ;;  %460 = vst [vmem:[#allocation2 + $0x98] sm:$0xff] %v2567_v32 }
  0x4d   : > { %461 = vst [vmem:[#allocation2 + $0x120] sm:$0xff] %v2567_v32  ;;  %462 = vst [vmem:[#allocation2 + $0x150] sm:$0xff] %v2567_v32 }
  0x4e   : > { %463 = vst [vmem:[#allocation2 + $0x108] sm:$0xff] %v2567_v32  ;;  %464 = vst [vmem:[#allocation2 + $0x60] sm:$0xff] %v2567_v32 }
  0x4f   : > { %465 = vst [vmem:[#allocation2 + $0xe0] sm:$0xff] %v2567_v32  ;;  %466 = vst [vmem:[#allocation2 + $0x188] sm:$0xff] %v2567_v32 }
  0x50   : > { %467 = vst [vmem:[#allocation2 + $0x138] sm:$0xff] %v2567_v32  ;;  %468 = vst [vmem:[#allocation2 + $0x140] sm:$0xff] %v2567_v32 }
  0x51   : > { %469 = vst [vmem:[#allocation2 + $0x80] sm:$0xff] %v2567_v32  ;;  %470 = vst [vmem:[#allocation2 + $0x1a8] sm:$0xff] %v2567_v32 }
  0x52   : > { %471 = vst [vmem:[#allocation2 + $0x1b8] sm:$0xff] %v2567_v32  ;;  %472 = vst [vmem:[#allocation2 + $0x28] sm:$0xff] %v2567_v32 }
  0x53   : > { %473 = vst [vmem:[#allocation2 + $0x1e8] sm:$0xff] %v2567_v32  ;;  %474 = vst [vmem:[#allocation2 + $0xf8] sm:$0xff] %v2567_v32 }
  0x54   : > { %475 = vst [vmem:[#allocation2 + $0x160] sm:$0xff] %v2567_v32  ;;  %476 = vst [vmem:[#allocation2 + $0x30] sm:$0xff] %v2567_v32 }
  0x55   : > { %477 = vst [vmem:[#allocation2 + $0x1e0] sm:$0xff] %v2567_v32  ;;  %478 = vst [vmem:[#allocation2] sm:$0xff] %v2567_v32 }
  0x56   : > { %479 = vst [vmem:[#allocation2 + $0xf0] sm:$0xff] %v2567_v32  ;;  %480 = vst [vmem:[#allocation2 + $0x8] sm:$0xff] %v2567_v32 }
  0x57   : > { %481 = vst [vmem:[#allocation2 + $0x148] sm:$0xff] %v2567_v32  ;;  %482 = vst [vmem:[#allocation2 + $0x1d0] sm:$0xff] %v2567_v32 }
  0x58   : > { %483 = vst [vmem:[#allocation2 + $0x100] sm:$0xff] %v2567_v32  ;;  %484 = vst [vmem:[#allocation2 + $0xc8] sm:$0xff] %v2567_v32 }
  0x59   : > { %485 = vst [vmem:[#allocation2 + $0x40] sm:$0xff] %v2567_v32  ;;  %486 = vst [vmem:[#allocation2 + $0x1f8] sm:$0xff] %v2567_v32 }
  0x5a   : > { %487 = vst [vmem:[#allocation2 + $0x20] sm:$0xff] %v2567_v32  ;;  %488 = vst [vmem:[#allocation2 + $0x128] sm:$0xff] %v2567_v32 }
  0x5b   : > { %489 = vst [vmem:[#allocation2 + $0x1a0] sm:$0xff] %v2567_v32  ;;  %490 = vst [vmem:[#allocation2 + $0x1f0] sm:$0xff] %v2567_v32 }
  0x5c   : > { %491 = vst [vmem:[#allocation2 + $0xe8] sm:$0xff] %v2567_v32  ;;  %492 = vst [vmem:[#allocation2 + $0x78] sm:$0xff] %v2567_v32 }
  0x5d   : > { %493 = vst [vmem:[#allocation2 + $0x70] sm:$0xff] %v2567_v32  ;;  %494 = vst [vmem:[#allocation2 + $0x90] sm:$0xff] %v2567_v32 }
  0x5e   : > { %495 = vst [vmem:[#allocation2 + $0x1d8] sm:$0xff] %v2567_v32  ;;  %496 = vst [vmem:[#allocation2 + $0xd0] sm:$0xff] %v2567_v32 }
  0x5f   : > { %497 = vst [vmem:[#allocation2 + $0xb8] sm:$0xff] %v2567_v32  ;;  %498 = vst [vmem:[#allocation2 + $0x88] sm:$0xff] %v2567_v32 }
  0x60   : > { %499 = vst [vmem:[#allocation2 + $0xa8] sm:$0xff] %v2567_v32  ;;  %500 = vst [vmem:[#allocation2 + $0x1c8] sm:$0xff] %v2567_v32 }
  0x61   : > { %501 = vst [vmem:[#allocation2 + $0x170] sm:$0xff] %v2567_v32  ;;  %502 = vst [vmem:[#allocation2 + $0x178] sm:$0xff] %v2567_v32 }
  0x62   : > { %503 = vst [vmem:[#allocation2 + $0x68] sm:$0xff] %v2567_v32  ;;  %504 = vst [vmem:[#allocation2 + $0x190] sm:$0xff] %v2567_v32 }
  0x63   : > { %505 = vst [vmem:[#allocation2 + $0x198] sm:$0xff] %v2567_v32  ;;  %506 = vst [vmem:[#allocation2 + $0x38] sm:$0xff] %v2567_v32 }
  0x64   : > { %507 = vst [vmem:[#allocation2 + $0xc0] sm:$0xff] %v2567_v32  ;;  %508 = vst [vmem:[#allocation2 + $0x1c0] sm:$0xff] %v2567_v32 }
  0x65   : > { %509 = vst [vmem:[#allocation2 + $0x158] sm:$0xff] %v2567_v32  ;;  %510 = vst [vmem:[#allocation2 + $0x10] sm:$0xff] %v2567_v32 }
  0x66   : > { %511 = vst [vmem:[#allocation2 + $0x58] sm:$0xff] %v2567_v32  ;;  %512 = vst [vmem:[#allocation2 + $0xa0] sm:$0xff] %v2567_v32 }
  0x67   : > { %514 = vst.msk [vmem:[#allocation3] sm:$0xf] %vm513_vm0, %v2567_v32 }
  0x68 PF: > { %v2789_v33 = vld [vmem:[%s2717_s12 + $0x38] sm:$0xff]   ;;  %v2802_v40 = vld [vmem:[%s2717_s12 + $0x30] sm:$0xff]   ;;  %v2815_v47 = vld [vmem:[%s2717_s12 + $0x28] sm:$0xff]   ;;  %vm613_vm1 = vcmask 1043456   ;;  %vm618_vm2 = vcmask 3072   ;;  %p2173_p13 = scmp.ne.s32.totalorder %s2549_s14, 1 }
  0x69   : > { %v2792_v34 = vld [vmem:[%s2719_s23 + $0x38] sm:$0xff]   ;;  %v4066_v35 = vunpack.c.l.bf16 %v2789_v33  ;;  %v4064_v36 = vunpack.c.h.bf16 %v2789_v33  ;;  %v2805_v41 = vld [vmem:[%s2719_s23 + $0x30] sm:$0xff]   ;;  %v4070_v43 = vunpack.c.l.bf16 %v2802_v40  ;;  %v4068_v44 = vunpack.c.h.bf16 %v2802_v40  ;;  %v2818_v48 = vld [vmem:[%s2719_s23 + $0x28] sm:$0xff]  }
  0x6a   : > { %v4065_v37 = vunpack.c.l.bf16 %v2792_v34  ;;  %v4063_v38 = vunpack.c.h.bf16 %v2792_v34  ;;  %v2799_v39 = vld [vmem:[%s2715_s22] ss:$0 sm:$0xff]  ;;  %v2808_v42 = vld [vmem:[%s2715_s22 + $0x1] ss:$0 sm:$0xff]  ;;  %v4069_v45 = vunpack.c.l.bf16 %v2805_v41  ;;  %v4067_v46 = vunpack.c.h.bf16 %v2805_v41  ;;  %v2877_v5 = vld [vmem:[%s2717_s12 + $0x20] sm:$0xff]  }
  0x6b   : > { %v2198_v51 = vunpack.c.l.bf16 %v2815_v47  ;;  %v2199_v52 = vunpack.c.h.bf16 %v2815_v47  ;;  %v2230_v55 = vunpack.c.l.bf16 %v2818_v48  ;;  %v2231_v56 = vunpack.c.h.bf16 %v2818_v48  ;;  %v2880_v6 = vld [vmem:[%s2719_s23 + $0x20] sm:$0xff]   ;;  %v2895_v17 = vld [vmem:[%s2717_s12 + $0x18] sm:$0xff]   ;;  %v2917_v27 = vld [vmem:[%s2717_s12 + $0x10] sm:$0xff]  }
  0x6c   : > { %v2824_v49 = vsub.f32 %v4066_v35, %v4065_v37  ;;  %v2830_v50 = vsub.f32 %v4064_v36, %v4063_v38  ;;  %v2838_v53 = vsub.f32 %v4070_v43, %v4069_v45  ;;  %v2844_v54 = vsub.f32 %v4068_v44, %v4067_v46  ;;  %v2898_v18 = vld [vmem:[%s2719_s23 + $0x18] sm:$0xff]   ;;  %v2920_v28 = vld [vmem:[%s2719_s23 + $0x10] sm:$0xff]   ;;  %v2177_v31 = vld [vmem:[%s2717_s12] sm:$0xff]  }
  0x6d   : > { %v2868_v3 = vsub.f32 %v2198_v51, %v2230_v55  ;;  %v2874_v4 = vsub.f32 %v2199_v52, %v2231_v56  ;;  %v4054_v10 = vunpack.c.l.bf16 %v2877_v5  ;;  %v4052_v11 = vunpack.c.h.bf16 %v2877_v5  ;;  %v2209_v32 = vld [vmem:[%s2719_s23] sm:$0xff]  }
  0x6e   : > { %v663_v57 = vmul.f32 %v2799_v39, %v2824_v49  ;;  %v664_v58 = vmul.f32 %v2799_v39, %v2830_v50  ;;  %v861_v59 = vmul.f32 %v2808_v42, %v2824_v49  ;;  %v862_v60 = vmul.f32 %v2808_v42, %v2830_v50 }
  0x6f   : > { %v661_v61 = vmul.f32 %v2799_v39, %v2838_v53  ;;  %v662_v62 = vmul.f32 %v2799_v39, %v2844_v54  ;;  %v859_v63 = vmul.f32 %v2808_v42, %v2838_v53  ;;  %v860_v0 = vmul.f32 %v2808_v42, %v2844_v54 }
  0x70   : > { %v672_v1 = vpack.c.bf16 %v664_v58, %v663_v57  ;;  %v870_v2 = vpack.c.bf16 %v862_v60, %v861_v59  ;;  %v659_v9 = vmul.f32 %v2799_v39, %v2868_v3  ;;  %v4053_v12 = vunpack.c.l.bf16 %v2880_v6 }
  0x71   : > { %v671_v7 = vpack.c.bf16 %v662_v62, %v661_v61  ;;  %v869_v8 = vpack.c.bf16 %v860_v0, %v859_v63  ;;  %v660_v13 = vmul.f32 %v2799_v39, %v2874_v4  ;;  %v857_v14 = vmul.f32 %v2808_v42, %v2868_v3 }
  0x72   : > { %2318 = vmatprep.subr.bf16.mxu0 %v672_v1  ;;  %2350 = vmatprep.subr.bf16.mxu1 %v870_v2  ;;  %v858_v15 = vmul.f32 %v2808_v42, %v2874_v4  ;;  %v4051_v16 = vunpack.c.h.bf16 %v2880_v6  ;;  %v2904_v19 = vsub.f32 %v4054_v10, %v4053_v12  ;;  %v4062_v20 = vunpack.c.l.bf16 %v2895_v17 }
  0x73   : > { %2319 = vmatpush3.bf16.xpose.msra.mxu0 %v672_v1  ;;  %2351 = vmatpush3.bf16.xpose.msra.mxu1 %v870_v2  ;;  %v4061_v21 = vunpack.c.l.bf16 %v2898_v18  ;;  %v670_v22 = vpack.c.bf16 %v660_v13, %v659_v9  ;;  %v4056_v25 = vunpack.c.h.bf16 %v2895_v17  ;;  %v4055_v26 = vunpack.c.h.bf16 %v2898_v18  ;;  %v2951_v13 = vld [vmem:[%s2717_s12 + $0x8] sm:$0xff]  }
  0x74   : > { %2320 = vmatprep.subr.bf16.mxu0 %v671_v7  ;;  %2352 = vmatprep.subr.bf16.mxu1 %v869_v8  ;;  %v868_v23 = vpack.c.bf16 %v858_v15, %v857_v14  ;;  %v2912_v24 = vsub.f32 %v4052_v11, %v4051_v16  ;;  %v657_v29 = vmul.f32 %v2799_v39, %v2904_v19  ;;  %v4058_v60 = vunpack.c.l.bf16 %v2917_v27  ;;  %v2954_v16 = vld [vmem:[%s2719_s23 + $0x8] sm:$0xff]  }
  0x75   : > { %v2928_v30 = vsub.f32 %v4062_v20, %v4061_v21  ;;  %v855_v58 = vmul.f32 %v2808_v42, %v2904_v19  ;;  %v2943_v61 = vsub.f32 %v4056_v25, %v4055_v26  ;;  %v4060_v62 = vunpack.c.h.bf16 %v2917_v27 }
  0x76   : > { %v658_v57 = vmul.f32 %v2799_v39, %v2912_v24  ;;  %v856_v59 = vmul.f32 %v2808_v42, %v2912_v24  ;;  %v4057_v63 = vunpack.c.l.bf16 %v2920_v28  ;;  %v4059_v0 = vunpack.c.h.bf16 %v2920_v28 }
  0x77   : > { %v2178_v1 = vunpack.c.l.bf16 %v2177_v31  ;;  %v2179_v2 = vunpack.c.h.bf16 %v2177_v31  ;;  %v655_v9 = vmul.f32 %v2799_v39, %v2928_v30  ;;  %v656_v10 = vmul.f32 %v2799_v39, %v2943_v61 }
  0x78   : > { %v669_v14 = vpack.c.bf16 %v658_v57, %v657_v29  ;;  %v867_v15 = vpack.c.bf16 %v856_v59, %v855_v58  ;;  %v853_v31 = vmul.f32 %v2808_v42, %v2928_v30  ;;  %v2970_v29 = vsub.f32 %v4058_v60, %v4057_v63 }
  0x79   : > { %v2976_v57 = vsub.f32 %v4060_v62, %v4059_v0  ;;  %v2182_v58 = vunpack.c.l.bf16 %v2951_v13  ;;  %v2183_v25 = vunpack.c.h.bf16 %v2951_v13  ;;  %v2214_v63 = vunpack.c.l.bf16 %v2954_v16 }
  0x7a   : > { %v2215_v60 = vunpack.c.h.bf16 %v2954_v16  ;;  %v668_v20 = vpack.c.bf16 %v656_v10, %v655_v9  ;;  %v851_v36 = vmul.f32 %v2808_v42, %v2970_v29 }
  0x7b   : > { %2321 = vmatpush3.bf16.xpose.msra.mxu0 %v671_v7  ;;  %2353 = vmatpush3.bf16.xpose.msra.mxu1 %v869_v8  ;;  %v2210_v7 = vunpack.c.l.bf16 %v2209_v32  ;;  %v2211_v8 = vunpack.c.h.bf16 %v2209_v32  ;;  %v854_v32 = vmul.f32 %v2808_v42, %v2943_v61  ;;  %v654_v38 = vmul.f32 %v2799_v39, %v2976_v57 }
  0x7c   : > { %2322 = vmatprep.subr.bf16.mxu0 %v670_v22  ;;  %2354 = vmatprep.subr.bf16.mxu1 %v868_v23  ;;  %v852_v37 = vmul.f32 %v2808_v42, %v2976_v57  ;;  %v3005_v10 = vsub.f32 %v2182_v58, %v2214_v63  ;;  %v3011_v9 = vsub.f32 %v2183_v25, %v2215_v60 }
  0x7d   : > { %v2956_v11 = vadd.f32 %v2210_v7, %v2178_v1  ;;  %v2958_v12 = vadd.f32 %v2211_v8, %v2179_v2 }
  0x7f   : > { %v625_v59 = vmul.f32 %v2799_v39, %v2956_v11  ;;  %v626_v26 = vmul.f32 %v2799_v39, %v2958_v12  ;;  %v823_v0 = vmul.f32 %v2808_v42, %v2956_v11  ;;  %v824_v21 = vmul.f32 %v2808_v42, %v2958_v12 }
  0x81   : > { %v641_v62 = vpack.c.bf16 %v626_v26, %v625_v59  ;;  %v839_v35 = vpack.c.bf16 %v824_v21, %v823_v0  ;;  %v2999_v26 = vld [vmem:[%s2715_s22 + $0x2] ss:$0 sm:$0xff]  ;;  %v3020_v0 = vsub.f32 %v2178_v1, %v2210_v7 }
  0x82   : > { %v1058_v21 = vmul.f32 %v2999_v26, %v2838_v53  ;;  %v1056_v45 = vmul.f32 %v2999_v26, %v2868_v3  ;;  %v1057_v43 = vmul.f32 %v2999_v26, %v2874_v4  ;;  %v612_v7 = vld [vmem:[%s2715_s22] sm:$0xf]  ;;  %v1048_v13 = vmul.f32 %v2999_v26, %v3005_v10 }
  0x83   : > { %2323 = vmatpush3.bf16.xpose.msra.mxu0 %v670_v22  ;;  %2355 = vmatpush3.bf16.xpose.msra.mxu1 %v868_v23  ;;  %v866_v22 = vpack.c.bf16 %v854_v32, %v853_v31  ;;  %v653_v23 = vmul.f32 %v2799_v39, %v2970_v29  ;;  %v3014_v31 = vld [vmem:[%s2715_s22 + $0x3] ss:$0 sm:$0xff]  ;;  %v3022_v32 = vsub.f32 %v2179_v2, %v2211_v8 }
  0x84   : > { %2324 = vmatprep.subr.bf16.mxu0 %v669_v14  ;;  %2356 = vmatprep.subr.bf16.mxu1 %v867_v15  ;;  %v1257_v59 = vmul.f32 %v3014_v31, %v2838_v53  ;;  %v1258_v46 = vmul.f32 %v3014_v31, %v2844_v54  ;;  %v1255_v1 = vmul.f32 %v3014_v31, %v2868_v3 }
  0x85   : > { %2334 = vmatprep.mubr.bf16.mxu0 %v641_v62  ;;  %v1059_v62 = vmul.f32 %v2999_v26, %v2844_v54  ;;  %2366 = vmatprep.mubr.bf16.mxu1 %v839_v35  ;;  %v1256_v35 = vmul.f32 %v3014_v31, %v2874_v4  ;;  %v1054_v53 = vmul.f32 %v2999_v26, %v2904_v19 }
  0x86   : > { %v3036_v2 = vpack.c.bf16 %v1258_v46, %v1257_v59  ;;  %v1055_v54 = vmul.f32 %v2999_v26, %v2912_v24  ;;  %v3045_v8 = vpack.c.bf16 %v1057_v43, %v1056_v45  ;;  %v1254_v46 = vmul.f32 %v3014_v31, %v2912_v24 }
  0x87   : > { %v3028_v44 = vpack.c.bf16 %v1059_v62, %v1058_v21  ;;  %v1253_v21 = vmul.f32 %v3014_v31, %v2904_v19  ;;  %v3051_v3 = vpack.c.bf16 %v1256_v35, %v1255_v1  ;;  %v1052_v62 = vmul.f32 %v2999_v26, %v2928_v30 }
  0x88   : > { %v3053_v4 = vpack.c.bf16 %v1055_v54, %v1054_v53  ;;  %v1053_v43 = vmul.f32 %v2999_v26, %v2943_v61  ;;  %v1251_v45 = vmul.f32 %v3014_v31, %v2928_v30  ;;  %v1252_v19 = vmul.f32 %v3014_v31, %v2943_v61 }
  0x89   : > { %v1050_v1 = vmul.f32 %v2999_v26, %v2970_v29  ;;  %v1051_v35 = vmul.f32 %v2999_v26, %v2976_v57  ;;  %v667_v53 = vpack.c.bf16 %v654_v38, %v653_v23  ;;  %v865_v54 = vpack.c.bf16 %v852_v37, %v851_v36 }
  0x8a   : > { %v3065_v24 = vpack.c.bf16 %v1053_v43, %v1052_v62  ;;  %v3067_v59 = vpack.c.bf16 %v1252_v19, %v1251_v45  ;;  %v652_v30 = vmul.f32 %v2799_v39, %v3011_v9  ;;  %v849_v61 = vmul.f32 %v2808_v42, %v3005_v10 }
  0x8b   : > { %2325 = vmatpush3.bf16.xpose.msra.mxu0 %v669_v14  ;;  %2357 = vmatpush3.bf16.xpose.msra.mxu1 %v867_v15  ;;  %v614_v14 = vsel %vm613_vm1, %v612_v7, 0.0  ;;  %v3057_v15 = vpack.c.bf16 %v1254_v46, %v1253_v21  ;;  %v651_v7 = vmul.f32 %v2799_v39, %v3005_v10  ;;  %v850_v21 = vmul.f32 %v2808_v42, %v3011_v9 }
  0x8c   : > { %2326 = vmatprep.subr.bf16.mxu0 %v668_v20  ;;  %2358 = vmatprep.subr.bf16.mxu1 %v866_v22  ;;  %v649_v46 = vmul.f32 %v2799_v39, %v3020_v0  ;;  %v650_v62 = vmul.f32 %v2799_v39, %v3022_v32  ;;  %v847_v36 = vmul.f32 %v2808_v42, %v3020_v0 }
  0x8d   : > { %615 = vadd.xlane.f32.xlu0 %v614_v14  ;;  %v848_v37 = vmul.f32 %v2808_v42, %v3022_v32  ;;  %v3089_v38 = vpack.c.bf16 %v1051_v35, %v1050_v1  ;;  %v1249_v23 = vmul.f32 %v3014_v31, %v2970_v29  ;;  %v3097_v14 = vadd.f32 %v2214_v63, %v2182_v58 }
  0x8e   : > { %v1250_v43 = vmul.f32 %v3014_v31, %v2976_v57  ;;  %v666_v45 = vpack.c.bf16 %v652_v30, %v651_v7  ;;  %v3105_v19 = vadd.f32 %v2215_v60, %v2183_v25  ;;  %v3119_v29 = vadd.f32 %v2231_v56, %v2199_v52 }
  0x8f   : > { %4144 = vst [vmem:[#allocation6_spill] sm:$0xff] %v3089_v38  ;;  %v1049_v16 = vmul.f32 %v2999_v26, %v3011_v9  ;;  %v864_v25 = vpack.c.bf16 %v850_v21, %v849_v61  ;;  %v3125_v60 = vpack.c.bf16 %v650_v62, %v649_v46  ;;  %v3127_v57 = vpack.c.bf16 %v848_v37, %v847_v36 }
  0x90   : > { %v3113_v63 = vpack.c.bf16 %v1250_v43, %v1249_v23  ;;  %v3139_v48 = vmul.f32 %v2799_v39, %v3119_v29  ;;  %v1061_v56 = vmul.f32 %v2999_v26, %v2830_v50  ;;  %v1259_v58 = vmul.f32 %v3014_v31, %v2824_v49 }
  0x91   : > { %v1247_v1 = vmul.f32 %v3014_v31, %v3005_v10  ;;  %v1248_v30 = vmul.f32 %v3014_v31, %v3011_v9  ;;  %v4147_v61 = vunpack.c.l.bf16 %v2802_v40  ;;  %v4148_v21 = vunpack.c.l.bf16 %v2805_v41 }
  0x92   : > { %4145 = vst [vmem:[#allocation7_spill] sm:$0xff] %v3113_v63  ;;  %v4150_v62 = vunpack.c.h.bf16 %v2805_v41  ;;  %v4151_v36 = vunpack.c.l.bf16 %v2789_v33  ;;  %v4152_v37 = vunpack.c.l.bf16 %v2792_v34  ;;  %v4153_v9 = vunpack.c.h.bf16 %v2789_v33 }
  0x93   : > { %2327 = vmatpush3.bf16.xpose.msra.mxu0 %v668_v20  ;;  %2359 = vmatpush3.bf16.xpose.msra.mxu1 %v866_v22  ;;  %v3111_v20 = vadd.f32 %v2230_v55, %v2198_v51  ;;  %v3131_v51 = vmul.f32 %v2999_v26, %v2824_v49  ;;  %v3147_v55 = vmul.f32 %v2808_v42, %v3119_v29  ;;  %v4149_v49 = vunpack.c.h.bf16 %v2802_v40 }
  0x94   : > { %2328 = vmatprep.subr.bf16.mxu0 %v667_v53  ;;  %2360 = vmatprep.subr.bf16.mxu1 %v865_v54  ;;  %v3153_v22 = vpack.c.bf16 %v1049_v16, %v1048_v13  ;;  %v3167_v46 = vadd.f32 %v4148_v21, %v4147_v61  ;;  %v3179_v23 = vadd.f32 %v4152_v37, %v4151_v36  ;;  %v4154_v43 = vunpack.c.h.bf16 %v2792_v34 }
  0x95   : > { %v3135_v47 = vmul.f32 %v2799_v39, %v3111_v20  ;;  %v3143_v52 = vmul.f32 %v2808_v42, %v3111_v20  ;;  %v3173_v10 = vadd.f32 %v4150_v62, %v4149_v49  ;;  %v1046_v16 = vmul.f32 %v2999_v26, %v3020_v0 }
  0x96   : > { %4146 = vst [vmem:[#allocation8_spill] sm:$0xff] %v3153_v22  ;;  %v3185_v13 = vadd.f32 %v4154_v43, %v4153_v9  ;;  %v3189_v40 = vpack.c.bf16 %v1248_v30, %v1247_v1  ;;  %v3193_v41 = vmul.f32 %v2799_v39, %v3167_v46  ;;  %v3197_v61 = vmul.f32 %v2808_v42, %v3167_v46 }
  0x97   : > { %v3201_v33 = vmul.f32 %v2799_v39, %v3173_v10  ;;  %v3205_v34 = vmul.f32 %v2808_v42, %v3173_v10  ;;  %v3217_v1 = vmul.f32 %v2808_v42, %v3179_v23  ;;  %v1047_v21 = vmul.f32 %v2999_v26, %v3022_v32 }
  0x98   : > { %4155 = vst [vmem:[#allocation9_spill] sm:$0xff] %v3189_v40  ;;  %v3221_v30 = vmul.f32 %v2808_v42, %v3185_v13  ;;  %v1245_v36 = vmul.f32 %v3014_v31, %v3020_v0  ;;  %v1246_v37 = vmul.f32 %v3014_v31, %v3022_v32  ;;  %v3241_v49 = vmul.f32 %v2999_v26, %v2956_v11 }
  0x99   : > { %v3237_v7 = vpack.c.bf16 %v1047_v21, %v1046_v16  ;;  %v3247_v0 = vmul.f32 %v2999_v26, %v2958_v12  ;;  %v3251_v32 = vmul.f32 %v3014_v31, %v2956_v11  ;;  %v3255_v9 = vmul.f32 %v3014_v31, %v2958_v12 }
  0x9a   : > { %v3243_v35 = vpack.c.bf16 %v1246_v37, %v1245_v36  ;;  %v3259_v16 = vmul.f32 %v2999_v26, %v3097_v14  ;;  %v3263_v21 = vmul.f32 %v2999_v26, %v3105_v19  ;;  %v3267_v36 = vmul.f32 %v3014_v31, %v3097_v14 }
  0x9b   : > { %2329 = vmatpush3.bf16.xpose.msra.mxu0 %v667_v53  ;;  %2361 = vmatpush3.bf16.xpose.msra.mxu1 %v865_v54  ;;  %v3209_v53 = vmul.f32 %v2799_v39, %v3179_v23  ;;  %v3213_v54 = vmul.f32 %v2799_v39, %v3185_v13  ;;  %4156 = vst [vmem:[#allocation10_spill] sm:$0xff] %v3237_v7  ;;  %v4160_v37 = vunpack.c.l.bf16 %v2895_v17  ;;  %v4161_v43 = vunpack.c.l.bf16 %v2898_v18 }
  0x9c   : > { %2330 = vmatprep.subr.bf16.mxu0 %v666_v45  ;;  %2362 = vmatprep.subr.bf16.mxu1 %v864_v25  ;;  %4157 = vst [vmem:[#allocation11_spill] sm:$0xff] %v3243_v35  ;;  %4158 = vst [vmem:[#allocation12_spill] sm:$0xff] %v3267_v36  ;;  %v3271_v11 = vmul.f32 %v3014_v31, %v3105_v19  ;;  %v1260_v12 = vmul.f32 %v3014_v31, %v2830_v50  ;;  %v4162_v40 = vunpack.c.h.bf16 %v2895_v17 }
  0x9d   : > { %v585_v62 = vadd.f32 %v4161_v43, %v4160_v37  ;;  %v4163_v22 = vunpack.c.h.bf16 %v2898_v18  ;;  %v627_v43 = vmul.f32 %v2799_v39, %v3097_v14  ;;  %v628_v17 = vmul.f32 %v2799_v39, %v3105_v19 }
  0x9e   : > { %4159 = vst [vmem:[#allocation13_spill] sm:$0xff] %v3271_v11  ;;  %v826_v37 = vmul.f32 %v2808_v42, %v3105_v19  ;;  %v1069_v38 = vpack.c.bf16 %v1061_v56, %v3131_v51  ;;  %v1268_v50 = vpack.c.bf16 %v1260_v12, %v1259_v58  ;;  %v3320_v36 = vmul.f32 %v2999_v26, %v3111_v20 }
  0x9f   : > { %v586_v63 = vadd.f32 %v4163_v22, %v4162_v40  ;;  %v825_v40 = vmul.f32 %v2808_v42, %v3097_v14  ;;  %v3324_v11 = vmul.f32 %v2999_v26, %v3119_v29  ;;  %v4166_v14 = vunpack.c.l.bf16 %v2917_v27 }
  0xa0   : > { %4165 = vst [vmem:[#allocation15_spill] sm:$0xff] %v3320_v36  ;;  %v4167_v19 = vunpack.c.l.bf16 %v2920_v28  ;;  %v4168_v56 = vunpack.c.h.bf16 %v2917_v27  ;;  %v4169_v58 = vunpack.c.h.bf16 %v2920_v28  ;;  %v3340_v35 = vmul.f32 %v3014_v31, %v3111_v20 }
  0xa1   : > { %v3301_v18 = vmul.f32 %v2999_v26, %v586_v63  ;;  %v3307_v22 = vmul.f32 %v3014_v31, %v586_v63  ;;  %v3344_v7 = vmul.f32 %v3014_v31, %v3119_v29  ;;  %v3354_v27 = vmul.f32 %v2999_v26, %v3173_v10 }
  0xa2   : > { %v3330_v51 = vadd.f32 %v4167_v19, %v4166_v14  ;;  %v3336_v12 = vadd.f32 %v4169_v58, %v4168_v56  ;;  %4170 = vst [vmem:[#allocation16_spill] sm:$0xff] %v3340_v35  ;;  %v3350_v14 = vmul.f32 %v2999_v26, %v3167_v46  ;;  %v3358_v28 = vmul.f32 %v3014_v31, %v3167_v46 }
  0xa3   : > { %2331 = vmatpush3.bf16.xpose.msra.mxu0 %v666_v45  ;;  %2363 = vmatpush3.bf16.xpose.msra.mxu1 %v864_v25  ;;  %v3296_v45 = vmul.f32 %v2999_v26, %v585_v62  ;;  %v3304_v25 = vmul.f32 %v3014_v31, %v585_v62  ;;  %4171 = vst [vmem:[#allocation17_spill] sm:$0xff] %v3344_v7  ;;  %4173 = vst [vmem:[#allocation19_spill] sm:$0xff] %v3354_v27  ;;  %v4178_v35 = vunpack.c.l.bf16 %v2877_v5 }
  0xa4   : > { %2332 = vmatprep.subr.bf16.mxu0 %v3125_v60  ;;  %2364 = vmatprep.subr.bf16.mxu1 %v3127_v57  ;;  %4172 = vst [vmem:[#allocation18_spill] sm:$0xff] %v3350_v14  ;;  %4174 = vst [vmem:[#allocation20_spill] sm:$0xff] %v3358_v28  ;;  %v3364_v29 = vmul.f32 %v3014_v31, %v3173_v10  ;;  %v3368_v19 = vmul.f32 %v2999_v26, %v3179_v23  ;;  %v4181_v7 = vunpack.c.h.bf16 %v2880_v6 }
  0xa5   : > { %4164 = vst [vmem:[#allocation14_spill] sm:$0xff] %v3304_v25  ;;  %v3372_v56 = vmul.f32 %v2999_v26, %v3185_v13  ;;  %v3380_v58 = vmul.f32 %v3014_v31, %v3179_v23  ;;  %v3384_v10 = vmul.f32 %v3014_v31, %v3185_v13  ;;  %v629_v20 = vmul.f32 %v2799_v39, %v3330_v51 }
  0xa6   : > { %4175 = vst [vmem:[#allocation21_spill] sm:$0xff] %v3364_v29  ;;  %4176 = vst [vmem:[#allocation22_spill] sm:$0xff] %v3368_v19  ;;  %v630_v46 = vmul.f32 %v2799_v39, %v3336_v12  ;;  %v827_v23 = vmul.f32 %v2808_v42, %v3330_v51  ;;  %v828_v13 = vmul.f32 %v2808_v42, %v3336_v12  ;;  %v4180_v29 = vunpack.c.h.bf16 %v2877_v5 }
  0xa7   : > { %4177 = vst [vmem:[#allocation23_spill] sm:$0xff] %v3372_v56  ;;  %v1244_v25 = vpack.c.bf16 %v3384_v10, %v3380_v58  ;;  %v642_v14 = vpack.c.bf16 %v628_v17, %v627_v43  ;;  %v840_v27 = vpack.c.bf16 %v826_v37, %v825_v40  ;;  %v631_v56 = vmul.f32 %v2799_v39, %v585_v62 }
  0xa8   : > { %v841_v19 = vpack.c.bf16 %v828_v13, %v827_v23  ;;  %v3411_v36 = vadd.f32 %v4181_v7, %v4180_v29  ;;  %v632_v43 = vmul.f32 %v2799_v39, %v586_v63  ;;  %v829_v17 = vmul.f32 %v2808_v42, %v585_v62 }
  0xa9   : > { %v830_v40 = vmul.f32 %v2808_v42, %v586_v63  ;;  %v4206_v29 = vld [vmem:[#allocation16_spill] sm:$0xff] }
  0xaa   : > { %v832_v63 = vmul.f32 %v2808_v42, %v3411_v36 }
  0xab   : > { %2333 = vmatpush3.bf16.xpose.msra.mxu0 %v3125_v60  ;;  %2365 = vmatpush3.bf16.xpose.msra.mxu1 %v3127_v57  ;;  %v4179_v60 = vunpack.c.l.bf16 %v2880_v6  ;;  %v643_v57 = vpack.c.bf16 %v630_v46, %v629_v20  ;;  %v634_v6 = vmul.f32 %v2799_v39, %v3411_v36  ;;  %v842_v7 = vpack.c.bf16 %v830_v40, %v829_v17  ;;  %v874_v17 = vld [vmem:[#allocation2 + $0x138] sm:$0xff] }
  0xac   : > { %2382 = vmatprep.subr.bf16.mxu0 %v1069_v38  ;;  %2414 = vmatprep.subr.bf16.mxu1 %v1268_v50 }
  0xad   : > { %v3404_v28 = vadd.f32 %v4179_v60, %v4178_v35  ;;  %v4215_v60 = vld [vmem:[#allocation22_spill] sm:$0xff] }
  0xaf   : > { %v633_v5 = vmul.f32 %v2799_v39, %v3404_v28  ;;  %v831_v35 = vmul.f32 %v2808_v42, %v3404_v28  ;;  %v4182_v39 = vpack.c.bf16 %v3139_v48, %v3135_v47  ;;  %v4183_v42 = vpack.c.bf16 %v3147_v55, %v3143_v52  ;;  %v4190_v52 = vld [vmem:[#allocation6_spill] sm:$0xff]  ;;  %v4193_v55 = vld [vmem:[#allocation9_spill] sm:$0xff] }
  0xb0   : > { %v4186_v47 = vpack.c.bf16 %v3213_v54, %v3209_v53  ;;  %v4189_v48 = vpack.c.bf16 %v3255_v9, %v3251_v32  ;;  %v1031_v32 = vmul.f32 %v2999_v26, %v3411_v36  ;;  %v1229_v37 = vmul.f32 %v3014_v31, %v3404_v28 }
  0xb1   : > { %v645_v62 = vpack.c.bf16 %v634_v6, %v633_v5  ;;  %v673_v6 = vld [vmem:[#allocation2 + $0xb0] sm:$0xff] }
  0xb2   : > { %2335 = vmatmul.mubr.bf16.vlgmr.msra.gmra.mxu0 %v642_v14  ;;  %2367 = vmatmul.mubr.bf16.vlgmr.msra.gmra.mxu1 %v840_v27  ;;  %v4201_v14 = vld [vmem:[#allocation14_spill] sm:$0xff] }
  0xb3   : > { %2383 = vmatpush3.bf16.xpose.msra.mxu0 %v1069_v38  ;;  %2415 = vmatpush3.bf16.xpose.msra.mxu1 %v1268_v50  ;;  %v644_v38 = vpack.c.bf16 %v632_v43, %v631_v56  ;;  %v843_v50 = vpack.c.bf16 %v832_v63, %v831_v35  ;;  %v4202_v27 = vpack.c.bf16 %v3307_v22, %v4201_v14  ;;  %v4214_v22 = vld [vmem:[#allocation23_spill] sm:$0xff]  ;;  %v675_v43 = vld [vmem:[#allocation2 + $0xd8] sm:$0xff]  ;;  %v872_v35 = vld [vmem:[#allocation2 + $0xe0] sm:$0xff] }
  0xb4   : > { %2384 = vmatprep.subr.bf16.mxu0 %v3028_v44  ;;  %2416 = vmatprep.subr.bf16.mxu1 %v3036_v2 }
  0xb5   : > { %2338 = vmatprep.mubr.bf16.mxu0 %v643_v57  ;;  %2370 = vmatprep.mubr.bf16.mxu1 %v841_v19  ;;  %v4216_v57 = vpack.c.bf16 %v4214_v22, %v4215_v60  ;;  %v684_v22 = vld [vmem:[#allocation2 + $0x98] sm:$0xff]  ;;  %v883_v60 = vld [vmem:[#allocation2 + $0x30] sm:$0xff] }
  0xba   : > { %2339 = vmatmul.mubr.bf16.gmra.mxu0 %v644_v38  ;;  %2371 = vmatmul.mubr.bf16.gmra.mxu1 %v842_v7 }
  0xbb   : > { %2385 = vmatpush3.bf16.xpose.msra.mxu0 %v3028_v44  ;;  %2417 = vmatpush3.bf16.xpose.msra.mxu1 %v3036_v2  ;;  %v4184_v44 = vpack.c.bf16 %v3201_v33, %v3193_v41  ;;  %v4185_v2 = vpack.c.bf16 %v3205_v34, %v3197_v61  ;;  %v4194_v41 = vld [vmem:[#allocation10_spill] sm:$0xff]  ;;  %v1027_v61 = vmul.f32 %v2999_v26, %v3336_v12 }
  0xbc   : > { %2386 = vmatprep.subr.bf16.mxu0 %v3045_v8  ;;  %2418 = vmatprep.subr.bf16.mxu1 %v3051_v3  ;;  %v1225_v33 = vmul.f32 %v3014_v31, %v3330_v51  ;;  %v1226_v34 = vmul.f32 %v3014_v31, %v3336_v12  ;;  %v4200_v12 = vpack.c.bf16 %v3301_v18, %v3296_v45  ;;  %v4211_v45 = vld [vmem:[#allocation21_spill] sm:$0xff]  ;;  %v4212_v18 = vld [vmem:[#allocation20_spill] sm:$0xff] }
  0xbd   : > { %2342 = vmatprep.mubr.bf16.mxu0 %v645_v62  ;;  %2374 = vmatprep.mubr.bf16.mxu1 %v843_v50  ;;  %v4213_v46 = vpack.c.bf16 %v4211_v45, %v4212_v18  ;;  %v676_v50 = vld [vmem:[#allocation2 + $0x18] sm:$0xff] }
  0xbe   : > { %v1239_v54 = vpack.c.bf16 %v1226_v34, %v1225_v33 }
  0xc2   : > { %2343 = vmatmul.mubr.bf16.gmra.mxu0 %v4182_v39  ;;  %2375 = vmatmul.mubr.bf16.gmra.mxu1 %v4183_v42  ;;  %v875_v39 = vld [vmem:[#allocation2 + $0x140] sm:$0xff] }
  0xc3   : > { %2387 = vmatpush3.bf16.xpose.msra.mxu0 %v3045_v8  ;;  %2419 = vmatpush3.bf16.xpose.msra.mxu1 %v3051_v3  ;;  %v4187_v8 = vpack.c.bf16 %v3221_v30, %v3217_v1  ;;  %v4188_v3 = vpack.c.bf16 %v3247_v0, %v3241_v49  ;;  %v4196_v1 = vpack.c.bf16 %v3263_v21, %v3259_v16  ;;  %v4197_v30 = vld [vmem:[#allocation13_spill] sm:$0xff]  ;;  %v4198_v49 = vld [vmem:[#allocation12_spill] sm:$0xff] }
  0xc4   : > { %2388 = vmatprep.subr.bf16.mxu0 %v3053_v4  ;;  %2420 = vmatprep.subr.bf16.mxu1 %v3057_v15  ;;  %v4199_v9 = vpack.c.bf16 %v4197_v30, %v4198_v49  ;;  %v1030_v0 = vmul.f32 %v2999_v26, %v3404_v28  ;;  %v4205_v28 = vld [vmem:[#allocation17_spill] sm:$0xff]  ;;  %v879_v30 = vld [vmem:[#allocation2 + $0x28] sm:$0xff] }
  0xc5   : > { %2346 = vmatprep.mubr.bf16.mxu0 %v4184_v44  ;;  %2378 = vmatprep.mubr.bf16.mxu1 %v4185_v2  ;;  %v4207_v19 = vpack.c.bf16 %v4205_v28, %v4206_v29  ;;  %v674_v44 = vld [vmem:[#allocation2 + $0x1b0] sm:$0xff]  ;;  %v873_v2 = vld [vmem:[#allocation2 + $0x188] sm:$0xff] }
  0xc6   : > { %v1042_v16 = vpack.c.bf16 %v1031_v32, %v1030_v0 }
  0xca   : > { %2347 = vmatmul.mubr.bf16.gmra.mxu0 %v4186_v47  ;;  %2379 = vmatmul.mubr.bf16.gmra.mxu1 %v4187_v8 }
  0xcb   : > { %2389 = vmatpush3.bf16.xpose.msra.mxu0 %v3053_v4  ;;  %2421 = vmatpush3.bf16.xpose.msra.mxu1 %v3057_v15  ;;  %v4191_v4 = vld [vmem:[#allocation7_spill] sm:$0xff]  ;;  %v4192_v15 = vld [vmem:[#allocation8_spill] sm:$0xff] }
  0xcc   : > { %2390 = vmatprep.subr.bf16.mxu0 %v3065_v24  ;;  %2422 = vmatprep.subr.bf16.mxu1 %v3067_v59 }
  0xcd   : > { %2398 = vmatprep.mubr.bf16.mxu0 %v4188_v3  ;;  %2430 = vmatprep.mubr.bf16.mxu1 %v4189_v48 }
  0xd3   : > { %2391 = vmatpush3.bf16.xpose.msra.mxu0 %v3065_v24  ;;  %2423 = vmatpush3.bf16.xpose.msra.mxu1 %v3067_v59  ;;  %v4195_v24 = vld [vmem:[#allocation11_spill] sm:$0xff]  ;;  %v1026_v59 = vmul.f32 %v2999_v26, %v3330_v51  ;;  %v1230_v51 = vmul.f32 %v3014_v31, %v3411_v36  ;;  %v4209_v36 = vld [vmem:[#allocation18_spill] sm:$0xff] }
  0xd4   : > { %2392 = vmatprep.subr.bf16.mxu0 %v4190_v52  ;;  %2424 = vmatprep.subr.bf16.mxu1 %v4191_v4  ;;  %v4203_v26 = vld [vmem:[#allocation15_spill] sm:$0xff] }
  0xd5   : > { %v1040_v53 = vpack.c.bf16 %v1027_v61, %v1026_v59  ;;  %v1241_v21 = vpack.c.bf16 %v1230_v51, %v1229_v37  ;;  %v4204_v20 = vpack.c.bf16 %v3324_v11, %v4203_v26  ;;  %v4208_v31 = vld [vmem:[#allocation19_spill] sm:$0xff]  ;;  %v611_v11 = vld [vmem:[#allocation3] sm:$0xf] }
  0xd6   : > { %v4210_v56 = vpack.c.bf16 %v4208_v31, %v4209_v36  ;;  %v677_v59 = vld [vmem:[#allocation2 + $0x50] sm:$0xff]  ;;  %v876_v61 = vld [vmem:[#allocation2 + $0x80] sm:$0xff]  ;;  %v678_v37 = vld [vmem:[#allocation2 + $0x168] sm:$0xff] }
  0xd7   : > { %v877_v51 = vld [vmem:[#allocation2 + $0x1a8] sm:$0xff]  ;;  %v882_v26 = vld [vmem:[#allocation2 + $0x160] sm:$0xff] }
  0xd8   : > { %v681_v31 = vld [vmem:[#allocation2 + $0x180] sm:$0xff]  ;;  %v880_v36 = vld [vmem:[#allocation2 + $0x1e8] sm:$0xff] }
  0xdb   : > { %2393 = vmatpush3.bf16.xpose.msra.mxu0 %v4190_v52  ;;  %2425 = vmatpush3.bf16.xpose.msra.mxu1 %v4191_v4  ;;  %v679_v52 = vld [vmem:[#allocation2 + $0x130] sm:$0xff]  ;;  %v878_v4 = vld [vmem:[#allocation2 + $0x1b8] sm:$0xff] }
  0xdc   : > { %2394 = vmatprep.subr.bf16.mxu0 %v4192_v15  ;;  %2426 = vmatprep.subr.bf16.mxu1 %v4193_v55 }
  0xe3   : > { %2395 = vmatpush3.bf16.xpose.msra.mxu0 %v4192_v15  ;;  %2427 = vmatpush3.bf16.xpose.msra.mxu1 %v4193_v55 }
  0xe4   : > { %2396 = vmatprep.subr.bf16.mxu0 %v4194_v41  ;;  %2428 = vmatprep.subr.bf16.mxu1 %v4195_v24 }
  0xeb   : > { %2397 = vmatpush3.bf16.xpose.msra.mxu0 %v4194_v41  ;;  %2429 = vmatpush3.bf16.xpose.msra.mxu1 %v4195_v24 }
  0xf2   : > { %2399 = vmatmul.mubr.bf16.vlgmr.msra.gmra.mxu0 %v4196_v1  ;;  %2431 = vmatmul.mubr.bf16.vlgmr.msra.gmra.mxu1 %v4199_v9  ;;  %v680_v1 = vld [vmem:[#allocation2 + $0x48] sm:$0xff] }
  0xf3   : > { %2402 = vmatprep.mubr.bf16.mxu0 %v1040_v53  ;;  %2434 = vmatprep.mubr.bf16.mxu1 %v1239_v54 }
  0xfa   : > { %2403 = vmatmul.mubr.bf16.gmra.mxu0 %v4200_v12  ;;  %2435 = vmatmul.mubr.bf16.gmra.mxu1 %v4202_v27  ;;  %v683_v27 = vld [vmem:[#allocation2 + $0x118] sm:$0xff] }
  0xfb   : > { %2406 = vmatprep.mubr.bf16.mxu0 %v1042_v16  ;;  %2438 = vmatprep.mubr.bf16.mxu1 %v1241_v21 }
 0x102   : > { %2407 = vmatmul.mubr.bf16.gmra.mxu0 %v4204_v20  ;;  %2439 = vmatmul.mubr.bf16.gmra.mxu1 %v4207_v19 }
 0x103   : > { %2410 = vmatprep.mubr.bf16.mxu0 %v4210_v56  ;;  %2442 = vmatprep.mubr.bf16.mxu1 %v4213_v46 }
 0x10a   : > { %2411 = vmatmul.mubr.bf16.gmra.mxu0 %v4216_v57  ;;  %2443 = vmatmul.mubr.bf16.gmra.mxu1 %v1244_v25 }
 0x116   : > { %v616_v23 = vpop.xlane.xlu0 %615 }
 0x117   : > { %v617_v13 = vadd.f32 %v616_v23, %v611_v11 }
 0x119   : > { %619 = vst.msk [vmem:[#allocation3] sm:$0xf] %vm618_vm2, %v617_v13 }
 0x172   : > { %v2336_v40 = vpop.f32.mrf.mxu0  ;;  %v2368_v5 = vpop.f32.mrf.mxu1 }
 0x173   : > { %v788_v63 = vadd.f32 %v2336_v40, %v675_v43  ;;  %v987_v38 = vadd.f32 %v2368_v5, %v874_v17  ;;  %v682_v43 = vld [vmem:[#allocation2 + $0x110] sm:$0xff]  ;;  %v881_v17 = vld [vmem:[#allocation2 + $0xf8] sm:$0xff] }
 0x174   : > { %v723_v7 = vpop.f32.mrf.mxu0  ;;  %v922_v62 = vpop.f32.mrf.mxu1 }
 0x175   : > { %804 = vst [vmem:[#allocation2 + $0xd8] sm:$0xff] %v788_v63  ;;  %1003 = vst [vmem:[#allocation2 + $0x138] sm:$0xff] %v987_v38  ;;  %v786_v25 = vadd.f32 %v723_v7, %v673_v6  ;;  %v985_v58 = vadd.f32 %v922_v62, %v872_v35  ;;  %v687_v63 = vld [vmem:[#allocation2 + $0x108] sm:$0xff]  ;;  %v886_v38 = vld [vmem:[#allocation2 + $0xf0] sm:$0xff] }
 0x176   : > { %v2337_v10 = vpop.f32.mrf.mxu0  ;;  %v2369_v42 = vpop.f32.mrf.mxu1 }
 0x177   : > { %802 = vst [vmem:[#allocation2 + $0xb0] sm:$0xff] %v786_v25  ;;  %1001 = vst [vmem:[#allocation2 + $0xe0] sm:$0xff] %v985_v58  ;;  %v789_v47 = vadd.f32 %v2337_v10, %v676_v50  ;;  %v988_v8 = vadd.f32 %v2369_v42, %v875_v39  ;;  %v685_v25 = vld [vmem:[#allocation2 + $0x120] sm:$0xff] }
 0x178   : > { %v726_v3 = vpop.f32.mrf.mxu0  ;;  %v925_v48 = vpop.f32.mrf.mxu1  ;;  %v884_v58 = vld [vmem:[#allocation2 + $0x1e0] sm:$0xff] }
 0x179   : > { %805 = vst [vmem:[#allocation2 + $0x18] sm:$0xff] %v789_v47  ;;  %1004 = vst [vmem:[#allocation2 + $0x140] sm:$0xff] %v988_v8  ;;  %v787_v15 = vadd.f32 %v726_v3, %v674_v44  ;;  %v986_v55 = vadd.f32 %v925_v48, %v873_v2  ;;  %v688_v47 = vld [vmem:[#allocation2 + $0x60] sm:$0xff]  ;;  %v887_v8 = vld [vmem:[#allocation2 + $0x8] sm:$0xff] }
 0x17a   : > { %v2340_v41 = vpop.f32.mrf.mxu0  ;;  %v2372_v24 = vpop.f32.mrf.mxu1 }
 0x17b   : > { %803 = vst [vmem:[#allocation2 + $0x1b0] sm:$0xff] %v787_v15  ;;  %1002 = vst [vmem:[#allocation2 + $0x188] sm:$0xff] %v986_v55  ;;  %v792_v33 = vadd.f32 %v2340_v41, %v679_v52  ;;  %v991_v34 = vadd.f32 %v2372_v24, %v878_v4  ;;  %v686_v15 = vld [vmem:[#allocation2 + $0x150] sm:$0xff]  ;;  %v885_v55 = vld [vmem:[#allocation2] sm:$0xff] }
 0x17c   : > { %v739_v53 = vpop.f32.mrf.mxu0  ;;  %v938_v54 = vpop.f32.mrf.mxu1 }
 0x17d   : > { %808 = vst [vmem:[#allocation2 + $0x130] sm:$0xff] %v792_v33  ;;  %1007 = vst [vmem:[#allocation2 + $0x1b8] sm:$0xff] %v991_v34  ;;  %v790_v49 = vadd.f32 %v739_v53, %v677_v59  ;;  %v989_v9 = vadd.f32 %v938_v54, %v876_v61  ;;  %v1073_v53 = vld [vmem:[#allocation2 + $0x100] sm:$0xff]  ;;  %v1272_v54 = vld [vmem:[#allocation2 + $0xa8] sm:$0xff] }
 0x17e   : > { %v2341_v0 = vpop.f32.mrf.mxu0  ;;  %v2373_v32 = vpop.f32.mrf.mxu1 }
 0x17f   : > { %806 = vst [vmem:[#allocation2 + $0x50] sm:$0xff] %v790_v49  ;;  %1005 = vst [vmem:[#allocation2 + $0x80] sm:$0xff] %v989_v9  ;;  %v793_v16 = vadd.f32 %v2341_v0, %v680_v1  ;;  %v992_v21 = vadd.f32 %v2373_v32, %v879_v30  ;;  %v1071_v49 = vld [vmem:[#allocation2 + $0x148] sm:$0xff]  ;;  %v1270_v9 = vld [vmem:[#allocation2 + $0xb8] sm:$0xff] }
 0x180   : > { %v742_v12 = vpop.f32.mrf.mxu0  ;;  %v941_v14 = vpop.f32.mrf.mxu1 }
 0x181   : > { %809 = vst [vmem:[#allocation2 + $0x48] sm:$0xff] %v793_v16  ;;  %1008 = vst [vmem:[#allocation2 + $0x28] sm:$0xff] %v992_v21  ;;  %v791_v20 = vadd.f32 %v742_v12, %v678_v37  ;;  %v990_v28 = vadd.f32 %v941_v14, %v877_v51  ;;  %v1074_v16 = vld [vmem:[#allocation2 + $0xc8] sm:$0xff] }
 0x182   : > { %v2344_v29 = vpop.f32.mrf.mxu0  ;;  %v2376_v19 = vpop.f32.mrf.mxu1  ;;  %v1273_v21 = vld [vmem:[#allocation2 + $0x1c8] sm:$0xff] }
 0x183   : > { %807 = vst [vmem:[#allocation2 + $0x168] sm:$0xff] %v791_v20  ;;  %1006 = vst [vmem:[#allocation2 + $0x1a8] sm:$0xff] %v990_v28  ;;  %v796_v56 = vadd.f32 %v2344_v29, %v683_v27  ;;  %v995_v45 = vadd.f32 %v2376_v19, %v882_v26  ;;  %v1072_v20 = vld [vmem:[#allocation2 + $0x1d0] sm:$0xff]  ;;  %v1271_v28 = vld [vmem:[#allocation2 + $0x88] sm:$0xff] }
 0x184   : > { %v755_v18 = vpop.f32.mrf.mxu0  ;;  %v954_v46 = vpop.f32.mrf.mxu1 }
 0x185   : > { %812 = vst [vmem:[#allocation2 + $0x118] sm:$0xff] %v796_v56  ;;  %1011 = vst [vmem:[#allocation2 + $0x160] sm:$0xff] %v995_v45  ;;  %v794_v57 = vadd.f32 %v755_v18, %v681_v31  ;;  %v993_v11 = vadd.f32 %v954_v46, %v880_v36  ;;  %v1077_v56 = vld [vmem:[#allocation2 + $0x20] sm:$0xff]  ;;  %v1276_v45 = vld [vmem:[#allocation2 + $0x68] sm:$0xff] }
 0x186   : > { %v2345_v23 = vpop.f32.mrf.mxu0  ;;  %v2377_v13 = vpop.f32.mrf.mxu1 }
 0x187   : > { %810 = vst [vmem:[#allocation2 + $0x180] sm:$0xff] %v794_v57  ;;  %1009 = vst [vmem:[#allocation2 + $0x1e8] sm:$0xff] %v993_v11  ;;  %v797_v40 = vadd.f32 %v2345_v23, %v684_v22  ;;  %v996_v5 = vadd.f32 %v2377_v13, %v883_v60  ;;  %v1075_v57 = vld [vmem:[#allocation2 + $0x40] sm:$0xff]  ;;  %v1274_v11 = vld [vmem:[#allocation2 + $0x170] sm:$0xff] }
 0x188   : > { %v758_v6 = vpop.f32.mrf.mxu0  ;;  %v957_v35 = vpop.f32.mrf.mxu1 }
 0x189   : > { %813 = vst [vmem:[#allocation2 + $0x98] sm:$0xff] %v797_v40  ;;  %1012 = vst [vmem:[#allocation2 + $0x30] sm:$0xff] %v996_v5  ;;  %v795_v7 = vadd.f32 %v758_v6, %v682_v43  ;;  %v994_v62 = vadd.f32 %v957_v35, %v881_v17  ;;  %v1078_v40 = vld [vmem:[#allocation2 + $0x128] sm:$0xff]  ;;  %v1277_v5 = vld [vmem:[#allocation2 + $0x190] sm:$0xff] }
 0x18a   : > { %v2348_v50 = vpop.f32.mrf.mxu0  ;;  %v2380_v39 = vpop.f32.mrf.mxu1 }
 0x18b   : > { %811 = vst [vmem:[#allocation2 + $0x110] sm:$0xff] %v795_v7  ;;  %1010 = vst [vmem:[#allocation2 + $0xf8] sm:$0xff] %v994_v62  ;;  %v800_v10 = vadd.f32 %v2348_v50, %v687_v63  ;;  %v999_v42 = vadd.f32 %v2380_v39, %v886_v38  ;;  %v1076_v7 = vld [vmem:[#allocation2 + $0x1f8] sm:$0xff] }
 0x18c   : > { %v771_v44 = vpop.f32.mrf.mxu0  ;;  %v970_v2 = vpop.f32.mrf.mxu1  ;;  %v1275_v62 = vld [vmem:[#allocation2 + $0x178] sm:$0xff] }
 0x18d   : > { %816 = vst [vmem:[#allocation2 + $0x108] sm:$0xff] %v800_v10  ;;  %1015 = vst [vmem:[#allocation2 + $0xf0] sm:$0xff] %v999_v42  ;;  %v798_v3 = vadd.f32 %v771_v44, %v685_v25  ;;  %v997_v48 = vadd.f32 %v970_v2, %v884_v58  ;;  %v1081_v10 = vld [vmem:[#allocation2 + $0xe8] sm:$0xff]  ;;  %v1280_v42 = vld [vmem:[#allocation2 + $0xc0] sm:$0xff] }
 0x18e   : > { %v2349_v52 = vpop.f32.mrf.mxu0  ;;  %v2381_v4 = vpop.f32.mrf.mxu1 }
 0x18f   : > { %814 = vst [vmem:[#allocation2 + $0x120] sm:$0xff] %v798_v3  ;;  %1013 = vst [vmem:[#allocation2 + $0x1e0] sm:$0xff] %v997_v48  ;;  %v801_v41 = vadd.f32 %v2349_v52, %v688_v47  ;;  %v1000_v24 = vadd.f32 %v2381_v4, %v887_v8  ;;  %v1079_v3 = vld [vmem:[#allocation2 + $0x1a0] sm:$0xff]  ;;  %v1278_v48 = vld [vmem:[#allocation2 + $0x198] sm:$0xff] }
 0x190   : > { %v774_v59 = vpop.f32.mrf.mxu0  ;;  %v973_v61 = vpop.f32.mrf.mxu1 }
 0x191   : > { %817 = vst [vmem:[#allocation2 + $0x60] sm:$0xff] %v801_v41  ;;  %1016 = vst [vmem:[#allocation2 + $0x8] sm:$0xff] %v1000_v24  ;;  %v799_v33 = vadd.f32 %v774_v59, %v686_v15  ;;  %v998_v34 = vadd.f32 %v973_v61, %v885_v55  ;;  %v1082_v41 = vld [vmem:[#allocation2 + $0x78] sm:$0xff]  ;;  %v1281_v24 = vld [vmem:[#allocation2 + $0x1c0] sm:$0xff] }
 0x193   : > { %815 = vst [vmem:[#allocation2 + $0x150] sm:$0xff] %v799_v33  ;;  %1014 = vst [vmem:[#allocation2] sm:$0xff] %v998_v34 }
 0x1b2   : > { %v2400_v1 = vpop.f32.mrf.mxu0  ;;  %v2432_v30 = vpop.f32.mrf.mxu1 }
 0x1b3   : > { %v1186_v0 = vadd.f32 %v2400_v1, %v1073_v53  ;;  %v1385_v32 = vadd.f32 %v2432_v30, %v1272_v54  ;;  %v1080_v53 = vld [vmem:[#allocation2 + $0x1f0] sm:$0xff]  ;;  %v1279_v54 = vld [vmem:[#allocation2 + $0x38] sm:$0xff] }
 0x1b4   : > { %v1121_v37 = vpop.f32.mrf.mxu0  ;;  %v1320_v51 = vpop.f32.mrf.mxu1 }
 0x1b5   : > { %1202 = vst [vmem:[#allocation2 + $0x100] sm:$0xff] %v1186_v0  ;;  %1401 = vst [vmem:[#allocation2 + $0xa8] sm:$0xff] %v1385_v32  ;;  %v1184_v12 = vadd.f32 %v1121_v37, %v1071_v49  ;;  %v1383_v14 = vadd.f32 %v1320_v51, %v1270_v9  ;;  %v1085_v0 = vld [vmem:[#allocation2 + $0x1d8] sm:$0xff] }
 0x1b6   : > { %v2401_v27 = vpop.f32.mrf.mxu0  ;;  %v2433_v26 = vpop.f32.mrf.mxu1  ;;  %v1284_v32 = vld [vmem:[#allocation2 + $0x58] sm:$0xff] }
 0x1b7   : > { %1200 = vst [vmem:[#allocation2 + $0x148] sm:$0xff] %v1184_v12  ;;  %1399 = vst [vmem:[#allocation2 + $0xb8] sm:$0xff] %v1383_v14  ;;  %v1187_v29 = vadd.f32 %v2401_v27, %v1074_v16  ;;  %v1386_v19 = vadd.f32 %v2433_v26, %v1273_v21  ;;  %v1083_v12 = vld [vmem:[#allocation2 + $0x70] sm:$0xff]  ;;  %v1282_v14 = vld [vmem:[#allocation2 + $0x158] sm:$0xff] }
 0x1b8   : > { %v1124_v31 = vpop.f32.mrf.mxu0  ;;  %v1323_v36 = vpop.f32.mrf.mxu1 }
 0x1b9   : > { %1203 = vst [vmem:[#allocation2 + $0xc8] sm:$0xff] %v1187_v29  ;;  %1402 = vst [vmem:[#allocation2 + $0x1c8] sm:$0xff] %v1386_v19  ;;  %v1185_v18 = vadd.f32 %v1124_v31, %v1072_v20  ;;  %v1384_v46 = vadd.f32 %v1323_v36, %v1271_v28  ;;  %v1086_v29 = vld [vmem:[#allocation2 + $0xd0] sm:$0xff]  ;;  %v1285_v19 = vld [vmem:[#allocation2 + $0xa0] sm:$0xff] }
 0x1ba   : > { %v2404_v22 = vpop.f32.mrf.mxu0  ;;  %v2436_v60 = vpop.f32.mrf.mxu1 }
 0x1bb   : > { %1201 = vst [vmem:[#allocation2 + $0x1d0] sm:$0xff] %v1185_v18  ;;  %1400 = vst [vmem:[#allocation2 + $0x88] sm:$0xff] %v1384_v46  ;;  %v1190_v23 = vadd.f32 %v2404_v22, %v1077_v56  ;;  %v1389_v13 = vadd.f32 %v2436_v60, %v1276_v45  ;;  %v1084_v18 = vld [vmem:[#allocation2 + $0x90] sm:$0xff] }
 0x1bc   : > { %v1137_v43 = vpop.f32.mrf.mxu0  ;;  %v1336_v17 = vpop.f32.mrf.mxu1  ;;  %v1283_v46 = vld [vmem:[#allocation2 + $0x10] sm:$0xff] }
 0x1bd   : > { %1206 = vst [vmem:[#allocation2 + $0x20] sm:$0xff] %v1190_v23  ;;  %1405 = vst [vmem:[#allocation2 + $0x68] sm:$0xff] %v1389_v13  ;;  %v1188_v6 = vadd.f32 %v1137_v43, %v1075_v57  ;;  %v1387_v35 = vadd.f32 %v1336_v17, %v1274_v11 }
 0x1be   : > { %v2405_v63 = vpop.f32.mrf.mxu0  ;;  %v2437_v38 = vpop.f32.mrf.mxu1 }
 0x1bf   : > { %1204 = vst [vmem:[#allocation2 + $0x40] sm:$0xff] %v1188_v6  ;;  %1403 = vst [vmem:[#allocation2 + $0x170] sm:$0xff] %v1387_v35  ;;  %v1191_v50 = vadd.f32 %v2405_v63, %v1078_v40  ;;  %v1390_v39 = vadd.f32 %v2437_v38, %v1277_v5 }
 0x1c0   : > { %v1140_v25 = vpop.f32.mrf.mxu0  ;;  %v1339_v58 = vpop.f32.mrf.mxu1 }
 0x1c1   : > { %1207 = vst [vmem:[#allocation2 + $0x128] sm:$0xff] %v1191_v50  ;;  %1406 = vst [vmem:[#allocation2 + $0x190] sm:$0xff] %v1390_v39  ;;  %v1189_v44 = vadd.f32 %v1140_v25, %v1076_v7  ;;  %v1388_v2 = vadd.f32 %v1339_v58, %v1275_v62 }
 0x1c2   : > { %v2408_v47 = vpop.f32.mrf.mxu0  ;;  %v2440_v8 = vpop.f32.mrf.mxu1 }
 0x1c3   : > { %1205 = vst [vmem:[#allocation2 + $0x1f8] sm:$0xff] %v1189_v44  ;;  %1404 = vst [vmem:[#allocation2 + $0x178] sm:$0xff] %v1388_v2  ;;  %v1194_v52 = vadd.f32 %v2408_v47, %v1081_v10  ;;  %v1393_v4 = vadd.f32 %v2440_v8, %v1280_v42 }
 0x1c4   : > { %v1153_v15 = vpop.f32.mrf.mxu0  ;;  %v1352_v55 = vpop.f32.mrf.mxu1 }
 0x1c5   : > { %1210 = vst [vmem:[#allocation2 + $0xe8] sm:$0xff] %v1194_v52  ;;  %1409 = vst [vmem:[#allocation2 + $0xc0] sm:$0xff] %v1393_v4  ;;  %v1192_v59 = vadd.f32 %v1153_v15, %v1079_v3  ;;  %v1391_v61 = vadd.f32 %v1352_v55, %v1278_v48 }
 0x1c6   : > { %v2409_v33 = vpop.f32.mrf.mxu0  ;;  %v2441_v34 = vpop.f32.mrf.mxu1 }
 0x1c7   : > { %1208 = vst [vmem:[#allocation2 + $0x1a0] sm:$0xff] %v1192_v59  ;;  %1407 = vst [vmem:[#allocation2 + $0x198] sm:$0xff] %v1391_v61  ;;  %v1195_v1 = vadd.f32 %v2409_v33, %v1082_v41  ;;  %v1394_v30 = vadd.f32 %v2441_v34, %v1281_v24 }
 0x1c8   : > { %v1156_v49 = vpop.f32.mrf.mxu0  ;;  %v1355_v9 = vpop.f32.mrf.mxu1 }
 0x1c9   : > { %1211 = vst [vmem:[#allocation2 + $0x78] sm:$0xff] %v1195_v1  ;;  %1410 = vst [vmem:[#allocation2 + $0x1c0] sm:$0xff] %v1394_v30  ;;  %v1193_v37 = vadd.f32 %v1156_v49, %v1080_v53  ;;  %v1392_v51 = vadd.f32 %v1355_v9, %v1279_v54 }
 0x1ca   : > { %v2412_v16 = vpop.f32.mrf.mxu0  ;;  %v2444_v21 = vpop.f32.mrf.mxu1 }
 0x1cb   : > { %1209 = vst [vmem:[#allocation2 + $0x1f0] sm:$0xff] %v1193_v37  ;;  %1408 = vst [vmem:[#allocation2 + $0x38] sm:$0xff] %v1392_v51  ;;  %v1198_v27 = vadd.f32 %v2412_v16, %v1085_v0  ;;  %v1397_v26 = vadd.f32 %v2444_v21, %v1284_v32 }
 0x1cc   : > { %v1169_v20 = vpop.f32.mrf.mxu0  ;;  %v1368_v28 = vpop.f32.mrf.mxu1 }
 0x1cd   : > { %1214 = vst [vmem:[#allocation2 + $0x1d8] sm:$0xff] %v1198_v27  ;;  %1413 = vst [vmem:[#allocation2 + $0x58] sm:$0xff] %v1397_v26  ;;  %v1196_v31 = vadd.f32 %v1169_v20, %v1083_v12  ;;  %v1395_v36 = vadd.f32 %v1368_v28, %v1282_v14 }
 0x1ce   : > { %v2413_v56 = vpop.f32.mrf.mxu0  ;;  %v2445_v45 = vpop.f32.mrf.mxu1 }
 0x1cf   : > { %1212 = vst [vmem:[#allocation2 + $0x70] sm:$0xff] %v1196_v31  ;;  %1411 = vst [vmem:[#allocation2 + $0x158] sm:$0xff] %v1395_v36  ;;  %v1199_v22 = vadd.f32 %v2413_v56, %v1086_v29  ;;  %v1398_v60 = vadd.f32 %v2445_v45, %v1285_v19  ;;  %1418 = sbr.rel (%p2173_p13) target bundleno = 987 (0x3db), region = 122 }
 0x1d0   : > { %v1172_v57 = vpop.f32.mrf.mxu0  ;;  %v1371_v11 = vpop.f32.mrf.mxu1 }
 0x1d1   : > { %1215 = vst [vmem:[#allocation2 + $0xd0] sm:$0xff] %v1199_v22  ;;  %1414 = vst [vmem:[#allocation2 + $0xa0] sm:$0xff] %v1398_v60  ;;  %v1197_v23 = vadd.f32 %v1172_v57, %v1084_v18  ;;  %v1396_v13 = vadd.f32 %v1371_v11, %v1283_v46 }
 0x1d3   : > { %1213 = vst [vmem:[#allocation2 + $0x90] sm:$0xff] %v1197_v23  ;;  %1412 = vst [vmem:[#allocation2 + $0x10] sm:$0xff] %v1396_v13 }
 0x1d4   : > { %v3523_v43 = vld [vmem:[#allocation2 + $0xb0] sm:$0xff]  ;;  %v3528_v40 = vld [vmem:[#allocation2 + $0xb8] sm:$0xff]  ;;  %v3531_v5 = vld [vmem:[#allocation2 + $0x88] sm:$0xff]  ;;  %vm2047_vm3 = vcmask 0  }
 0x1d5   : > { %1435 = vxpose.xlu0.b32.start [1/16] %v3523_v43, 128  ;;  %v3526_v17 = vld [vmem:[#allocation2 + $0x1b0] sm:$0xff]  ;;  %1906 = vxpose.xlu1.b32.start [1/16] %v3528_v40, 128  ;;  %v3534_v6 = vld [vmem:[#allocation2 + $0xd8] sm:$0xff]  ;;  %v3537_v35 = vld [vmem:[#allocation2 + $0xa8] sm:$0xff]  ;;  %v1467_v20 = vmul.f32 %v3523_v43, %v3523_v43 }
 0x1d6   : > { %v3540_v63 = vld [vmem:[#allocation2 + $0x18] sm:$0xff]  ;;  %v3543_v38 = vld [vmem:[#allocation2 + $0x1c8] sm:$0xff]  ;;  %v3546_v7 = vld [vmem:[#allocation2 + $0x50] sm:$0xff] }
 0x1d7   : > { %v3549_v62 = vld [vmem:[#allocation2 + $0x170] sm:$0xff]  ;;  %v3552_v50 = vld [vmem:[#allocation2 + $0x168] sm:$0xff]  ;;  %v3555_v39 = vld [vmem:[#allocation2 + $0x178] sm:$0xff] }
 0x1d8   : > { %4217 = vst [vmem:[#allocation24_spill] sm:$0xff] %v3555_v39  ;;  %v3558_v25 = vld [vmem:[#allocation2 + $0x130] sm:$0xff]  ;;  %v3561_v58 = vld [vmem:[#allocation2 + $0x68] sm:$0xff]  ;;  %v3570_v44 = vld [vmem:[#allocation2 + $0x180] sm:$0xff] }
 0x1d9   : > { %1436 = vxpose.xlu0.b32.cont [2/16] %v3526_v17, 128  ;;  %1907 = vxpose.xlu1.b32.cont [2/16] %v3531_v5, 128  ;;  %4218 = vst [vmem:[#allocation25_spill] sm:$0xff] %v3561_v58  ;;  %v3564_v10 = vld [vmem:[#allocation2 + $0x48] sm:$0xff]  ;;  %v3567_v42 = vld [vmem:[#allocation2 + $0x190] sm:$0xff]  ;;  %v3573_v2 = vld [vmem:[#allocation2 + $0x198] sm:$0xff] }
 0x1da   : > { %4219 = vst [vmem:[#allocation26_spill] sm:$0xff] %v3567_v42  ;;  %4220 = vst [vmem:[#allocation27_spill] sm:$0xff] %v3573_v2  ;;  %v3576_v47 = vld [vmem:[#allocation2 + $0x110] sm:$0xff]  ;;  %v3579_v8 = vld [vmem:[#allocation2 + $0x38] sm:$0xff] }
 0x1db   : > { %4221 = vst [vmem:[#allocation28_spill] sm:$0xff] %v3579_v8  ;;  %v3582_v3 = vld [vmem:[#allocation2 + $0x118] sm:$0xff]  ;;  %v3585_v48 = vld [vmem:[#allocation2 + $0xc0] sm:$0xff]  ;;  %v3600_v41 = vld [vmem:[#allocation2 + $0x150] sm:$0xff] }
 0x1dc   : > { %4222 = vst [vmem:[#allocation29_spill] sm:$0xff] %v3585_v48  ;;  %v3588_v52 = vld [vmem:[#allocation2 + $0x98] sm:$0xff]  ;;  %v3591_v4 = vld [vmem:[#allocation2 + $0x1c0] sm:$0xff]  ;;  %v3603_v24 = vld [vmem:[#allocation2 + $0x10] sm:$0xff] }
 0x1dd   : > { %1437 = vxpose.xlu0.b32.cont [3/16] %v3534_v6, 128  ;;  %1908 = vxpose.xlu1.b32.cont [3/16] %v3537_v35, 128  ;;  %4223 = vst [vmem:[#allocation30_spill] sm:$0xff] %v3591_v4  ;;  %v3594_v15 = vld [vmem:[#allocation2 + $0x120] sm:$0xff]  ;;  %v3597_v55 = vld [vmem:[#allocation2 + $0x158] sm:$0xff]  ;;  %4225 = vst [vmem:[#allocation32_spill] sm:$0xff] %v3603_v24 }
 0x1de   : > { %4224 = vst [vmem:[#allocation31_spill] sm:$0xff] %v3597_v55  ;;  %v3606_v59 = vld [vmem:[#allocation2 + $0x108] sm:$0xff]  ;;  %v3609_v61 = vld [vmem:[#allocation2 + $0x58] sm:$0xff]  ;;  %v3612_v33 = vld [vmem:[#allocation2 + $0x60] sm:$0xff] }
 0x1df   : > { %4226 = vst [vmem:[#allocation33_spill] sm:$0xff] %v3609_v61  ;;  %v3615_v34 = vld [vmem:[#allocation2 + $0xa0] sm:$0xff]  ;;  %v3622_v54 = vld [vmem:[#allocation2 + $0x188] sm:$0xff]  ;;  %v3625_v1 = vld [vmem:[#allocation2 + $0x138] sm:$0xff] }
 0x1e0   : > { %4227 = vst [vmem:[#allocation34_spill] sm:$0xff] %v3615_v34  ;;  %v3618_v53 = vld [vmem:[#allocation2 + $0xe0] sm:$0xff]  ;;  %v3634_v9 = vld [vmem:[#allocation2 + $0x1a8] sm:$0xff]  ;;  %v3637_v0 = vld [vmem:[#allocation2 + $0x1b8] sm:$0xff] }
 0x1e1   : > { %1438 = vxpose.xlu0.b32.cont [4/16] %v3540_v63, 128  ;;  %1909 = vxpose.xlu1.b32.cont [4/16] %v3543_v38, 128  ;;  %v3628_v30 = vld [vmem:[#allocation2 + $0x140] sm:$0xff]  ;;  %v3640_v32 = vld [vmem:[#allocation2 + $0x28] sm:$0xff]  ;;  %v3646_v51 = vld [vmem:[#allocation2 + $0xf8] sm:$0xff] }
 0x1e2   : > { %v3631_v49 = vld [vmem:[#allocation2 + $0x80] sm:$0xff]  ;;  %v3643_v37 = vld [vmem:[#allocation2 + $0x1e8] sm:$0xff]  ;;  %v3652_v21 = vld [vmem:[#allocation2 + $0x30] sm:$0xff] }
 0x1e3   : > { %v3649_v16 = vld [vmem:[#allocation2 + $0x160] sm:$0xff]  ;;  %4228 = vst [vmem:[#allocation35_spill] sm:$0xff] %v3652_v21  ;;  %v3661_v27 = vld [vmem:[#allocation2 + $0xf0] sm:$0xff]  ;;  %v3664_v26 = vld [vmem:[#allocation2 + $0x8] sm:$0xff] }
 0x1e4   : > { %v3655_v12 = vld [vmem:[#allocation2 + $0x1e0] sm:$0xff]  ;;  %4231 = vst [vmem:[#allocation38_spill] sm:$0xff] %v3661_v27  ;;  %4232 = vst [vmem:[#allocation39_spill] sm:$0xff] %v3664_v26  ;;  %v3670_v19 = vld [vmem:[#allocation2 + $0x148] sm:$0xff] }
 0x1e5   : > { %1439 = vxpose.xlu0.b32.cont [5/16] %v3546_v7, 128  ;;  %1910 = vxpose.xlu1.b32.cont [5/16] %v3549_v62, 128  ;;  %4229 = vst [vmem:[#allocation36_spill] sm:$0xff] %v3655_v12  ;;  %v3658_v14 = vld [vmem:[#allocation2] sm:$0xff]  ;;  %v3673_v56 = vld [vmem:[#allocation2 + $0x1d0] sm:$0xff]  ;;  %v3681_v22 = vld [vmem:[#allocation2 + $0xc8] sm:$0xff] }
 0x1e6   : > { %4230 = vst [vmem:[#allocation37_spill] sm:$0xff] %v3658_v14  ;;  %v3676_v18 = vld [vmem:[#allocation2 + $0x100] sm:$0xff]  ;;  %v3691_v23 = vld [vmem:[#allocation2 + $0x1f8] sm:$0xff] }
 0x1e7   : > { %4233 = vst [vmem:[#allocation40_spill] sm:$0xff] %v3676_v18  ;;  %v3686_v57 = vld [vmem:[#allocation2 + $0x40] sm:$0xff] }
 0x1e9   : > { %1440 = vxpose.xlu0.b32.cont [6/16] %v3552_v50, 128  ;;  %1911 = vxpose.xlu1.b32.cont [6/16] %v3555_v39, 128 }
 0x1ed   : > { %1441 = vxpose.xlu0.b32.cont [7/16] %v3558_v25, 128  ;;  %1912 = vxpose.xlu1.b32.cont [7/16] %v3561_v58, 128 }
 0x1f1   : > { %1442 = vxpose.xlu0.b32.cont [8/16] %v3564_v10, 128  ;;  %1913 = vxpose.xlu1.b32.cont [8/16] %v3567_v42, 128 }
 0x1f5   : > { %1443 = vxpose.xlu0.b32.cont [9/16] %v3570_v44, 128  ;;  %1914 = vxpose.xlu1.b32.cont [9/16] %v3573_v2, 128  ;;  %v1624_v2 = vmul.f32 %v3618_v53, %v3618_v53 }
 0x1f9   : > { %1444 = vxpose.xlu0.b32.cont [10/16] %v3576_v47, 128  ;;  %1915 = vxpose.xlu1.b32.cont [10/16] %v3579_v8, 128 }
 0x1fd   : > { %1445 = vxpose.xlu0.b32.cont [11/16] %v3582_v3, 128  ;;  %1916 = vxpose.xlu1.b32.cont [11/16] %v3585_v48, 128  ;;  %v3721_v48 = vld [vmem:[#allocation2 + $0x78] sm:$0xff] }
 0x1fe   : > { %4239 = vst [vmem:[#allocation46_spill] sm:$0xff] %v3721_v48 }
 0x201   : > { %1446 = vxpose.xlu0.b32.cont [12/16] %v3588_v52, 128  ;;  %1917 = vxpose.xlu1.b32.cont [12/16] %v3591_v4, 128 }
 0x205   : > { %1447 = vxpose.xlu0.b32.cont [13/16] %v3594_v15, 128  ;;  %1918 = vxpose.xlu1.b32.cont [13/16] %v3597_v55, 128  ;;  %v3716_v55 = vld [vmem:[#allocation2 + $0xe8] sm:$0xff] }
 0x206   : > { %4238 = vst [vmem:[#allocation45_spill] sm:$0xff] %v3716_v55 }
 0x209   : > { %1448 = vxpose.xlu0.b32.cont [14/16] %v3600_v41, 128  ;;  %1919 = vxpose.xlu1.b32.cont [14/16] %v3603_v24, 128 }
 0x20d   : > { %1449 = vxpose.xlu0.b32.cont [15/16] %v3606_v59, 128  ;;  %1920 = vxpose.xlu1.b32.cont [15/16] %v3609_v61, 128  ;;  %v3711_v61 = vld [vmem:[#allocation2 + $0x1f0] sm:$0xff] }
 0x20e   : > { %4237 = vst [vmem:[#allocation44_spill] sm:$0xff] %v3711_v61 }
 0x211   : > { %1450 = vxpose.xlu0.b32.end [16/16] %v3612_v33, 128  ;;  %1921 = vxpose.xlu1.b32.end [16/16] %v3615_v34, 128 }
 0x215   : > { %1592 = vxpose.xlu0.b32.start [1/16] %v3618_v53, 128 }
 0x219   : > { %1593 = vxpose.xlu0.b32.cont [2/16] %v3622_v54, 128 }
 0x21d   : > { %1594 = vxpose.xlu0.b32.cont [3/16] %v3625_v1, 128 }
 0x221   : > { %1595 = vxpose.xlu0.b32.cont [4/16] %v3628_v30, 128 }
 0x225   : > { %1596 = vxpose.xlu0.b32.cont [5/16] %v3631_v49, 128 }
 0x229   : > { %1597 = vxpose.xlu0.b32.cont [6/16] %v3634_v9, 128 }
 0x22d   : > { %1598 = vxpose.xlu0.b32.cont [7/16] %v3637_v0, 128 }
 0x231   : > { %1599 = vxpose.xlu0.b32.cont [8/16] %v3640_v32, 128 }
 0x235   : > { %1600 = vxpose.xlu0.b32.cont [9/16] %v3643_v37, 128 }
 0x239   : > { %1601 = vxpose.xlu0.b32.cont [10/16] %v3646_v51, 128 }
 0x23d   : > { %1602 = vxpose.xlu0.b32.cont [11/16] %v3649_v16, 128 }
 0x241   : > { %1603 = vxpose.xlu0.b32.cont [12/16] %v3652_v21, 128 }
 0x245   : > { %1604 = vxpose.xlu0.b32.cont [13/16] %v3655_v12, 128  ;;  %v1625_v12 = vmul.f32 %v3622_v54, %v3622_v54 }
 0x249   : > { %1605 = vxpose.xlu0.b32.cont [14/16] %v3658_v14, 128  ;;  %v1468_v14 = vmul.f32 %v3526_v17, %v3526_v17 }
 0x24d   : > { %1606 = vxpose.xlu0.b32.cont [15/16] %v3661_v27, 128 }
 0x251   : > { %1607 = vxpose.xlu0.b32.end [16/16] %v3664_v26, 128  ;;  %v1451_v28 = vpop.trf.xlu0 }
 0x252   : > { %v1483_v29 = vmul.f32 %v1451_v28, %v3523_v43  ;;  %v3696_v43 = vld [vmem:[#allocation2 + $0x20] sm:$0xff]  ;;  %v3701_v28 = vld [vmem:[#allocation2 + $0x128] sm:$0xff] }
 0x253   : > { %4234 = vst [vmem:[#allocation41_spill] sm:$0xff] %v3696_v43  ;;  %4235 = vst [vmem:[#allocation42_spill] sm:$0xff] %v3701_v28 }
 0x254   : > { %v1499_v31 = vadd.f32 %v1483_v29, %v1467_v20 }
 0x255   : > { %1749 = vxpose.xlu0.b32.start [1/16] %v3670_v19, 128  ;;  %v1452_v36 = vpop.trf.xlu0 }
 0x256   : > { %1515 = vadd.xlane.f32.xlu1 %v1499_v31  ;;  %v3706_v31 = vld [vmem:[#allocation2 + $0x1a0] sm:$0xff] }
 0x257   : > { %4236 = vst [vmem:[#allocation43_spill] sm:$0xff] %v3706_v31 }
 0x259   : > { %1750 = vxpose.xlu0.b32.cont [2/16] %v3673_v56, 128  ;;  %v1453_v45 = vpop.trf.xlu0 }
 0x25d   : > { %1751 = vxpose.xlu0.b32.cont [3/16] %v3676_v18, 128  ;;  %v3679_v46 = vpop.trf.xlu0 }
 0x261   : > { %1752 = vxpose.xlu0.b32.cont [4/16] %v3681_v22, 128  ;;  %v3684_v60 = vpop.trf.xlu0 }
 0x265   : > { %1753 = vxpose.xlu0.b32.cont [5/16] %v3686_v57, 128  ;;  %v3689_v11 = vpop.trf.xlu0 }
 0x269   : > { %1754 = vxpose.xlu0.b32.cont [6/16] %v3691_v23, 128  ;;  %v3694_v13 = vpop.trf.xlu0 }
 0x26d   : > { %1755 = vxpose.xlu0.b32.cont [7/16] %v3696_v43, 128  ;;  %v3699_v20 = vpop.trf.xlu0  ;;  %v1485_v43 = vmul.f32 %v1453_v45, %v3534_v6  ;;  %v1488_v45 = vmul.f32 %v3689_v11, %v3552_v50 }
 0x26e   : > { %v1490_v11 = vmul.f32 %v3699_v20, %v3564_v10 }
 0x271   : > { %1756 = vxpose.xlu0.b32.cont [8/16] %v3701_v28, 128  ;;  %v3704_v29 = vpop.trf.xlu0 }
 0x275   : > { %1757 = vxpose.xlu0.b32.cont [9/16] %v3706_v31, 128  ;;  %v3709_v34 = vpop.trf.xlu0  ;;  %v3726_v31 = vld [vmem:[#allocation2 + $0x70] sm:$0xff] }
 0x276   : > { %4240 = vst [vmem:[#allocation47_spill] sm:$0xff] %v3726_v31  ;;  %v1492_v20 = vmul.f32 %v3709_v34, %v3576_v47 }
 0x279   : > { %1758 = vxpose.xlu0.b32.cont [10/16] %v3711_v61, 128  ;;  %v3714_v24 = vpop.trf.xlu0  ;;  %v3731_v61 = vld [vmem:[#allocation2 + $0x90] sm:$0xff] }
 0x27a   : > { %4241 = vst [vmem:[#allocation48_spill] sm:$0xff] %v3731_v61 }
 0x27d   : > { %1759 = vxpose.xlu0.b32.cont [11/16] %v3716_v55, 128  ;;  %v3719_v4 = vpop.trf.xlu0  ;;  %v3736_v55 = vld [vmem:[#allocation2 + $0x1d8] sm:$0xff] }
 0x27e   : > { %4242 = vst [vmem:[#allocation49_spill] sm:$0xff] %v3736_v55  ;;  %v1494_v34 = vmul.f32 %v3719_v4, %v3588_v52 }
 0x281   : > { %1760 = vxpose.xlu0.b32.cont [12/16] %v3721_v48, 128  ;;  %v3724_v28 = vpop.trf.xlu0  ;;  %v3741_v48 = vld [vmem:[#allocation2 + $0xd0] sm:$0xff] }
 0x282   : > { %4243 = vst [vmem:[#allocation50_spill] sm:$0xff] %v3741_v48 }
 0x285   : > { %1761 = vxpose.xlu0.b32.cont [13/16] %v3726_v31, 128  ;;  %v3729_v18 = vpop.trf.xlu0 }
 0x286   : > { %v1496_v4 = vmul.f32 %v3729_v18, %v3600_v41 }
 0x289   : > { %1762 = vxpose.xlu0.b32.cont [14/16] %v3731_v61, 128  ;;  %v3734_v8 = vpop.trf.xlu0  ;;  %v1484_v61 = vmul.f32 %v1452_v36, %v3526_v17  ;;  %v1626_v17 = vmul.f32 %v3625_v1, %v3625_v1  ;;  %v1471_v36 = vmul.f32 %v3546_v7, %v3546_v7 }
 0x28b   : > { %v1500_v39 = vadd.f32 %v1484_v61, %v1468_v14  ;;  %v1487_v14 = vmul.f32 %v3684_v60, %v3546_v7  ;;  %v1473_v7 = vmul.f32 %v3558_v25, %v3558_v25 }
 0x28d   : > { %1763 = vxpose.xlu0.b32.cont [15/16] %v3736_v55, 128  ;;  %v3739_v26 = vpop.trf.xlu0 }
 0x291   : > { %1764 = vxpose.xlu0.b32.end [16/16] %v3741_v48, 128  ;;  %v1608_v31 = vpop.trf.xlu0 }
 0x292   : > { %v1640_v27 = vmul.f32 %v1608_v31, %v3618_v53  ;;  %v1469_v53 = vmul.f32 %v3534_v6, %v3534_v6  ;;  %v1489_v31 = vmul.f32 %v3694_v13, %v3558_v25  ;;  %v1491_v13 = vmul.f32 %v3704_v29, %v3570_v44 }
 0x293   : > { %v1475_v25 = vmul.f32 %v3570_v44, %v3570_v44  ;;  %v1493_v29 = vmul.f32 %v3714_v24, %v3582_v3  ;;  %v1477_v44 = vmul.f32 %v3582_v3, %v3582_v3  ;;  %v1495_v24 = vmul.f32 %v3724_v28, %v3594_v15 }
 0x294   : > { %v1656_v42 = vadd.f32 %v1640_v27, %v1624_v2  ;;  %v1479_v3 = vmul.f32 %v3594_v15, %v3594_v15  ;;  %v1782_v15 = vmul.f32 %v3673_v56, %v3673_v56 }
 0x295   : > { %v1609_v58 = vpop.trf.xlu0 }
 0x296   : > { %v1641_v55 = vmul.f32 %v1609_v58, %v3622_v54  ;;  %1672 = vadd.xlane.f32.xlu1 %v1656_v42  ;;  %v1501_v58 = vadd.f32 %v1485_v43, %v1469_v53 }
 0x298   : > { %v1657_v48 = vadd.f32 %v1641_v55, %v1625_v12  ;;  %v1470_v55 = vmul.f32 %v3540_v63, %v3540_v63 }
 0x299   : > { %v1610_v21 = vpop.trf.xlu0 }
 0x29a   : > { %1517 = vadd.xlane.f32.xlu1 %v1500_v39  ;;  %v1642_v27 = vmul.f32 %v1610_v21, %v3625_v1  ;;  %v1486_v39 = vmul.f32 %v3679_v46, %v3540_v63  ;;  %v1503_v46 = vadd.f32 %v1487_v14, %v1471_v36  ;;  %v1509_v14 = vadd.f32 %v1493_v29, %v1477_v44 }
 0x29b   : > { %v1628_v44 = vmul.f32 %v3631_v49, %v3631_v49 }
 0x29c   : > { %v1658_v61 = vadd.f32 %v1642_v27, %v1626_v17  ;;  %v1502_v1 = vadd.f32 %v1486_v39, %v1470_v55  ;;  %v1922_v17 = vpop.trf.xlu1  ;;  %v1507_v39 = vadd.f32 %v1491_v13, %v1475_v25  ;;  %v1481_v13 = vmul.f32 %v3606_v59, %v3606_v59 }
 0x29d   : > { %v1611_v2 = vpop.trf.xlu0 }
 0x29e   : > { %1674 = vadd.xlane.f32.xlu1 %v1657_v48  ;;  %v1643_v6 = vmul.f32 %v1611_v2, %v3628_v30  ;;  %v1627_v48 = vmul.f32 %v3628_v30, %v3628_v30  ;;  %v1472_v30 = vmul.f32 %v3552_v50, %v3552_v50  ;;  %v1505_v2 = vadd.f32 %v1489_v31, %v1473_v7 }
 0x29f   : > { %v1474_v50 = vmul.f32 %v3564_v10, %v3564_v10  ;;  %v1476_v10 = vmul.f32 %v3576_v47, %v3576_v47  ;;  %v1478_v47 = vmul.f32 %v3588_v52, %v3588_v52  ;;  %v1511_v31 = vadd.f32 %v1495_v24, %v1479_v3 }
 0x2a0   : > { %v1659_v12 = vadd.f32 %v1643_v6, %v1627_v48  ;;  %v1504_v60 = vadd.f32 %v1488_v45, %v1472_v30  ;;  %v1923_v55 = vpop.trf.xlu1  ;;  %v1781_v52 = vmul.f32 %v3670_v19, %v3670_v19 }
 0x2a1   : > { %v3759_v42 = vpop.trf.xlu0  ;;  %v1508_v48 = vadd.f32 %v1492_v20, %v1476_v10  ;;  %v1510_v45 = vadd.f32 %v1494_v34, %v1478_v47  ;;  %v1498_v20 = vmul.f32 %v3739_v26, %v3612_v33  ;;  %v1482_v10 = vmul.f32 %v3612_v33, %v3612_v33 }
 0x2a2   : > { %1519 = vadd.xlane.f32.xlu1 %v1501_v58  ;;  %v1506_v58 = vadd.f32 %v1490_v11, %v1474_v50  ;;  %v1644_v26 = vmul.f32 %v3759_v42, %v3631_v49  ;;  %v1784_v34 = vmul.f32 %v3681_v22, %v3681_v22  ;;  %v1629_v42 = vmul.f32 %v3634_v9, %v3634_v9 }
 0x2a3   : > { %v1940_v49 = vmul.f32 %v3537_v35, %v3537_v35 }
 0x2a5   : > { %v3765_v54 = vpop.trf.xlu0 }
 0x2a6   : > { %1676 = vadd.xlane.f32.xlu1 %v1658_v61 }
 0x2a9   : > { %v3770_v21 = vpop.trf.xlu0 }
 0x2aa   : > { %1521 = vadd.xlane.f32.xlu1 %v1502_v1 }
 0x2ad   : > { %v3776_v63 = vpop.trf.xlu0 }
 0x2ae   : > { %1678 = vadd.xlane.f32.xlu1 %v1659_v12  ;;  %v1924_v12 = vpop.trf.xlu1 }
 0x2b1   : > { %v3782_v43 = vpop.trf.xlu0 }
 0x2b2   : > { %1523 = vadd.xlane.f32.xlu1 %v1503_v46  ;;  %v3824_v46 = vpop.trf.xlu1 }
 0x2b5   : > { %v3788_v53 = vpop.trf.xlu0 }
 0x2b6   : > { %1525 = vadd.xlane.f32.xlu1 %v1504_v60  ;;  %v1480_v60 = vmul.f32 %v3600_v41, %v3600_v41  ;;  %v3837_v11 = vpop.trf.xlu1  ;;  %v1938_v41 = vmul.f32 %v3528_v40, %v3528_v40 }
 0x2b8   : > { %v1512_v50 = vadd.f32 %v1496_v4, %v1480_v60  ;;  %v1956_v4 = vmul.f32 %v1924_v12, %v3537_v35  ;;  %v1647_v35 = vmul.f32 %v3776_v63, %v3640_v32 }
 0x2b9   : > { %v3794_v27 = vpop.trf.xlu0 }
 0x2ba   : > { %1527 = vadd.xlane.f32.xlu1 %v1505_v2  ;;  %v1497_v2 = vmul.f32 %v3734_v8, %v3606_v59  ;;  %v3851_v29 = vpop.trf.xlu1 }
 0x2bc   : > { %v1513_v8 = vadd.f32 %v1497_v2, %v1481_v13 }
 0x2bd   : > { %v3800_v61 = vpop.trf.xlu0 }
 0x2be   : > { %1529 = vadd.xlane.f32.xlu1 %v1506_v58  ;;  %v3865_v24 = vpop.trf.xlu1 }
 0x2c1   : > { %v3806_v6 = vpop.trf.xlu0 }
 0x2c2   : > { %1531 = vadd.xlane.f32.xlu1 %v1507_v39 }
 0x2c5   : > { %v3812_v1 = vpop.trf.xlu0 }
 0x2c6   : > { %1533 = vadd.xlane.f32.xlu1 %v1508_v48  ;;  %v1939_v48 = vmul.f32 %v3531_v5, %v3531_v5 }
 0x2c9   : > { %v3818_v36 = vpop.trf.xlu0 }
 0x2ca   : > { %1535 = vadd.xlane.f32.xlu1 %v1509_v14 }
 0x2cd   : > { %v3826_v30 = vpop.trf.xlu0 }
 0x2ce   : > { %1537 = vadd.xlane.f32.xlu1 %v1510_v45 }
 0x2d1   : > { %v1765_v28 = vpop.trf.xlu0 }
 0x2d2   : > { %v1797_v7 = vmul.f32 %v1765_v28, %v3670_v19  ;;  %1539 = vadd.xlane.f32.xlu1 %v1511_v31  ;;  %v1954_v19 = vmul.f32 %v1922_v17, %v3528_v40  ;;  %v1514_v17 = vadd.f32 %v1498_v20, %v1482_v10  ;;  %v1972_v28 = vadd.f32 %v1956_v4, %v1940_v49 }
 0x2d3   : > { %v1958_v20 = vmul.f32 %v3837_v11, %v3549_v62 }
 0x2d4   : > { %v1813_v18 = vadd.f32 %v1797_v7, %v1781_v52  ;;  %v1970_v40 = vadd.f32 %v1954_v19, %v1938_v41  ;;  %v3878_v52 = vpop.trf.xlu1  ;;  %v1649_v41 = vmul.f32 %v3788_v53, %v3646_v51  ;;  %v1634_v53 = vmul.f32 %v3649_v16, %v3649_v16 }
 0x2d5   : > { %v1766_v58 = vpop.trf.xlu0 }
 0x2d6   : > { %v1798_v25 = vmul.f32 %v1766_v58, %v3673_v56  ;;  %1829 = vadd.xlane.f32.xlu0 %v1813_v18  ;;  %1541 = vadd.xlane.f32.xlu1 %v1512_v50  ;;  %v1955_v56 = vmul.f32 %v1923_v55, %v3531_v5  ;;  %v1645_v5 = vmul.f32 %v3765_v54, %v3634_v9 }
 0x2d7   : > { %v1660_v55 = vadd.f32 %v1644_v26, %v1628_v44  ;;  %v1630_v54 = vmul.f32 %v3637_v0, %v3637_v0  ;;  %v1785_v9 = vmul.f32 %v3686_v57, %v3686_v57  ;;  %v1648_v18 = vmul.f32 %v3782_v43, %v3643_v37 }
 0x2d8   : > { %v1814_v39 = vadd.f32 %v1798_v25, %v1782_v15  ;;  %v1971_v14 = vadd.f32 %v1955_v56, %v1939_v48  ;;  %v1661_v31 = vadd.f32 %v1645_v5, %v1629_v42  ;;  %v3889_v15 = vpop.trf.xlu1  ;;  %v1632_v50 = vmul.f32 %v3643_v37, %v3643_v37  ;;  %v4245_v56 = vld [vmem:[#allocation35_spill] sm:$0xff] }
 0x2d9   : > { %v3853_v59 = vpop.trf.xlu0  ;;  %v1942_v37 = vmul.f32 %v3549_v62, %v3549_v62  ;;  %v1651_v26 = vmul.f32 %v3800_v61, %v4245_v56 }
 0x2da   : > { %1831 = vadd.xlane.f32.xlu0 %v1814_v39  ;;  %1543 = vadd.xlane.f32.xlu1 %v1513_v8  ;;  %v1664_v19 = vadd.f32 %v1648_v18, %v1632_v50  ;;  %v4244_v8 = vld [vmem:[#allocation41_spill] sm:$0xff] }
 0x2dc   : > { %v1931_v43 = vpop.trf.xlu1 }
 0x2dd   : > { %v1768_v33 = vpop.trf.xlu0 }
 0x2de   : > { %1986 = vadd.xlane.f32.xlu0 %v1970_v40  ;;  %1545 = vadd.xlane.f32.xlu1 %v1514_v17  ;;  %v1800_v47 = vmul.f32 %v1768_v33, %v3681_v22  ;;  %v1646_v22 = vmul.f32 %v3770_v21, %v3637_v0  ;;  %v1631_v21 = vmul.f32 %v3640_v32, %v3640_v32 }
 0x2df   : > { %v1941_v0 = vmul.f32 %v3543_v38, %v3543_v38  ;;  %v1786_v32 = vmul.f32 %v3691_v23, %v3691_v23  ;;  %v1974_v40 = vadd.f32 %v1958_v20, %v1942_v37 }
 0x2e0   : > { %v1816_v45 = vadd.f32 %v1800_v47, %v1784_v34  ;;  %v1662_v12 = vadd.f32 %v1646_v22, %v1630_v54  ;;  %v1663_v63 = vadd.f32 %v1647_v35, %v1631_v21  ;;  %v1932_v48 = vpop.trf.xlu1  ;;  %v4247_v34 = vld [vmem:[#allocation36_spill] sm:$0xff] }
 0x2e1   : > { %v1769_v3 = vpop.trf.xlu0  ;;  %v1636_v61 = vmul.f32 %v4247_v34, %v4247_v34 }
 0x2e2   : > { %1988 = vadd.xlane.f32.xlu0 %v1971_v14  ;;  %1680 = vadd.xlane.f32.xlu1 %v1660_v55  ;;  %v1801_v60 = vmul.f32 %v1769_v3, %v3686_v57  ;;  %v1957_v57 = vmul.f32 %v3824_v46, %v3543_v38  ;;  %v1633_v38 = vmul.f32 %v3646_v51, %v3646_v51  ;;  %v4248_v55 = vld [vmem:[#allocation25_spill] sm:$0xff] }
 0x2e3   : > { %v1787_v51 = vmul.f32 %v4244_v8, %v4244_v8  ;;  %v1652_v14 = vmul.f32 %v3806_v6, %v4247_v34  ;;  %v1944_v42 = vmul.f32 %v4248_v55, %v4248_v55 }
 0x2e4   : > { %v1817_v7 = vadd.f32 %v1801_v60, %v1785_v9  ;;  %v1973_v58 = vadd.f32 %v1957_v57, %v1941_v0  ;;  %v1665_v39 = vadd.f32 %v1649_v41, %v1633_v38  ;;  %v1933_v5 = vpop.trf.xlu1  ;;  %v4251_v60 = vld [vmem:[#allocation38_spill] sm:$0xff]  ;;  %v4253_v0 = vld [vmem:[#allocation39_spill] sm:$0xff] }
 0x2e5   : > { %v1770_v2 = vpop.trf.xlu0  ;;  %v1668_v4 = vadd.f32 %v1652_v14, %v1636_v61  ;;  %v4261_v14 = vld [vmem:[#allocation31_spill] sm:$0xff] }
 0x2e6   : > { %1835 = vadd.xlane.f32.xlu0 %v1816_v45  ;;  %1682 = vadd.xlane.f32.xlu1 %v1661_v31  ;;  %v1802_v13 = vmul.f32 %v1770_v2, %v3691_v23  ;;  %v1650_v23 = vmul.f32 %v3794_v27, %v3649_v16  ;;  %v1635_v27 = vmul.f32 %v4245_v56, %v4245_v56  ;;  %v4246_v16 = vld [vmem:[#allocation24_spill] sm:$0xff]  ;;  %v4249_v45 = vld [vmem:[#allocation37_spill] sm:$0xff]  ;;  %v4250_v31 = vld [vmem:[#allocation26_spill] sm:$0xff] }
 0x2e7   : > { %v1943_v17 = vmul.f32 %v4246_v16, %v4246_v16  ;;  %v1959_v33 = vmul.f32 %v3851_v29, %v4246_v16  ;;  %v1637_v49 = vmul.f32 %v4249_v45, %v4249_v45  ;;  %v1960_v29 = vmul.f32 %v3865_v24, %v4248_v55 }
 0x2e8   : > { %v1818_v46 = vadd.f32 %v1802_v13, %v1786_v32  ;;  %v1666_v62 = vadd.f32 %v1650_v23, %v1634_v53  ;;  %v1667_v47 = vadd.f32 %v1651_v26, %v1635_v27  ;;  %v1653_v6 = vmul.f32 %v3812_v1, %v4249_v45  ;;  %v1934_v9 = vpop.trf.xlu1  ;;  %v4252_v1 = vld [vmem:[#allocation27_spill] sm:$0xff]  ;;  %v4262_v45 = vld [vmem:[#allocation45_spill] sm:$0xff] }
 0x2e9   : > { %v1771_v25 = vpop.trf.xlu0  ;;  %v1975_v3 = vadd.f32 %v1959_v33, %v1943_v17  ;;  %v1945_v54 = vmul.f32 %v4250_v31, %v4250_v31  ;;  %v1976_v35 = vadd.f32 %v1960_v29, %v1944_v42  ;;  %v1654_v24 = vmul.f32 %v3818_v36, %v4251_v60  ;;  %v4254_v36 = vld [vmem:[#allocation28_spill] sm:$0xff] }
 0x2ea   : > { %1990 = vadd.xlane.f32.xlu0 %v1972_v28  ;;  %1684 = vadd.xlane.f32.xlu1 %v1662_v12  ;;  %v1803_v10 = vmul.f32 %v1771_v25, %v4244_v8  ;;  %v1638_v28 = vmul.f32 %v4251_v60, %v4251_v60  ;;  %v1961_v12 = vmul.f32 %v3878_v52, %v4250_v31  ;;  %v4256_v25 = vld [vmem:[#allocation42_spill] sm:$0xff] }
 0x2eb   : > { %v1669_v21 = vadd.f32 %v1653_v6, %v1637_v49  ;;  %v1639_v2 = vmul.f32 %v4253_v0, %v4253_v0  ;;  %v1655_v52 = vmul.f32 %v3826_v30, %v4253_v0  ;;  %v1947_v13 = vmul.f32 %v4254_v36, %v4254_v36  ;;  %v4263_v6 = vld [vmem:[#allocation32_spill] sm:$0xff]  ;;  %v4266_v0 = vld [vmem:[#allocation47_spill] sm:$0xff] }
 0x2ec   : > { %v1819_v11 = vadd.f32 %v1803_v10, %v1787_v51  ;;  %v1977_v18 = vadd.f32 %v1961_v12, %v1945_v54  ;;  %v1670_v50 = vadd.f32 %v1654_v24, %v1638_v28  ;;  %v1935_v32 = vpop.trf.xlu1  ;;  %v1963_v38 = vmul.f32 %v1931_v43, %v4254_v36  ;;  %v4258_v10 = vld [vmem:[#allocation43_spill] sm:$0xff]  ;;  %v4264_v54 = vld [vmem:[#allocation46_spill] sm:$0xff]  ;;  %v4265_v24 = vld [vmem:[#allocation33_spill] sm:$0xff] }
 0x2ed   : > { %v1772_v44 = vpop.trf.xlu0  ;;  %v1788_v30 = vmul.f32 %v4256_v25, %v4256_v25  ;;  %v1966_v55 = vmul.f32 %v1934_v9, %v4261_v14  ;;  %v1791_v49 = vmul.f32 %v4262_v45, %v4262_v45  ;;  %v1967_v31 = vmul.f32 %v1935_v32, %v4263_v6  ;;  %v4267_v36 = vld [vmem:[#allocation48_spill] sm:$0xff] }
 0x2ee   : > { %1837 = vadd.xlane.f32.xlu0 %v1817_v7  ;;  %1686 = vadd.xlane.f32.xlu1 %v1663_v63  ;;  %v1946_v7 = vmul.f32 %v4252_v1, %v4252_v1  ;;  %v1962_v63 = vmul.f32 %v3889_v15, %v4252_v1  ;;  %v1671_v15 = vadd.f32 %v1655_v52, %v1639_v2 }
 0x2ef   : > { %v1804_v20 = vmul.f32 %v1772_v44, %v4256_v25  ;;  %v1979_v8 = vadd.f32 %v1963_v38, %v1947_v13  ;;  %v4260_v44 = vld [vmem:[#allocation44_spill] sm:$0xff]  ;;  %v1792_v60 = vmul.f32 %v4264_v54, %v4264_v54  ;;  %v1793_v2 = vmul.f32 %v4266_v0, %v4266_v0 }
 0x2f0   : > { %v1936_v23 = vpop.trf.xlu1  ;;  %v1794_v13 = vmul.f32 %v4267_v36, %v4267_v36 }
 0x2f1   : > { %v1773_v22 = vpop.trf.xlu0 }
 0x2f2   : > { %1992 = vadd.xlane.f32.xlu0 %v1973_v58  ;;  %1688 = vadd.xlane.f32.xlu1 %v1664_v19  ;;  %v4255_v58 = vld [vmem:[#allocation40_spill] sm:$0xff]  ;;  %v1978_v19 = vadd.f32 %v1962_v63, %v1946_v7  ;;  %v1805_v56 = vmul.f32 %v1773_v22, %v4258_v10  ;;  %v1968_v7 = vmul.f32 %v1936_v23, %v4265_v24 }
 0x2f3   : > { %v1783_v41 = vmul.f32 %v4255_v58, %v4255_v58 }
 0x2f4   : > { %v1937_v17 = vpop.trf.xlu1 }
 0x2f5   : > { %v1774_v57 = vpop.trf.xlu0 }
 0x2f6   : > { %1839 = vadd.xlane.f32.xlu0 %v1818_v46  ;;  %1690 = vadd.xlane.f32.xlu1 %v1665_v39  ;;  %v1799_v46 = vmul.f32 %v3853_v59, %v4255_v58  ;;  %v4257_v39 = vld [vmem:[#allocation29_spill] sm:$0xff]  ;;  %v1789_v59 = vmul.f32 %v4258_v10, %v4258_v10  ;;  %v1806_v34 = vmul.f32 %v1774_v57, %v4260_v44 }
 0x2f7   : > { %v1948_v53 = vmul.f32 %v4257_v39, %v4257_v39  ;;  %v1964_v51 = vmul.f32 %v1932_v48, %v4257_v39  ;;  %v1790_v48 = vmul.f32 %v4260_v44, %v4260_v44  ;;  %v4269_v39 = vld [vmem:[#allocation50_spill] sm:$0xff] }
 0x2f8   : > { %v1815_v43 = vadd.f32 %v1799_v46, %v1783_v41  ;;  %v1821_v33 = vadd.f32 %v1805_v56, %v1789_v59  ;;  %v1516_v29 = vpop.xlane.xlu1 %1515  ;;  %v4268_v46 = vld [vmem:[#allocation49_spill] sm:$0xff]  ;;  %v4270_v56 = vld [vmem:[#allocation34_spill] sm:$0xff] }
 0x2f9   : > { %v1775_v37 = vpop.trf.xlu0 }
 0x2fa   : > { %1994 = vadd.xlane.f32.xlu0 %v1974_v40  ;;  %1692 = vadd.xlane.f32.xlu1 %v1666_v62  ;;  %v1820_v40 = vadd.f32 %v1804_v20, %v1788_v30  ;;  %v4259_v62 = vld [vmem:[#allocation30_spill] sm:$0xff] }
 0x2fb   : > { %v1949_v27 = vmul.f32 %v4259_v62, %v4259_v62  ;;  %v1965_v16 = vmul.f32 %v1933_v5, %v4259_v62  ;;  %v1822_v5 = vadd.f32 %v1806_v34, %v1790_v48  ;;  %v1969_v62 = vmul.f32 %v1937_v17, %v4270_v56 }
 0x2fd   : > { %v1776_v26 = vpop.trf.xlu0  ;;  %v1981_v61 = vadd.f32 %v1965_v16, %v1949_v27 }
 0x2fe   : > { %1841 = vadd.xlane.f32.xlu0 %v1819_v11  ;;  %1694 = vadd.xlane.f32.xlu1 %v1667_v47  ;;  %v1980_v11 = vadd.f32 %v1964_v51, %v1948_v53  ;;  %v1950_v47 = vmul.f32 %v4261_v14, %v4261_v14  ;;  %v1808_v28 = vmul.f32 %v1776_v26, %v4264_v54 }
 0x2ff   : > { %v1796_v53 = vmul.f32 %v4269_v39, %v4269_v39  ;;  %v1953_v26 = vmul.f32 %v4270_v56, %v4270_v56 }
 0x300   : > { %v1982_v22 = vadd.f32 %v1966_v55, %v1950_v47  ;;  %v1824_v57 = vadd.f32 %v1808_v28, %v1792_v60 }
 0x301   : > { %v1777_v42 = vpop.trf.xlu0  ;;  %v1985_v16 = vadd.f32 %v1969_v62, %v1953_v26 }
 0x302   : > { %1996 = vadd.xlane.f32.xlu0 %v1975_v3  ;;  %1696 = vadd.xlane.f32.xlu1 %v1668_v4  ;;  %v1807_v3 = vmul.f32 %v1775_v37, %v4262_v45  ;;  %v1951_v4 = vmul.f32 %v4263_v6, %v4263_v6 }
 0x304   : > { %v1823_v9 = vadd.f32 %v1807_v3, %v1791_v49  ;;  %v1983_v1 = vadd.f32 %v1967_v31, %v1951_v4 }
 0x305   : > { %v1778_v12 = vpop.trf.xlu0 }
 0x306   : > { %1998 = vadd.xlane.f32.xlu0 %v1976_v35  ;;  %1698 = vadd.xlane.f32.xlu1 %v1669_v21  ;;  %v1952_v21 = vmul.f32 %v4265_v24, %v4265_v24  ;;  %v1810_v41 = vmul.f32 %v1778_v12, %v4267_v36 }
 0x308   : > { %v1984_v52 = vadd.f32 %v1968_v7, %v1952_v21  ;;  %v1826_v37 = vadd.f32 %v1810_v41, %v1794_v13 }
 0x309   : > { %v1779_v32 = vpop.trf.xlu0 }
 0x30a   : > { %2000 = vadd.xlane.f32.xlu0 %v1977_v18  ;;  %1700 = vadd.xlane.f32.xlu1 %v1670_v50  ;;  %v1809_v18 = vmul.f32 %v1777_v42, %v4266_v0  ;;  %v1811_v25 = vmul.f32 %v1779_v32, %v4268_v46 }
 0x30c   : > { %v1825_v58 = vadd.f32 %v1809_v18, %v1793_v2 }
 0x30d   : > { %v1780_v20 = vpop.trf.xlu0 }
 0x30e   : > { %2002 = vadd.xlane.f32.xlu0 %v1978_v19  ;;  %1702 = vadd.xlane.f32.xlu1 %v1671_v15  ;;  %v1795_v15 = vmul.f32 %v4268_v46, %v4268_v46  ;;  %v1812_v51 = vmul.f32 %v1780_v20, %v4269_v39  ;;  %v1569_v39 = vld [vmem:[#allocation3] sm:$0x1] }
 0x310   : > { %v1828_v59 = vadd.f32 %v1812_v51, %v1796_v53 }
 0x312   : > { %2004 = vadd.xlane.f32.xlu0 %v1979_v8  ;;  %1833 = vadd.xlane.f32.xlu1 %v1815_v43  ;;  %v1827_v8 = vadd.f32 %v1811_v25, %v1795_v15 }
 0x316   : > { %2006 = vadd.xlane.f32.xlu0 %v1980_v11  ;;  %1843 = vadd.xlane.f32.xlu1 %v1820_v40 }
 0x31a   : > { %2008 = vadd.xlane.f32.xlu0 %v1981_v61  ;;  %1845 = vadd.xlane.f32.xlu1 %v1821_v33 }
 0x31e   : > { %2010 = vadd.xlane.f32.xlu0 %v1982_v22  ;;  %1847 = vadd.xlane.f32.xlu1 %v1822_v5 }
 0x31f   : > { %v1673_v35 = vpop.xlane.xlu1 %1672 }
 0x322   : > { %2012 = vadd.xlane.f32.xlu0 %v1983_v1  ;;  %1849 = vadd.xlane.f32.xlu1 %v1823_v9 }
 0x323   : > { %v1518_v63 = vpop.xlane.xlu1 %1517 }
 0x324   : > { %v1547_v50 = vadd.f32 %v1518_v63, %v1516_v29 }
 0x326   : > { %2014 = vadd.xlane.f32.xlu0 %v1984_v52  ;;  %1851 = vadd.xlane.f32.xlu1 %v1824_v57 }
 0x327   : > { %v1675_v19 = vpop.xlane.xlu1 %1674 }
 0x328   : > { %v1704_v38 = vadd.f32 %v1675_v19, %v1673_v35 }
 0x32a   : > { %1853 = vadd.xlane.f32.xlu1 %v1825_v58 }
 0x32b   : > { %v1520_v30 = vpop.xlane.xlu1 %1519 }
 0x32c   : > { %v1548_v23 = vadd.f32 %v1547_v50, %v1520_v30 }
 0x32e   : > { %1855 = vadd.xlane.f32.xlu1 %v1826_v37 }
 0x32f   : > { %v1677_v43 = vpop.xlane.xlu1 %1676 }
 0x330   : > { %v1705_v10 = vadd.f32 %v1704_v38, %v1677_v43  ;;  %v1726_v43 = vld [vmem:[#allocation3 + $0x1] sm:$0x1] }
 0x332   : > { %1857 = vadd.xlane.f32.xlu1 %v1827_v8 }
 0x333   : > { %v1522_v40 = vpop.xlane.xlu1 %1521 }
 0x334   : > { %v1549_v27 = vadd.f32 %v1548_v23, %v1522_v40 }
 0x336   : > { %1859 = vadd.xlane.f32.xlu1 %v1828_v59 }
 0x337   : > { %v1679_v11 = vpop.xlane.xlu1 %1678 }
 0x338   : > { %v1706_v44 = vadd.f32 %v1705_v10, %v1679_v11  ;;  %v1570_v10 = vadd.f32 1e-08, %v1569_v39 }
 0x33a   : > { %2016 = vadd.xlane.f32.xlu1 %v1985_v16  ;;  %v1571_v11 = vmul.f32 32.0, %v1570_v10 }
 0x33b   : > { %v1524_v48 = vpop.xlane.xlu1 %1523 }
 0x33c   : > { %v1550_v33 = vadd.f32 %v1549_v27, %v1524_v48  ;;  %v1727_v27 = vadd.f32 1e-08, %v1726_v43  ;;  %2503 = vrcp.f32 %v1571_v11 }
 0x33f   : > { %v1526_v34 = vpop.xlane.xlu1 %1525 }
 0x340   : > { %v1551_v14 = vadd.f32 %v1550_v33, %v1526_v34  ;;  %v1728_v34 = vmul.f32 32.0, %v1727_v27 }
 0x342   : > { %2505 = vrcp.f32 %v1728_v34 }
 0x343   : > { %v1528_v47 = vpop.xlane.xlu1 %1527 }
 0x344   : > { %v1552_v61 = vadd.f32 %v1551_v14, %v1528_v47 }
 0x347   : > { %v1530_v55 = vpop.xlane.xlu1 %1529 }
 0x348   : > { %v1553_v42 = vadd.f32 %v1552_v61, %v1530_v55 }
 0x34b   : > { %v1532_v45 = vpop.xlane.xlu1 %1531 }
 0x34c   : > { %v1554_v49 = vadd.f32 %v1553_v42, %v1532_v45 }
 0x34f   : > { %v1534_v5 = vpop.xlane.xlu1 %1533 }
 0x350   : > { %v1555_v3 = vadd.f32 %v1554_v49, %v1534_v5 }
 0x353   : > { %v1536_v29 = vpop.xlane.xlu1 %1535 }
 0x354   : > { %v1556_v17 = vadd.f32 %v1555_v3, %v1536_v29 }
 0x357   : > { %v1538_v6 = vpop.xlane.xlu1 %1537 }
 0x358   : > { %v1557_v4 = vadd.f32 %v1556_v17, %v1538_v6 }
 0x35b   : > { %v1540_v22 = vpop.xlane.xlu1 %1539 }
 0x35c   : > { %v1558_v31 = vadd.f32 %v1557_v4, %v1540_v22 }
 0x35f   : > { %v1830_v54 = vpop.xlane.xlu0 %1829  ;;  %v1542_v60 = vpop.xlane.xlu1 %1541 }
 0x360   : > { %v1559_v9 = vadd.f32 %v1558_v31, %v1542_v60 }
 0x363   : > { %v1832_v28 = vpop.xlane.xlu0 %1831  ;;  %v1544_v35 = vpop.xlane.xlu1 %1543 }
 0x364   : > { %v1560_v12 = vadd.f32 %v1559_v9, %v1544_v35  ;;  %v1861_v45 = vadd.f32 %v1832_v28, %v1830_v54 }
 0x367   : > { %v4003_v24 = vpop.xlane.xlu0 %1986  ;;  %v1546_v21 = vpop.xlane.xlu1 %1545 }
 0x368   : > { %v1561_v1 = vadd.f32 %v1560_v12, %v1546_v21 }
 0x36a   : > { %v1562_v20 = vrot.slane %v1561_v1, 4 }
 0x36b   : > { %v4005_v7 = vpop.xlane.xlu0 %1988  ;;  %v1681_v0 = vpop.xlane.xlu1 %1680 }
 0x36c   : > { %v1707_v41 = vadd.f32 %v1706_v44, %v1681_v0  ;;  %v1563_v59 = vadd.f32 %v1562_v20, %v1561_v1 }
 0x36e   : > { %v1564_v16 = vrot.slane %v1563_v59, 2 }
 0x36f   : > { %v1836_v2 = vpop.xlane.xlu0 %1835  ;;  %v1683_v57 = vpop.xlane.xlu1 %1682 }
 0x370   : > { %v1708_v46 = vadd.f32 %v1707_v41, %v1683_v57  ;;  %v1565_v47 = vadd.f32 %v1564_v16, %v1563_v59  ;;  %v2504_v57 = vpop.eup %2503 }
 0x371   : > { %v2506_v54 = vpop.eup %2505 }
 0x372   : > { %v1566_v49 = vrot.slane %v1565_v47, 1 }
 0x373   : > { %v4007_v18 = vpop.xlane.xlu0 %1990  ;;  %v1685_v63 = vpop.xlane.xlu1 %1684 }
 0x374   : > { %v1709_v15 = vadd.f32 %v1708_v46, %v1685_v63  ;;  %v1567_v4 = vadd.f32 %v1566_v49, %v1565_v47  ;;  %v2018_v46 = vadd.f32 %v4005_v7, %v4003_v24 }
 0x376   : > { %v1568_v21 = vmul.f32 0.5, %v1567_v4 }
 0x377   : > { %v1838_v52 = vpop.xlane.xlu0 %1837  ;;  %v1687_v50 = vpop.xlane.xlu1 %1686 }
 0x378   : > { %v1710_v30 = vadd.f32 %v1709_v15, %v1687_v50  ;;  %v1573_v28 = vmul.f32 %v2504_v57, %v1568_v21 }
 0x37a   : > { %v1574_v15 = vmul.f32 %v2504_v57, %v1573_v28 }
 0x37b   : > { %v4009_v32 = vpop.xlane.xlu0 %1992  ;;  %v1689_v36 = vpop.xlane.xlu1 %1688 }
 0x37c   : > { %v1711_v23 = vadd.f32 %v1710_v30, %v1689_v36 }
 0x37f   : > { %v1840_v13 = vpop.xlane.xlu0 %1839  ;;  %v1691_v58 = vpop.xlane.xlu1 %1690 }
 0x380   : > { %v1712_v51 = vadd.f32 %v1711_v23, %v1691_v58 }
 0x383   : > { %v4011_v19 = vpop.xlane.xlu0 %1994  ;;  %v1693_v38 = vpop.xlane.xlu1 %1692 }
 0x384   : > { %v1713_v40 = vadd.f32 %v1712_v51, %v1693_v38 }
 0x387   : > { %v1842_v37 = vpop.xlane.xlu0 %1841  ;;  %v1695_v25 = vpop.xlane.xlu1 %1694 }
 0x388   : > { %v1714_v62 = vadd.f32 %v1713_v40, %v1695_v25 }
 0x38b   : > { %v4013_v53 = vpop.xlane.xlu0 %1996  ;;  %v1697_v8 = vpop.xlane.xlu1 %1696 }
 0x38c   : > { %v1715_v44 = vadd.f32 %v1714_v62, %v1697_v8 }
 0x38f   : > { %v1999_v56 = vpop.xlane.xlu0 %1998  ;;  %v1699_v26 = vpop.xlane.xlu1 %1698 }
 0x390   : > { %v1716_v33 = vadd.f32 %v1715_v44, %v1699_v26  ;;  %v1883_v26 = vld [vmem:[#allocation3 + $0x2] sm:$0x1] }
 0x393   : > { %v1701_v48 = vpop.xlane.xlu1 %1700  ;;  %v2001_v14 = vpop.xlane.xlu0 %2000 }
 0x394   : > { %v1717_v61 = vadd.f32 %v1716_v33, %v1701_v48  ;;  %v2040_v48 = vld [vmem:[#allocation3 + $0x3] sm:$0x1] }
 0x397   : > { %v1703_v55 = vpop.xlane.xlu1 %1702  ;;  %v2003_v3 = vpop.xlane.xlu0 %2002 }
 0x398   : > { %v1718_v42 = vadd.f32 %v1717_v61, %v1703_v55 }
 0x39a   : > { %v1719_v5 = vrot.slane %v1718_v42, 4 }
 0x39b   : > { %v1834_v29 = vpop.xlane.xlu1 %1833  ;;  %v2005_v12 = vpop.xlane.xlu0 %2004 }
 0x39c   : > { %v1720_v17 = vadd.f32 %v1719_v5, %v1718_v42  ;;  %v1862_v6 = vadd.f32 %v1861_v45, %v1834_v29 }
 0x39e   : > { %v1721_v22 = vrot.slane %v1720_v17, 2  ;;  %v1863_v31 = vadd.f32 %v1862_v6, %v1836_v2 }
 0x39f   : > { %v1844_v60 = vpop.xlane.xlu1 %1843  ;;  %v2007_v41 = vpop.xlane.xlu0 %2006 }
 0x3a0   : > { %v1722_v9 = vadd.f32 %v1721_v22, %v1720_v17  ;;  %v1864_v35 = vadd.f32 %v1863_v31, %v1838_v52  ;;  %v2019_v52 = vadd.f32 %v2018_v46, %v4007_v18 }
 0x3a2   : > { %v1723_v1 = vrot.slane %v1722_v9, 1  ;;  %v1865_v0 = vadd.f32 %v1864_v35, %v1840_v13  ;;  %v2020_v13 = vadd.f32 %v2019_v52, %v4009_v32  ;;  %v1884_v32 = vadd.f32 1e-08, %v1883_v26 }
 0x3a3   : > { %v1846_v63 = vpop.xlane.xlu1 %1845  ;;  %v2009_v39 = vpop.xlane.xlu0 %2008 }
 0x3a4   : > { %v1724_v50 = vadd.f32 %v1723_v1, %v1722_v9  ;;  %v1866_v58 = vadd.f32 %v1865_v0, %v1842_v37  ;;  %v2021_v8 = vadd.f32 %v2020_v13, %v4011_v19 }
 0x3a6   : > { %v1725_v36 = vmul.f32 0.5, %v1724_v50  ;;  %v1867_v30 = vadd.f32 %v1866_v58, %v1844_v60  ;;  %v2022_v43 = vadd.f32 %v2021_v8, %v4013_v53  ;;  %v1885_v53 = vmul.f32 32.0, %v1884_v32 }
 0x3a7   : > { %v1848_v38 = vpop.xlane.xlu1 %1847  ;;  %v2011_v24 = vpop.xlane.xlu0 %2010 }
 0x3a8   : > { %v1730_v2 = vmul.f32 %v2506_v54, %v1725_v36  ;;  %v1868_v51 = vadd.f32 %v1867_v30, %v1846_v63  ;;  %v2023_v10 = vadd.f32 %v2022_v43, %v1999_v56  ;;  %v2041_v56 = vadd.f32 1e-08, %v2040_v48 }
 0x3a9   : > { %2507 = vrcp.f32 %v1885_v53 }
 0x3aa   : > { %v1731_v25 = vmul.f32 %v2506_v54, %v1730_v2  ;;  %v1869_v59 = vadd.f32 %v1868_v51, %v1848_v38  ;;  %v2024_v40 = vadd.f32 %v2023_v10, %v2001_v14 }
 0x3ab   : > { %v1850_v20 = vpop.xlane.xlu1 %1849  ;;  %v2013_v44 = vpop.xlane.xlu0 %2012 }
 0x3ac   : > { %v1732_v23 = vadd.f32 %v1731_v25, %v1574_v15  ;;  %v2025_v18 = vadd.f32 %v2024_v40, %v2003_v3  ;;  %v1870_v62 = vadd.f32 %v1869_v59, %v1850_v20  ;;  %v2042_v3 = vmul.f32 32.0, %v2041_v56 }
 0x3ae   : > { %v2026_v11 = vadd.f32 %v2025_v18, %v2005_v12  ;;  %2509 = vrcp.f32 %v2042_v3 }
 0x3af   : > { %v1852_v37 = vpop.xlane.xlu1 %1851  ;;  %v2015_v45 = vpop.xlane.xlu0 %2014 }
 0x3b0   : > { %v1871_v16 = vadd.f32 %v1870_v62, %v1852_v37  ;;  %v2027_v33 = vadd.f32 %v2026_v11, %v2007_v41 }
 0x3b2   : > { %v2028_v47 = vadd.f32 %v2027_v33, %v2009_v39 }
 0x3b3   : > { %v1854_v7 = vpop.xlane.xlu1 %1853 }
 0x3b4   : > { %v1872_v19 = vadd.f32 %v1871_v16, %v1854_v7  ;;  %v2029_v55 = vadd.f32 %v2028_v47, %v2011_v24 }
 0x3b6   : > { %v2030_v49 = vadd.f32 %v2029_v55, %v2013_v44  ;;  %v2508_v57 = vpop.eup %2507 }
 0x3b7   : > { %v1856_v27 = vpop.xlane.xlu1 %1855 }
 0x3b8   : > { %v1873_v61 = vadd.f32 %v1872_v19, %v1856_v27  ;;  %v2031_v29 = vadd.f32 %v2030_v49, %v2015_v45 }
 0x3bb   : > { %v1858_v34 = vpop.xlane.xlu1 %1857  ;;  %v2510_v36 = vpop.eup %2509 }
 0x3bc   : > { %v1874_v42 = vadd.f32 %v1873_v61, %v1858_v34 }
 0x3bf   : > { %v1860_v14 = vpop.xlane.xlu1 %1859 }
 0x3c0   : > { %v1875_v5 = vadd.f32 %v1874_v42, %v1860_v14 }
 0x3c2   : > { %v1876_v17 = vrot.slane %v1875_v5, 4 }
 0x3c3   : > { %v2017_v6 = vpop.xlane.xlu1 %2016 }
 0x3c4   : > { %v1877_v4 = vadd.f32 %v1876_v17, %v1875_v5  ;;  %v2032_v22 = vadd.f32 %v2031_v29, %v2017_v6 }
 0x3c6   : > { %v1878_v31 = vrot.slane %v1877_v4, 2  ;;  %v2033_v60 = vrot.slane %v2032_v22, 4 }
 0x3c8   : > { %v1879_v9 = vadd.f32 %v1878_v31, %v1877_v4  ;;  %v2034_v35 = vadd.f32 %v2033_v60, %v2032_v22 }
 0x3ca   : > { %v1880_v12 = vrot.slane %v1879_v9, 1  ;;  %v2035_v21 = vrot.slane %v2034_v35, 2 }
 0x3cc   : > { %v1881_v1 = vadd.f32 %v1880_v12, %v1879_v9  ;;  %v2036_v0 = vadd.f32 %v2035_v21, %v2034_v35 }
 0x3ce   : > { %v1882_v63 = vmul.f32 0.5, %v1881_v1  ;;  %v2037_v50 = vrot.slane %v2036_v0, 1 }
 0x3d0   : > { %v1887_v54 = vmul.f32 %v2508_v57, %v1882_v63  ;;  %v2038_v28 = vadd.f32 %v2037_v50, %v2036_v0 }
 0x3d2   : > { %v1888_v58 = vmul.f32 %v2508_v57, %v1887_v54  ;;  %v2039_v41 = vmul.f32 0.5, %v2038_v28 }
 0x3d4   : > { %v2044_v38 = vmul.f32 %v2510_v36, %v2039_v41  ;;  %v1889_v46 = vadd.f32 %v1888_v58, %v1732_v23 }
 0x3d6   : > { %v2045_v2 = vmul.f32 %v2510_v36, %v2044_v38 }
 0x3d8   : > { %v2046_v15 = vadd.f32 %v2045_v2, %v1889_v46 }
 0x3da   : > { %2048 = vst.msk [vmem:[%s443_s7] sm:$0x1] %vm2047_vm3, %v2046_v15 }
 0x3db PF: > { %s13_s18 = sadd.s32 1, %s2565_s18   ;;  %s4271_s12 = smov %s2545_s13 }
 0x3dc   : > { %p10_p0 = scmp.ge.s32.totalorder %s13_s18, 6   ;;  %s4272_s13 = smov %s2643_s26 }
 0x3dd   : > { %s4273_s14 = smov %s2557_s16  ;;  %s4274_s15 = smov %s2561_s17 }
 0x3de   : > { %s4275_s16 = smov %s4278_s19  ;;  %s4276_s17 = smov %s4282_s20 }
 0x3df   :  { %12 = sbr.rel (!%p10_p0) target bundleno = 4 (0x4), region = 171 }

// kernel: region_style_loss.4
= control target key start
LH: loop header
LB: loop body
LE: loop exit
PB: predicated region body
PF: predicated region fallthrough
CT: control target
= control target key end

     0   :  { %s2570_s12 = smov 0   ;;  %s2572_s13 = smov 0   ;;  %s3883_s0 = inlined_call_operand.vmem [shape: bf16[2,128,64], index: 0, kind: input, shape index: {}]   ;;  %s3884_s1 = inlined_call_operand.vmem [shape: bf16[2,128,64], index: 1, kind: input, shape index: {}]   ;;  %s3885_s2 = inlined_call_operand.vmem [shape: f32[2,4,64], index: 2, kind: input, shape index: {}]   ;;  %s3886_s3 = inlined_call_operand.vmem [shape: f32[2,1,1], index: 3, kind: output, shape index: {}]  }
   0x1   :  { %s2574_s14 = smov 0  }
   0x2 LB: > { %s25_s15 = sadd.s32 1, %s2543_s13  ;;  %p2144_p0 = scmp.ge.s32.totalorder %s2547_s14, 1  ;;  %s2547_s14 = sphi %s2574_s14, %s13_s14   ;;  %s2543_s13 = sphi %s2572_s13, %s4094_s13   ;;  %s2539_s12 = sphi %s2570_s12, %s4093_s12  }
   0x3   : > { %p27_p1 = scmp.ge.s32.totalorder %s25_s15, 2  ;;  %p183_p2 = scmp.lt.s32.totalorder %s2547_s14, 3 }
   0x5   : > { %s4096_s15 = smov (%p27_p1, %s25_s15), 0  ;;  %p184_p3 = pnand %p2144_p0, %p183_p2 }
   0x7   : > { %187 = sbr.rel (%p184_p3) target bundleno = 740 (0x2e4), region = 32 }
   0xc   : > { %p223_p4 = scmp.lt.s32.totalorder %s2539_s12, 1  ;;  %vm494_vm0 = vcmask 523264   ;;  %vm418_vm1 = vcmask 519168   ;;  %vm318_vm2 = vcmask 3072   ;;  %vm2044_vm3 = vcmask 0  }
   0xe   : > { %s4098_s12 = smov (!%p223_p4, %s2539_s12), 1 }
   0xf   : > { %s2188_s16 = sshll.u32 %s4098_s12, 6  ;;  %s2149_s17 = sshll.u32 %s4098_s12, 2 }
  0x10   : > { %s2595_s20 = scalar_lea.vmem %s3883_s0, %s2188_s16  ;;  %s2600_s23 = scalar_lea.vmem %s3884_s1, %s2188_s16 }
  0x11   : > { %s2605_s26 = scalar_lea.vmem %s3885_s2, %s2149_s17  ;;  %v2260_v0 = vld [vmem:[%s2595_s20 + $0x38] sm:$0xff]   ;;  %v2610_v2 = vld [vmem:[%s2595_s20 + $0x30] sm:$0xff]   ;;  %v2624_v12 = vld [vmem:[%s2595_s20 + $0x28] sm:$0xff]   ;;  %s248_s29 = scalar_lea.vmem %s3886_s3, %s4098_s12 }
  0x12   : > { %v2267_v1 = vld [vmem:[%s2600_s23 + $0x38] sm:$0xff]   ;;  %v2220_v3 = vunpack.c.l.bf16 %v2260_v0  ;;  %v2221_v4 = vunpack.c.h.bf16 %v2260_v0  ;;  %v2613_v7 = vld [vmem:[%s2605_s26] ss:$0 sm:$0xff]  ;;  %v2616_v8 = vld [vmem:[%s2605_s26 + $0x1] ss:$0 sm:$0xff]  ;;  %v3902_v9 = vunpack.c.l.bf16 %v2610_v2  ;;  %v3900_v10 = vunpack.c.h.bf16 %v2610_v2 }
  0x13   : > { %v2252_v5 = vunpack.c.l.bf16 %v2267_v1  ;;  %v2253_v6 = vunpack.c.h.bf16 %v2267_v1  ;;  %v2621_v11 = vld [vmem:[%s2600_s23 + $0x30] sm:$0xff]   ;;  %v2635_v17 = vld [vmem:[%s2600_s23 + $0x28] sm:$0xff]   ;;  %v2212_v20 = vunpack.c.l.bf16 %v2624_v12  ;;  %v3904_v21 = vunpack.c.h.bf16 %v2624_v12  ;;  %v2642_v22 = vld [vmem:[%s2595_s20 + $0x20] sm:$0xff]  }
  0x14   : > { %v3901_v18 = vunpack.c.l.bf16 %v2621_v11  ;;  %v3899_v19 = vunpack.c.h.bf16 %v2621_v11  ;;  %v2244_v29 = vunpack.c.l.bf16 %v2635_v17  ;;  %v3903_v30 = vunpack.c.h.bf16 %v2635_v17  ;;  %v2669_v35 = vld [vmem:[%s2600_s23 + $0x20] sm:$0xff]   ;;  %v2722_v58 = vld [vmem:[%s2595_s20 + $0x18] sm:$0xff]  }
  0x15   : > { %v2626_v13 = vadd.f32 %v2252_v5, %v2220_v3  ;;  %v2628_v14 = vadd.f32 %v2253_v6, %v2221_v4  ;;  %v2630_v15 = vsub.f32 %v2220_v3, %v2252_v5  ;;  %v2632_v16 = vsub.f32 %v2221_v4, %v2253_v6  ;;  %v2725_v59 = vld [vmem:[%s2600_s23 + $0x18] sm:$0xff]   ;;  %v2742_v5 = vld [vmem:[%s2595_s20] sm:$0xff]  }
  0x16   : > { %v2656_v27 = vsub.f32 %v3902_v9, %v3901_v18  ;;  %v2662_v28 = vsub.f32 %v3900_v10, %v3899_v19  ;;  %v3890_v33 = vunpack.c.l.bf16 %v2642_v22  ;;  %v3888_v34 = vunpack.c.h.bf16 %v2642_v22  ;;  %v2745_v6 = vld [vmem:[%s2600_s23] sm:$0xff]  }
  0x17   : > { %v468_v23 = vmul.f32 %v2613_v7, %v2630_v15  ;;  %v469_v24 = vmul.f32 %v2613_v7, %v2632_v16  ;;  %v715_v25 = vmul.f32 %v2616_v8, %v2630_v15  ;;  %v716_v26 = vmul.f32 %v2616_v8, %v2632_v16 }
  0x18   : > { %v466_v36 = vmul.f32 %v2613_v7, %v2656_v27  ;;  %v467_v37 = vmul.f32 %v2613_v7, %v2662_v28  ;;  %v713_v38 = vmul.f32 %v2616_v8, %v2656_v27  ;;  %v714_v39 = vmul.f32 %v2616_v8, %v2662_v28 }
  0x19   : > { %v477_v31 = vpack.c.bf16 %v469_v24, %v468_v23  ;;  %v724_v32 = vpack.c.bf16 %v716_v26, %v715_v25  ;;  %v2687_v42 = vsub.f32 %v2212_v20, %v2244_v29  ;;  %v2693_v43 = vsub.f32 %v3904_v21, %v3903_v30  ;;  %v2755_v25 = vld [vmem:[%s2595_s20 + $0x10] sm:$0xff]  }
  0x1a   : > { %v476_v44 = vpack.c.bf16 %v467_v37, %v466_v36  ;;  %v723_v45 = vpack.c.bf16 %v714_v39, %v713_v38  ;;  %v3889_v46 = vunpack.c.l.bf16 %v2669_v35  ;;  %v3887_v47 = vunpack.c.h.bf16 %v2669_v35  ;;  %v2758_v26 = vld [vmem:[%s2600_s23 + $0x10] sm:$0xff]  }
  0x1b   : > { %2460 = vmatprep.subr.msk.bf16.mxu0 %vm494_vm0, %v477_v31  ;;  %2468 = vmatprep.subr.msk.bf16.mxu1 %vm494_vm0, %v724_v32  ;;  %v541_v40 = vsel %vm494_vm0, %v477_v31, 0  ;;  %v788_v41 = vsel %vm494_vm0, %v724_v32, 0  ;;  %v464_v48 = vmul.f32 %v2613_v7, %v2687_v42  ;;  %v465_v49 = vmul.f32 %v2613_v7, %v2693_v43 }
  0x1c   : > { %2333 = vmatpush3.bf16.xpose.msra.mxu0 %v541_v40  ;;  %2365 = vmatpush3.bf16.xpose.msra.mxu1 %v788_v41  ;;  %v711_v50 = vmul.f32 %v2616_v8, %v2687_v42  ;;  %v712_v51 = vmul.f32 %v2616_v8, %v2693_v43  ;;  %v538_v52 = vsel %vm494_vm0, %v476_v44, 0  ;;  %v2712_v53 = vsub.f32 %v3890_v33, %v3889_v46 }
  0x1d   : > { %2461 = vmatprep.subr.msk.bf16.mxu0 %vm494_vm0, %v476_v44  ;;  %2469 = vmatprep.subr.msk.bf16.mxu1 %vm494_vm0, %v723_v45  ;;  %v785_v54 = vsel %vm494_vm0, %v723_v45, 0  ;;  %v475_v55 = vpack.c.bf16 %v465_v49, %v464_v48  ;;  %v2719_v57 = vsub.f32 %v3888_v34, %v3887_v47  ;;  %v3894_v61 = vunpack.c.l.bf16 %v2722_v58  ;;  %v2254_v49 = vld [vmem:[%s2595_s20 + $0x8] sm:$0xff]  }
  0x1e   : > { %v722_v56 = vpack.c.bf16 %v712_v51, %v711_v50  ;;  %v462_v60 = vmul.f32 %v2613_v7, %v2712_v53  ;;  %v3892_v62 = vunpack.c.h.bf16 %v2722_v58  ;;  %v3893_v63 = vunpack.c.l.bf16 %v2725_v59  ;;  %v2261_v50 = vld [vmem:[%s2600_s23 + $0x8] sm:$0xff]  }
  0x1f   : > { %v463_v0 = vmul.f32 %v2613_v7, %v2719_v57  ;;  %v709_v1 = vmul.f32 %v2616_v8, %v2712_v53  ;;  %v710_v3 = vmul.f32 %v2616_v8, %v2719_v57  ;;  %v3891_v4 = vunpack.c.h.bf16 %v2725_v59 }
  0x20   : > { %v535_v23 = vsel %vm494_vm0, %v475_v55, 0  ;;  %v2752_v24 = vsub.f32 %v3894_v61, %v3893_v63  ;;  %v782_v31 = vsel %vm494_vm0, %v722_v56, 0  ;;  %v2192_v38 = vunpack.c.l.bf16 %v2742_v5 }
  0x21   : > { %v474_v32 = vpack.c.bf16 %v463_v0, %v462_v60  ;;  %v721_v36 = vpack.c.bf16 %v710_v3, %v709_v1  ;;  %v2765_v37 = vsub.f32 %v3892_v62, %v3891_v4  ;;  %v2224_v39 = vunpack.c.l.bf16 %v2745_v6 }
  0x22   : > { %v3898_v40 = vunpack.c.l.bf16 %v2755_v25  ;;  %v3896_v41 = vunpack.c.h.bf16 %v2755_v25  ;;  %v3897_v44 = vunpack.c.l.bf16 %v2758_v26  ;;  %v3895_v45 = vunpack.c.h.bf16 %v2758_v26 }
  0x23   : > { %v460_v48 = vmul.f32 %v2613_v7, %v2752_v24  ;;  %v2193_v51 = vunpack.c.h.bf16 %v2742_v5  ;;  %v708_v60 = vmul.f32 %v2616_v8, %v2765_v37  ;;  %v532_v0 = vsel %vm494_vm0, %v474_v32, 0 }
  0x24   : > { %2335 = vmatpush3.bf16.xpose.msra.mxu0 %v538_v52  ;;  %2367 = vmatpush3.bf16.xpose.msra.mxu1 %v785_v54  ;;  %v2225_v52 = vunpack.c.h.bf16 %v2745_v6  ;;  %v2779_v54 = vadd.f32 %v2224_v39, %v2192_v38  ;;  %v779_v5 = vsel %vm494_vm0, %v721_v36, 0  ;;  %v2799_v6 = vsub.f32 %v3898_v40, %v3897_v44  ;;  %v417_v44 = vld [vmem:[%s2605_s26] sm:$0xf] }
  0x25   : > { %2462 = vmatprep.subr.msk.bf16.mxu0 %vm494_vm0, %v475_v55  ;;  %2470 = vmatprep.subr.msk.bf16.mxu1 %vm494_vm0, %v722_v56  ;;  %v461_v55 = vmul.f32 %v2613_v7, %v2765_v37  ;;  %v707_v56 = vmul.f32 %v2616_v8, %v2752_v24  ;;  %v2197_v4 = vunpack.c.h.bf16 %v2254_v49  ;;  %v2229_v62 = vunpack.c.h.bf16 %v2261_v50  ;;  %v2819_v40 = vld [vmem:[%s2605_s26 + $0x2] ss:$0 sm:$0xff] }
  0x26   : > { %v2790_v1 = vadd.f32 %v2225_v52, %v2193_v51  ;;  %v430_v3 = vmul.f32 %v2613_v7, %v2779_v54  ;;  %v2923_v30 = vadd.f32 %v2244_v29, %v2212_v20 }
  0x27   : > { %v473_v46 = vpack.c.bf16 %v461_v55, %v460_v48  ;;  %v720_v33 = vpack.c.bf16 %v708_v60, %v707_v56  ;;  %v705_v48 = vmul.f32 %v2616_v8, %v2799_v6  ;;  %v960_v55 = vmul.f32 %v2819_v40, %v2656_v27 }
  0x28   : > { %v431_v47 = vmul.f32 %v2613_v7, %v2790_v1  ;;  %v678_v34 = vmul.f32 %v2616_v8, %v2790_v1  ;;  %v419_v56 = vsel %vm418_vm1, %v417_v44, 0.0  ;;  %v961_v60 = vmul.f32 %v2819_v40, %v2662_v28 }
  0x29   : > { %420 = vadd.xlane.f32.xlu0 %v419_v56  ;;  %v2858_v18 = vadd.f32 %v2229_v62, %v2197_v4  ;;  %v2938_v20 = vmul.f32 %v2613_v7, %v2923_v30 }
  0x2a   : > { %v446_v63 = vpack.c.bf16 %v431_v47, %v430_v3 }
  0x2c   : > { %2337 = vmatpush3.bf16.xpose.msra.mxu0 %v535_v23  ;;  %2369 = vmatpush3.bf16.xpose.msra.mxu1 %v782_v31  ;;  %v2196_v23 = vunpack.c.l.bf16 %v2254_v49  ;;  %v2228_v31 = vunpack.c.l.bf16 %v2261_v50  ;;  %v2832_v49 = vsub.f32 %v2197_v4, %v2229_v62  ;;  %v2834_v50 = vsub.f32 %v2192_v38, %v2224_v39 }
  0x2d   : > { %2463 = vmatprep.subr.msk.bf16.mxu0 %vm494_vm0, %v474_v32  ;;  %2471 = vmatprep.subr.msk.bf16.mxu1 %vm494_vm0, %v721_v36  ;;  %v2805_v32 = vsub.f32 %v3896_v41, %v3895_v45  ;;  %v677_v36 = vmul.f32 %v2616_v8, %v2779_v54  ;;  %v458_v45 = vmul.f32 %v2613_v7, %v2799_v6  ;;  %v529_v39 = vsel %vm494_vm0, %v473_v46, 0 }
  0x2e   : > { %v2815_v41 = vsub.f32 %v2196_v23, %v2228_v31  ;;  %2348 = vmatprep.mubr.msk.bf16.mxu0 %vm494_vm0, %v446_v63  ;;  %v2848_v38 = vadd.f32 %v2228_v31, %v2196_v23  ;;  %v959_v31 = vmul.f32 %v2819_v40, %v2693_v43 }
  0x2f   : > { %v693_v61 = vpack.c.bf16 %v678_v34, %v677_v36  ;;  %v459_v19 = vmul.f32 %v2613_v7, %v2805_v32  ;;  %v706_v47 = vmul.f32 %v2616_v8, %v2805_v32  ;;  %v2828_v34 = vld [vmem:[%s2605_s26 + $0x3] ss:$0 sm:$0xff]  ;;  %v776_v36 = vsel %vm494_vm0, %v720_v33, 0 }
  0x30   : > { %v1208_v3 = vmul.f32 %v2828_v34, %v2662_v28  ;;  %v456_v63 = vmul.f32 %v2613_v7, %v2815_v41  ;;  %v457_v28 = vmul.f32 %v2613_v7, %v2832_v49  ;;  %v2876_v62 = vmul.f32 %v2613_v7, %v2848_v38 }
  0x31   : > { %2380 = vmatprep.mubr.msk.bf16.mxu1 %vm494_vm0, %v693_v61  ;;  %v2853_v61 = vpack.c.bf16 %v961_v60, %v960_v55  ;;  %v719_v10 = vpack.c.bf16 %v706_v47, %v705_v48  ;;  %v2880_v4 = vmul.f32 %v2616_v8, %v2848_v38  ;;  %v2891_v47 = vmul.f32 %v2613_v7, %v2858_v18 }
  0x32   : > { %v2895_v55 = vmul.f32 %v2616_v8, %v2858_v18  ;;  %v1205_v56 = vmul.f32 %v2828_v34, %v2687_v42 }
  0x33   : > { %v773_v21 = vsel %vm494_vm0, %v719_v10, 0 }
  0x34   : > { %2339 = vmatpush3.bf16.xpose.msra.mxu0 %v532_v0  ;;  %2371 = vmatpush3.bf16.xpose.msra.mxu1 %v779_v5  ;;  %v1207_v0 = vmul.f32 %v2828_v34, %v2656_v27  ;;  %v2846_v5 = vsub.f32 %v2193_v51, %v2225_v52  ;;  %v472_v27 = vpack.c.bf16 %v459_v19, %v458_v45 }
  0x35   : > { %2464 = vmatprep.subr.msk.bf16.mxu0 %vm494_vm0, %v473_v46  ;;  %2472 = vmatprep.subr.msk.bf16.mxu1 %vm494_vm0, %v720_v33  ;;  %v703_v51 = vmul.f32 %v2616_v8, %v2815_v41  ;;  %v704_v46 = vmul.f32 %v2616_v8, %v2832_v49  ;;  %v454_v52 = vmul.f32 %v2613_v7, %v2834_v50 }
  0x36   : > { %v2855_v44 = vpack.c.bf16 %v1208_v3, %v1207_v0  ;;  %v455_v23 = vmul.f32 %v2613_v7, %v2846_v5  ;;  %v701_v19 = vmul.f32 %v2616_v8, %v2834_v50  ;;  %v702_v33 = vmul.f32 %v2616_v8, %v2846_v5 }
  0x37   : > { %v958_v45 = vmul.f32 %v2819_v40, %v2687_v42  ;;  %v526_v48 = vsel %vm494_vm0, %v472_v27, 0  ;;  %v1206_v0 = vmul.f32 %v2828_v34, %v2693_v43  ;;  %v956_v3 = vmul.f32 %v2819_v40, %v2712_v53 }
  0x38   : > { %3977 = vst [vmem:[#allocation4_spill] sm:$0xff] %v2855_v44  ;;  %v1203_v42 = vmul.f32 %v2828_v34, %v2712_v53  ;;  %v3979_v53 = vunpack.c.h.bf16 %v2624_v12  ;;  %v1209_v12 = vmul.f32 %v2828_v34, %v2630_v15 }
  0x39   : > { %v2899_v60 = vpack.c.bf16 %v959_v31, %v958_v45  ;;  %v1204_v45 = vmul.f32 %v2828_v34, %v2719_v57  ;;  %v471_v31 = vpack.c.bf16 %v457_v28, %v456_v63  ;;  %v2915_v43 = vpack.c.bf16 %v1206_v0, %v1205_v56 }
  0x3a   : > { %v470_v28 = vpack.c.bf16 %v455_v23, %v454_v52  ;;  %v717_v56 = vpack.c.bf16 %v702_v33, %v701_v19  ;;  %v954_v23 = vmul.f32 %v2819_v40, %v2752_v24  ;;  %v955_v33 = vmul.f32 %v2819_v40, %v2765_v37 }
  0x3b   : > { %3978 = vst [vmem:[#allocation5_spill] sm:$0xff] %v2899_v60  ;;  %v718_v60 = vpack.c.bf16 %v704_v46, %v703_v51  ;;  %v2926_v44 = vpack.c.bf16 %v1204_v45, %v1203_v42  ;;  %v523_v51 = vsel %vm494_vm0, %v471_v31, 0  ;;  %v2953_v46 = vmul.f32 %v2616_v8, %v2923_v30 }
  0x3c   : > { %2341 = vmatpush3.bf16.xpose.msra.mxu0 %v529_v39  ;;  %2373 = vmatpush3.bf16.xpose.msra.mxu1 %v776_v36  ;;  %v957_v39 = vmul.f32 %v2819_v40, %v2719_v57  ;;  %v962_v36 = vmul.f32 %v2819_v40, %v2630_v15  ;;  %v3980_v57 = vunpack.c.h.bf16 %v2635_v17  ;;  %v1200_v42 = vmul.f32 %v2828_v34, %v2805_v32 }
  0x3d   : > { %2465 = vmatprep.subr.msk.bf16.mxu0 %vm494_vm0, %v472_v27  ;;  %2473 = vmatprep.subr.msk.bf16.mxu1 %vm494_vm0, %v719_v10  ;;  %v963_v27 = vmul.f32 %v2819_v40, %v2632_v16  ;;  %v770_v15 = vsel %vm494_vm0, %v718_v60, 0  ;;  %v1195_v19 = vmul.f32 %v2828_v34, %v2834_v50 }
  0x3e   : > { %v2917_v9 = vpack.c.bf16 %v957_v39, %v956_v3  ;;  %v2932_v63 = vadd.f32 %v3980_v57, %v3979_v53  ;;  %v1201_v3 = vmul.f32 %v2828_v34, %v2752_v24  ;;  %v1202_v39 = vmul.f32 %v2828_v34, %v2765_v37 }
  0x3f   : > { %v2942_v29 = vpack.c.bf16 %v963_v27, %v962_v36  ;;  %v2978_v36 = vpack.c.bf16 %v955_v33, %v954_v23  ;;  %v1199_v27 = vmul.f32 %v2828_v34, %v2799_v6  ;;  %v3981_v24 = vunpack.c.l.bf16 %v2610_v2 }
  0x40   : > { %v2948_v17 = vmul.f32 %v2613_v7, %v2932_v63  ;;  %v2957_v52 = vmul.f32 %v2616_v8, %v2932_v63  ;;  %v2986_v45 = vpack.c.bf16 %v1202_v39, %v1201_v3  ;;  %v3982_v37 = vunpack.c.l.bf16 %v2621_v11 }
  0x41   : > { %v3983_v53 = vunpack.c.h.bf16 %v2610_v2  ;;  %v3984_v57 = vunpack.c.h.bf16 %v2621_v11  ;;  %v3006_v3 = vpack.c.bf16 %v1200_v42, %v1199_v27  ;;  %v3010_v39 = vmul.f32 %v2613_v7, %v2628_v14 }
  0x42   : > { %v3986_v2 = vunpack.c.l.bf16 %v2758_v26  ;;  %v3991_v42 = vunpack.c.l.bf16 %v2722_v58 }
  0x43   : > { %v2998_v23 = vadd.f32 %v3984_v57, %v3983_v53  ;;  %v3992_v53 = vunpack.c.l.bf16 %v2725_v59 }
  0x44   : > { %2343 = vmatpush3.bf16.xpose.msra.mxu0 %v526_v48  ;;  %2375 = vmatpush3.bf16.xpose.msra.mxu1 %v773_v21  ;;  %v1210_v21 = vmul.f32 %v2828_v34, %v2632_v16  ;;  %v953_v16 = vmul.f32 %v2819_v40, %v2805_v32 }
  0x45   : > { %2466 = vmatprep.subr.msk.bf16.mxu0 %vm494_vm0, %v471_v31  ;;  %2474 = vmatprep.subr.msk.bf16.mxu1 %vm494_vm0, %v718_v60  ;;  %v952_v60 = vmul.f32 %v2819_v40, %v2799_v6  ;;  %v2992_v31 = vadd.f32 %v3982_v37, %v3981_v24  ;;  %v3002_v6 = vmul.f32 %v2613_v7, %v2626_v13  ;;  %v3985_v24 = vunpack.c.l.bf16 %v2755_v25 }
  0x46   : > { %v1218_v33 = vpack.c.bf16 %v1210_v21, %v1209_v12  ;;  %v3024_v12 = vmul.f32 %v2613_v7, %v2998_v23  ;;  %v390_v57 = vadd.f32 %v3992_v53, %v3991_v42  ;;  %v950_v42 = vmul.f32 %v2819_v40, %v2815_v41 }
  0x47   : > { %v3004_v32 = vpack.c.bf16 %v953_v16, %v952_v60  ;;  %v3016_v11 = vadd.f32 %v3986_v2, %v3985_v24  ;;  %v3020_v37 = vmul.f32 %v2613_v7, %v2992_v31  ;;  %v3028_v21 = vmul.f32 %v2616_v8, %v2992_v31 }
  0x48   : > { %v3988_v60 = vunpack.c.h.bf16 %v2755_v25  ;;  %v3989_v16 = vunpack.c.h.bf16 %v2758_v26  ;;  %v3044_v2 = vmul.f32 %v2616_v8, %v2998_v23  ;;  %v520_v25 = vsel %vm494_vm0, %v470_v28, 0 }
  0x49   : > { %3987 = vst [vmem:[#allocation6_spill] sm:$0xff] %v3016_v11  ;;  %v951_v53 = vmul.f32 %v2819_v40, %v2832_v49  ;;  %v1197_v26 = vmul.f32 %v2828_v34, %v2815_v41  ;;  %v1196_v24 = vmul.f32 %v2828_v34, %v2846_v5  ;;  %v3086_v41 = vmul.f32 %v2819_v40, %v2779_v54 }
  0x4a   : > { %v3034_v27 = vadd.f32 %v3989_v16, %v3988_v60  ;;  %v3051_v60 = vmul.f32 %v2616_v8, %v2626_v13  ;;  %v3055_v16 = vmul.f32 %v2616_v8, %v2628_v14 }
  0x4b   : > { %v3074_v48 = vpack.c.bf16 %v951_v53, %v950_v42  ;;  %v3094_v42 = vmul.f32 %v2828_v34, %v2779_v54  ;;  %v3994_v53 = vunpack.c.h.bf16 %v2722_v58  ;;  %v3114_v58 = vmul.f32 %v2819_v40, %v2848_v38 }
  0x4c   : > { %3990 = vst [vmem:[#allocation7_spill] sm:$0xff] %v3034_v27  ;;  %2345 = vmatpush3.bf16.xpose.msra.mxu0 %v523_v51  ;;  %2377 = vmatpush3.bf16.xpose.msra.mxu1 %v770_v15  ;;  %v767_v51 = vsel %vm494_vm0, %v717_v56, 0  ;;  %v949_v15 = vmul.f32 %v2819_v40, %v2846_v5  ;;  %v3138_v54 = vmul.f32 %v2828_v34, %v2858_v18 }
  0x4d   : > { %2467 = vmatprep.subr.msk.bf16.mxu0 %vm494_vm0, %v470_v28  ;;  %2475 = vmatprep.subr.msk.bf16.mxu1 %vm494_vm0, %v717_v56  ;;  %v1198_v28 = vmul.f32 %v2828_v34, %v2832_v49  ;;  %v948_v56 = vmul.f32 %v2819_v40, %v2834_v50  ;;  %v3090_v49 = vmul.f32 %v2819_v40, %v2790_v1  ;;  %v3995_v50 = vunpack.c.h.bf16 %v2725_v59 }
  0x4e   : > { %3998 = vst [vmem:[#allocation11_spill] sm:$0xff] %v3114_v58  ;;  %v3118_v59 = vmul.f32 %v2819_v40, %v2858_v18  ;;  %v436_v18 = vmul.f32 %v2613_v7, %v390_v57  ;;  %v4004_v58 = vunpack.c.h.bf16 %v2669_v35 }
  0x4f   : > { %v3082_v10 = vpack.c.bf16 %v1198_v28, %v1197_v26  ;;  %v391_v0 = vadd.f32 %v3995_v50, %v3994_v53  ;;  %v3100_v5 = vpack.c.bf16 %v949_v15, %v948_v56  ;;  %v3102_v26 = vpack.c.bf16 %v1196_v24, %v1195_v19 }
  0x50   : > { %v3106_v28 = vmul.f32 %v2828_v34, %v2790_v1  ;;  %3999 = vst [vmem:[#allocation12_spill] sm:$0xff] %v3118_v59  ;;  %v435_v19 = vmul.f32 %v2613_v7, %v3034_v27  ;;  %v681_v1 = vmul.f32 %v2616_v8, %v3016_v11  ;;  %v3128_v15 = vmul.f32 %v2828_v34, %v2848_v38 }
  0x51   : > { %3993 = vst [vmem:[#allocation8_spill] sm:$0xff] %v3082_v10  ;;  %3996 = vst [vmem:[#allocation9_spill] sm:$0xff] %v3100_v5  ;;  %v434_v10 = vmul.f32 %v2613_v7, %v3016_v11  ;;  %v1035_v56 = vsel %vm494_vm0, %v2942_v29, 0  ;;  %v682_v53 = vmul.f32 %v2616_v8, %v3034_v27  ;;  %v1282_v38 = vsel %vm494_vm0, %v1218_v33, 0 }
  0x52   : > { %3997 = vst [vmem:[#allocation10_spill] sm:$0xff] %v3102_v26  ;;  %v3151_v27 = vmul.f32 %v2819_v40, %v390_v57  ;;  %v3154_v50 = vmul.f32 %v2819_v40, %v391_v0  ;;  %v437_v11 = vmul.f32 %v2613_v7, %v391_v0  ;;  %v3172_v5 = vmul.f32 %v2828_v34, %v391_v0 }
  0x54   : > { %2347 = vmatpush3.bf16.xpose.msra.mxu0 %v520_v25  ;;  %2379 = vmatpush3.bf16.xpose.msra.mxu1 %v767_v51  ;;  %v4000_v25 = vunpack.c.l.bf16 %v2642_v22  ;;  %v4001_v51 = vunpack.c.l.bf16 %v2669_v35  ;;  %4002 = vst [vmem:[#allocation13_spill] sm:$0xff] %v3151_v27  ;;  %v684_v35 = vmul.f32 %v2616_v8, %v391_v0  ;;  %v3198_v27 = vmul.f32 %v2828_v34, %v2932_v63 }
  0x55   : > { %2476 = vmatprep.subr.msk.bf16.mxu0 %vm494_vm0, %v2942_v29  ;;  %2484 = vmatprep.subr.msk.bf16.mxu1 %vm494_vm0, %v1218_v33  ;;  %v4003_v29 = vunpack.c.h.bf16 %v2642_v22  ;;  %v683_v22 = vmul.f32 %v2616_v8, %v390_v57  ;;  %v3220_v33 = vmul.f32 %v2819_v40, %v2626_v13 }
  0x56   : > { %v3148_v24 = vadd.f32 %v4001_v51, %v4000_v25  ;;  %v3166_v25 = vmul.f32 %v2828_v34, %v390_v57  ;;  %v448_v51 = vpack.c.bf16 %v435_v19, %v434_v10  ;;  %v695_v10 = vpack.c.bf16 %v682_v53, %v681_v1 }
  0x57   : > { %v3161_v59 = vadd.f32 %v4004_v58, %v4003_v29  ;;  %v3178_v58 = vmul.f32 %v2819_v40, %v2923_v30  ;;  %v3182_v29 = vmul.f32 %v2819_v40, %v2932_v63  ;;  %v3190_v57 = vmul.f32 %v2828_v34, %v2923_v30 }
  0x58   : > { %v438_v19 = vmul.f32 %v2613_v7, %v3148_v24  ;;  %v3202_v1 = vmul.f32 %v2819_v40, %v2992_v31  ;;  %v4005_v53 = vpack.c.bf16 %v2891_v47, %v2876_v62  ;;  %v4006_v30 = vpack.c.bf16 %v2895_v55, %v2880_v4  ;;  %v4007_v55 = vld [vmem:[#allocation4_spill] sm:$0xff] }
  0x59   : > { %v439_v0 = vmul.f32 %v2613_v7, %v3161_v59  ;;  %v685_v7 = vmul.f32 %v2616_v8, %v3148_v24  ;;  %v3216_v63 = vmul.f32 %v2819_v40, %v2998_v23  ;;  %v3226_v4 = vmul.f32 %v2819_v40, %v2628_v14 }
  0x5a   : > { %v3230_v47 = vmul.f32 %v2828_v34, %v2992_v31  ;;  %v686_v31 = vmul.f32 %v2616_v8, %v3161_v59  ;;  %v696_v62 = vpack.c.bf16 %v684_v35, %v683_v22  ;;  %v1279_v8 = vsel %vm494_vm0, %v4007_v55, 0 }
  0x5b   : > { %2349 = vmatmul.mubr.msk.bf16.vlgmr.msra.gmra.mxu0 %vm494_vm0, %v4005_v53  ;;  %2381 = vmatmul.mubr.msk.bf16.vlgmr.msra.gmra.mxu1 %vm494_vm0, %v4006_v30  ;;  %v3244_v53 = vmul.f32 %v2828_v34, %v2626_v13  ;;  %v450_v26 = vpack.c.bf16 %v439_v0, %v438_v19  ;;  %v4010_v22 = vpack.c.bf16 %v2957_v52, %v2953_v46  ;;  %v1273_v46 = vsel %vm494_vm0, %v2926_v44, 0  ;;  %v4022_v0 = vld [vmem:[#allocation12_spill] sm:$0xff] }
  0x5c   : > { %2397 = vmatpush3.bf16.xpose.msra.mxu0 %v1035_v56  ;;  %2429 = vmatpush3.bf16.xpose.msra.mxu1 %v1282_v38  ;;  %v3240_v38 = vmul.f32 %v2828_v34, %v2998_v23  ;;  %v3254_v56 = vmul.f32 %v2828_v34, %v2628_v14  ;;  %v449_v23 = vpack.c.bf16 %v437_v11, %v436_v18  ;;  %v4008_v14 = vld [vmem:[#allocation5_spill] sm:$0xff]  ;;  %v1276_v11 = vsel %vm494_vm0, %v2915_v43, 0 }
  0x5d   : > { %2477 = vmatprep.subr.msk.bf16.mxu0 %vm494_vm0, %v2853_v61  ;;  %2485 = vmatprep.subr.msk.bf16.mxu1 %vm494_vm0, %v4007_v55  ;;  %v697_v30 = vpack.c.bf16 %v686_v31, %v685_v7  ;;  %v4009_v18 = vpack.c.bf16 %v2948_v17, %v2938_v20  ;;  %v4012_v20 = vpack.c.bf16 %v3044_v2, %v3028_v21  ;;  %v1026_v17 = vsel %vm494_vm0, %v2917_v9, 0  ;;  %v4023_v7 = vld [vmem:[#allocation11_spill] sm:$0xff] }
  0x5e   : > { %2352 = vmatprep.mubr.msk.bf16.mxu0 %vm494_vm0, %v448_v51  ;;  %2384 = vmatprep.mubr.msk.bf16.mxu1 %vm494_vm0, %v695_v10  ;;  %v1193_v13 = vpack.c.bf16 %v3240_v38, %v3230_v47  ;;  %v1194_v51 = vpack.c.bf16 %v3254_v56, %v3244_v53  ;;  %v1032_v10 = vsel %vm494_vm0, %v2853_v61, 0  ;;  %v1029_v61 = vsel %vm494_vm0, %v4008_v14, 0 }
  0x5f   : > { %v4013_v52 = vpack.c.bf16 %v3010_v39, %v3002_v6  ;;  %v1023_v6 = vsel %vm494_vm0, %v2978_v36, 0  ;;  %v1270_v39 = vsel %vm494_vm0, %v2986_v45, 0  ;;  %v1267_v21 = vsel %vm494_vm0, %v3006_v3, 0 }
  0x60   : > { %v4025_v55 = vpack.c.bf16 %v3138_v54, %v3128_v15  ;;  %v932_v31 = vmul.f32 %v2819_v40, %v3148_v24  ;;  %v4026_v15 = vld [vmem:[#allocation13_spill] sm:$0xff] }
  0x63   : > { %2353 = vmatmul.mubr.msk.bf16.gmra.mxu0 %vm494_vm0, %v449_v23  ;;  %2385 = vmatmul.mubr.msk.bf16.gmra.mxu1 %vm494_vm0, %v696_v62  ;;  %v4024_v62 = vpack.c.bf16 %v4022_v0, %v4023_v7  ;;  %v1179_v23 = vmul.f32 %v2828_v34, %v3148_v24 }
  0x64   : > { %2399 = vmatpush3.bf16.xpose.msra.mxu0 %v1032_v10  ;;  %2431 = vmatpush3.bf16.xpose.msra.mxu1 %v1279_v8  ;;  %v1180_v10 = vmul.f32 %v2828_v34, %v3161_v59 }
  0x65   : > { %2478 = vmatprep.subr.msk.bf16.mxu0 %vm494_vm0, %v4008_v14  ;;  %2486 = vmatprep.subr.msk.bf16.mxu1 %vm494_vm0, %v2915_v43  ;;  %v4011_v43 = vpack.c.bf16 %v3024_v12, %v3020_v37  ;;  %v4014_v37 = vpack.c.bf16 %v3055_v16, %v3051_v60  ;;  %v1020_v12 = vsel %vm494_vm0, %v3004_v32, 0  ;;  %v4027_v14 = vpack.c.bf16 %v3154_v50, %v4026_v15 }
  0x66   : > { %2356 = vmatprep.mubr.msk.bf16.mxu0 %vm494_vm0, %v450_v26  ;;  %2388 = vmatprep.mubr.msk.bf16.mxu1 %vm494_vm0, %v697_v30  ;;  %v933_v30 = vmul.f32 %v2819_v40, %v3161_v59  ;;  %v1191_v54 = vpack.c.bf16 %v1180_v10, %v1179_v23  ;;  %v4031_v59 = vpack.c.bf16 %v3216_v63, %v3202_v1 }
  0x68   : > { %v944_v8 = vpack.c.bf16 %v933_v30, %v932_v31 }
  0x6b   : > { %2357 = vmatmul.mubr.msk.bf16.gmra.mxu0 %vm494_vm0, %v4009_v18  ;;  %2389 = vmatmul.mubr.msk.bf16.gmra.mxu1 %vm494_vm0, %v4010_v22 }
  0x6c   : > { %2401 = vmatpush3.bf16.xpose.msra.mxu0 %v1029_v61  ;;  %2433 = vmatpush3.bf16.xpose.msra.mxu1 %v1276_v11  ;;  %v4028_v61 = vpack.c.bf16 %v3172_v5, %v3166_v25  ;;  %v4032_v5 = vpack.c.bf16 %v3226_v4, %v3220_v33 }
  0x6d   : > { %2479 = vmatprep.subr.msk.bf16.mxu0 %vm494_vm0, %v2917_v9  ;;  %2487 = vmatprep.subr.msk.bf16.mxu1 %vm494_vm0, %v2926_v44  ;;  %v4015_v9 = vpack.c.bf16 %v3090_v49, %v3086_v41  ;;  %v4016_v44 = vpack.c.bf16 %v3106_v28, %v3094_v42  ;;  %v4020_v41 = vld [vmem:[#allocation6_spill] sm:$0xff]  ;;  %v4021_v49 = vld [vmem:[#allocation7_spill] sm:$0xff] }
  0x6e   : > { %2360 = vmatprep.mubr.msk.bf16.mxu0 %vm494_vm0, %v4011_v43  ;;  %2392 = vmatprep.mubr.msk.bf16.mxu1 %vm494_vm0, %v4012_v20  ;;  %v929_v42 = vmul.f32 %v2819_v40, %v4021_v49  ;;  %v1175_v26 = vmul.f32 %v2828_v34, %v4020_v41  ;;  %v1176_v28 = vmul.f32 %v2828_v34, %v4021_v49 }
  0x6f   : > { %v4030_v34 = vpack.c.bf16 %v3198_v27, %v3190_v57  ;;  %v2549_v27 = vmov 0.0  }
  0x70   : > { %v1189_v19 = vpack.c.bf16 %v1176_v28, %v1175_v26  ;;  %319 = vst.msk [vmem:[#allocation3] sm:$0xf] %vm318_vm2, %v2549_v27 }
  0x73   : > { %2361 = vmatmul.mubr.msk.bf16.gmra.mxu0 %vm494_vm0, %v4013_v52  ;;  %2393 = vmatmul.mubr.msk.bf16.gmra.mxu1 %vm494_vm0, %v4014_v37 }
  0x74   : > { %2403 = vmatpush3.bf16.xpose.msra.mxu0 %v1026_v17  ;;  %2435 = vmatpush3.bf16.xpose.msra.mxu1 %v1273_v46 }
  0x75   : > { %2480 = vmatprep.subr.msk.bf16.mxu0 %vm494_vm0, %v2978_v36  ;;  %2488 = vmatprep.subr.msk.bf16.mxu1 %vm494_vm0, %v2986_v45  ;;  %v4017_v36 = vld [vmem:[#allocation8_spill] sm:$0xff]  ;;  %v1017_v45 = vsel %vm494_vm0, %v3074_v48, 0 }
  0x76   : > { %2412 = vmatprep.mubr.msk.bf16.mxu0 %vm494_vm0, %v4015_v9  ;;  %2444 = vmatprep.mubr.msk.bf16.mxu1 %vm494_vm0, %v4016_v44  ;;  %v1264_v2 = vsel %vm494_vm0, %v4017_v36, 0 }
  0x77   : > { %v416_v50 = vld [vmem:[#allocation3] sm:$0xf] }
  0x7c   : > { %2405 = vmatpush3.bf16.xpose.msra.mxu0 %v1023_v6  ;;  %2437 = vmatpush3.bf16.xpose.msra.mxu1 %v1270_v39 }
  0x7d   : > { %2481 = vmatprep.subr.msk.bf16.mxu0 %vm494_vm0, %v3004_v32  ;;  %2489 = vmatprep.subr.msk.bf16.mxu1 %vm494_vm0, %v3006_v3  ;;  %v4018_v32 = vld [vmem:[#allocation9_spill] sm:$0xff]  ;;  %v4019_v3 = vld [vmem:[#allocation10_spill] sm:$0xff] }
  0x7e   : > { %v1014_v60 = vsel %vm494_vm0, %v4018_v32, 0  ;;  %v1261_v16 = vsel %vm494_vm0, %v4019_v3, 0 }
  0x84   : > { %2407 = vmatpush3.bf16.xpose.msra.mxu0 %v1020_v12  ;;  %2439 = vmatpush3.bf16.xpose.msra.mxu1 %v1267_v21 }
  0x85   : > { %2482 = vmatprep.subr.msk.bf16.mxu0 %vm494_vm0, %v3074_v48  ;;  %2490 = vmatprep.subr.msk.bf16.mxu1 %vm494_vm0, %v4017_v36  ;;  %v928_v48 = vmul.f32 %v2819_v40, %v4020_v41  ;;  %v4029_v40 = vpack.c.bf16 %v3182_v29, %v3178_v58 }
  0x87   : > { %v942_v35 = vpack.c.bf16 %v929_v42, %v928_v48 }
  0x8c   : > { %2409 = vmatpush3.bf16.xpose.msra.mxu0 %v1017_v45  ;;  %2441 = vmatpush3.bf16.xpose.msra.mxu1 %v1264_v2 }
  0x8d   : > { %2483 = vmatprep.subr.msk.bf16.mxu0 %vm494_vm0, %v4018_v32  ;;  %2491 = vmatprep.subr.msk.bf16.mxu1 %vm494_vm0, %v4019_v3 }
  0x94   : > { %2411 = vmatpush3.bf16.xpose.msra.mxu0 %v1014_v60  ;;  %2443 = vmatpush3.bf16.xpose.msra.mxu1 %v1261_v16 }
  0x9b   : > { %2413 = vmatmul.mubr.msk.bf16.vlgmr.msra.gmra.mxu0 %vm494_vm0, %v4024_v62  ;;  %2445 = vmatmul.mubr.msk.bf16.vlgmr.msra.gmra.mxu1 %vm494_vm0, %v4025_v55 }
  0x9c   : > { %2416 = vmatprep.mubr.msk.bf16.mxu0 %vm494_vm0, %v942_v35  ;;  %2448 = vmatprep.mubr.msk.bf16.mxu1 %vm494_vm0, %v1189_v19 }
  0xa3   : > { %2417 = vmatmul.mubr.msk.bf16.gmra.mxu0 %vm494_vm0, %v4027_v14  ;;  %2449 = vmatmul.mubr.msk.bf16.gmra.mxu1 %vm494_vm0, %v4028_v61 }
  0xa4   : > { %2420 = vmatprep.mubr.msk.bf16.mxu0 %vm494_vm0, %v944_v8  ;;  %2452 = vmatprep.mubr.msk.bf16.mxu1 %vm494_vm0, %v1191_v54 }
  0xab   : > { %2421 = vmatmul.mubr.msk.bf16.gmra.mxu0 %vm494_vm0, %v4029_v40  ;;  %2453 = vmatmul.mubr.msk.bf16.gmra.mxu1 %vm494_vm0, %v4030_v34 }
  0xac   : > { %2424 = vmatprep.mubr.msk.bf16.mxu0 %vm494_vm0, %v4031_v59  ;;  %2456 = vmatprep.mubr.msk.bf16.mxu1 %vm494_vm0, %v1193_v13 }
  0xb2   : > { %v421_v24 = vpop.xlane.xlu0 %420 }
  0xb3   : > { %2425 = vmatmul.mubr.msk.bf16.gmra.mxu0 %vm494_vm0, %v4032_v5  ;;  %2457 = vmatmul.mubr.msk.bf16.gmra.mxu1 %vm494_vm0, %v1194_v51  ;;  %v422_v25 = vadd.f32 %v421_v24, %v416_v50 }
  0xb5   : > { %424 = vst.msk [vmem:[#allocation3] sm:$0xf] %vm318_vm2, %v422_v25 }
 0x11b   : > { %v3408_v58 = vpop.f32.mrf.mxu0  ;;  %v3410_v29 = vpop.f32.mrf.mxu1 }
 0x11d   : > { %v3412_v57 = vpop.f32.mrf.mxu0  ;;  %v3414_v33 = vpop.f32.mrf.mxu1 }
 0x11e   : > { %1589 = vxpose.xlu1.b32.start [1/16] %v3414_v33, 128  ;;  %1432 = vxpose.xlu0.b32.start [1/16] %v3412_v57, 128 }
 0x11f   : > { %v3418_v1 = vpop.f32.mrf.mxu0  ;;  %v3420_v63 = vpop.f32.mrf.mxu1 }
 0x121   : > { %v3422_v4 = vpop.f32.mrf.mxu0  ;;  %v3424_v47 = vpop.f32.mrf.mxu1 }
 0x122   : > { %1590 = vxpose.xlu1.b32.cont [2/16] %v3424_v47, 128  ;;  %1433 = vxpose.xlu0.b32.cont [2/16] %v3422_v4, 128 }
 0x123   : > { %v3428_v56 = vpop.f32.mrf.mxu0  ;;  %v3430_v38 = vpop.f32.mrf.mxu1 }
 0x125   : > { %v3434_v53 = vpop.f32.mrf.mxu0  ;;  %v3436_v13 = vpop.f32.mrf.mxu1 }
 0x126   : > { %1591 = vxpose.xlu1.b32.cont [3/16] %v3410_v29, 128  ;;  %1434 = vxpose.xlu0.b32.cont [3/16] %v3408_v58, 128 }
 0x127   : > { %v3440_v51 = vpop.f32.mrf.mxu0  ;;  %v3442_v11 = vpop.f32.mrf.mxu1 }
 0x129   : > { %v3446_v18 = vpop.f32.mrf.mxu0  ;;  %v3448_v22 = vpop.f32.mrf.mxu1 }
 0x12a   : > { %1592 = vxpose.xlu1.b32.cont [4/16] %v3420_v63, 128  ;;  %1435 = vxpose.xlu0.b32.cont [4/16] %v3418_v1, 128 }
 0x12b   : > { %v3452_v43 = vpop.f32.mrf.mxu0  ;;  %v3454_v20 = vpop.f32.mrf.mxu1 }
 0x12d   : > { %v3458_v17 = vpop.f32.mrf.mxu0  ;;  %v3460_v46 = vpop.f32.mrf.mxu1 }
 0x12e   : > { %1593 = vxpose.xlu1.b32.cont [5/16] %v3436_v13, 128  ;;  %1436 = vxpose.xlu0.b32.cont [5/16] %v3434_v53, 128 }
 0x12f   : > { %v3464_v52 = vpop.f32.mrf.mxu0  ;;  %v3466_v37 = vpop.f32.mrf.mxu1 }
 0x131   : > { %v3470_v9 = vpop.f32.mrf.mxu0  ;;  %v3472_v44 = vpop.f32.mrf.mxu1 }
 0x132   : > { %1594 = vxpose.xlu1.b32.cont [6/16] %v3448_v22, 128  ;;  %1437 = vxpose.xlu0.b32.cont [6/16] %v3446_v18, 128 }
 0x133   : > { %v3476_v6 = vpop.f32.mrf.mxu0  ;;  %v3478_v39 = vpop.f32.mrf.mxu1 }
 0x135   : > { %v3482_v12 = vpop.f32.mrf.mxu0  ;;  %v3484_v21 = vpop.f32.mrf.mxu1 }
 0x136   : > { %1595 = vxpose.xlu1.b32.cont [7/16] %v3430_v38, 128  ;;  %1438 = vxpose.xlu0.b32.cont [7/16] %v3428_v56, 128 }
 0x137   : > { %v3488_v36 = vpop.f32.mrf.mxu0  ;;  %v3490_v45 = vpop.f32.mrf.mxu1 }
 0x139   : > { %v3494_v2 = vpop.f32.mrf.mxu0  ;;  %v3496_v32 = vpop.f32.mrf.mxu1 }
 0x13a   : > { %1596 = vxpose.xlu1.b32.cont [8/16] %v3442_v11, 128  ;;  %1439 = vxpose.xlu0.b32.cont [8/16] %v3440_v51, 128 }
 0x13e   : > { %1597 = vxpose.xlu1.b32.cont [9/16] %v3460_v46, 128  ;;  %1440 = vxpose.xlu0.b32.cont [9/16] %v3458_v17, 128 }
 0x142   : > { %1598 = vxpose.xlu1.b32.cont [10/16] %v3472_v44, 128  ;;  %1441 = vxpose.xlu0.b32.cont [10/16] %v3470_v9, 128 }
 0x146   : > { %1599 = vxpose.xlu1.b32.cont [11/16] %v3454_v20, 128  ;;  %1442 = vxpose.xlu0.b32.cont [11/16] %v3452_v43, 128 }
 0x14a   : > { %1600 = vxpose.xlu1.b32.cont [12/16] %v3466_v37, 128  ;;  %1443 = vxpose.xlu0.b32.cont [12/16] %v3464_v52, 128 }
 0x14e   : > { %1601 = vxpose.xlu1.b32.cont [13/16] %v3484_v21, 128  ;;  %1444 = vxpose.xlu0.b32.cont [13/16] %v3482_v12, 128 }
 0x152   : > { %1602 = vxpose.xlu1.b32.cont [14/16] %v3496_v32, 128  ;;  %1445 = vxpose.xlu0.b32.cont [14/16] %v3494_v2, 128 }
 0x156   : > { %1603 = vxpose.xlu1.b32.cont [15/16] %v3478_v39, 128  ;;  %1446 = vxpose.xlu0.b32.cont [15/16] %v3476_v6, 128 }
 0x15a   : > { %1604 = vxpose.xlu1.b32.end [16/16] %v3490_v45, 128  ;;  %1447 = vxpose.xlu0.b32.end [16/16] %v3488_v36, 128 }
 0x15b   : > { %v3504_v3 = vpop.f32.mrf.mxu0  ;;  %v3506_v60 = vpop.f32.mrf.mxu1 }
 0x15c   : > { %4033 = vst [vmem:[#allocation4_spill] sm:$0xff] %v3504_v3  ;;  %4034 = vst [vmem:[#allocation5_spill] sm:$0xff] %v3506_v60 }
 0x15d   : > { %v3508_v16 = vpop.f32.mrf.mxu0  ;;  %v3510_v41 = vpop.f32.mrf.mxu1 }
 0x15e   : > { %4035 = vst [vmem:[#allocation8_spill] sm:$0xff] %v3510_v41  ;;  %1903 = vxpose.xlu1.b32.start [1/16] %v3510_v41, 128  ;;  %1746 = vxpose.xlu0.b32.start [1/16] %v3508_v16, 128 }
 0x15f   : > { %v3514_v48 = vpop.f32.mrf.mxu0  ;;  %v3516_v49 = vpop.f32.mrf.mxu1 }
 0x160   : > { %4036 = vst [vmem:[#allocation9_spill] sm:$0xff] %v3514_v48  ;;  %4037 = vst [vmem:[#allocation10_spill] sm:$0xff] %v3516_v49 }
 0x161   : > { %v3518_v42 = vpop.f32.mrf.mxu0  ;;  %v3520_v26 = vpop.f32.mrf.mxu1 }
 0x162   : > { %4038 = vst [vmem:[#allocation6_spill] sm:$0xff] %v3520_v26  ;;  %1904 = vxpose.xlu1.b32.cont [2/16] %v3520_v26, 128  ;;  %1747 = vxpose.xlu0.b32.cont [2/16] %v3518_v42, 128  ;;  %v1621_v26 = vmul.f32 %v3414_v33, %v3414_v33 }
 0x163   : > { %v3524_v28 = vpop.f32.mrf.mxu0  ;;  %v3526_v35 = vpop.f32.mrf.mxu1 }
 0x164   : > { %4039 = vst [vmem:[#allocation7_spill] sm:$0xff] %v3524_v28  ;;  %4040 = vst [vmem:[#allocation12_spill] sm:$0xff] %v3526_v35 }
 0x165   : > { %v3530_v19 = vpop.f32.mrf.mxu0  ;;  %v3532_v0 = vpop.f32.mrf.mxu1 }
 0x166   : > { %1905 = vxpose.xlu1.b32.cont [3/16] %v3506_v60, 128  ;;  %1748 = vxpose.xlu0.b32.cont [3/16] %v3504_v3, 128  ;;  %4041 = vst [vmem:[#allocation11_spill] sm:$0xff] %v3530_v19  ;;  %4042 = vst [vmem:[#allocation13_spill] sm:$0xff] %v3532_v0 }
 0x167   : > { %v3536_v7 = vpop.f32.mrf.mxu0  ;;  %v3538_v62 = vpop.f32.mrf.mxu1 }
 0x168   : > { %4043 = vst [vmem:[#allocation14_spill] sm:$0xff] %v3536_v7  ;;  %4044 = vst [vmem:[#allocation15_spill] sm:$0xff] %v3538_v62 }
 0x169   : > { %v3542_v55 = vpop.f32.mrf.mxu0  ;;  %v3544_v31 = vpop.f32.mrf.mxu1 }
 0x16a   : > { %1906 = vxpose.xlu1.b32.cont [4/16] %v3516_v49, 128  ;;  %1749 = vxpose.xlu0.b32.cont [4/16] %v3514_v48, 128  ;;  %4045 = vst [vmem:[#allocation16_spill] sm:$0xff] %v3542_v55  ;;  %4046 = vst [vmem:[#allocation17_spill] sm:$0xff] %v3544_v31  ;;  %v1465_v48 = vmul.f32 %v3422_v4, %v3422_v4 }
 0x16b   : > { %v3548_v30 = vpop.f32.mrf.mxu0  ;;  %v3550_v23 = vpop.f32.mrf.mxu1 }
 0x16c   : > { %4047 = vst [vmem:[#allocation18_spill] sm:$0xff] %v3548_v30  ;;  %4048 = vst [vmem:[#allocation19_spill] sm:$0xff] %v3550_v23 }
 0x16d   : > { %v3554_v10 = vpop.f32.mrf.mxu0  ;;  %v3556_v8 = vpop.f32.mrf.mxu1 }
 0x16e   : > { %1907 = vxpose.xlu1.b32.cont [5/16] %v3532_v0, 128  ;;  %1750 = vxpose.xlu0.b32.cont [5/16] %v3530_v19, 128  ;;  %4049 = vst [vmem:[#allocation20_spill] sm:$0xff] %v3554_v10  ;;  %4050 = vst [vmem:[#allocation21_spill] sm:$0xff] %v3556_v8 }
 0x16f   : > { %v3560_v54 = vpop.f32.mrf.mxu0  ;;  %v3562_v15 = vpop.f32.mrf.mxu1 }
 0x170   : > { %4051 = vst [vmem:[#allocation22_spill] sm:$0xff] %v3560_v54  ;;  %4052 = vst [vmem:[#allocation23_spill] sm:$0xff] %v3562_v15 }
 0x171   : > { %v3566_v14 = vpop.f32.mrf.mxu0  ;;  %v3568_v61 = vpop.f32.mrf.mxu1 }
 0x172   : > { %1908 = vxpose.xlu1.b32.cont [6/16] %v3544_v31, 128  ;;  %1751 = vxpose.xlu0.b32.cont [6/16] %v3542_v55, 128  ;;  %4053 = vst [vmem:[#allocation24_spill] sm:$0xff] %v3566_v14  ;;  %4054 = vst [vmem:[#allocation25_spill] sm:$0xff] %v3568_v61 }
 0x173   : > { %v3572_v40 = vpop.f32.mrf.mxu0  ;;  %v3574_v34 = vpop.f32.mrf.mxu1 }
 0x174   : > { %4055 = vst [vmem:[#allocation26_spill] sm:$0xff] %v3572_v40  ;;  %4056 = vst [vmem:[#allocation27_spill] sm:$0xff] %v3574_v34 }
 0x175   : > { %v3578_v59 = vpop.f32.mrf.mxu0  ;;  %v3580_v5 = vpop.f32.mrf.mxu1 }
 0x176   : > { %1909 = vxpose.xlu1.b32.cont [7/16] %v3526_v35, 128  ;;  %1752 = vxpose.xlu0.b32.cont [7/16] %v3524_v28, 128  ;;  %4057 = vst [vmem:[#allocation28_spill] sm:$0xff] %v3578_v59  ;;  %4058 = vst [vmem:[#allocation29_spill] sm:$0xff] %v3580_v5  ;;  %v1464_v28 = vmul.f32 %v3412_v57, %v3412_v57 }
 0x177   : > { %v3584_v27 = vpop.f32.mrf.mxu0  ;;  %v3586_v24 = vpop.f32.mrf.mxu1 }
 0x178   : > { %4059 = vst [vmem:[#allocation30_spill] sm:$0xff] %v3584_v27  ;;  %4060 = vst [vmem:[#allocation31_spill] sm:$0xff] %v3586_v24 }
 0x179   : > { %v3590_v50 = vpop.f32.mrf.mxu0  ;;  %v3592_v25 = vpop.f32.mrf.mxu1 }
 0x17a   : > { %1910 = vxpose.xlu1.b32.cont [8/16] %v3538_v62, 128  ;;  %1753 = vxpose.xlu0.b32.cont [8/16] %v3536_v7, 128  ;;  %4061 = vst [vmem:[#allocation32_spill] sm:$0xff] %v3590_v50  ;;  %4062 = vst [vmem:[#allocation33_spill] sm:$0xff] %v3592_v25 }
 0x17e   : > { %1911 = vxpose.xlu1.b32.cont [9/16] %v3556_v8, 128  ;;  %1754 = vxpose.xlu0.b32.cont [9/16] %v3554_v10, 128 }
 0x182   : > { %1912 = vxpose.xlu1.b32.cont [10/16] %v3568_v61, 128  ;;  %1755 = vxpose.xlu0.b32.cont [10/16] %v3566_v14, 128 }
 0x186   : > { %1913 = vxpose.xlu1.b32.cont [11/16] %v3550_v23, 128  ;;  %1756 = vxpose.xlu0.b32.cont [11/16] %v3548_v30, 128 }
 0x18a   : > { %1914 = vxpose.xlu1.b32.cont [12/16] %v3562_v15, 128  ;;  %1757 = vxpose.xlu0.b32.cont [12/16] %v3560_v54, 128 }
 0x18e   : > { %1915 = vxpose.xlu1.b32.cont [13/16] %v3580_v5, 128  ;;  %1758 = vxpose.xlu0.b32.cont [13/16] %v3578_v59, 128 }
 0x192   : > { %1916 = vxpose.xlu1.b32.cont [14/16] %v3592_v25, 128  ;;  %1759 = vxpose.xlu0.b32.cont [14/16] %v3590_v50, 128 }
 0x196   : > { %1917 = vxpose.xlu1.b32.cont [15/16] %v3574_v34, 128  ;;  %1760 = vxpose.xlu0.b32.cont [15/16] %v3572_v40, 128 }
 0x19a   : > { %v1605_v15 = vpop.trf.xlu1  ;;  %1918 = vxpose.xlu1.b32.end [16/16] %v3586_v24, 128  ;;  %v1448_v54 = vpop.trf.xlu0  ;;  %1761 = vxpose.xlu0.b32.end [16/16] %v3584_v27, 128 }
 0x19b   : > { %v1480_v27 = vmul.f32 %v1448_v54, %v3412_v57  ;;  %v1637_v49 = vmul.f32 %v1605_v15, %v3414_v33 }
 0x19d   : > { %v1496_v19 = vadd.f32 %v1480_v27, %v1464_v28  ;;  %v1653_v28 = vadd.f32 %v1637_v49, %v1621_v26  ;;  %v1467_v49 = vmul.f32 %v3418_v1, %v3418_v1 }
 0x19e   : > { %v1606_v5 = vpop.trf.xlu1  ;;  %v1449_v59 = vpop.trf.xlu0 }
 0x19f   : > { %v1481_v0 = vmul.f32 %v1449_v59, %v3422_v4  ;;  %v1638_v41 = vmul.f32 %v1606_v5, %v3424_v47  ;;  %v1623_v5 = vmul.f32 %v3410_v29, %v3410_v29 }
 0x1a1   : > { %v1497_v57 = vadd.f32 %v1481_v0, %v1465_v48  ;;  %v1622_v48 = vmul.f32 %v3424_v47, %v3424_v47 }
 0x1a2   : > { %v1607_v23 = vpop.trf.xlu1  ;;  %v1450_v30 = vpop.trf.xlu0 }
 0x1a3   : > { %v1482_v54 = vmul.f32 %v3408_v58, %v1450_v30  ;;  %v1639_v33 = vmul.f32 %v3410_v29, %v1607_v23  ;;  %v1654_v0 = vadd.f32 %v1638_v41, %v1622_v48  ;;  %v1468_v41 = vmul.f32 %v3434_v53, %v3434_v53 }
 0x1a5   : > { %v1655_v23 = vadd.f32 %v1639_v33, %v1623_v5  ;;  %v1470_v33 = vmul.f32 %v3428_v56, %v3428_v56  ;;  %v1627_v5 = vmul.f32 %v3430_v38, %v3430_v38 }
 0x1a6   : > { %v1608_v61 = vpop.trf.xlu1  ;;  %v1451_v14 = vpop.trf.xlu0 }
 0x1a7   : > { %v1483_v59 = vmul.f32 %v3418_v1, %v1451_v14  ;;  %v1640_v47 = vmul.f32 %v3420_v63, %v1608_v61 }
 0x1a9   : > { %v1499_v14 = vadd.f32 %v1483_v59, %v1467_v49  ;;  %v1626_v49 = vmul.f32 %v3448_v22, %v3448_v22 }
 0x1aa   : > { %v1609_v8 = vpop.trf.xlu1  ;;  %v1452_v25 = vpop.trf.xlu0 }
 0x1ab   : > { %v1484_v30 = vmul.f32 %v1452_v25, %v3434_v53  ;;  %v1641_v29 = vmul.f32 %v1609_v8, %v3436_v13 }
 0x1ad   : > { %v1500_v25 = vadd.f32 %v1484_v30, %v1468_v41  ;;  %v1629_v41 = vmul.f32 %v3460_v46, %v3460_v46 }
 0x1ae   : > { %v1610_v10 = vpop.trf.xlu1  ;;  %v1453_v50 = vpop.trf.xlu0 }
 0x1b2   : > { %v3600_v62 = vpop.trf.xlu1  ;;  %v1454_v34 = vpop.trf.xlu0 }
 0x1b3   : > { %v1486_v53 = vmul.f32 %v3428_v56, %v1454_v34 }
 0x1b5   : > { %v1502_v34 = vadd.f32 %v1486_v53, %v1470_v33  ;;  %v1631_v53 = vmul.f32 %v3454_v20, %v3454_v20  ;;  %v1475_v33 = vmul.f32 %v3464_v52, %v3464_v52 }
 0x1b6   : > { %v3602_v40 = vpop.trf.xlu1  ;;  %v1455_v7 = vpop.trf.xlu0 }
 0x1b7   : > { %v1644_v56 = vmul.f32 %v3442_v11, %v3602_v40 }
 0x1ba   : > { %v3604_v24 = vpop.trf.xlu1  ;;  %v3606_v35 = vpop.trf.xlu0 }
 0x1be   : > { %v3611_v31 = vpop.trf.xlu1  ;;  %v3613_v55 = vpop.trf.xlu0 }
 0x1c1   : > { %1512 = vadd.xlane.f32.xlu1 %v1496_v19  ;;  %v1466_v19 = vmul.f32 %v3408_v58, %v3408_v58 }
 0x1c2   : > { %v3619_v60 = vpop.trf.xlu1  ;;  %v3621_v3 = vpop.trf.xlu0 }
 0x1c3   : > { %v1498_v27 = vadd.f32 %v1482_v54, %v1466_v19  ;;  %v1469_v19 = vmul.f32 %v3446_v18, %v3446_v18 }
 0x1c5   : > { %1514 = vadd.xlane.f32.xlu1 %v1497_v57  ;;  %v1485_v57 = vmul.f32 %v1453_v50, %v3446_v18  ;;  %v1625_v50 = vmul.f32 %v3436_v13, %v3436_v13  ;;  %v1487_v18 = vmul.f32 %v3440_v51, %v1455_v7  ;;  %v1643_v13 = vmul.f32 %v3430_v38, %v3600_v62 }
 0x1c6   : > { %v3629_v15 = vpop.trf.xlu1  ;;  %v3631_v4 = vpop.trf.xlu0  ;;  %v1646_v38 = vmul.f32 %v3611_v31, %v3472_v44 }
 0x1c7   : > { %1669 = vadd.xlane.f32.xlu0 %v1653_v28  ;;  %v1624_v28 = vmul.f32 %v3420_v63, %v3420_v63  ;;  %v1642_v63 = vmul.f32 %v1610_v10, %v3448_v22  ;;  %v1657_v8 = vadd.f32 %v1641_v29, %v1625_v50  ;;  %v1471_v10 = vmul.f32 %v3440_v51, %v3440_v51 }
 0x1c8   : > { %v1645_v22 = vmul.f32 %v3604_v24, %v3460_v46  ;;  %v1659_v62 = vadd.f32 %v1643_v13, %v1627_v5  ;;  %v1628_v51 = vmul.f32 %v3442_v11, %v3442_v11  ;;  %v1489_v11 = vmul.f32 %v3613_v55, %v3470_v9 }
 0x1c9   : > { %1516 = vadd.xlane.f32.xlu1 %v1498_v27  ;;  %v1656_v61 = vadd.f32 %v1640_v47, %v1624_v28  ;;  %v1501_v27 = vadd.f32 %v1485_v57, %v1469_v19  ;;  %v1658_v30 = vadd.f32 %v1642_v63, %v1626_v49  ;;  %v1503_v7 = vadd.f32 %v1487_v18, %v1471_v10 }
 0x1ca   : > { %v3639_v26 = vpop.trf.xlu1  ;;  %v3641_v58 = vpop.trf.xlu0  ;;  %v1660_v40 = vadd.f32 %v1644_v56, %v1628_v51  ;;  %v1661_v24 = vadd.f32 %v1645_v22, %v1629_v41  ;;  %v1630_v46 = vmul.f32 %v3472_v44, %v3472_v44  ;;  %v1647_v29 = vmul.f32 %v3454_v20, %v3619_v60 }
 0x1cb   : > { %1671 = vadd.xlane.f32.xlu0 %v1654_v0  ;;  %v1648_v44 = vmul.f32 %v3466_v37, %v3629_v15  ;;  %v1491_v50 = vmul.f32 %v3464_v52, %v3631_v4  ;;  %v1632_v63 = vmul.f32 %v3466_v37, %v3466_v37  ;;  %v1649_v20 = vmul.f32 %v3639_v26, %v3484_v21 }
 0x1cc   : > { %v1662_v31 = vadd.f32 %v1646_v38, %v1630_v46  ;;  %v1663_v60 = vadd.f32 %v1647_v29, %v1631_v53  ;;  %v1633_v37 = vmul.f32 %v3484_v21, %v3484_v21  ;;  %v1476_v49 = vmul.f32 %v3482_v12, %v3482_v12 }
 0x1cd   : > { %1518 = vadd.xlane.f32.xlu1 %v1499_v14  ;;  %v1664_v15 = vadd.f32 %v1648_v44, %v1632_v63  ;;  %v1507_v4 = vadd.f32 %v1491_v50, %v1475_v33  ;;  %v1477_v56 = vmul.f32 %v3494_v2, %v3494_v2  ;;  %v1636_v51 = vmul.f32 %v3490_v45, %v3490_v45  ;;  %v4068_v63 = vld [vmem:[#allocation10_spill] sm:$0xff] }
 0x1ce   : > { %v3649_v54 = vpop.trf.xlu1  ;;  %v3651_v1 = vpop.trf.xlu0  ;;  %v1665_v26 = vadd.f32 %v1649_v20, %v1633_v37 }
 0x1cf   : > { %1673 = vadd.xlane.f32.xlu0 %v1655_v23  ;;  %v1488_v23 = vmul.f32 %v3606_v35, %v3458_v17  ;;  %v1493_v52 = vmul.f32 %v3651_v1, %v3494_v2  ;;  %v1635_v1 = vmul.f32 %v3478_v39, %v3478_v39 }
 0x1d1   : > { %1520 = vadd.xlane.f32.xlu1 %v1500_v25  ;;  %v1472_v25 = vmul.f32 %v3458_v17, %v3458_v17  ;;  %v1490_v17 = vmul.f32 %v3452_v43, %v3621_v3 }
 0x1d2   : > { %v3659_v59 = vpop.trf.xlu0  ;;  %v3664_v48 = vpop.trf.xlu1 }
 0x1d3   : > { %1675 = vadd.xlane.f32.xlu0 %v1656_v61  ;;  %v1504_v35 = vadd.f32 %v1488_v23, %v1472_v25  ;;  %v1473_v61 = vmul.f32 %v3470_v9, %v3470_v9  ;;  %v1474_v9 = vmul.f32 %v3452_v43, %v3452_v43  ;;  %v1492_v43 = vmul.f32 %v3641_v58, %v3482_v12 }
 0x1d4   : > { %v1634_v58 = vmul.f32 %v3496_v32, %v3496_v32  ;;  %v1651_v21 = vmul.f32 %v3478_v39, %v3664_v48  ;;  %v1494_v12 = vmul.f32 %v3476_v6, %v3659_v59  ;;  %v1478_v48 = vmul.f32 %v3476_v6, %v3476_v6 }
 0x1d5   : > { %1522 = vadd.xlane.f32.xlu1 %v1501_v27  ;;  %v1505_v55 = vadd.f32 %v1489_v11, %v1473_v61  ;;  %v1506_v3 = vadd.f32 %v1490_v17, %v1474_v9  ;;  %v4064_v11 = vld [vmem:[#allocation6_spill] sm:$0xff] }
 0x1d6   : > { %v3669_v0 = vpop.trf.xlu0  ;;  %v3678_v14 = vpop.trf.xlu1  ;;  %v1667_v22 = vadd.f32 %v1651_v21, %v1635_v1  ;;  %v1510_v59 = vadd.f32 %v1494_v12, %v1478_v48 }
 0x1d7   : > { %1677 = vadd.xlane.f32.xlu0 %v1657_v8  ;;  %v1495_v2 = vmul.f32 %v3488_v36, %v3669_v0  ;;  %v1778_v0 = vmul.f32 %v3508_v16, %v3508_v16 }
 0x1d9   : > { %1524 = vadd.xlane.f32.xlu1 %v1502_v34  ;;  %v1650_v34 = vmul.f32 %v3649_v54, %v3496_v32  ;;  %v1652_v32 = vmul.f32 %v3490_v45, %v3678_v14  ;;  %v1479_v14 = vmul.f32 %v3488_v36, %v3488_v36  ;;  %v1779_v45 = vmul.f32 %v3518_v42, %v3518_v42 }
 0x1da   : > { %v3684_v47 = vpop.trf.xlu0  ;;  %v3694_v57 = vpop.trf.xlu1 }
 0x1db   : > { %1679 = vadd.xlane.f32.xlu0 %v1658_v30  ;;  %v1508_v30 = vadd.f32 %v1492_v43, %v1476_v49  ;;  %v1666_v54 = vadd.f32 %v1650_v34, %v1634_v58  ;;  %v1794_v39 = vmul.f32 %v3684_v47, %v3508_v16  ;;  %v1668_v23 = vadd.f32 %v1652_v32, %v1636_v51  ;;  %v4069_v43 = vld [vmem:[#allocation11_spill] sm:$0xff]  ;;  %v4070_v34 = vld [vmem:[#allocation13_spill] sm:$0xff] }
 0x1dc   : > { %v1511_v41 = vadd.f32 %v1495_v2, %v1479_v14  ;;  %v1936_v16 = vmul.f32 %v4064_v11, %v4064_v11  ;;  %v4074_v2 = vld [vmem:[#allocation12_spill] sm:$0xff]  ;;  %v4075_v14 = vld [vmem:[#allocation14_spill] sm:$0xff] }
 0x1dd   : > { %1526 = vadd.xlane.f32.xlu1 %v1503_v7  ;;  %v1509_v7 = vadd.f32 %v1493_v52, %v1477_v56  ;;  %v1810_v25 = vadd.f32 %v1794_v39, %v1778_v0  ;;  %v4072_v56 = vld [vmem:[#allocation17_spill] sm:$0xff]  ;;  %v1941_v39 = vmul.f32 %v4074_v2, %v4074_v2  ;;  %v4076_v0 = vld [vmem:[#allocation15_spill] sm:$0xff] }
 0x1de   : > { %v3700_v28 = vpop.trf.xlu0  ;;  %v3710_v19 = vpop.trf.xlu1 }
 0x1df   : > { %1681 = vadd.xlane.f32.xlu0 %v1659_v62  ;;  %v1795_v6 = vmul.f32 %v3700_v28, %v3518_v42  ;;  %v1952_v28 = vmul.f32 %v3710_v19, %v4064_v11  ;;  %v4065_v42 = vld [vmem:[#allocation4_spill] sm:$0xff] }
 0x1e0   : > { %v1780_v61 = vmul.f32 %v4065_v42, %v4065_v42 }
 0x1e1   : > { %1683 = vadd.xlane.f32.xlu1 %v1660_v40  ;;  %v1968_v17 = vadd.f32 %v1952_v28, %v1936_v16 }
 0x1e2   : > { %v3716_v27 = vpop.trf.xlu0  ;;  %v3726_v8 = vpop.trf.xlu1 }
 0x1e3   : > { %1685 = vadd.xlane.f32.xlu0 %v1661_v24  ;;  %v4063_v24 = vld [vmem:[#allocation8_spill] sm:$0xff] }
 0x1e4   : > { %v1951_v47 = vmul.f32 %v3694_v57, %v4063_v24  ;;  %v1935_v36 = vmul.f32 %v4063_v24, %v4063_v24  ;;  %v1942_v24 = vmul.f32 %v4076_v0, %v4076_v0 }
 0x1e5   : > { %1528 = vadd.xlane.f32.xlu1 %v1504_v35  ;;  %v1811_v35 = vadd.f32 %v1795_v6, %v1779_v45  ;;  %v1785_v6 = vmul.f32 %v4075_v14, %v4075_v14 }
 0x1e6   : > { %v3732_v18 = vpop.trf.xlu0  ;;  %v1922_v13 = vpop.trf.xlu1  ;;  %v1967_v29 = vadd.f32 %v1951_v47, %v1935_v36 }
 0x1e7   : > { %1687 = vadd.xlane.f32.xlu0 %v1662_v31  ;;  %v1796_v31 = vmul.f32 %v4065_v42, %v3716_v27  ;;  %v1954_v20 = vmul.f32 %v4068_v63, %v1922_v13  ;;  %v1939_v13 = vmul.f32 %v4070_v34, %v4070_v34 }
 0x1e9   : > { %1530 = vadd.xlane.f32.xlu1 %v1505_v55  ;;  %v4066_v55 = vld [vmem:[#allocation5_spill] sm:$0xff]  ;;  %v1812_v44 = vadd.f32 %v1796_v31, %v1780_v61  ;;  %v4079_v31 = vld [vmem:[#allocation24_spill] sm:$0xff] }
 0x1ea   : > { %v1766_v10 = vpop.trf.xlu0  ;;  %v1923_v5 = vpop.trf.xlu1  ;;  %v1953_v53 = vmul.f32 %v4066_v55, %v3726_v8  ;;  %v1937_v19 = vmul.f32 %v4066_v55, %v4066_v55  ;;  %v1938_v8 = vmul.f32 %v4068_v63, %v4068_v63 }
 0x1eb   : > { %1689 = vadd.xlane.f32.xlu0 %v1663_v60  ;;  %v4067_v60 = vld [vmem:[#allocation9_spill] sm:$0xff] }
 0x1ec   : > { %v1797_v9 = vmul.f32 %v4067_v60, %v3732_v18  ;;  %v1781_v27 = vmul.f32 %v4067_v60, %v4067_v60  ;;  %v1782_v18 = vmul.f32 %v4069_v43, %v4069_v43  ;;  %v1970_v37 = vadd.f32 %v1954_v20, %v1938_v8  ;;  %v4082_v20 = vld [vmem:[#allocation19_spill] sm:$0xff] }
 0x1ed   : > { %1532 = vadd.xlane.f32.xlu1 %v1506_v3  ;;  %v1969_v3 = vadd.f32 %v1953_v53, %v1937_v19  ;;  %v4080_v53 = vld [vmem:[#allocation25_spill] sm:$0xff] }
 0x1ee   : > { %v1767_v62 = vpop.trf.xlu0  ;;  %v1924_v40 = vpop.trf.xlu1  ;;  %v1813_v33 = vadd.f32 %v1797_v9, %v1781_v27  ;;  %v1944_v60 = vmul.f32 %v4080_v53, %v4080_v53 }
 0x1ef   : > { %1691 = vadd.xlane.f32.xlu0 %v1664_v15  ;;  %v1956_v12 = vmul.f32 %v1924_v40, %v4072_v56 }
 0x1f1   : > { %1534 = vadd.xlane.f32.xlu1 %v1507_v4  ;;  %v1798_v4 = vmul.f32 %v1766_v10, %v4069_v43 }
 0x1f2   : > { %v1768_v38 = vpop.trf.xlu0  ;;  %v1925_v46 = vpop.trf.xlu1 }
 0x1f3   : > { %1693 = vadd.xlane.f32.xlu0 %v1665_v26  ;;  %v1955_v26 = vmul.f32 %v1923_v5, %v4070_v34  ;;  %v1814_v52 = vadd.f32 %v1798_v4, %v1782_v18  ;;  %v4073_v5 = vld [vmem:[#allocation7_spill] sm:$0xff]  ;;  %v4083_v4 = vld [vmem:[#allocation22_spill] sm:$0xff] }
 0x1f4   : > { %v1800_v32 = vmul.f32 %v4073_v5, %v1768_v38  ;;  %v1784_v48 = vmul.f32 %v4073_v5, %v4073_v5  ;;  %v1789_v34 = vmul.f32 %v4083_v4, %v4083_v4 }
 0x1f5   : > { %1536 = vadd.xlane.f32.xlu1 %v1508_v30  ;;  %v4071_v30 = vld [vmem:[#allocation16_spill] sm:$0xff] }
 0x1f6   : > { %v1769_v57 = vpop.trf.xlu0  ;;  %v1926_v50 = vpop.trf.xlu1  ;;  %v1799_v58 = vmul.f32 %v1767_v62, %v4071_v30  ;;  %v1783_v10 = vmul.f32 %v4071_v30, %v4071_v30 }
 0x1f7   : > { %1695 = vadd.xlane.f32.xlu0 %v1666_v54  ;;  %v1971_v54 = vadd.f32 %v1955_v26, %v1939_v13  ;;  %v1801_v40 = vmul.f32 %v4075_v14, %v1769_v57  ;;  %v1958_v38 = vmul.f32 %v4076_v0, %v1926_v50  ;;  %v4081_v50 = vld [vmem:[#allocation18_spill] sm:$0xff] }
 0x1f8   : > { %v1815_v1 = vadd.f32 %v1799_v58, %v1783_v10  ;;  %v4085_v58 = vld [vmem:[#allocation28_spill] sm:$0xff] }
 0x1f9   : > { %1538 = vadd.xlane.f32.xlu1 %v1509_v7  ;;  %v1940_v7 = vmul.f32 %v4072_v56, %v4072_v56  ;;  %v1817_v47 = vadd.f32 %v1801_v40, %v1785_v6  ;;  %v4089_v40 = vld [vmem:[#allocation26_spill] sm:$0xff] }
 0x1fa   : > { %v1770_v15 = vpop.trf.xlu0  ;;  %v1927_v49 = vpop.trf.xlu1  ;;  %v1792_v0 = vmul.f32 %v4089_v40, %v4089_v40 }
 0x1fb   : > { %1697 = vadd.xlane.f32.xlu0 %v1667_v22  ;;  %v1972_v62 = vadd.f32 %v1956_v12, %v1940_v7  ;;  %v4086_v12 = vld [vmem:[#allocation29_spill] sm:$0xff] }
 0x1fc   : > { %v1947_v5 = vmul.f32 %v4086_v12, %v4086_v12 }
 0x1fd   : > { %1540 = vadd.xlane.f32.xlu1 %v1510_v59  ;;  %v1957_v59 = vmul.f32 %v4074_v2, %v1925_v46  ;;  %v4078_v46 = vld [vmem:[#allocation21_spill] sm:$0xff] }
 0x1fe   : > { %v1771_v21 = vpop.trf.xlu0  ;;  %v1928_v22 = vpop.trf.xlu1  ;;  %v1959_v16 = vmul.f32 %v1927_v49, %v4078_v46  ;;  %v4084_v49 = vld [vmem:[#allocation23_spill] sm:$0xff] }
 0x1ff   : > { %1699 = vadd.xlane.f32.xlu0 %v1668_v23  ;;  %v1816_v23 = vadd.f32 %v1800_v32, %v1784_v48  ;;  %v1803_v57 = vmul.f32 %v1771_v21, %v4079_v31  ;;  %v1960_v19 = vmul.f32 %v1928_v22, %v4080_v53  ;;  %v4087_v22 = vld [vmem:[#allocation32_spill] sm:$0xff] }
 0x201   : > { %1542 = vadd.xlane.f32.xlu1 %v1511_v41  ;;  %v1973_v41 = vadd.f32 %v1957_v59, %v1941_v39  ;;  %v1976_v63 = vadd.f32 %v1960_v19, %v1944_v60  ;;  %v4088_v59 = vld [vmem:[#allocation33_spill] sm:$0xff] }
 0x202   : > { %v1772_v51 = vpop.trf.xlu0  ;;  %v1929_v45 = vpop.trf.xlu1 }
 0x203   : > { %1826 = vadd.xlane.f32.xlu0 %v1810_v25  ;;  %v4077_v25 = vld [vmem:[#allocation20_spill] sm:$0xff]  ;;  %v1804_v27 = vmul.f32 %v4081_v50, %v1772_v51 }
 0x204   : > { %v1802_v36 = vmul.f32 %v1770_v15, %v4077_v25  ;;  %v1786_v28 = vmul.f32 %v4077_v25, %v4077_v25  ;;  %v1961_v15 = vmul.f32 %v4082_v20, %v1929_v45  ;;  %v4090_v45 = vld [vmem:[#allocation27_spill] sm:$0xff] }
 0x205   : > { %1828 = vadd.xlane.f32.xlu1 %v1811_v35  ;;  %v1974_v35 = vadd.f32 %v1958_v38, %v1942_v24 }
 0x206   : > { %v1773_v11 = vpop.trf.xlu0  ;;  %v1818_v42 = vadd.f32 %v1802_v36, %v1786_v28  ;;  %v1930_v61 = vpop.trf.xlu1  ;;  %v4091_v36 = vld [vmem:[#allocation30_spill] sm:$0xff] }
 0x207   : > { %1983 = vadd.xlane.f32.xlu0 %v1967_v29  ;;  %v1943_v29 = vmul.f32 %v4078_v46, %v4078_v46  ;;  %v1805_v18 = vmul.f32 %v4083_v4, %v1773_v11  ;;  %v1962_v13 = vmul.f32 %v4084_v49, %v1930_v61 }
 0x209   : > { %1985 = vadd.xlane.f32.xlu1 %v1968_v17  ;;  %v1787_v17 = vmul.f32 %v4079_v31, %v4079_v31  ;;  %v1975_v55 = vadd.f32 %v1959_v16, %v1943_v29  ;;  %v1821_v30 = vadd.f32 %v1805_v18, %v1789_v34  ;;  %v4092_v16 = vld [vmem:[#allocation31_spill] sm:$0xff] }
 0x20a   : > { %v1931_v8 = vpop.trf.xlu1  ;;  %v1950_v31 = vmul.f32 %v4092_v16, %v4092_v16 }
 0x20b   : > { %1830 = vadd.xlane.f32.xlu0 %v1812_v44  ;;  %v1774_v44 = vpop.trf.xlu0  ;;  %v1819_v9 = vadd.f32 %v1803_v57, %v1787_v17  ;;  %v1963_v7 = vmul.f32 %v1931_v8, %v4086_v12 }
 0x20c   : > { %v1806_v21 = vmul.f32 %v1774_v44, %v4085_v58 }
 0x20d   : > { %1987 = vadd.xlane.f32.xlu1 %v1969_v3  ;;  %v1788_v3 = vmul.f32 %v4081_v50, %v4081_v50  ;;  %v1979_v2 = vadd.f32 %v1963_v7, %v1947_v5 }
 0x20e   : > { %v1932_v10 = vpop.trf.xlu1 }
 0x20f   : > { %1832 = vadd.xlane.f32.xlu0 %v1813_v33  ;;  %v1945_v33 = vmul.f32 %v4082_v20, %v4082_v20  ;;  %v1820_v43 = vadd.f32 %v1804_v27, %v1788_v3  ;;  %v1964_v51 = vmul.f32 %v1932_v10, %v4088_v59 }
 0x211   : > { %1989 = vadd.xlane.f32.xlu1 %v1970_v37  ;;  %v1775_v37 = vpop.trf.xlu0  ;;  %v1977_v26 = vadd.f32 %v1961_v15, %v1945_v33 }
 0x212   : > { %v1807_v48 = vmul.f32 %v1775_v37, %v4087_v22  ;;  %v1933_v39 = vpop.trf.xlu1 }
 0x213   : > { %1834 = vadd.xlane.f32.xlu0 %v1814_v52  ;;  %v1946_v52 = vmul.f32 %v4084_v49, %v4084_v49  ;;  %v1965_v24 = vmul.f32 %v4090_v45, %v1933_v39 }
 0x215   : > { %1991 = vadd.xlane.f32.xlu1 %v1971_v54  ;;  %v1790_v54 = vmul.f32 %v4085_v58, %v4085_v58  ;;  %v1978_v56 = vadd.f32 %v1962_v13, %v1946_v52 }
 0x216   : > { %v1934_v28 = vpop.trf.xlu1 }
 0x217   : > { %1836 = vadd.xlane.f32.xlu0 %v1815_v1  ;;  %v1776_v1 = vpop.trf.xlu0  ;;  %v1822_v32 = vadd.f32 %v1806_v21, %v1790_v54  ;;  %v1966_v29 = vmul.f32 %v4092_v16, %v1934_v28 }
 0x218   : > { %v1808_v6 = vmul.f32 %v4089_v40, %v1776_v1 }
 0x219   : > { %1993 = vadd.xlane.f32.xlu1 %v1972_v62  ;;  %v1791_v62 = vmul.f32 %v4087_v22, %v4087_v22  ;;  %v1982_v57 = vadd.f32 %v1966_v29, %v1950_v31 }
 0x21a   : > { %v1824_v25 = vadd.f32 %v1808_v6, %v1792_v0 }
 0x21b   : > { %1838 = vadd.xlane.f32.xlu0 %v1816_v23  ;;  %v1948_v23 = vmul.f32 %v4088_v59, %v4088_v59  ;;  %v1823_v14 = vadd.f32 %v1807_v48, %v1791_v62 }
 0x21d   : > { %1995 = vadd.xlane.f32.xlu1 %v1973_v41  ;;  %v1777_v41 = vpop.trf.xlu0  ;;  %v1980_v38 = vadd.f32 %v1964_v51, %v1948_v23 }
 0x21e   : > { %v1809_v11 = vmul.f32 %v4091_v36, %v1777_v41 }
 0x21f   : > { %1840 = vadd.xlane.f32.xlu0 %v1817_v47  ;;  %v1949_v47 = vmul.f32 %v4090_v45, %v4090_v45 }
 0x221   : > { %1997 = vadd.xlane.f32.xlu1 %v1974_v35  ;;  %v1793_v35 = vmul.f32 %v4091_v36, %v4091_v36  ;;  %v1981_v46 = vadd.f32 %v1965_v24, %v1949_v47  ;;  %v1723_v24 = vld [vmem:[#allocation3 + $0x1] sm:$0x1]  ;;  %v1566_v36 = vld [vmem:[#allocation3] sm:$0x1] }
 0x223   : > { %1842 = vadd.xlane.f32.xlu0 %v1818_v42  ;;  %v1825_v42 = vadd.f32 %v1809_v11, %v1793_v35  ;;  %v1724_v11 = vadd.f32 1e-08, %v1723_v24 }
 0x225   : > { %1999 = vadd.xlane.f32.xlu1 %v1975_v55 }
 0x227   : > { %1844 = vadd.xlane.f32.xlu0 %v1819_v9 }
 0x229   : > { %2001 = vadd.xlane.f32.xlu1 %v1976_v63 }
 0x22b   : > { %1846 = vadd.xlane.f32.xlu0 %v1820_v43 }
 0x22d   : > { %2003 = vadd.xlane.f32.xlu1 %v1977_v26 }
 0x22f   : > { %1848 = vadd.xlane.f32.xlu0 %v1821_v30 }
 0x231   : > { %2005 = vadd.xlane.f32.xlu1 %v1978_v56 }
 0x233   : > { %1850 = vadd.xlane.f32.xlu0 %v1822_v32 }
 0x235   : > { %2007 = vadd.xlane.f32.xlu1 %v1979_v2 }
 0x237   : > { %1852 = vadd.xlane.f32.xlu0 %v1823_v14 }
 0x239   : > { %2009 = vadd.xlane.f32.xlu1 %v1980_v38 }
 0x23b   : > { %1854 = vadd.xlane.f32.xlu0 %v1824_v25 }
 0x23d   : > { %2011 = vadd.xlane.f32.xlu1 %v1981_v46  ;;  %v1567_v46 = vadd.f32 1e-08, %v1566_v36 }
 0x23f   : > { %1856 = vadd.xlane.f32.xlu0 %v1825_v42  ;;  %v1725_v42 = vmul.f32 64.0, %v1724_v11 }
 0x241   : > { %2517 = vrcp.f32 %v1725_v42 }
 0x243   : > { %2013 = vadd.xlane.f32.xlu0 %v1982_v57 }
 0x24a   : > { %v1513_v61 = vpop.xlane.xlu1 %1512 }
 0x24e   : > { %v1515_v17 = vpop.xlane.xlu1 %1514 }
 0x24f   : > { %v1544_v55 = vadd.f32 %v1515_v17, %v1513_v61  ;;  %v1568_v17 = vmul.f32 64.0, %v1567_v46 }
 0x250   : > { %v1670_v53 = vpop.xlane.xlu0 %1669 }
 0x251   : > { %2519 = vrcp.f32 %v1568_v17 }
 0x252   : > { %v1517_v19 = vpop.xlane.xlu1 %1516 }
 0x253   : > { %v1545_v44 = vadd.f32 %v1544_v55, %v1517_v19 }
 0x254   : > { %v1672_v60 = vpop.xlane.xlu0 %1671 }
 0x255   : > { %v1701_v9 = vadd.f32 %v1672_v60, %v1670_v53 }
 0x256   : > { %v1519_v50 = vpop.xlane.xlu1 %1518 }
 0x257   : > { %v1546_v27 = vadd.f32 %v1545_v44, %v1519_v50 }
 0x258   : > { %v1674_v3 = vpop.xlane.xlu0 %1673 }
 0x259   : > { %v1702_v63 = vadd.f32 %v1701_v9, %v1674_v3 }
 0x25a   : > { %v1521_v20 = vpop.xlane.xlu1 %1520 }
 0x25b   : > { %v1547_v15 = vadd.f32 %v1546_v27, %v1521_v20 }
 0x25c   : > { %v1676_v8 = vpop.xlane.xlu0 %1675 }
 0x25d   : > { %v1703_v33 = vadd.f32 %v1702_v63, %v1676_v8 }
 0x25e   : > { %v1523_v43 = vpop.xlane.xlu1 %1522 }
 0x25f   : > { %v1548_v4 = vadd.f32 %v1547_v15, %v1523_v43 }
 0x260   : > { %v1678_v18 = vpop.xlane.xlu0 %1677 }
 0x261   : > { %v1704_v37 = vadd.f32 %v1703_v33, %v1678_v18 }
 0x262   : > { %v1525_v34 = vpop.xlane.xlu1 %1524 }
 0x263   : > { %v1549_v26 = vadd.f32 %v1548_v4, %v1525_v34 }
 0x264   : > { %v1680_v49 = vpop.xlane.xlu0 %1679 }
 0x265   : > { %v1705_v13 = vadd.f32 %v1704_v37, %v1680_v49 }
 0x266   : > { %v1527_v52 = vpop.xlane.xlu1 %1526 }
 0x267   : > { %v1550_v30 = vadd.f32 %v1549_v26, %v1527_v52 }
 0x268   : > { %v1682_v58 = vpop.xlane.xlu0 %1681 }
 0x269   : > { %v1706_v21 = vadd.f32 %v1705_v13, %v1682_v58  ;;  %v2518_v13 = vpop.eup %2517 }
 0x26a   : > { %v1684_v10 = vpop.xlane.xlu1 %1683 }
 0x26b   : > { %v1707_v54 = vadd.f32 %v1706_v21, %v1684_v10  ;;  %v2520_v21 = vpop.eup %2519 }
 0x26c   : > { %v1686_v56 = vpop.xlane.xlu0 %1685 }
 0x26d   : > { %v1708_v12 = vadd.f32 %v1707_v54, %v1686_v56 }
 0x26e   : > { %v1529_v7 = vpop.xlane.xlu1 %1528 }
 0x26f   : > { %v1551_v1 = vadd.f32 %v1550_v30, %v1529_v7 }
 0x270   : > { %v1688_v5 = vpop.xlane.xlu0 %1687 }
 0x271   : > { %v1709_v32 = vadd.f32 %v1708_v12, %v1688_v5 }
 0x272   : > { %v1531_v22 = vpop.xlane.xlu1 %1530 }
 0x273   : > { %v1552_v48 = vadd.f32 %v1551_v1, %v1531_v22 }
 0x274   : > { %v1690_v62 = vpop.xlane.xlu0 %1689 }
 0x275   : > { %v1710_v2 = vadd.f32 %v1709_v32, %v1690_v62 }
 0x276   : > { %v1533_v59 = vpop.xlane.xlu1 %1532 }
 0x277   : > { %v1553_v51 = vadd.f32 %v1552_v48, %v1533_v59 }
 0x278   : > { %v1692_v39 = vpop.xlane.xlu0 %1691 }
 0x279   : > { %v1711_v23 = vadd.f32 %v1710_v2, %v1692_v39 }
 0x27a   : > { %v1535_v14 = vpop.xlane.xlu1 %1534 }
 0x27b   : > { %v1554_v40 = vadd.f32 %v1553_v51, %v1535_v14 }
 0x27c   : > { %v1694_v6 = vpop.xlane.xlu0 %1693 }
 0x27d   : > { %v1712_v41 = vadd.f32 %v1711_v23, %v1694_v6 }
 0x27e   : > { %v1537_v0 = vpop.xlane.xlu1 %1536 }
 0x27f   : > { %v1555_v38 = vadd.f32 %v1554_v40, %v1537_v0 }
 0x280   : > { %v1696_v45 = vpop.xlane.xlu0 %1695 }
 0x281   : > { %v1713_v47 = vadd.f32 %v1712_v41, %v1696_v45 }
 0x282   : > { %v1539_v25 = vpop.xlane.xlu1 %1538 }
 0x283   : > { %v1556_v29 = vadd.f32 %v1555_v38, %v1539_v25 }
 0x284   : > { %v1698_v28 = vpop.xlane.xlu0 %1697 }
 0x285   : > { %v1714_v35 = vadd.f32 %v1713_v47, %v1698_v28 }
 0x286   : > { %v1541_v16 = vpop.xlane.xlu1 %1540 }
 0x287   : > { %v1557_v57 = vadd.f32 %v1556_v29, %v1541_v16 }
 0x288   : > { %v1700_v31 = vpop.xlane.xlu0 %1699 }
 0x289   : > { %v1715_v61 = vadd.f32 %v1714_v35, %v1700_v31 }
 0x28a   : > { %v1543_v55 = vpop.xlane.xlu1 %1542 }
 0x28b   : > { %v1716_v53 = vrot.slane %v1715_v61, 4  ;;  %v1558_v19 = vadd.f32 %v1557_v57, %v1543_v55 }
 0x28c   : > { %v1827_v44 = vpop.xlane.xlu0 %1826 }
 0x28d   : > { %v1717_v60 = vadd.f32 %v1716_v53, %v1715_v61  ;;  %v1559_v9 = vrot.slane %v1558_v19, 4 }
 0x28e   : > { %v1829_v50 = vpop.xlane.xlu1 %1828 }
 0x28f   : > { %v1718_v27 = vrot.slane %v1717_v60, 2  ;;  %v1560_v3 = vadd.f32 %v1559_v9, %v1558_v19  ;;  %v1858_v39 = vadd.f32 %v1829_v50, %v1827_v44 }
 0x290   : > { %v1984_v63 = vpop.xlane.xlu0 %1983 }
 0x291   : > { %v1719_v20 = vadd.f32 %v1718_v27, %v1717_v60  ;;  %v1561_v15 = vrot.slane %v1560_v3, 2  ;;  %v1880_v60 = vld [vmem:[#allocation3 + $0x2] sm:$0x1] }
 0x292   : > { %v1986_v8 = vpop.xlane.xlu1 %1985 }
 0x293   : > { %v1720_v33 = vrot.slane %v1719_v20, 1  ;;  %v1562_v43 = vadd.f32 %v1561_v15, %v1560_v3  ;;  %v2015_v6 = vadd.f32 %v1986_v8, %v1984_v63  ;;  %v2037_v8 = vld [vmem:[#allocation3 + $0x3] sm:$0x1] }
 0x294   : > { %v1831_v4 = vpop.xlane.xlu0 %1830 }
 0x295   : > { %v1721_v18 = vadd.f32 %v1720_v33, %v1719_v20  ;;  %v1563_v37 = vrot.slane %v1562_v43, 1  ;;  %v1859_v14 = vadd.f32 %v1858_v39, %v1831_v4  ;;  %v1881_v20 = vadd.f32 1e-08, %v1880_v60 }
 0x296   : > { %v1988_v34 = vpop.xlane.xlu1 %1987 }
 0x297   : > { %v1722_v26 = vmul.f32 0.5, %v1721_v18  ;;  %v1564_v49 = vadd.f32 %v1563_v37, %v1562_v43  ;;  %v2016_v38 = vadd.f32 %v2015_v6, %v1988_v34  ;;  %v1882_v37 = vmul.f32 64.0, %v1881_v20 }
 0x298   : > { %v1833_v52 = vpop.xlane.xlu0 %1832  ;;  %v2038_v34 = vadd.f32 1e-08, %v2037_v8 }
 0x299   : > { %v1727_v30 = vmul.f32 %v2518_v13, %v1722_v26  ;;  %v1565_v58 = vmul.f32 0.5, %v1564_v49  ;;  %v1860_v41 = vadd.f32 %v1859_v14, %v1833_v52  ;;  %2521 = vrcp.f32 %v1882_v37 }
 0x29a   : > { %v1990_v10 = vpop.xlane.xlu1 %1989 }
 0x29b   : > { %v1570_v54 = vmul.f32 %v2520_v21, %v1565_v58  ;;  %v1728_v12 = vmul.f32 %v2518_v13, %v1727_v30  ;;  %v2017_v47 = vadd.f32 %v2016_v38, %v1990_v10 }
 0x29c   : > { %v1835_v56 = vpop.xlane.xlu0 %1834 }
 0x29d   : > { %v1571_v7 = vmul.f32 %v2520_v21, %v1570_v54  ;;  %v1861_v45 = vadd.f32 %v1860_v41, %v1835_v56  ;;  %v2039_v21 = vmul.f32 64.0, %v2038_v34 }
 0x29e   : > { %v1992_v1 = vpop.xlane.xlu1 %1991 }
 0x29f   : > { %v3867_v5 = vadd.f32 %v1728_v12, %v1571_v7  ;;  %v2018_v11 = vadd.f32 %v2017_v47, %v1992_v1  ;;  %2523 = vrcp.f32 %v2039_v21 }
 0x2a0   : > { %v1837_v32 = vpop.xlane.xlu0 %1836 }
 0x2a1   : > { %v1862_v25 = vadd.f32 %v1861_v45, %v1837_v32 }
 0x2a2   : > { %v1994_v22 = vpop.xlane.xlu1 %1993 }
 0x2a3   : > { %v2019_v46 = vadd.f32 %v2018_v11, %v1994_v22 }
 0x2a4   : > { %v1839_v48 = vpop.xlane.xlu0 %1838 }
 0x2a5   : > { %v1863_v28 = vadd.f32 %v1862_v25, %v1839_v48 }
 0x2a6   : > { %v1996_v62 = vpop.xlane.xlu1 %1995  ;;  %v2522_v39 = vpop.eup %2521 }
 0x2a7   : > { %v2020_v42 = vadd.f32 %v2019_v46, %v1996_v62 }
 0x2a8   : > { %v1841_v2 = vpop.xlane.xlu0 %1840 }
 0x2a9   : > { %v1864_v16 = vadd.f32 %v1863_v28, %v1841_v2 }
 0x2aa   : > { %v1998_v59 = vpop.xlane.xlu1 %1997 }
 0x2ab   : > { %v2021_v61 = vadd.f32 %v2020_v42, %v1998_v59 }
 0x2ac   : > { %v1843_v51 = vpop.xlane.xlu0 %1842  ;;  %v2524_v41 = vpop.eup %2523 }
 0x2ad   : > { %v1865_v31 = vadd.f32 %v1864_v16, %v1843_v51 }
 0x2ae   : > { %v2000_v23 = vpop.xlane.xlu1 %1999 }
 0x2af   : > { %v2022_v53 = vadd.f32 %v2021_v61, %v2000_v23 }
 0x2b0   : > { %v1845_v40 = vpop.xlane.xlu0 %1844 }
 0x2b1   : > { %v1866_v17 = vadd.f32 %v1865_v31, %v1845_v40 }
 0x2b2   : > { %v2002_v0 = vpop.xlane.xlu1 %2001 }
 0x2b3   : > { %v2023_v9 = vadd.f32 %v2022_v53, %v2002_v0 }
 0x2b4   : > { %v1847_v24 = vpop.xlane.xlu0 %1846 }
 0x2b5   : > { %v1867_v19 = vadd.f32 %v1866_v17, %v1847_v24 }
 0x2b6   : > { %v2004_v36 = vpop.xlane.xlu1 %2003 }
 0x2b7   : > { %v2024_v3 = vadd.f32 %v2023_v9, %v2004_v36 }
 0x2b8   : > { %v1849_v35 = vpop.xlane.xlu0 %1848 }
 0x2b9   : > { %v1868_v50 = vadd.f32 %v1867_v19, %v1849_v35 }
 0x2ba   : > { %v2006_v29 = vpop.xlane.xlu1 %2005 }
 0x2bb   : > { %v2025_v33 = vadd.f32 %v2024_v3, %v2006_v29 }
 0x2bc   : > { %v1851_v57 = vpop.xlane.xlu0 %1850 }
 0x2bd   : > { %v1869_v63 = vadd.f32 %v1868_v50, %v1851_v57 }
 0x2be   : > { %v2008_v55 = vpop.xlane.xlu1 %2007 }
 0x2bf   : > { %v2026_v4 = vadd.f32 %v2025_v33, %v2008_v55 }
 0x2c0   : > { %v1853_v44 = vpop.xlane.xlu0 %1852 }
 0x2c1   : > { %v1870_v43 = vadd.f32 %v1869_v63, %v1853_v44 }
 0x2c2   : > { %v2010_v27 = vpop.xlane.xlu1 %2009 }
 0x2c3   : > { %v2027_v13 = vadd.f32 %v2026_v4, %v2010_v27 }
 0x2c4   : > { %v1855_v15 = vpop.xlane.xlu0 %1854 }
 0x2c5   : > { %v1871_v18 = vadd.f32 %v1870_v43, %v1855_v15 }
 0x2c6   : > { %v2012_v26 = vpop.xlane.xlu1 %2011 }
 0x2c7   : > { %v2028_v30 = vadd.f32 %v2027_v13, %v2012_v26 }
 0x2c8   : > { %v1857_v49 = vpop.xlane.xlu0 %1856 }
 0x2c9   : > { %v1872_v52 = vadd.f32 %v1871_v18, %v1857_v49 }
 0x2cb   : > { %v1873_v58 = vrot.slane %v1872_v52, 4 }
 0x2cc   : > { %v2014_v10 = vpop.xlane.xlu0 %2013 }
 0x2cd   : > { %v1874_v54 = vadd.f32 %v1873_v58, %v1872_v52  ;;  %v2029_v56 = vadd.f32 %v2028_v30, %v2014_v10 }
 0x2cf   : > { %v1875_v12 = vrot.slane %v1874_v54, 2  ;;  %v2030_v7 = vrot.slane %v2029_v56, 4 }
 0x2d1   : > { %v1876_v1 = vadd.f32 %v1875_v12, %v1874_v54  ;;  %v2031_v32 = vadd.f32 %v2030_v7, %v2029_v56 }
 0x2d3   : > { %v1877_v22 = vrot.slane %v1876_v1, 1  ;;  %v2032_v48 = vrot.slane %v2031_v32, 2 }
 0x2d5   : > { %v1878_v62 = vadd.f32 %v1877_v22, %v1876_v1  ;;  %v2033_v2 = vadd.f32 %v2032_v48, %v2031_v32 }
 0x2d7   : > { %v1879_v59 = vmul.f32 0.5, %v1878_v62  ;;  %v2034_v51 = vrot.slane %v2033_v2, 1 }
 0x2d9   : > { %v1884_v23 = vmul.f32 %v2522_v39, %v1879_v59  ;;  %v2035_v14 = vadd.f32 %v2034_v51, %v2033_v2 }
 0x2db   : > { %v1885_v40 = vmul.f32 %v2522_v39, %v1884_v23  ;;  %v2036_v6 = vmul.f32 0.5, %v2035_v14 }
 0x2dd   : > { %v2041_v0 = vmul.f32 %v2524_v41, %v2036_v6  ;;  %v1886_v38 = vadd.f32 %v1885_v40, %v3867_v5 }
 0x2df   : > { %v2042_v45 = vmul.f32 %v2524_v41, %v2041_v0 }
 0x2e1   : > { %v2043_v24 = vadd.f32 %v2042_v45, %v1886_v38 }
 0x2e3   : > { %2045 = vst.msk [vmem:[%s248_s29] sm:$0x1] %vm2044_vm3, %v2043_v24 }
 0x2e4 PF: > { %s13_s14 = sadd.s32 1, %s2547_s14   ;;  %s4093_s12 = smov %s2543_s13 }
 0x2e5   : > { %p10_p5 = scmp.ge.s32.totalorder %s13_s14, 4   ;;  %s4094_s13 = smov %s4096_s15 }
 0x2e7   :  { %12 = sbr.rel (!%p10_p5) target bundleno = 2 (0x2), region = 79 }

// kernel: region_style_loss.5
= control target key start
LH: loop header
LB: loop body
LE: loop exit
PB: predicated region body
PF: predicated region fallthrough
CT: control target
= control target key end

     0   :  { %s2570_s12 = smov 0   ;;  %s2572_s13 = smov 0   ;;  %s3883_s0 = inlined_call_operand.vmem [shape: bf16[2,128,16], index: 0, kind: input, shape index: {}]   ;;  %s3884_s1 = inlined_call_operand.vmem [shape: bf16[2,128,16], index: 1, kind: input, shape index: {}]   ;;  %s3885_s2 = inlined_call_operand.vmem [shape: f32[2,4,16], index: 2, kind: input, shape index: {}]   ;;  %s3886_s3 = inlined_call_operand.vmem [shape: f32[2,1,1], index: 3, kind: output, shape index: {}]  }
   0x1   :  { %s2574_s14 = smov 0  }
   0x2 LB: > { %s25_s15 = sadd.s32 1, %s2543_s13  ;;  %p2144_p0 = scmp.ge.s32.totalorder %s2547_s14, 1  ;;  %s2547_s14 = sphi %s2574_s14, %s13_s14   ;;  %s2543_s13 = sphi %s2572_s13, %s4094_s13   ;;  %s2539_s12 = sphi %s2570_s12, %s4093_s12  }
   0x3   : > { %p27_p1 = scmp.ge.s32.totalorder %s25_s15, 2  ;;  %p183_p2 = scmp.lt.s32.totalorder %s2547_s14, 3 }
   0x5   : > { %s4096_s15 = smov (%p27_p1, %s25_s15), 0  ;;  %p184_p3 = pnand %p2144_p0, %p183_p2 }
   0x7   : > { %187 = sbr.rel (%p184_p3) target bundleno = 740 (0x2e4), region = 32 }
   0xc   : > { %p223_p4 = scmp.lt.s32.totalorder %s2539_s12, 1  ;;  %vm494_vm0 = vcmask 130048   ;;  %vm418_vm1 = vcmask 125952   ;;  %vm318_vm2 = vcmask 3072   ;;  %vm2044_vm3 = vcmask 0  }
   0xe   : > { %s4098_s12 = smov (!%p223_p4, %s2539_s12), 1 }
   0xf   : > { %s2188_s16 = sshll.u32 %s4098_s12, 6  ;;  %s2149_s17 = sshll.u32 %s4098_s12, 2 }
  0x10   : > { %s2595_s20 = scalar_lea.vmem %s3883_s0, %s2188_s16  ;;  %s2600_s23 = scalar_lea.vmem %s3884_s1, %s2188_s16 }
  0x11   : > { %s2605_s26 = scalar_lea.vmem %s3885_s2, %s2149_s17  ;;  %v2260_v0 = vld [vmem:[%s2595_s20 + $0x38] sm:$0xff]   ;;  %v2610_v2 = vld [vmem:[%s2595_s20 + $0x30] sm:$0xff]   ;;  %v2624_v12 = vld [vmem:[%s2595_s20 + $0x28] sm:$0xff]   ;;  %s248_s29 = scalar_lea.vmem %s3886_s3, %s4098_s12 }
  0x12   : > { %v2267_v1 = vld [vmem:[%s2600_s23 + $0x38] sm:$0xff]   ;;  %v2220_v3 = vunpack.c.l.bf16 %v2260_v0  ;;  %v2221_v4 = vunpack.c.h.bf16 %v2260_v0  ;;  %v2613_v7 = vld [vmem:[%s2605_s26] ss:$0 sm:$0xff]  ;;  %v2616_v8 = vld [vmem:[%s2605_s26 + $0x1] ss:$0 sm:$0xff]  ;;  %v3902_v9 = vunpack.c.l.bf16 %v2610_v2  ;;  %v3900_v10 = vunpack.c.h.bf16 %v2610_v2 }
  0x13   : > { %v2252_v5 = vunpack.c.l.bf16 %v2267_v1  ;;  %v2253_v6 = vunpack.c.h.bf16 %v2267_v1  ;;  %v2621_v11 = vld [vmem:[%s2600_s23 + $0x30] sm:$0xff]   ;;  %v2635_v17 = vld [vmem:[%s2600_s23 + $0x28] sm:$0xff]   ;;  %v2212_v20 = vunpack.c.l.bf16 %v2624_v12  ;;  %v3904_v21 = vunpack.c.h.bf16 %v2624_v12  ;;  %v2642_v22 = vld [vmem:[%s2595_s20 + $0x20] sm:$0xff]  }
  0x14   : > { %v3901_v18 = vunpack.c.l.bf16 %v2621_v11  ;;  %v3899_v19 = vunpack.c.h.bf16 %v2621_v11  ;;  %v2244_v29 = vunpack.c.l.bf16 %v2635_v17  ;;  %v3903_v30 = vunpack.c.h.bf16 %v2635_v17  ;;  %v2669_v35 = vld [vmem:[%s2600_s23 + $0x20] sm:$0xff]   ;;  %v2722_v58 = vld [vmem:[%s2595_s20 + $0x18] sm:$0xff]  }
  0x15   : > { %v2626_v13 = vadd.f32 %v2252_v5, %v2220_v3  ;;  %v2628_v14 = vadd.f32 %v2253_v6, %v2221_v4  ;;  %v2630_v15 = vsub.f32 %v2220_v3, %v2252_v5  ;;  %v2632_v16 = vsub.f32 %v2221_v4, %v2253_v6  ;;  %v2725_v59 = vld [vmem:[%s2600_s23 + $0x18] sm:$0xff]   ;;  %v2742_v5 = vld [vmem:[%s2595_s20] sm:$0xff]  }
  0x16   : > { %v2656_v27 = vsub.f32 %v3902_v9, %v3901_v18  ;;  %v2662_v28 = vsub.f32 %v3900_v10, %v3899_v19  ;;  %v3890_v33 = vunpack.c.l.bf16 %v2642_v22  ;;  %v3888_v34 = vunpack.c.h.bf16 %v2642_v22  ;;  %v2745_v6 = vld [vmem:[%s2600_s23] sm:$0xff]  }
  0x17   : > { %v468_v23 = vmul.f32 %v2613_v7, %v2630_v15  ;;  %v469_v24 = vmul.f32 %v2613_v7, %v2632_v16  ;;  %v715_v25 = vmul.f32 %v2616_v8, %v2630_v15  ;;  %v716_v26 = vmul.f32 %v2616_v8, %v2632_v16 }
  0x18   : > { %v466_v36 = vmul.f32 %v2613_v7, %v2656_v27  ;;  %v467_v37 = vmul.f32 %v2613_v7, %v2662_v28  ;;  %v713_v38 = vmul.f32 %v2616_v8, %v2656_v27  ;;  %v714_v39 = vmul.f32 %v2616_v8, %v2662_v28 }
  0x19   : > { %v477_v31 = vpack.c.bf16 %v469_v24, %v468_v23  ;;  %v724_v32 = vpack.c.bf16 %v716_v26, %v715_v25  ;;  %v2687_v42 = vsub.f32 %v2212_v20, %v2244_v29  ;;  %v2693_v43 = vsub.f32 %v3904_v21, %v3903_v30  ;;  %v2755_v25 = vld [vmem:[%s2595_s20 + $0x10] sm:$0xff]  }
  0x1a   : > { %v476_v44 = vpack.c.bf16 %v467_v37, %v466_v36  ;;  %v723_v45 = vpack.c.bf16 %v714_v39, %v713_v38  ;;  %v3889_v46 = vunpack.c.l.bf16 %v2669_v35  ;;  %v3887_v47 = vunpack.c.h.bf16 %v2669_v35  ;;  %v2758_v26 = vld [vmem:[%s2600_s23 + $0x10] sm:$0xff]  }
  0x1b   : > { %2460 = vmatprep.subr.msk.bf16.mxu0 %vm494_vm0, %v477_v31  ;;  %2468 = vmatprep.subr.msk.bf16.mxu1 %vm494_vm0, %v724_v32  ;;  %v541_v40 = vsel %vm494_vm0, %v477_v31, 0  ;;  %v788_v41 = vsel %vm494_vm0, %v724_v32, 0  ;;  %v464_v48 = vmul.f32 %v2613_v7, %v2687_v42  ;;  %v465_v49 = vmul.f32 %v2613_v7, %v2693_v43 }
  0x1c   : > { %2333 = vmatpush3.bf16.xpose.msra.mxu0 %v541_v40  ;;  %2365 = vmatpush3.bf16.xpose.msra.mxu1 %v788_v41  ;;  %v711_v50 = vmul.f32 %v2616_v8, %v2687_v42  ;;  %v712_v51 = vmul.f32 %v2616_v8, %v2693_v43  ;;  %v538_v52 = vsel %vm494_vm0, %v476_v44, 0  ;;  %v2712_v53 = vsub.f32 %v3890_v33, %v3889_v46 }
  0x1d   : > { %2461 = vmatprep.subr.msk.bf16.mxu0 %vm494_vm0, %v476_v44  ;;  %2469 = vmatprep.subr.msk.bf16.mxu1 %vm494_vm0, %v723_v45  ;;  %v785_v54 = vsel %vm494_vm0, %v723_v45, 0  ;;  %v475_v55 = vpack.c.bf16 %v465_v49, %v464_v48  ;;  %v2719_v57 = vsub.f32 %v3888_v34, %v3887_v47  ;;  %v3894_v61 = vunpack.c.l.bf16 %v2722_v58  ;;  %v2254_v49 = vld [vmem:[%s2595_s20 + $0x8] sm:$0xff]  }
  0x1e   : > { %v722_v56 = vpack.c.bf16 %v712_v51, %v711_v50  ;;  %v462_v60 = vmul.f32 %v2613_v7, %v2712_v53  ;;  %v3892_v62 = vunpack.c.h.bf16 %v2722_v58  ;;  %v3893_v63 = vunpack.c.l.bf16 %v2725_v59  ;;  %v2261_v50 = vld [vmem:[%s2600_s23 + $0x8] sm:$0xff]  }
  0x1f   : > { %v463_v0 = vmul.f32 %v2613_v7, %v2719_v57  ;;  %v709_v1 = vmul.f32 %v2616_v8, %v2712_v53  ;;  %v710_v3 = vmul.f32 %v2616_v8, %v2719_v57  ;;  %v3891_v4 = vunpack.c.h.bf16 %v2725_v59 }
  0x20   : > { %v535_v23 = vsel %vm494_vm0, %v475_v55, 0  ;;  %v2752_v24 = vsub.f32 %v3894_v61, %v3893_v63  ;;  %v782_v31 = vsel %vm494_vm0, %v722_v56, 0  ;;  %v2192_v38 = vunpack.c.l.bf16 %v2742_v5 }
  0x21   : > { %v474_v32 = vpack.c.bf16 %v463_v0, %v462_v60  ;;  %v721_v36 = vpack.c.bf16 %v710_v3, %v709_v1  ;;  %v2765_v37 = vsub.f32 %v3892_v62, %v3891_v4  ;;  %v2224_v39 = vunpack.c.l.bf16 %v2745_v6 }
  0x22   : > { %v3898_v40 = vunpack.c.l.bf16 %v2755_v25  ;;  %v3896_v41 = vunpack.c.h.bf16 %v2755_v25  ;;  %v3897_v44 = vunpack.c.l.bf16 %v2758_v26  ;;  %v3895_v45 = vunpack.c.h.bf16 %v2758_v26 }
  0x23   : > { %v460_v48 = vmul.f32 %v2613_v7, %v2752_v24  ;;  %v2193_v51 = vunpack.c.h.bf16 %v2742_v5  ;;  %v708_v60 = vmul.f32 %v2616_v8, %v2765_v37  ;;  %v532_v0 = vsel %vm494_vm0, %v474_v32, 0 }
  0x24   : > { %2335 = vmatpush3.bf16.xpose.msra.mxu0 %v538_v52  ;;  %2367 = vmatpush3.bf16.xpose.msra.mxu1 %v785_v54  ;;  %v2225_v52 = vunpack.c.h.bf16 %v2745_v6  ;;  %v2779_v54 = vadd.f32 %v2224_v39, %v2192_v38  ;;  %v779_v5 = vsel %vm494_vm0, %v721_v36, 0  ;;  %v2799_v6 = vsub.f32 %v3898_v40, %v3897_v44  ;;  %v417_v44 = vld [vmem:[%s2605_s26] sm:$0xf] }
  0x25   : > { %2462 = vmatprep.subr.msk.bf16.mxu0 %vm494_vm0, %v475_v55  ;;  %2470 = vmatprep.subr.msk.bf16.mxu1 %vm494_vm0, %v722_v56  ;;  %v461_v55 = vmul.f32 %v2613_v7, %v2765_v37  ;;  %v707_v56 = vmul.f32 %v2616_v8, %v2752_v24  ;;  %v2197_v4 = vunpack.c.h.bf16 %v2254_v49  ;;  %v2229_v62 = vunpack.c.h.bf16 %v2261_v50  ;;  %v2819_v40 = vld [vmem:[%s2605_s26 + $0x2] ss:$0 sm:$0xff] }
  0x26   : > { %v2790_v1 = vadd.f32 %v2225_v52, %v2193_v51  ;;  %v430_v3 = vmul.f32 %v2613_v7, %v2779_v54  ;;  %v2923_v30 = vadd.f32 %v2244_v29, %v2212_v20 }
  0x27   : > { %v473_v46 = vpack.c.bf16 %v461_v55, %v460_v48  ;;  %v720_v33 = vpack.c.bf16 %v708_v60, %v707_v56  ;;  %v705_v48 = vmul.f32 %v2616_v8, %v2799_v6  ;;  %v960_v55 = vmul.f32 %v2819_v40, %v2656_v27 }
  0x28   : > { %v431_v47 = vmul.f32 %v2613_v7, %v2790_v1  ;;  %v678_v34 = vmul.f32 %v2616_v8, %v2790_v1  ;;  %v419_v56 = vsel %vm418_vm1, %v417_v44, 0.0  ;;  %v961_v60 = vmul.f32 %v2819_v40, %v2662_v28 }
  0x29   : > { %420 = vadd.xlane.f32.xlu0 %v419_v56  ;;  %v2858_v18 = vadd.f32 %v2229_v62, %v2197_v4  ;;  %v2938_v20 = vmul.f32 %v2613_v7, %v2923_v30 }
  0x2a   : > { %v446_v63 = vpack.c.bf16 %v431_v47, %v430_v3 }
  0x2c   : > { %2337 = vmatpush3.bf16.xpose.msra.mxu0 %v535_v23  ;;  %2369 = vmatpush3.bf16.xpose.msra.mxu1 %v782_v31  ;;  %v2196_v23 = vunpack.c.l.bf16 %v2254_v49  ;;  %v2228_v31 = vunpack.c.l.bf16 %v2261_v50  ;;  %v2832_v49 = vsub.f32 %v2197_v4, %v2229_v62  ;;  %v2834_v50 = vsub.f32 %v2192_v38, %v2224_v39 }
  0x2d   : > { %2463 = vmatprep.subr.msk.bf16.mxu0 %vm494_vm0, %v474_v32  ;;  %2471 = vmatprep.subr.msk.bf16.mxu1 %vm494_vm0, %v721_v36  ;;  %v2805_v32 = vsub.f32 %v3896_v41, %v3895_v45  ;;  %v677_v36 = vmul.f32 %v2616_v8, %v2779_v54  ;;  %v458_v45 = vmul.f32 %v2613_v7, %v2799_v6  ;;  %v529_v39 = vsel %vm494_vm0, %v473_v46, 0 }
  0x2e   : > { %v2815_v41 = vsub.f32 %v2196_v23, %v2228_v31  ;;  %2348 = vmatprep.mubr.msk.bf16.mxu0 %vm494_vm0, %v446_v63  ;;  %v2848_v38 = vadd.f32 %v2228_v31, %v2196_v23  ;;  %v959_v31 = vmul.f32 %v2819_v40, %v2693_v43 }
  0x2f   : > { %v693_v61 = vpack.c.bf16 %v678_v34, %v677_v36  ;;  %v459_v19 = vmul.f32 %v2613_v7, %v2805_v32  ;;  %v706_v47 = vmul.f32 %v2616_v8, %v2805_v32  ;;  %v2828_v34 = vld [vmem:[%s2605_s26 + $0x3] ss:$0 sm:$0xff]  ;;  %v776_v36 = vsel %vm494_vm0, %v720_v33, 0 }
  0x30   : > { %v1208_v3 = vmul.f32 %v2828_v34, %v2662_v28  ;;  %v456_v63 = vmul.f32 %v2613_v7, %v2815_v41  ;;  %v457_v28 = vmul.f32 %v2613_v7, %v2832_v49  ;;  %v2876_v62 = vmul.f32 %v2613_v7, %v2848_v38 }
  0x31   : > { %2380 = vmatprep.mubr.msk.bf16.mxu1 %vm494_vm0, %v693_v61  ;;  %v2853_v61 = vpack.c.bf16 %v961_v60, %v960_v55  ;;  %v719_v10 = vpack.c.bf16 %v706_v47, %v705_v48  ;;  %v2880_v4 = vmul.f32 %v2616_v8, %v2848_v38  ;;  %v2891_v47 = vmul.f32 %v2613_v7, %v2858_v18 }
  0x32   : > { %v2895_v55 = vmul.f32 %v2616_v8, %v2858_v18  ;;  %v1205_v56 = vmul.f32 %v2828_v34, %v2687_v42 }
  0x33   : > { %v773_v21 = vsel %vm494_vm0, %v719_v10, 0 }
  0x34   : > { %2339 = vmatpush3.bf16.xpose.msra.mxu0 %v532_v0  ;;  %2371 = vmatpush3.bf16.xpose.msra.mxu1 %v779_v5  ;;  %v1207_v0 = vmul.f32 %v2828_v34, %v2656_v27  ;;  %v2846_v5 = vsub.f32 %v2193_v51, %v2225_v52  ;;  %v472_v27 = vpack.c.bf16 %v459_v19, %v458_v45 }
  0x35   : > { %2464 = vmatprep.subr.msk.bf16.mxu0 %vm494_vm0, %v473_v46  ;;  %2472 = vmatprep.subr.msk.bf16.mxu1 %vm494_vm0, %v720_v33  ;;  %v703_v51 = vmul.f32 %v2616_v8, %v2815_v41  ;;  %v704_v46 = vmul.f32 %v2616_v8, %v2832_v49  ;;  %v454_v52 = vmul.f32 %v2613_v7, %v2834_v50 }
  0x36   : > { %v2855_v44 = vpack.c.bf16 %v1208_v3, %v1207_v0  ;;  %v455_v23 = vmul.f32 %v2613_v7, %v2846_v5  ;;  %v701_v19 = vmul.f32 %v2616_v8, %v2834_v50  ;;  %v702_v33 = vmul.f32 %v2616_v8, %v2846_v5 }
  0x37   : > { %v958_v45 = vmul.f32 %v2819_v40, %v2687_v42  ;;  %v526_v48 = vsel %vm494_vm0, %v472_v27, 0  ;;  %v1206_v0 = vmul.f32 %v2828_v34, %v2693_v43  ;;  %v956_v3 = vmul.f32 %v2819_v40, %v2712_v53 }
  0x38   : > { %3977 = vst [vmem:[#allocation4_spill] sm:$0xff] %v2855_v44  ;;  %v1203_v42 = vmul.f32 %v2828_v34, %v2712_v53  ;;  %v3979_v53 = vunpack.c.h.bf16 %v2624_v12  ;;  %v1209_v12 = vmul.f32 %v2828_v34, %v2630_v15 }
  0x39   : > { %v2899_v60 = vpack.c.bf16 %v959_v31, %v958_v45  ;;  %v1204_v45 = vmul.f32 %v2828_v34, %v2719_v57  ;;  %v471_v31 = vpack.c.bf16 %v457_v28, %v456_v63  ;;  %v2915_v43 = vpack.c.bf16 %v1206_v0, %v1205_v56 }
  0x3a   : > { %v470_v28 = vpack.c.bf16 %v455_v23, %v454_v52  ;;  %v717_v56 = vpack.c.bf16 %v702_v33, %v701_v19  ;;  %v954_v23 = vmul.f32 %v2819_v40, %v2752_v24  ;;  %v955_v33 = vmul.f32 %v2819_v40, %v2765_v37 }
  0x3b   : > { %3978 = vst [vmem:[#allocation5_spill] sm:$0xff] %v2899_v60  ;;  %v718_v60 = vpack.c.bf16 %v704_v46, %v703_v51  ;;  %v2926_v44 = vpack.c.bf16 %v1204_v45, %v1203_v42  ;;  %v523_v51 = vsel %vm494_vm0, %v471_v31, 0  ;;  %v2953_v46 = vmul.f32 %v2616_v8, %v2923_v30 }
  0x3c   : > { %2341 = vmatpush3.bf16.xpose.msra.mxu0 %v529_v39  ;;  %2373 = vmatpush3.bf16.xpose.msra.mxu1 %v776_v36  ;;  %v957_v39 = vmul.f32 %v2819_v40, %v2719_v57  ;;  %v962_v36 = vmul.f32 %v2819_v40, %v2630_v15  ;;  %v3980_v57 = vunpack.c.h.bf16 %v2635_v17  ;;  %v1200_v42 = vmul.f32 %v2828_v34, %v2805_v32 }
  0x3d   : > { %2465 = vmatprep.subr.msk.bf16.mxu0 %vm494_vm0, %v472_v27  ;;  %2473 = vmatprep.subr.msk.bf16.mxu1 %vm494_vm0, %v719_v10  ;;  %v963_v27 = vmul.f32 %v2819_v40, %v2632_v16  ;;  %v770_v15 = vsel %vm494_vm0, %v718_v60, 0  ;;  %v1195_v19 = vmul.f32 %v2828_v34, %v2834_v50 }
  0x3e   : > { %v2917_v9 = vpack.c.bf16 %v957_v39, %v956_v3  ;;  %v2932_v63 = vadd.f32 %v3980_v57, %v3979_v53  ;;  %v1201_v3 = vmul.f32 %v2828_v34, %v2752_v24  ;;  %v1202_v39 = vmul.f32 %v2828_v34, %v2765_v37 }
  0x3f   : > { %v2942_v29 = vpack.c.bf16 %v963_v27, %v962_v36  ;;  %v2978_v36 = vpack.c.bf16 %v955_v33, %v954_v23  ;;  %v1199_v27 = vmul.f32 %v2828_v34, %v2799_v6  ;;  %v3981_v24 = vunpack.c.l.bf16 %v2610_v2 }
  0x40   : > { %v2948_v17 = vmul.f32 %v2613_v7, %v2932_v63  ;;  %v2957_v52 = vmul.f32 %v2616_v8, %v2932_v63  ;;  %v2986_v45 = vpack.c.bf16 %v1202_v39, %v1201_v3  ;;  %v3982_v37 = vunpack.c.l.bf16 %v2621_v11 }
  0x41   : > { %v3983_v53 = vunpack.c.h.bf16 %v2610_v2  ;;  %v3984_v57 = vunpack.c.h.bf16 %v2621_v11  ;;  %v3006_v3 = vpack.c.bf16 %v1200_v42, %v1199_v27  ;;  %v3010_v39 = vmul.f32 %v2613_v7, %v2628_v14 }
  0x42   : > { %v3986_v2 = vunpack.c.l.bf16 %v2758_v26  ;;  %v3991_v42 = vunpack.c.l.bf16 %v2722_v58 }
  0x43   : > { %v2998_v23 = vadd.f32 %v3984_v57, %v3983_v53  ;;  %v3992_v53 = vunpack.c.l.bf16 %v2725_v59 }
  0x44   : > { %2343 = vmatpush3.bf16.xpose.msra.mxu0 %v526_v48  ;;  %2375 = vmatpush3.bf16.xpose.msra.mxu1 %v773_v21  ;;  %v1210_v21 = vmul.f32 %v2828_v34, %v2632_v16  ;;  %v953_v16 = vmul.f32 %v2819_v40, %v2805_v32 }
  0x45   : > { %2466 = vmatprep.subr.msk.bf16.mxu0 %vm494_vm0, %v471_v31  ;;  %2474 = vmatprep.subr.msk.bf16.mxu1 %vm494_vm0, %v718_v60  ;;  %v952_v60 = vmul.f32 %v2819_v40, %v2799_v6  ;;  %v2992_v31 = vadd.f32 %v3982_v37, %v3981_v24  ;;  %v3002_v6 = vmul.f32 %v2613_v7, %v2626_v13  ;;  %v3985_v24 = vunpack.c.l.bf16 %v2755_v25 }
  0x46   : > { %v1218_v33 = vpack.c.bf16 %v1210_v21, %v1209_v12  ;;  %v3024_v12 = vmul.f32 %v2613_v7, %v2998_v23  ;;  %v390_v57 = vadd.f32 %v3992_v53, %v3991_v42  ;;  %v950_v42 = vmul.f32 %v2819_v40, %v2815_v41 }
  0x47   : > { %v3004_v32 = vpack.c.bf16 %v953_v16, %v952_v60  ;;  %v3016_v11 = vadd.f32 %v3986_v2, %v3985_v24  ;;  %v3020_v37 = vmul.f32 %v2613_v7, %v2992_v31  ;;  %v3028_v21 = vmul.f32 %v2616_v8, %v2992_v31 }
  0x48   : > { %v3988_v60 = vunpack.c.h.bf16 %v2755_v25  ;;  %v3989_v16 = vunpack.c.h.bf16 %v2758_v26  ;;  %v3044_v2 = vmul.f32 %v2616_v8, %v2998_v23  ;;  %v520_v25 = vsel %vm494_vm0, %v470_v28, 0 }
  0x49   : > { %3987 = vst [vmem:[#allocation6_spill] sm:$0xff] %v3016_v11  ;;  %v951_v53 = vmul.f32 %v2819_v40, %v2832_v49  ;;  %v1197_v26 = vmul.f32 %v2828_v34, %v2815_v41  ;;  %v1196_v24 = vmul.f32 %v2828_v34, %v2846_v5  ;;  %v3086_v41 = vmul.f32 %v2819_v40, %v2779_v54 }
  0x4a   : > { %v3034_v27 = vadd.f32 %v3989_v16, %v3988_v60  ;;  %v3051_v60 = vmul.f32 %v2616_v8, %v2626_v13  ;;  %v3055_v16 = vmul.f32 %v2616_v8, %v2628_v14 }
  0x4b   : > { %v3074_v48 = vpack.c.bf16 %v951_v53, %v950_v42  ;;  %v3094_v42 = vmul.f32 %v2828_v34, %v2779_v54  ;;  %v3994_v53 = vunpack.c.h.bf16 %v2722_v58  ;;  %v3114_v58 = vmul.f32 %v2819_v40, %v2848_v38 }
  0x4c   : > { %3990 = vst [vmem:[#allocation7_spill] sm:$0xff] %v3034_v27  ;;  %2345 = vmatpush3.bf16.xpose.msra.mxu0 %v523_v51  ;;  %2377 = vmatpush3.bf16.xpose.msra.mxu1 %v770_v15  ;;  %v767_v51 = vsel %vm494_vm0, %v717_v56, 0  ;;  %v949_v15 = vmul.f32 %v2819_v40, %v2846_v5  ;;  %v3138_v54 = vmul.f32 %v2828_v34, %v2858_v18 }
  0x4d   : > { %2467 = vmatprep.subr.msk.bf16.mxu0 %vm494_vm0, %v470_v28  ;;  %2475 = vmatprep.subr.msk.bf16.mxu1 %vm494_vm0, %v717_v56  ;;  %v1198_v28 = vmul.f32 %v2828_v34, %v2832_v49  ;;  %v948_v56 = vmul.f32 %v2819_v40, %v2834_v50  ;;  %v3090_v49 = vmul.f32 %v2819_v40, %v2790_v1  ;;  %v3995_v50 = vunpack.c.h.bf16 %v2725_v59 }
  0x4e   : > { %3998 = vst [vmem:[#allocation11_spill] sm:$0xff] %v3114_v58  ;;  %v3118_v59 = vmul.f32 %v2819_v40, %v2858_v18  ;;  %v436_v18 = vmul.f32 %v2613_v7, %v390_v57  ;;  %v4004_v58 = vunpack.c.h.bf16 %v2669_v35 }
  0x4f   : > { %v3082_v10 = vpack.c.bf16 %v1198_v28, %v1197_v26  ;;  %v391_v0 = vadd.f32 %v3995_v50, %v3994_v53  ;;  %v3100_v5 = vpack.c.bf16 %v949_v15, %v948_v56  ;;  %v3102_v26 = vpack.c.bf16 %v1196_v24, %v1195_v19 }
  0x50   : > { %v3106_v28 = vmul.f32 %v2828_v34, %v2790_v1  ;;  %3999 = vst [vmem:[#allocation12_spill] sm:$0xff] %v3118_v59  ;;  %v435_v19 = vmul.f32 %v2613_v7, %v3034_v27  ;;  %v681_v1 = vmul.f32 %v2616_v8, %v3016_v11  ;;  %v3128_v15 = vmul.f32 %v2828_v34, %v2848_v38 }
  0x51   : > { %3993 = vst [vmem:[#allocation8_spill] sm:$0xff] %v3082_v10  ;;  %3996 = vst [vmem:[#allocation9_spill] sm:$0xff] %v3100_v5  ;;  %v434_v10 = vmul.f32 %v2613_v7, %v3016_v11  ;;  %v1035_v56 = vsel %vm494_vm0, %v2942_v29, 0  ;;  %v682_v53 = vmul.f32 %v2616_v8, %v3034_v27  ;;  %v1282_v38 = vsel %vm494_vm0, %v1218_v33, 0 }
  0x52   : > { %3997 = vst [vmem:[#allocation10_spill] sm:$0xff] %v3102_v26  ;;  %v3151_v27 = vmul.f32 %v2819_v40, %v390_v57  ;;  %v3154_v50 = vmul.f32 %v2819_v40, %v391_v0  ;;  %v437_v11 = vmul.f32 %v2613_v7, %v391_v0  ;;  %v3172_v5 = vmul.f32 %v2828_v34, %v391_v0 }
  0x54   : > { %2347 = vmatpush3.bf16.xpose.msra.mxu0 %v520_v25  ;;  %2379 = vmatpush3.bf16.xpose.msra.mxu1 %v767_v51  ;;  %v4000_v25 = vunpack.c.l.bf16 %v2642_v22  ;;  %v4001_v51 = vunpack.c.l.bf16 %v2669_v35  ;;  %4002 = vst [vmem:[#allocation13_spill] sm:$0xff] %v3151_v27  ;;  %v684_v35 = vmul.f32 %v2616_v8, %v391_v0  ;;  %v3198_v27 = vmul.f32 %v2828_v34, %v2932_v63 }
  0x55   : > { %2476 = vmatprep.subr.msk.bf16.mxu0 %vm494_vm0, %v2942_v29  ;;  %2484 = vmatprep.subr.msk.bf16.mxu1 %vm494_vm0, %v1218_v33  ;;  %v4003_v29 = vunpack.c.h.bf16 %v2642_v22  ;;  %v683_v22 = vmul.f32 %v2616_v8, %v390_v57  ;;  %v3220_v33 = vmul.f32 %v2819_v40, %v2626_v13 }
  0x56   : > { %v3148_v24 = vadd.f32 %v4001_v51, %v4000_v25  ;;  %v3166_v25 = vmul.f32 %v2828_v34, %v390_v57  ;;  %v448_v51 = vpack.c.bf16 %v435_v19, %v434_v10  ;;  %v695_v10 = vpack.c.bf16 %v682_v53, %v681_v1 }
  0x57   : > { %v3161_v59 = vadd.f32 %v4004_v58, %v4003_v29  ;;  %v3178_v58 = vmul.f32 %v2819_v40, %v2923_v30  ;;  %v3182_v29 = vmul.f32 %v2819_v40, %v2932_v63  ;;  %v3190_v57 = vmul.f32 %v2828_v34, %v2923_v30 }
  0x58   : > { %v438_v19 = vmul.f32 %v2613_v7, %v3148_v24  ;;  %v3202_v1 = vmul.f32 %v2819_v40, %v2992_v31  ;;  %v4005_v53 = vpack.c.bf16 %v2891_v47, %v2876_v62  ;;  %v4006_v30 = vpack.c.bf16 %v2895_v55, %v2880_v4  ;;  %v4007_v55 = vld [vmem:[#allocation4_spill] sm:$0xff] }
  0x59   : > { %v439_v0 = vmul.f32 %v2613_v7, %v3161_v59  ;;  %v685_v7 = vmul.f32 %v2616_v8, %v3148_v24  ;;  %v3216_v63 = vmul.f32 %v2819_v40, %v2998_v23  ;;  %v3226_v4 = vmul.f32 %v2819_v40, %v2628_v14 }
  0x5a   : > { %v3230_v47 = vmul.f32 %v2828_v34, %v2992_v31  ;;  %v686_v31 = vmul.f32 %v2616_v8, %v3161_v59  ;;  %v696_v62 = vpack.c.bf16 %v684_v35, %v683_v22  ;;  %v1279_v8 = vsel %vm494_vm0, %v4007_v55, 0 }
  0x5b   : > { %2349 = vmatmul.mubr.msk.bf16.vlgmr.msra.gmra.mxu0 %vm494_vm0, %v4005_v53  ;;  %2381 = vmatmul.mubr.msk.bf16.vlgmr.msra.gmra.mxu1 %vm494_vm0, %v4006_v30  ;;  %v3244_v53 = vmul.f32 %v2828_v34, %v2626_v13  ;;  %v450_v26 = vpack.c.bf16 %v439_v0, %v438_v19  ;;  %v4010_v22 = vpack.c.bf16 %v2957_v52, %v2953_v46  ;;  %v1273_v46 = vsel %vm494_vm0, %v2926_v44, 0  ;;  %v4022_v0 = vld [vmem:[#allocation12_spill] sm:$0xff] }
  0x5c   : > { %2397 = vmatpush3.bf16.xpose.msra.mxu0 %v1035_v56  ;;  %2429 = vmatpush3.bf16.xpose.msra.mxu1 %v1282_v38  ;;  %v3240_v38 = vmul.f32 %v2828_v34, %v2998_v23  ;;  %v3254_v56 = vmul.f32 %v2828_v34, %v2628_v14  ;;  %v449_v23 = vpack.c.bf16 %v437_v11, %v436_v18  ;;  %v4008_v14 = vld [vmem:[#allocation5_spill] sm:$0xff]  ;;  %v1276_v11 = vsel %vm494_vm0, %v2915_v43, 0 }
  0x5d   : > { %2477 = vmatprep.subr.msk.bf16.mxu0 %vm494_vm0, %v2853_v61  ;;  %2485 = vmatprep.subr.msk.bf16.mxu1 %vm494_vm0, %v4007_v55  ;;  %v697_v30 = vpack.c.bf16 %v686_v31, %v685_v7  ;;  %v4009_v18 = vpack.c.bf16 %v2948_v17, %v2938_v20  ;;  %v4012_v20 = vpack.c.bf16 %v3044_v2, %v3028_v21  ;;  %v1026_v17 = vsel %vm494_vm0, %v2917_v9, 0  ;;  %v4023_v7 = vld [vmem:[#allocation11_spill] sm:$0xff] }
  0x5e   : > { %2352 = vmatprep.mubr.msk.bf16.mxu0 %vm494_vm0, %v448_v51  ;;  %2384 = vmatprep.mubr.msk.bf16.mxu1 %vm494_vm0, %v695_v10  ;;  %v1193_v13 = vpack.c.bf16 %v3240_v38, %v3230_v47  ;;  %v1194_v51 = vpack.c.bf16 %v3254_v56, %v3244_v53  ;;  %v1032_v10 = vsel %vm494_vm0, %v2853_v61, 0  ;;  %v1029_v61 = vsel %vm494_vm0, %v4008_v14, 0 }
  0x5f   : > { %v4013_v52 = vpack.c.bf16 %v3010_v39, %v3002_v6  ;;  %v1023_v6 = vsel %vm494_vm0, %v2978_v36, 0  ;;  %v1270_v39 = vsel %vm494_vm0, %v2986_v45, 0  ;;  %v1267_v21 = vsel %vm494_vm0, %v3006_v3, 0 }
  0x60   : > { %v4025_v55 = vpack.c.bf16 %v3138_v54, %v3128_v15  ;;  %v932_v31 = vmul.f32 %v2819_v40, %v3148_v24  ;;  %v4026_v15 = vld [vmem:[#allocation13_spill] sm:$0xff] }
  0x63   : > { %2353 = vmatmul.mubr.msk.bf16.gmra.mxu0 %vm494_vm0, %v449_v23  ;;  %2385 = vmatmul.mubr.msk.bf16.gmra.mxu1 %vm494_vm0, %v696_v62  ;;  %v4024_v62 = vpack.c.bf16 %v4022_v0, %v4023_v7  ;;  %v1179_v23 = vmul.f32 %v2828_v34, %v3148_v24 }
  0x64   : > { %2399 = vmatpush3.bf16.xpose.msra.mxu0 %v1032_v10  ;;  %2431 = vmatpush3.bf16.xpose.msra.mxu1 %v1279_v8  ;;  %v1180_v10 = vmul.f32 %v2828_v34, %v3161_v59 }
  0x65   : > { %2478 = vmatprep.subr.msk.bf16.mxu0 %vm494_vm0, %v4008_v14  ;;  %2486 = vmatprep.subr.msk.bf16.mxu1 %vm494_vm0, %v2915_v43  ;;  %v4011_v43 = vpack.c.bf16 %v3024_v12, %v3020_v37  ;;  %v4014_v37 = vpack.c.bf16 %v3055_v16, %v3051_v60  ;;  %v1020_v12 = vsel %vm494_vm0, %v3004_v32, 0  ;;  %v4027_v14 = vpack.c.bf16 %v3154_v50, %v4026_v15 }
  0x66   : > { %2356 = vmatprep.mubr.msk.bf16.mxu0 %vm494_vm0, %v450_v26  ;;  %2388 = vmatprep.mubr.msk.bf16.mxu1 %vm494_vm0, %v697_v30  ;;  %v933_v30 = vmul.f32 %v2819_v40, %v3161_v59  ;;  %v1191_v54 = vpack.c.bf16 %v1180_v10, %v1179_v23  ;;  %v4031_v59 = vpack.c.bf16 %v3216_v63, %v3202_v1 }
  0x68   : > { %v944_v8 = vpack.c.bf16 %v933_v30, %v932_v31 }
  0x6b   : > { %2357 = vmatmul.mubr.msk.bf16.gmra.mxu0 %vm494_vm0, %v4009_v18  ;;  %2389 = vmatmul.mubr.msk.bf16.gmra.mxu1 %vm494_vm0, %v4010_v22 }
  0x6c   : > { %2401 = vmatpush3.bf16.xpose.msra.mxu0 %v1029_v61  ;;  %2433 = vmatpush3.bf16.xpose.msra.mxu1 %v1276_v11  ;;  %v4028_v61 = vpack.c.bf16 %v3172_v5, %v3166_v25  ;;  %v4032_v5 = vpack.c.bf16 %v3226_v4, %v3220_v33 }
  0x6d   : > { %2479 = vmatprep.subr.msk.bf16.mxu0 %vm494_vm0, %v2917_v9  ;;  %2487 = vmatprep.subr.msk.bf16.mxu1 %vm494_vm0, %v2926_v44  ;;  %v4015_v9 = vpack.c.bf16 %v3090_v49, %v3086_v41  ;;  %v4016_v44 = vpack.c.bf16 %v3106_v28, %v3094_v42  ;;  %v4020_v41 = vld [vmem:[#allocation6_spill] sm:$0xff]  ;;  %v4021_v49 = vld [vmem:[#allocation7_spill] sm:$0xff] }
  0x6e   : > { %2360 = vmatprep.mubr.msk.bf16.mxu0 %vm494_vm0, %v4011_v43  ;;  %2392 = vmatprep.mubr.msk.bf16.mxu1 %vm494_vm0, %v4012_v20  ;;  %v929_v42 = vmul.f32 %v2819_v40, %v4021_v49  ;;  %v1175_v26 = vmul.f32 %v2828_v34, %v4020_v41  ;;  %v1176_v28 = vmul.f32 %v2828_v34, %v4021_v49 }
  0x6f   : > { %v4030_v34 = vpack.c.bf16 %v3198_v27, %v3190_v57  ;;  %v2549_v27 = vmov 0.0  }
  0x70   : > { %v1189_v19 = vpack.c.bf16 %v1176_v28, %v1175_v26  ;;  %319 = vst.msk [vmem:[#allocation3] sm:$0xf] %vm318_vm2, %v2549_v27 }
  0x73   : > { %2361 = vmatmul.mubr.msk.bf16.gmra.mxu0 %vm494_vm0, %v4013_v52  ;;  %2393 = vmatmul.mubr.msk.bf16.gmra.mxu1 %vm494_vm0, %v4014_v37 }
  0x74   : > { %2403 = vmatpush3.bf16.xpose.msra.mxu0 %v1026_v17  ;;  %2435 = vmatpush3.bf16.xpose.msra.mxu1 %v1273_v46 }
  0x75   : > { %2480 = vmatprep.subr.msk.bf16.mxu0 %vm494_vm0, %v2978_v36  ;;  %2488 = vmatprep.subr.msk.bf16.mxu1 %vm494_vm0, %v2986_v45  ;;  %v4017_v36 = vld [vmem:[#allocation8_spill] sm:$0xff]  ;;  %v1017_v45 = vsel %vm494_vm0, %v3074_v48, 0 }
  0x76   : > { %2412 = vmatprep.mubr.msk.bf16.mxu0 %vm494_vm0, %v4015_v9  ;;  %2444 = vmatprep.mubr.msk.bf16.mxu1 %vm494_vm0, %v4016_v44  ;;  %v1264_v2 = vsel %vm494_vm0, %v4017_v36, 0 }
  0x77   : > { %v416_v50 = vld [vmem:[#allocation3] sm:$0xf] }
  0x7c   : > { %2405 = vmatpush3.bf16.xpose.msra.mxu0 %v1023_v6  ;;  %2437 = vmatpush3.bf16.xpose.msra.mxu1 %v1270_v39 }
  0x7d   : > { %2481 = vmatprep.subr.msk.bf16.mxu0 %vm494_vm0, %v3004_v32  ;;  %2489 = vmatprep.subr.msk.bf16.mxu1 %vm494_vm0, %v3006_v3  ;;  %v4018_v32 = vld [vmem:[#allocation9_spill] sm:$0xff]  ;;  %v4019_v3 = vld [vmem:[#allocation10_spill] sm:$0xff] }
  0x7e   : > { %v1014_v60 = vsel %vm494_vm0, %v4018_v32, 0  ;;  %v1261_v16 = vsel %vm494_vm0, %v4019_v3, 0 }
  0x84   : > { %2407 = vmatpush3.bf16.xpose.msra.mxu0 %v1020_v12  ;;  %2439 = vmatpush3.bf16.xpose.msra.mxu1 %v1267_v21 }
  0x85   : > { %2482 = vmatprep.subr.msk.bf16.mxu0 %vm494_vm0, %v3074_v48  ;;  %2490 = vmatprep.subr.msk.bf16.mxu1 %vm494_vm0, %v4017_v36  ;;  %v928_v48 = vmul.f32 %v2819_v40, %v4020_v41  ;;  %v4029_v40 = vpack.c.bf16 %v3182_v29, %v3178_v58 }
  0x87   : > { %v942_v35 = vpack.c.bf16 %v929_v42, %v928_v48 }
  0x8c   : > { %2409 = vmatpush3.bf16.xpose.msra.mxu0 %v1017_v45  ;;  %2441 = vmatpush3.bf16.xpose.msra.mxu1 %v1264_v2 }
  0x8d   : > { %2483 = vmatprep.subr.msk.bf16.mxu0 %vm494_vm0, %v4018_v32  ;;  %2491 = vmatprep.subr.msk.bf16.mxu1 %vm494_vm0, %v4019_v3 }
  0x94   : > { %2411 = vmatpush3.bf16.xpose.msra.mxu0 %v1014_v60  ;;  %2443 = vmatpush3.bf16.xpose.msra.mxu1 %v1261_v16 }
  0x9b   : > { %2413 = vmatmul.mubr.msk.bf16.vlgmr.msra.gmra.mxu0 %vm494_vm0, %v4024_v62  ;;  %2445 = vmatmul.mubr.msk.bf16.vlgmr.msra.gmra.mxu1 %vm494_vm0, %v4025_v55 }
  0x9c   : > { %2416 = vmatprep.mubr.msk.bf16.mxu0 %vm494_vm0, %v942_v35  ;;  %2448 = vmatprep.mubr.msk.bf16.mxu1 %vm494_vm0, %v1189_v19 }
  0xa3   : > { %2417 = vmatmul.mubr.msk.bf16.gmra.mxu0 %vm494_vm0, %v4027_v14  ;;  %2449 = vmatmul.mubr.msk.bf16.gmra.mxu1 %vm494_vm0, %v4028_v61 }
  0xa4   : > { %2420 = vmatprep.mubr.msk.bf16.mxu0 %vm494_vm0, %v944_v8  ;;  %2452 = vmatprep.mubr.msk.bf16.mxu1 %vm494_vm0, %v1191_v54 }
  0xab   : > { %2421 = vmatmul.mubr.msk.bf16.gmra.mxu0 %vm494_vm0, %v4029_v40  ;;  %2453 = vmatmul.mubr.msk.bf16.gmra.mxu1 %vm494_vm0, %v4030_v34 }
  0xac   : > { %2424 = vmatprep.mubr.msk.bf16.mxu0 %vm494_vm0, %v4031_v59  ;;  %2456 = vmatprep.mubr.msk.bf16.mxu1 %vm494_vm0, %v1193_v13 }
  0xb2   : > { %v421_v24 = vpop.xlane.xlu0 %420 }
  0xb3   : > { %2425 = vmatmul.mubr.msk.bf16.gmra.mxu0 %vm494_vm0, %v4032_v5  ;;  %2457 = vmatmul.mubr.msk.bf16.gmra.mxu1 %vm494_vm0, %v1194_v51  ;;  %v422_v25 = vadd.f32 %v421_v24, %v416_v50 }
  0xb5   : > { %424 = vst.msk [vmem:[#allocation3] sm:$0xf] %vm318_vm2, %v422_v25 }
 0x11b   : > { %v3408_v58 = vpop.f32.mrf.mxu0  ;;  %v3410_v29 = vpop.f32.mrf.mxu1 }
 0x11d   : > { %v3412_v57 = vpop.f32.mrf.mxu0  ;;  %v3414_v33 = vpop.f32.mrf.mxu1 }
 0x11e   : > { %1589 = vxpose.xlu1.b32.start [1/16] %v3414_v33, 128  ;;  %1432 = vxpose.xlu0.b32.start [1/16] %v3412_v57, 128 }
 0x11f   : > { %v3418_v1 = vpop.f32.mrf.mxu0  ;;  %v3420_v63 = vpop.f32.mrf.mxu1 }
 0x121   : > { %v3422_v4 = vpop.f32.mrf.mxu0  ;;  %v3424_v47 = vpop.f32.mrf.mxu1 }
 0x122   : > { %1590 = vxpose.xlu1.b32.cont [2/16] %v3424_v47, 128  ;;  %1433 = vxpose.xlu0.b32.cont [2/16] %v3422_v4, 128 }
 0x123   : > { %v3428_v56 = vpop.f32.mrf.mxu0  ;;  %v3430_v38 = vpop.f32.mrf.mxu1 }
 0x125   : > { %v3434_v53 = vpop.f32.mrf.mxu0  ;;  %v3436_v13 = vpop.f32.mrf.mxu1 }
 0x126   : > { %1591 = vxpose.xlu1.b32.cont [3/16] %v3410_v29, 128  ;;  %1434 = vxpose.xlu0.b32.cont [3/16] %v3408_v58, 128 }
 0x127   : > { %v3440_v51 = vpop.f32.mrf.mxu0  ;;  %v3442_v11 = vpop.f32.mrf.mxu1 }
 0x129   : > { %v3446_v18 = vpop.f32.mrf.mxu0  ;;  %v3448_v22 = vpop.f32.mrf.mxu1 }
 0x12a   : > { %1592 = vxpose.xlu1.b32.cont [4/16] %v3420_v63, 128  ;;  %1435 = vxpose.xlu0.b32.cont [4/16] %v3418_v1, 128 }
 0x12b   : > { %v3452_v43 = vpop.f32.mrf.mxu0  ;;  %v3454_v20 = vpop.f32.mrf.mxu1 }
 0x12d   : > { %v3458_v17 = vpop.f32.mrf.mxu0  ;;  %v3460_v46 = vpop.f32.mrf.mxu1 }
 0x12e   : > { %1593 = vxpose.xlu1.b32.cont [5/16] %v3436_v13, 128  ;;  %1436 = vxpose.xlu0.b32.cont [5/16] %v3434_v53, 128 }
 0x12f   : > { %v3464_v52 = vpop.f32.mrf.mxu0  ;;  %v3466_v37 = vpop.f32.mrf.mxu1 }
 0x131   : > { %v3470_v9 = vpop.f32.mrf.mxu0  ;;  %v3472_v44 = vpop.f32.mrf.mxu1 }
 0x132   : > { %1594 = vxpose.xlu1.b32.cont [6/16] %v3448_v22, 128  ;;  %1437 = vxpose.xlu0.b32.cont [6/16] %v3446_v18, 128 }
 0x133   : > { %v3476_v6 = vpop.f32.mrf.mxu0  ;;  %v3478_v39 = vpop.f32.mrf.mxu1 }
 0x135   : > { %v3482_v12 = vpop.f32.mrf.mxu0  ;;  %v3484_v21 = vpop.f32.mrf.mxu1 }
 0x136   : > { %1595 = vxpose.xlu1.b32.cont [7/16] %v3430_v38, 128  ;;  %1438 = vxpose.xlu0.b32.cont [7/16] %v3428_v56, 128 }
 0x137   : > { %v3488_v36 = vpop.f32.mrf.mxu0  ;;  %v3490_v45 = vpop.f32.mrf.mxu1 }
 0x139   : > { %v3494_v2 = vpop.f32.mrf.mxu0  ;;  %v3496_v32 = vpop.f32.mrf.mxu1 }
 0x13a   : > { %1596 = vxpose.xlu1.b32.cont [8/16] %v3442_v11, 128  ;;  %1439 = vxpose.xlu0.b32.cont [8/16] %v3440_v51, 128 }
 0x13e   : > { %1597 = vxpose.xlu1.b32.cont [9/16] %v3460_v46, 128  ;;  %1440 = vxpose.xlu0.b32.cont [9/16] %v3458_v17, 128 }
 0x142   : > { %1598 = vxpose.xlu1.b32.cont [10/16] %v3472_v44, 128  ;;  %1441 = vxpose.xlu0.b32.cont [10/16] %v3470_v9, 128 }
 0x146   : > { %1599 = vxpose.xlu1.b32.cont [11/16] %v3454_v20, 128  ;;  %1442 = vxpose.xlu0.b32.cont [11/16] %v3452_v43, 128 }
 0x14a   : > { %1600 = vxpose.xlu1.b32.cont [12/16] %v3466_v37, 128  ;;  %1443 = vxpose.xlu0.b32.cont [12/16] %v3464_v52, 128 }
 0x14e   : > { %1601 = vxpose.xlu1.b32.cont [13/16] %v3484_v21, 128  ;;  %1444 = vxpose.xlu0.b32.cont [13/16] %v3482_v12, 128 }
 0x152   : > { %1602 = vxpose.xlu1.b32.cont [14/16] %v3496_v32, 128  ;;  %1445 = vxpose.xlu0.b32.cont [14/16] %v3494_v2, 128 }
 0x156   : > { %1603 = vxpose.xlu1.b32.cont [15/16] %v3478_v39, 128  ;;  %1446 = vxpose.xlu0.b32.cont [15/16] %v3476_v6, 128 }
 0x15a   : > { %1604 = vxpose.xlu1.b32.end [16/16] %v3490_v45, 128  ;;  %1447 = vxpose.xlu0.b32.end [16/16] %v3488_v36, 128 }
 0x15b   : > { %v3504_v3 = vpop.f32.mrf.mxu0  ;;  %v3506_v60 = vpop.f32.mrf.mxu1 }
 0x15c   : > { %4033 = vst [vmem:[#allocation4_spill] sm:$0xff] %v3504_v3  ;;  %4034 = vst [vmem:[#allocation5_spill] sm:$0xff] %v3506_v60 }
 0x15d   : > { %v3508_v16 = vpop.f32.mrf.mxu0  ;;  %v3510_v41 = vpop.f32.mrf.mxu1 }
 0x15e   : > { %4035 = vst [vmem:[#allocation8_spill] sm:$0xff] %v3510_v41  ;;  %1903 = vxpose.xlu1.b32.start [1/16] %v3510_v41, 128  ;;  %1746 = vxpose.xlu0.b32.start [1/16] %v3508_v16, 128 }
 0x15f   : > { %v3514_v48 = vpop.f32.mrf.mxu0  ;;  %v3516_v49 = vpop.f32.mrf.mxu1 }
 0x160   : > { %4036 = vst [vmem:[#allocation9_spill] sm:$0xff] %v3514_v48  ;;  %4037 = vst [vmem:[#allocation10_spill] sm:$0xff] %v3516_v49 }
 0x161   : > { %v3518_v42 = vpop.f32.mrf.mxu0  ;;  %v3520_v26 = vpop.f32.mrf.mxu1 }
 0x162   : > { %4038 = vst [vmem:[#allocation6_spill] sm:$0xff] %v3520_v26  ;;  %1904 = vxpose.xlu1.b32.cont [2/16] %v3520_v26, 128  ;;  %1747 = vxpose.xlu0.b32.cont [2/16] %v3518_v42, 128  ;;  %v1621_v26 = vmul.f32 %v3414_v33, %v3414_v33 }
 0x163   : > { %v3524_v28 = vpop.f32.mrf.mxu0  ;;  %v3526_v35 = vpop.f32.mrf.mxu1 }
 0x164   : > { %4039 = vst [vmem:[#allocation7_spill] sm:$0xff] %v3524_v28  ;;  %4040 = vst [vmem:[#allocation12_spill] sm:$0xff] %v3526_v35 }
 0x165   : > { %v3530_v19 = vpop.f32.mrf.mxu0  ;;  %v3532_v0 = vpop.f32.mrf.mxu1 }
 0x166   : > { %1905 = vxpose.xlu1.b32.cont [3/16] %v3506_v60, 128  ;;  %1748 = vxpose.xlu0.b32.cont [3/16] %v3504_v3, 128  ;;  %4041 = vst [vmem:[#allocation11_spill] sm:$0xff] %v3530_v19  ;;  %4042 = vst [vmem:[#allocation13_spill] sm:$0xff] %v3532_v0 }
 0x167   : > { %v3536_v7 = vpop.f32.mrf.mxu0  ;;  %v3538_v62 = vpop.f32.mrf.mxu1 }
 0x168   : > { %4043 = vst [vmem:[#allocation14_spill] sm:$0xff] %v3536_v7  ;;  %4044 = vst [vmem:[#allocation15_spill] sm:$0xff] %v3538_v62 }
 0x169   : > { %v3542_v55 = vpop.f32.mrf.mxu0  ;;  %v3544_v31 = vpop.f32.mrf.mxu1 }
 0x16a   : > { %1906 = vxpose.xlu1.b32.cont [4/16] %v3516_v49, 128  ;;  %1749 = vxpose.xlu0.b32.cont [4/16] %v3514_v48, 128  ;;  %4045 = vst [vmem:[#allocation16_spill] sm:$0xff] %v3542_v55  ;;  %4046 = vst [vmem:[#allocation17_spill] sm:$0xff] %v3544_v31  ;;  %v1465_v48 = vmul.f32 %v3422_v4, %v3422_v4 }
 0x16b   : > { %v3548_v30 = vpop.f32.mrf.mxu0  ;;  %v3550_v23 = vpop.f32.mrf.mxu1 }
 0x16c   : > { %4047 = vst [vmem:[#allocation18_spill] sm:$0xff] %v3548_v30  ;;  %4048 = vst [vmem:[#allocation19_spill] sm:$0xff] %v3550_v23 }
 0x16d   : > { %v3554_v10 = vpop.f32.mrf.mxu0  ;;  %v3556_v8 = vpop.f32.mrf.mxu1 }
 0x16e   : > { %1907 = vxpose.xlu1.b32.cont [5/16] %v3532_v0, 128  ;;  %1750 = vxpose.xlu0.b32.cont [5/16] %v3530_v19, 128  ;;  %4049 = vst [vmem:[#allocation20_spill] sm:$0xff] %v3554_v10  ;;  %4050 = vst [vmem:[#allocation21_spill] sm:$0xff] %v3556_v8 }
 0x16f   : > { %v3560_v54 = vpop.f32.mrf.mxu0  ;;  %v3562_v15 = vpop.f32.mrf.mxu1 }
 0x170   : > { %4051 = vst [vmem:[#allocation22_spill] sm:$0xff] %v3560_v54  ;;  %4052 = vst [vmem:[#allocation23_spill] sm:$0xff] %v3562_v15 }
 0x171   : > { %v3566_v14 = vpop.f32.mrf.mxu0  ;;  %v3568_v61 = vpop.f32.mrf.mxu1 }
 0x172   : > { %1908 = vxpose.xlu1.b32.cont [6/16] %v3544_v31, 128  ;;  %1751 = vxpose.xlu0.b32.cont [6/16] %v3542_v55, 128  ;;  %4053 = vst [vmem:[#allocation24_spill] sm:$0xff] %v3566_v14  ;;  %4054 = vst [vmem:[#allocation25_spill] sm:$0xff] %v3568_v61 }
 0x173   : > { %v3572_v40 = vpop.f32.mrf.mxu0  ;;  %v3574_v34 = vpop.f32.mrf.mxu1 }
 0x174   : > { %4055 = vst [vmem:[#allocation26_spill] sm:$0xff] %v3572_v40  ;;  %4056 = vst [vmem:[#allocation27_spill] sm:$0xff] %v3574_v34 }
 0x175   : > { %v3578_v59 = vpop.f32.mrf.mxu0  ;;  %v3580_v5 = vpop.f32.mrf.mxu1 }
 0x176   : > { %1909 = vxpose.xlu1.b32.cont [7/16] %v3526_v35, 128  ;;  %1752 = vxpose.xlu0.b32.cont [7/16] %v3524_v28, 128  ;;  %4057 = vst [vmem:[#allocation28_spill] sm:$0xff] %v3578_v59  ;;  %4058 = vst [vmem:[#allocation29_spill] sm:$0xff] %v3580_v5  ;;  %v1464_v28 = vmul.f32 %v3412_v57, %v3412_v57 }
 0x177   : > { %v3584_v27 = vpop.f32.mrf.mxu0  ;;  %v3586_v24 = vpop.f32.mrf.mxu1 }
 0x178   : > { %4059 = vst [vmem:[#allocation30_spill] sm:$0xff] %v3584_v27  ;;  %4060 = vst [vmem:[#allocation31_spill] sm:$0xff] %v3586_v24 }
 0x179   : > { %v3590_v50 = vpop.f32.mrf.mxu0  ;;  %v3592_v25 = vpop.f32.mrf.mxu1 }
 0x17a   : > { %1910 = vxpose.xlu1.b32.cont [8/16] %v3538_v62, 128  ;;  %1753 = vxpose.xlu0.b32.cont [8/16] %v3536_v7, 128  ;;  %4061 = vst [vmem:[#allocation32_spill] sm:$0xff] %v3590_v50  ;;  %4062 = vst [vmem:[#allocation33_spill] sm:$0xff] %v3592_v25 }
 0x17e   : > { %1911 = vxpose.xlu1.b32.cont [9/16] %v3556_v8, 128  ;;  %1754 = vxpose.xlu0.b32.cont [9/16] %v3554_v10, 128 }
 0x182   : > { %1912 = vxpose.xlu1.b32.cont [10/16] %v3568_v61, 128  ;;  %1755 = vxpose.xlu0.b32.cont [10/16] %v3566_v14, 128 }
 0x186   : > { %1913 = vxpose.xlu1.b32.cont [11/16] %v3550_v23, 128  ;;  %1756 = vxpose.xlu0.b32.cont [11/16] %v3548_v30, 128 }
 0x18a   : > { %1914 = vxpose.xlu1.b32.cont [12/16] %v3562_v15, 128  ;;  %1757 = vxpose.xlu0.b32.cont [12/16] %v3560_v54, 128 }
 0x18e   : > { %1915 = vxpose.xlu1.b32.cont [13/16] %v3580_v5, 128  ;;  %1758 = vxpose.xlu0.b32.cont [13/16] %v3578_v59, 128 }
 0x192   : > { %1916 = vxpose.xlu1.b32.cont [14/16] %v3592_v25, 128  ;;  %1759 = vxpose.xlu0.b32.cont [14/16] %v3590_v50, 128 }
 0x196   : > { %1917 = vxpose.xlu1.b32.cont [15/16] %v3574_v34, 128  ;;  %1760 = vxpose.xlu0.b32.cont [15/16] %v3572_v40, 128 }
 0x19a   : > { %v1605_v15 = vpop.trf.xlu1  ;;  %1918 = vxpose.xlu1.b32.end [16/16] %v3586_v24, 128  ;;  %v1448_v54 = vpop.trf.xlu0  ;;  %1761 = vxpose.xlu0.b32.end [16/16] %v3584_v27, 128 }
 0x19b   : > { %v1480_v27 = vmul.f32 %v1448_v54, %v3412_v57  ;;  %v1637_v49 = vmul.f32 %v1605_v15, %v3414_v33 }
 0x19d   : > { %v1496_v19 = vadd.f32 %v1480_v27, %v1464_v28  ;;  %v1653_v28 = vadd.f32 %v1637_v49, %v1621_v26  ;;  %v1467_v49 = vmul.f32 %v3418_v1, %v3418_v1 }
 0x19e   : > { %v1606_v5 = vpop.trf.xlu1  ;;  %v1449_v59 = vpop.trf.xlu0 }
 0x19f   : > { %v1481_v0 = vmul.f32 %v1449_v59, %v3422_v4  ;;  %v1638_v41 = vmul.f32 %v1606_v5, %v3424_v47  ;;  %v1623_v5 = vmul.f32 %v3410_v29, %v3410_v29 }
 0x1a1   : > { %v1497_v57 = vadd.f32 %v1481_v0, %v1465_v48  ;;  %v1622_v48 = vmul.f32 %v3424_v47, %v3424_v47 }
 0x1a2   : > { %v1607_v23 = vpop.trf.xlu1  ;;  %v1450_v30 = vpop.trf.xlu0 }
 0x1a3   : > { %v1482_v54 = vmul.f32 %v3408_v58, %v1450_v30  ;;  %v1639_v33 = vmul.f32 %v3410_v29, %v1607_v23  ;;  %v1654_v0 = vadd.f32 %v1638_v41, %v1622_v48  ;;  %v1468_v41 = vmul.f32 %v3434_v53, %v3434_v53 }
 0x1a5   : > { %v1655_v23 = vadd.f32 %v1639_v33, %v1623_v5  ;;  %v1470_v33 = vmul.f32 %v3428_v56, %v3428_v56  ;;  %v1627_v5 = vmul.f32 %v3430_v38, %v3430_v38 }
 0x1a6   : > { %v1608_v61 = vpop.trf.xlu1  ;;  %v1451_v14 = vpop.trf.xlu0 }
 0x1a7   : > { %v1483_v59 = vmul.f32 %v3418_v1, %v1451_v14  ;;  %v1640_v47 = vmul.f32 %v3420_v63, %v1608_v61 }
 0x1a9   : > { %v1499_v14 = vadd.f32 %v1483_v59, %v1467_v49  ;;  %v1626_v49 = vmul.f32 %v3448_v22, %v3448_v22 }
 0x1aa   : > { %v1609_v8 = vpop.trf.xlu1  ;;  %v1452_v25 = vpop.trf.xlu0 }
 0x1ab   : > { %v1484_v30 = vmul.f32 %v1452_v25, %v3434_v53  ;;  %v1641_v29 = vmul.f32 %v1609_v8, %v3436_v13 }
 0x1ad   : > { %v1500_v25 = vadd.f32 %v1484_v30, %v1468_v41  ;;  %v1629_v41 = vmul.f32 %v3460_v46, %v3460_v46 }
 0x1ae   : > { %v1610_v10 = vpop.trf.xlu1  ;;  %v1453_v50 = vpop.trf.xlu0 }
 0x1b2   : > { %v3600_v62 = vpop.trf.xlu1  ;;  %v1454_v34 = vpop.trf.xlu0 }
 0x1b3   : > { %v1486_v53 = vmul.f32 %v3428_v56, %v1454_v34 }
 0x1b5   : > { %v1502_v34 = vadd.f32 %v1486_v53, %v1470_v33  ;;  %v1631_v53 = vmul.f32 %v3454_v20, %v3454_v20  ;;  %v1475_v33 = vmul.f32 %v3464_v52, %v3464_v52 }
 0x1b6   : > { %v3602_v40 = vpop.trf.xlu1  ;;  %v1455_v7 = vpop.trf.xlu0 }
 0x1b7   : > { %v1644_v56 = vmul.f32 %v3442_v11, %v3602_v40 }
 0x1ba   : > { %v3604_v24 = vpop.trf.xlu1  ;;  %v3606_v35 = vpop.trf.xlu0 }
 0x1be   : > { %v3611_v31 = vpop.trf.xlu1  ;;  %v3613_v55 = vpop.trf.xlu0 }
 0x1c1   : > { %1512 = vadd.xlane.f32.xlu1 %v1496_v19  ;;  %v1466_v19 = vmul.f32 %v3408_v58, %v3408_v58 }
 0x1c2   : > { %v3619_v60 = vpop.trf.xlu1  ;;  %v3621_v3 = vpop.trf.xlu0 }
 0x1c3   : > { %v1498_v27 = vadd.f32 %v1482_v54, %v1466_v19  ;;  %v1469_v19 = vmul.f32 %v3446_v18, %v3446_v18 }
 0x1c5   : > { %1514 = vadd.xlane.f32.xlu1 %v1497_v57  ;;  %v1485_v57 = vmul.f32 %v1453_v50, %v3446_v18  ;;  %v1625_v50 = vmul.f32 %v3436_v13, %v3436_v13  ;;  %v1487_v18 = vmul.f32 %v3440_v51, %v1455_v7  ;;  %v1643_v13 = vmul.f32 %v3430_v38, %v3600_v62 }
 0x1c6   : > { %v3629_v15 = vpop.trf.xlu1  ;;  %v3631_v4 = vpop.trf.xlu0  ;;  %v1646_v38 = vmul.f32 %v3611_v31, %v3472_v44 }
 0x1c7   : > { %1669 = vadd.xlane.f32.xlu0 %v1653_v28  ;;  %v1624_v28 = vmul.f32 %v3420_v63, %v3420_v63  ;;  %v1642_v63 = vmul.f32 %v1610_v10, %v3448_v22  ;;  %v1657_v8 = vadd.f32 %v1641_v29, %v1625_v50  ;;  %v1471_v10 = vmul.f32 %v3440_v51, %v3440_v51 }
 0x1c8   : > { %v1645_v22 = vmul.f32 %v3604_v24, %v3460_v46  ;;  %v1659_v62 = vadd.f32 %v1643_v13, %v1627_v5  ;;  %v1628_v51 = vmul.f32 %v3442_v11, %v3442_v11  ;;  %v1489_v11 = vmul.f32 %v3613_v55, %v3470_v9 }
 0x1c9   : > { %1516 = vadd.xlane.f32.xlu1 %v1498_v27  ;;  %v1656_v61 = vadd.f32 %v1640_v47, %v1624_v28  ;;  %v1501_v27 = vadd.f32 %v1485_v57, %v1469_v19  ;;  %v1658_v30 = vadd.f32 %v1642_v63, %v1626_v49  ;;  %v1503_v7 = vadd.f32 %v1487_v18, %v1471_v10 }
 0x1ca   : > { %v3639_v26 = vpop.trf.xlu1  ;;  %v3641_v58 = vpop.trf.xlu0  ;;  %v1660_v40 = vadd.f32 %v1644_v56, %v1628_v51  ;;  %v1661_v24 = vadd.f32 %v1645_v22, %v1629_v41  ;;  %v1630_v46 = vmul.f32 %v3472_v44, %v3472_v44  ;;  %v1647_v29 = vmul.f32 %v3454_v20, %v3619_v60 }
 0x1cb   : > { %1671 = vadd.xlane.f32.xlu0 %v1654_v0  ;;  %v1648_v44 = vmul.f32 %v3466_v37, %v3629_v15  ;;  %v1491_v50 = vmul.f32 %v3464_v52, %v3631_v4  ;;  %v1632_v63 = vmul.f32 %v3466_v37, %v3466_v37  ;;  %v1649_v20 = vmul.f32 %v3639_v26, %v3484_v21 }
 0x1cc   : > { %v1662_v31 = vadd.f32 %v1646_v38, %v1630_v46  ;;  %v1663_v60 = vadd.f32 %v1647_v29, %v1631_v53  ;;  %v1633_v37 = vmul.f32 %v3484_v21, %v3484_v21  ;;  %v1476_v49 = vmul.f32 %v3482_v12, %v3482_v12 }
 0x1cd   : > { %1518 = vadd.xlane.f32.xlu1 %v1499_v14  ;;  %v1664_v15 = vadd.f32 %v1648_v44, %v1632_v63  ;;  %v1507_v4 = vadd.f32 %v1491_v50, %v1475_v33  ;;  %v1477_v56 = vmul.f32 %v3494_v2, %v3494_v2  ;;  %v1636_v51 = vmul.f32 %v3490_v45, %v3490_v45  ;;  %v4068_v63 = vld [vmem:[#allocation10_spill] sm:$0xff] }
 0x1ce   : > { %v3649_v54 = vpop.trf.xlu1  ;;  %v3651_v1 = vpop.trf.xlu0  ;;  %v1665_v26 = vadd.f32 %v1649_v20, %v1633_v37 }
 0x1cf   : > { %1673 = vadd.xlane.f32.xlu0 %v1655_v23  ;;  %v1488_v23 = vmul.f32 %v3606_v35, %v3458_v17  ;;  %v1493_v52 = vmul.f32 %v3651_v1, %v3494_v2  ;;  %v1635_v1 = vmul.f32 %v3478_v39, %v3478_v39 }
 0x1d1   : > { %1520 = vadd.xlane.f32.xlu1 %v1500_v25  ;;  %v1472_v25 = vmul.f32 %v3458_v17, %v3458_v17  ;;  %v1490_v17 = vmul.f32 %v3452_v43, %v3621_v3 }
 0x1d2   : > { %v3659_v59 = vpop.trf.xlu0  ;;  %v3664_v48 = vpop.trf.xlu1 }
 0x1d3   : > { %1675 = vadd.xlane.f32.xlu0 %v1656_v61  ;;  %v1504_v35 = vadd.f32 %v1488_v23, %v1472_v25  ;;  %v1473_v61 = vmul.f32 %v3470_v9, %v3470_v9  ;;  %v1474_v9 = vmul.f32 %v3452_v43, %v3452_v43  ;;  %v1492_v43 = vmul.f32 %v3641_v58, %v3482_v12 }
 0x1d4   : > { %v1634_v58 = vmul.f32 %v3496_v32, %v3496_v32  ;;  %v1651_v21 = vmul.f32 %v3478_v39, %v3664_v48  ;;  %v1494_v12 = vmul.f32 %v3476_v6, %v3659_v59  ;;  %v1478_v48 = vmul.f32 %v3476_v6, %v3476_v6 }
 0x1d5   : > { %1522 = vadd.xlane.f32.xlu1 %v1501_v27  ;;  %v1505_v55 = vadd.f32 %v1489_v11, %v1473_v61  ;;  %v1506_v3 = vadd.f32 %v1490_v17, %v1474_v9  ;;  %v4064_v11 = vld [vmem:[#allocation6_spill] sm:$0xff] }
 0x1d6   : > { %v3669_v0 = vpop.trf.xlu0  ;;  %v3678_v14 = vpop.trf.xlu1  ;;  %v1667_v22 = vadd.f32 %v1651_v21, %v1635_v1  ;;  %v1510_v59 = vadd.f32 %v1494_v12, %v1478_v48 }
 0x1d7   : > { %1677 = vadd.xlane.f32.xlu0 %v1657_v8  ;;  %v1495_v2 = vmul.f32 %v3488_v36, %v3669_v0  ;;  %v1778_v0 = vmul.f32 %v3508_v16, %v3508_v16 }
 0x1d9   : > { %1524 = vadd.xlane.f32.xlu1 %v1502_v34  ;;  %v1650_v34 = vmul.f32 %v3649_v54, %v3496_v32  ;;  %v1652_v32 = vmul.f32 %v3490_v45, %v3678_v14  ;;  %v1479_v14 = vmul.f32 %v3488_v36, %v3488_v36  ;;  %v1779_v45 = vmul.f32 %v3518_v42, %v3518_v42 }
 0x1da   : > { %v3684_v47 = vpop.trf.xlu0  ;;  %v3694_v57 = vpop.trf.xlu1 }
 0x1db   : > { %1679 = vadd.xlane.f32.xlu0 %v1658_v30  ;;  %v1508_v30 = vadd.f32 %v1492_v43, %v1476_v49  ;;  %v1666_v54 = vadd.f32 %v1650_v34, %v1634_v58  ;;  %v1794_v39 = vmul.f32 %v3684_v47, %v3508_v16  ;;  %v1668_v23 = vadd.f32 %v1652_v32, %v1636_v51  ;;  %v4069_v43 = vld [vmem:[#allocation11_spill] sm:$0xff]  ;;  %v4070_v34 = vld [vmem:[#allocation13_spill] sm:$0xff] }
 0x1dc   : > { %v1511_v41 = vadd.f32 %v1495_v2, %v1479_v14  ;;  %v1936_v16 = vmul.f32 %v4064_v11, %v4064_v11  ;;  %v4074_v2 = vld [vmem:[#allocation12_spill] sm:$0xff]  ;;  %v4075_v14 = vld [vmem:[#allocation14_spill] sm:$0xff] }
 0x1dd   : > { %1526 = vadd.xlane.f32.xlu1 %v1503_v7  ;;  %v1509_v7 = vadd.f32 %v1493_v52, %v1477_v56  ;;  %v1810_v25 = vadd.f32 %v1794_v39, %v1778_v0  ;;  %v4072_v56 = vld [vmem:[#allocation17_spill] sm:$0xff]  ;;  %v1941_v39 = vmul.f32 %v4074_v2, %v4074_v2  ;;  %v4076_v0 = vld [vmem:[#allocation15_spill] sm:$0xff] }
 0x1de   : > { %v3700_v28 = vpop.trf.xlu0  ;;  %v3710_v19 = vpop.trf.xlu1 }
 0x1df   : > { %1681 = vadd.xlane.f32.xlu0 %v1659_v62  ;;  %v1795_v6 = vmul.f32 %v3700_v28, %v3518_v42  ;;  %v1952_v28 = vmul.f32 %v3710_v19, %v4064_v11  ;;  %v4065_v42 = vld [vmem:[#allocation4_spill] sm:$0xff] }
 0x1e0   : > { %v1780_v61 = vmul.f32 %v4065_v42, %v4065_v42 }
 0x1e1   : > { %1683 = vadd.xlane.f32.xlu1 %v1660_v40  ;;  %v1968_v17 = vadd.f32 %v1952_v28, %v1936_v16 }
 0x1e2   : > { %v3716_v27 = vpop.trf.xlu0  ;;  %v3726_v8 = vpop.trf.xlu1 }
 0x1e3   : > { %1685 = vadd.xlane.f32.xlu0 %v1661_v24  ;;  %v4063_v24 = vld [vmem:[#allocation8_spill] sm:$0xff] }
 0x1e4   : > { %v1951_v47 = vmul.f32 %v3694_v57, %v4063_v24  ;;  %v1935_v36 = vmul.f32 %v4063_v24, %v4063_v24  ;;  %v1942_v24 = vmul.f32 %v4076_v0, %v4076_v0 }
 0x1e5   : > { %1528 = vadd.xlane.f32.xlu1 %v1504_v35  ;;  %v1811_v35 = vadd.f32 %v1795_v6, %v1779_v45  ;;  %v1785_v6 = vmul.f32 %v4075_v14, %v4075_v14 }
 0x1e6   : > { %v3732_v18 = vpop.trf.xlu0  ;;  %v1922_v13 = vpop.trf.xlu1  ;;  %v1967_v29 = vadd.f32 %v1951_v47, %v1935_v36 }
 0x1e7   : > { %1687 = vadd.xlane.f32.xlu0 %v1662_v31  ;;  %v1796_v31 = vmul.f32 %v4065_v42, %v3716_v27  ;;  %v1954_v20 = vmul.f32 %v4068_v63, %v1922_v13  ;;  %v1939_v13 = vmul.f32 %v4070_v34, %v4070_v34 }
 0x1e9   : > { %1530 = vadd.xlane.f32.xlu1 %v1505_v55  ;;  %v4066_v55 = vld [vmem:[#allocation5_spill] sm:$0xff]  ;;  %v1812_v44 = vadd.f32 %v1796_v31, %v1780_v61  ;;  %v4079_v31 = vld [vmem:[#allocation24_spill] sm:$0xff] }
 0x1ea   : > { %v1766_v10 = vpop.trf.xlu0  ;;  %v1923_v5 = vpop.trf.xlu1  ;;  %v1953_v53 = vmul.f32 %v4066_v55, %v3726_v8  ;;  %v1937_v19 = vmul.f32 %v4066_v55, %v4066_v55  ;;  %v1938_v8 = vmul.f32 %v4068_v63, %v4068_v63 }
 0x1eb   : > { %1689 = vadd.xlane.f32.xlu0 %v1663_v60  ;;  %v4067_v60 = vld [vmem:[#allocation9_spill] sm:$0xff] }
 0x1ec   : > { %v1797_v9 = vmul.f32 %v4067_v60, %v3732_v18  ;;  %v1781_v27 = vmul.f32 %v4067_v60, %v4067_v60  ;;  %v1782_v18 = vmul.f32 %v4069_v43, %v4069_v43  ;;  %v1970_v37 = vadd.f32 %v1954_v20, %v1938_v8  ;;  %v4082_v20 = vld [vmem:[#allocation19_spill] sm:$0xff] }
 0x1ed   : > { %1532 = vadd.xlane.f32.xlu1 %v1506_v3  ;;  %v1969_v3 = vadd.f32 %v1953_v53, %v1937_v19  ;;  %v4080_v53 = vld [vmem:[#allocation25_spill] sm:$0xff] }
 0x1ee   : > { %v1767_v62 = vpop.trf.xlu0  ;;  %v1924_v40 = vpop.trf.xlu1  ;;  %v1813_v33 = vadd.f32 %v1797_v9, %v1781_v27  ;;  %v1944_v60 = vmul.f32 %v4080_v53, %v4080_v53 }
 0x1ef   : > { %1691 = vadd.xlane.f32.xlu0 %v1664_v15  ;;  %v1956_v12 = vmul.f32 %v1924_v40, %v4072_v56 }
 0x1f1   : > { %1534 = vadd.xlane.f32.xlu1 %v1507_v4  ;;  %v1798_v4 = vmul.f32 %v1766_v10, %v4069_v43 }
 0x1f2   : > { %v1768_v38 = vpop.trf.xlu0  ;;  %v1925_v46 = vpop.trf.xlu1 }
 0x1f3   : > { %1693 = vadd.xlane.f32.xlu0 %v1665_v26  ;;  %v1955_v26 = vmul.f32 %v1923_v5, %v4070_v34  ;;  %v1814_v52 = vadd.f32 %v1798_v4, %v1782_v18  ;;  %v4073_v5 = vld [vmem:[#allocation7_spill] sm:$0xff]  ;;  %v4083_v4 = vld [vmem:[#allocation22_spill] sm:$0xff] }
 0x1f4   : > { %v1800_v32 = vmul.f32 %v4073_v5, %v1768_v38  ;;  %v1784_v48 = vmul.f32 %v4073_v5, %v4073_v5  ;;  %v1789_v34 = vmul.f32 %v4083_v4, %v4083_v4 }
 0x1f5   : > { %1536 = vadd.xlane.f32.xlu1 %v1508_v30  ;;  %v4071_v30 = vld [vmem:[#allocation16_spill] sm:$0xff] }
 0x1f6   : > { %v1769_v57 = vpop.trf.xlu0  ;;  %v1926_v50 = vpop.trf.xlu1  ;;  %v1799_v58 = vmul.f32 %v1767_v62, %v4071_v30  ;;  %v1783_v10 = vmul.f32 %v4071_v30, %v4071_v30 }
 0x1f7   : > { %1695 = vadd.xlane.f32.xlu0 %v1666_v54  ;;  %v1971_v54 = vadd.f32 %v1955_v26, %v1939_v13  ;;  %v1801_v40 = vmul.f32 %v4075_v14, %v1769_v57  ;;  %v1958_v38 = vmul.f32 %v4076_v0, %v1926_v50  ;;  %v4081_v50 = vld [vmem:[#allocation18_spill] sm:$0xff] }
 0x1f8   : > { %v1815_v1 = vadd.f32 %v1799_v58, %v1783_v10  ;;  %v4085_v58 = vld [vmem:[#allocation28_spill] sm:$0xff] }
 0x1f9   : > { %1538 = vadd.xlane.f32.xlu1 %v1509_v7  ;;  %v1940_v7 = vmul.f32 %v4072_v56, %v4072_v56  ;;  %v1817_v47 = vadd.f32 %v1801_v40, %v1785_v6  ;;  %v4089_v40 = vld [vmem:[#allocation26_spill] sm:$0xff] }
 0x1fa   : > { %v1770_v15 = vpop.trf.xlu0  ;;  %v1927_v49 = vpop.trf.xlu1  ;;  %v1792_v0 = vmul.f32 %v4089_v40, %v4089_v40 }
 0x1fb   : > { %1697 = vadd.xlane.f32.xlu0 %v1667_v22  ;;  %v1972_v62 = vadd.f32 %v1956_v12, %v1940_v7  ;;  %v4086_v12 = vld [vmem:[#allocation29_spill] sm:$0xff] }
 0x1fc   : > { %v1947_v5 = vmul.f32 %v4086_v12, %v4086_v12 }
 0x1fd   : > { %1540 = vadd.xlane.f32.xlu1 %v1510_v59  ;;  %v1957_v59 = vmul.f32 %v4074_v2, %v1925_v46  ;;  %v4078_v46 = vld [vmem:[#allocation21_spill] sm:$0xff] }
 0x1fe   : > { %v1771_v21 = vpop.trf.xlu0  ;;  %v1928_v22 = vpop.trf.xlu1  ;;  %v1959_v16 = vmul.f32 %v1927_v49, %v4078_v46  ;;  %v4084_v49 = vld [vmem:[#allocation23_spill] sm:$0xff] }
 0x1ff   : > { %1699 = vadd.xlane.f32.xlu0 %v1668_v23  ;;  %v1816_v23 = vadd.f32 %v1800_v32, %v1784_v48  ;;  %v1803_v57 = vmul.f32 %v1771_v21, %v4079_v31  ;;  %v1960_v19 = vmul.f32 %v1928_v22, %v4080_v53  ;;  %v4087_v22 = vld [vmem:[#allocation32_spill] sm:$0xff] }
 0x201   : > { %1542 = vadd.xlane.f32.xlu1 %v1511_v41  ;;  %v1973_v41 = vadd.f32 %v1957_v59, %v1941_v39  ;;  %v1976_v63 = vadd.f32 %v1960_v19, %v1944_v60  ;;  %v4088_v59 = vld [vmem:[#allocation33_spill] sm:$0xff] }
 0x202   : > { %v1772_v51 = vpop.trf.xlu0  ;;  %v1929_v45 = vpop.trf.xlu1 }
 0x203   : > { %1826 = vadd.xlane.f32.xlu0 %v1810_v25  ;;  %v4077_v25 = vld [vmem:[#allocation20_spill] sm:$0xff]  ;;  %v1804_v27 = vmul.f32 %v4081_v50, %v1772_v51 }
 0x204   : > { %v1802_v36 = vmul.f32 %v1770_v15, %v4077_v25  ;;  %v1786_v28 = vmul.f32 %v4077_v25, %v4077_v25  ;;  %v1961_v15 = vmul.f32 %v4082_v20, %v1929_v45  ;;  %v4090_v45 = vld [vmem:[#allocation27_spill] sm:$0xff] }
 0x205   : > { %1828 = vadd.xlane.f32.xlu1 %v1811_v35  ;;  %v1974_v35 = vadd.f32 %v1958_v38, %v1942_v24 }
 0x206   : > { %v1773_v11 = vpop.trf.xlu0  ;;  %v1818_v42 = vadd.f32 %v1802_v36, %v1786_v28  ;;  %v1930_v61 = vpop.trf.xlu1  ;;  %v4091_v36 = vld [vmem:[#allocation30_spill] sm:$0xff] }
 0x207   : > { %1983 = vadd.xlane.f32.xlu0 %v1967_v29  ;;  %v1943_v29 = vmul.f32 %v4078_v46, %v4078_v46  ;;  %v1805_v18 = vmul.f32 %v4083_v4, %v1773_v11  ;;  %v1962_v13 = vmul.f32 %v4084_v49, %v1930_v61 }
 0x209   : > { %1985 = vadd.xlane.f32.xlu1 %v1968_v17  ;;  %v1787_v17 = vmul.f32 %v4079_v31, %v4079_v31  ;;  %v1975_v55 = vadd.f32 %v1959_v16, %v1943_v29  ;;  %v1821_v30 = vadd.f32 %v1805_v18, %v1789_v34  ;;  %v4092_v16 = vld [vmem:[#allocation31_spill] sm:$0xff] }
 0x20a   : > { %v1931_v8 = vpop.trf.xlu1  ;;  %v1950_v31 = vmul.f32 %v4092_v16, %v4092_v16 }
 0x20b   : > { %1830 = vadd.xlane.f32.xlu0 %v1812_v44  ;;  %v1774_v44 = vpop.trf.xlu0  ;;  %v1819_v9 = vadd.f32 %v1803_v57, %v1787_v17  ;;  %v1963_v7 = vmul.f32 %v1931_v8, %v4086_v12 }
 0x20c   : > { %v1806_v21 = vmul.f32 %v1774_v44, %v4085_v58 }
 0x20d   : > { %1987 = vadd.xlane.f32.xlu1 %v1969_v3  ;;  %v1788_v3 = vmul.f32 %v4081_v50, %v4081_v50  ;;  %v1979_v2 = vadd.f32 %v1963_v7, %v1947_v5 }
 0x20e   : > { %v1932_v10 = vpop.trf.xlu1 }
 0x20f   : > { %1832 = vadd.xlane.f32.xlu0 %v1813_v33  ;;  %v1945_v33 = vmul.f32 %v4082_v20, %v4082_v20  ;;  %v1820_v43 = vadd.f32 %v1804_v27, %v1788_v3  ;;  %v1964_v51 = vmul.f32 %v1932_v10, %v4088_v59 }
 0x211   : > { %1989 = vadd.xlane.f32.xlu1 %v1970_v37  ;;  %v1775_v37 = vpop.trf.xlu0  ;;  %v1977_v26 = vadd.f32 %v1961_v15, %v1945_v33 }
 0x212   : > { %v1807_v48 = vmul.f32 %v1775_v37, %v4087_v22  ;;  %v1933_v39 = vpop.trf.xlu1 }
 0x213   : > { %1834 = vadd.xlane.f32.xlu0 %v1814_v52  ;;  %v1946_v52 = vmul.f32 %v4084_v49, %v4084_v49  ;;  %v1965_v24 = vmul.f32 %v4090_v45, %v1933_v39 }
 0x215   : > { %1991 = vadd.xlane.f32.xlu1 %v1971_v54  ;;  %v1790_v54 = vmul.f32 %v4085_v58, %v4085_v58  ;;  %v1978_v56 = vadd.f32 %v1962_v13, %v1946_v52 }
 0x216   : > { %v1934_v28 = vpop.trf.xlu1 }
 0x217   : > { %1836 = vadd.xlane.f32.xlu0 %v1815_v1  ;;  %v1776_v1 = vpop.trf.xlu0  ;;  %v1822_v32 = vadd.f32 %v1806_v21, %v1790_v54  ;;  %v1966_v29 = vmul.f32 %v4092_v16, %v1934_v28 }
 0x218   : > { %v1808_v6 = vmul.f32 %v4089_v40, %v1776_v1 }
 0x219   : > { %1993 = vadd.xlane.f32.xlu1 %v1972_v62  ;;  %v1791_v62 = vmul.f32 %v4087_v22, %v4087_v22  ;;  %v1982_v57 = vadd.f32 %v1966_v29, %v1950_v31 }
 0x21a   : > { %v1824_v25 = vadd.f32 %v1808_v6, %v1792_v0 }
 0x21b   : > { %1838 = vadd.xlane.f32.xlu0 %v1816_v23  ;;  %v1948_v23 = vmul.f32 %v4088_v59, %v4088_v59  ;;  %v1823_v14 = vadd.f32 %v1807_v48, %v1791_v62 }
 0x21d   : > { %1995 = vadd.xlane.f32.xlu1 %v1973_v41  ;;  %v1777_v41 = vpop.trf.xlu0  ;;  %v1980_v38 = vadd.f32 %v1964_v51, %v1948_v23 }
 0x21e   : > { %v1809_v11 = vmul.f32 %v4091_v36, %v1777_v41 }
 0x21f   : > { %1840 = vadd.xlane.f32.xlu0 %v1817_v47  ;;  %v1949_v47 = vmul.f32 %v4090_v45, %v4090_v45 }
 0x221   : > { %1997 = vadd.xlane.f32.xlu1 %v1974_v35  ;;  %v1793_v35 = vmul.f32 %v4091_v36, %v4091_v36  ;;  %v1981_v46 = vadd.f32 %v1965_v24, %v1949_v47  ;;  %v1723_v24 = vld [vmem:[#allocation3 + $0x1] sm:$0x1]  ;;  %v1566_v36 = vld [vmem:[#allocation3] sm:$0x1] }
 0x223   : > { %1842 = vadd.xlane.f32.xlu0 %v1818_v42  ;;  %v1825_v42 = vadd.f32 %v1809_v11, %v1793_v35  ;;  %v1724_v11 = vadd.f32 1e-08, %v1723_v24 }
 0x225   : > { %1999 = vadd.xlane.f32.xlu1 %v1975_v55 }
 0x227   : > { %1844 = vadd.xlane.f32.xlu0 %v1819_v9 }
 0x229   : > { %2001 = vadd.xlane.f32.xlu1 %v1976_v63 }
 0x22b   : > { %1846 = vadd.xlane.f32.xlu0 %v1820_v43 }
 0x22d   : > { %2003 = vadd.xlane.f32.xlu1 %v1977_v26 }
 0x22f   : > { %1848 = vadd.xlane.f32.xlu0 %v1821_v30 }
 0x231   : > { %2005 = vadd.xlane.f32.xlu1 %v1978_v56 }
 0x233   : > { %1850 = vadd.xlane.f32.xlu0 %v1822_v32 }
 0x235   : > { %2007 = vadd.xlane.f32.xlu1 %v1979_v2 }
 0x237   : > { %1852 = vadd.xlane.f32.xlu0 %v1823_v14 }
 0x239   : > { %2009 = vadd.xlane.f32.xlu1 %v1980_v38 }
 0x23b   : > { %1854 = vadd.xlane.f32.xlu0 %v1824_v25 }
 0x23d   : > { %2011 = vadd.xlane.f32.xlu1 %v1981_v46  ;;  %v1567_v46 = vadd.f32 1e-08, %v1566_v36 }
 0x23f   : > { %1856 = vadd.xlane.f32.xlu0 %v1825_v42  ;;  %v1725_v42 = vmul.f32 64.0, %v1724_v11 }
 0x241   : > { %2517 = vrcp.f32 %v1725_v42 }
 0x243   : > { %2013 = vadd.xlane.f32.xlu0 %v1982_v57 }
 0x24a   : > { %v1513_v61 = vpop.xlane.xlu1 %1512 }
 0x24e   : > { %v1515_v17 = vpop.xlane.xlu1 %1514 }
 0x24f   : > { %v1544_v55 = vadd.f32 %v1515_v17, %v1513_v61  ;;  %v1568_v17 = vmul.f32 64.0, %v1567_v46 }
 0x250   : > { %v1670_v53 = vpop.xlane.xlu0 %1669 }
 0x251   : > { %2519 = vrcp.f32 %v1568_v17 }
 0x252   : > { %v1517_v19 = vpop.xlane.xlu1 %1516 }
 0x253   : > { %v1545_v44 = vadd.f32 %v1544_v55, %v1517_v19 }
 0x254   : > { %v1672_v60 = vpop.xlane.xlu0 %1671 }
 0x255   : > { %v1701_v9 = vadd.f32 %v1672_v60, %v1670_v53 }
 0x256   : > { %v1519_v50 = vpop.xlane.xlu1 %1518 }
 0x257   : > { %v1546_v27 = vadd.f32 %v1545_v44, %v1519_v50 }
 0x258   : > { %v1674_v3 = vpop.xlane.xlu0 %1673 }
 0x259   : > { %v1702_v63 = vadd.f32 %v1701_v9, %v1674_v3 }
 0x25a   : > { %v1521_v20 = vpop.xlane.xlu1 %1520 }
 0x25b   : > { %v1547_v15 = vadd.f32 %v1546_v27, %v1521_v20 }
 0x25c   : > { %v1676_v8 = vpop.xlane.xlu0 %1675 }
 0x25d   : > { %v1703_v33 = vadd.f32 %v1702_v63, %v1676_v8 }
 0x25e   : > { %v1523_v43 = vpop.xlane.xlu1 %1522 }
 0x25f   : > { %v1548_v4 = vadd.f32 %v1547_v15, %v1523_v43 }
 0x260   : > { %v1678_v18 = vpop.xlane.xlu0 %1677 }
 0x261   : > { %v1704_v37 = vadd.f32 %v1703_v33, %v1678_v18 }
 0x262   : > { %v1525_v34 = vpop.xlane.xlu1 %1524 }
 0x263   : > { %v1549_v26 = vadd.f32 %v1548_v4, %v1525_v34 }
 0x264   : > { %v1680_v49 = vpop.xlane.xlu0 %1679 }
 0x265   : > { %v1705_v13 = vadd.f32 %v1704_v37, %v1680_v49 }
 0x266   : > { %v1527_v52 = vpop.xlane.xlu1 %1526 }
 0x267   : > { %v1550_v30 = vadd.f32 %v1549_v26, %v1527_v52 }
 0x268   : > { %v1682_v58 = vpop.xlane.xlu0 %1681 }
 0x269   : > { %v1706_v21 = vadd.f32 %v1705_v13, %v1682_v58  ;;  %v2518_v13 = vpop.eup %2517 }
 0x26a   : > { %v1684_v10 = vpop.xlane.xlu1 %1683 }
 0x26b   : > { %v1707_v54 = vadd.f32 %v1706_v21, %v1684_v10  ;;  %v2520_v21 = vpop.eup %2519 }
 0x26c   : > { %v1686_v56 = vpop.xlane.xlu0 %1685 }
 0x26d   : > { %v1708_v12 = vadd.f32 %v1707_v54, %v1686_v56 }
 0x26e   : > { %v1529_v7 = vpop.xlane.xlu1 %1528 }
 0x26f   : > { %v1551_v1 = vadd.f32 %v1550_v30, %v1529_v7 }
 0x270   : > { %v1688_v5 = vpop.xlane.xlu0 %1687 }
 0x271   : > { %v1709_v32 = vadd.f32 %v1708_v12, %v1688_v5 }
 0x272   : > { %v1531_v22 = vpop.xlane.xlu1 %1530 }
 0x273   : > { %v1552_v48 = vadd.f32 %v1551_v1, %v1531_v22 }
 0x274   : > { %v1690_v62 = vpop.xlane.xlu0 %1689 }
 0x275   : > { %v1710_v2 = vadd.f32 %v1709_v32, %v1690_v62 }
 0x276   : > { %v1533_v59 = vpop.xlane.xlu1 %1532 }
 0x277   : > { %v1553_v51 = vadd.f32 %v1552_v48, %v1533_v59 }
 0x278   : > { %v1692_v39 = vpop.xlane.xlu0 %1691 }
 0x279   : > { %v1711_v23 = vadd.f32 %v1710_v2, %v1692_v39 }
 0x27a   : > { %v1535_v14 = vpop.xlane.xlu1 %1534 }
 0x27b   : > { %v1554_v40 = vadd.f32 %v1553_v51, %v1535_v14 }
 0x27c   : > { %v1694_v6 = vpop.xlane.xlu0 %1693 }
 0x27d   : > { %v1712_v41 = vadd.f32 %v1711_v23, %v1694_v6 }
 0x27e   : > { %v1537_v0 = vpop.xlane.xlu1 %1536 }
 0x27f   : > { %v1555_v38 = vadd.f32 %v1554_v40, %v1537_v0 }
 0x280   : > { %v1696_v45 = vpop.xlane.xlu0 %1695 }
 0x281   : > { %v1713_v47 = vadd.f32 %v1712_v41, %v1696_v45 }
 0x282   : > { %v1539_v25 = vpop.xlane.xlu1 %1538 }
 0x283   : > { %v1556_v29 = vadd.f32 %v1555_v38, %v1539_v25 }
 0x284   : > { %v1698_v28 = vpop.xlane.xlu0 %1697 }
 0x285   : > { %v1714_v35 = vadd.f32 %v1713_v47, %v1698_v28 }
 0x286   : > { %v1541_v16 = vpop.xlane.xlu1 %1540 }
 0x287   : > { %v1557_v57 = vadd.f32 %v1556_v29, %v1541_v16 }
 0x288   : > { %v1700_v31 = vpop.xlane.xlu0 %1699 }
 0x289   : > { %v1715_v61 = vadd.f32 %v1714_v35, %v1700_v31 }
 0x28a   : > { %v1543_v55 = vpop.xlane.xlu1 %1542 }
 0x28b   : > { %v1716_v53 = vrot.slane %v1715_v61, 4  ;;  %v1558_v19 = vadd.f32 %v1557_v57, %v1543_v55 }
 0x28c   : > { %v1827_v44 = vpop.xlane.xlu0 %1826 }
 0x28d   : > { %v1717_v60 = vadd.f32 %v1716_v53, %v1715_v61  ;;  %v1559_v9 = vrot.slane %v1558_v19, 4 }
 0x28e   : > { %v1829_v50 = vpop.xlane.xlu1 %1828 }
 0x28f   : > { %v1718_v27 = vrot.slane %v1717_v60, 2  ;;  %v1560_v3 = vadd.f32 %v1559_v9, %v1558_v19  ;;  %v1858_v39 = vadd.f32 %v1829_v50, %v1827_v44 }
 0x290   : > { %v1984_v63 = vpop.xlane.xlu0 %1983 }
 0x291   : > { %v1719_v20 = vadd.f32 %v1718_v27, %v1717_v60  ;;  %v1561_v15 = vrot.slane %v1560_v3, 2  ;;  %v1880_v60 = vld [vmem:[#allocation3 + $0x2] sm:$0x1] }
 0x292   : > { %v1986_v8 = vpop.xlane.xlu1 %1985 }
 0x293   : > { %v1720_v33 = vrot.slane %v1719_v20, 1  ;;  %v1562_v43 = vadd.f32 %v1561_v15, %v1560_v3  ;;  %v2015_v6 = vadd.f32 %v1986_v8, %v1984_v63  ;;  %v2037_v8 = vld [vmem:[#allocation3 + $0x3] sm:$0x1] }
 0x294   : > { %v1831_v4 = vpop.xlane.xlu0 %1830 }
 0x295   : > { %v1721_v18 = vadd.f32 %v1720_v33, %v1719_v20  ;;  %v1563_v37 = vrot.slane %v1562_v43, 1  ;;  %v1859_v14 = vadd.f32 %v1858_v39, %v1831_v4  ;;  %v1881_v20 = vadd.f32 1e-08, %v1880_v60 }
 0x296   : > { %v1988_v34 = vpop.xlane.xlu1 %1987 }
 0x297   : > { %v1722_v26 = vmul.f32 0.5, %v1721_v18  ;;  %v1564_v49 = vadd.f32 %v1563_v37, %v1562_v43  ;;  %v2016_v38 = vadd.f32 %v2015_v6, %v1988_v34  ;;  %v1882_v37 = vmul.f32 64.0, %v1881_v20 }
 0x298   : > { %v1833_v52 = vpop.xlane.xlu0 %1832  ;;  %v2038_v34 = vadd.f32 1e-08, %v2037_v8 }
 0x299   : > { %v1727_v30 = vmul.f32 %v2518_v13, %v1722_v26  ;;  %v1565_v58 = vmul.f32 0.5, %v1564_v49  ;;  %v1860_v41 = vadd.f32 %v1859_v14, %v1833_v52  ;;  %2521 = vrcp.f32 %v1882_v37 }
 0x29a   : > { %v1990_v10 = vpop.xlane.xlu1 %1989 }
 0x29b   : > { %v1570_v54 = vmul.f32 %v2520_v21, %v1565_v58  ;;  %v1728_v12 = vmul.f32 %v2518_v13, %v1727_v30  ;;  %v2017_v47 = vadd.f32 %v2016_v38, %v1990_v10 }
 0x29c   : > { %v1835_v56 = vpop.xlane.xlu0 %1834 }
 0x29d   : > { %v1571_v7 = vmul.f32 %v2520_v21, %v1570_v54  ;;  %v1861_v45 = vadd.f32 %v1860_v41, %v1835_v56  ;;  %v2039_v21 = vmul.f32 64.0, %v2038_v34 }
 0x29e   : > { %v1992_v1 = vpop.xlane.xlu1 %1991 }
 0x29f   : > { %v3867_v5 = vadd.f32 %v1728_v12, %v1571_v7  ;;  %v2018_v11 = vadd.f32 %v2017_v47, %v1992_v1  ;;  %2523 = vrcp.f32 %v2039_v21 }
 0x2a0   : > { %v1837_v32 = vpop.xlane.xlu0 %1836 }
 0x2a1   : > { %v1862_v25 = vadd.f32 %v1861_v45, %v1837_v32 }
 0x2a2   : > { %v1994_v22 = vpop.xlane.xlu1 %1993 }
 0x2a3   : > { %v2019_v46 = vadd.f32 %v2018_v11, %v1994_v22 }
 0x2a4   : > { %v1839_v48 = vpop.xlane.xlu0 %1838 }
 0x2a5   : > { %v1863_v28 = vadd.f32 %v1862_v25, %v1839_v48 }
 0x2a6   : > { %v1996_v62 = vpop.xlane.xlu1 %1995  ;;  %v2522_v39 = vpop.eup %2521 }
 0x2a7   : > { %v2020_v42 = vadd.f32 %v2019_v46, %v1996_v62 }
 0x2a8   : > { %v1841_v2 = vpop.xlane.xlu0 %1840 }
 0x2a9   : > { %v1864_v16 = vadd.f32 %v1863_v28, %v1841_v2 }
 0x2aa   : > { %v1998_v59 = vpop.xlane.xlu1 %1997 }
 0x2ab   : > { %v2021_v61 = vadd.f32 %v2020_v42, %v1998_v59 }
 0x2ac   : > { %v1843_v51 = vpop.xlane.xlu0 %1842  ;;  %v2524_v41 = vpop.eup %2523 }
 0x2ad   : > { %v1865_v31 = vadd.f32 %v1864_v16, %v1843_v51 }
 0x2ae   : > { %v2000_v23 = vpop.xlane.xlu1 %1999 }
 0x2af   : > { %v2022_v53 = vadd.f32 %v2021_v61, %v2000_v23 }
 0x2b0   : > { %v1845_v40 = vpop.xlane.xlu0 %1844 }
 0x2b1   : > { %v1866_v17 = vadd.f32 %v1865_v31, %v1845_v40 }
 0x2b2   : > { %v2002_v0 = vpop.xlane.xlu1 %2001 }
 0x2b3   : > { %v2023_v9 = vadd.f32 %v2022_v53, %v2002_v0 }
 0x2b4   : > { %v1847_v24 = vpop.xlane.xlu0 %1846 }
 0x2b5   : > { %v1867_v19 = vadd.f32 %v1866_v17, %v1847_v24 }
 0x2b6   : > { %v2004_v36 = vpop.xlane.xlu1 %2003 }
 0x2b7   : > { %v2024_v3 = vadd.f32 %v2023_v9, %v2004_v36 }
 0x2b8   : > { %v1849_v35 = vpop.xlane.xlu0 %1848 }
 0x2b9   : > { %v1868_v50 = vadd.f32 %v1867_v19, %v1849_v35 }
 0x2ba   : > { %v2006_v29 = vpop.xlane.xlu1 %2005 }
 0x2bb   : > { %v2025_v33 = vadd.f32 %v2024_v3, %v2006_v29 }
 0x2bc   : > { %v1851_v57 = vpop.xlane.xlu0 %1850 }
 0x2bd   : > { %v1869_v63 = vadd.f32 %v1868_v50, %v1851_v57 }
 0x2be   : > { %v2008_v55 = vpop.xlane.xlu1 %2007 }
 0x2bf   : > { %v2026_v4 = vadd.f32 %v2025_v33, %v2008_v55 }
 0x2c0   : > { %v1853_v44 = vpop.xlane.xlu0 %1852 }
 0x2c1   : > { %v1870_v43 = vadd.f32 %v1869_v63, %v1853_v44 }
 0x2c2   : > { %v2010_v27 = vpop.xlane.xlu1 %2009 }
 0x2c3   : > { %v2027_v13 = vadd.f32 %v2026_v4, %v2010_v27 }
 0x2c4   : > { %v1855_v15 = vpop.xlane.xlu0 %1854 }
 0x2c5   : > { %v1871_v18 = vadd.f32 %v1870_v43, %v1855_v15 }
 0x2c6   : > { %v2012_v26 = vpop.xlane.xlu1 %2011 }
 0x2c7   : > { %v2028_v30 = vadd.f32 %v2027_v13, %v2012_v26 }
 0x2c8   : > { %v1857_v49 = vpop.xlane.xlu0 %1856 }
 0x2c9   : > { %v1872_v52 = vadd.f32 %v1871_v18, %v1857_v49 }
 0x2cb   : > { %v1873_v58 = vrot.slane %v1872_v52, 4 }
 0x2cc   : > { %v2014_v10 = vpop.xlane.xlu0 %2013 }
 0x2cd   : > { %v1874_v54 = vadd.f32 %v1873_v58, %v1872_v52  ;;  %v2029_v56 = vadd.f32 %v2028_v30, %v2014_v10 }
 0x2cf   : > { %v1875_v12 = vrot.slane %v1874_v54, 2  ;;  %v2030_v7 = vrot.slane %v2029_v56, 4 }
 0x2d1   : > { %v1876_v1 = vadd.f32 %v1875_v12, %v1874_v54  ;;  %v2031_v32 = vadd.f32 %v2030_v7, %v2029_v56 }
 0x2d3   : > { %v1877_v22 = vrot.slane %v1876_v1, 1  ;;  %v2032_v48 = vrot.slane %v2031_v32, 2 }
 0x2d5   : > { %v1878_v62 = vadd.f32 %v1877_v22, %v1876_v1  ;;  %v2033_v2 = vadd.f32 %v2032_v48, %v2031_v32 }
 0x2d7   : > { %v1879_v59 = vmul.f32 0.5, %v1878_v62  ;;  %v2034_v51 = vrot.slane %v2033_v2, 1 }
 0x2d9   : > { %v1884_v23 = vmul.f32 %v2522_v39, %v1879_v59  ;;  %v2035_v14 = vadd.f32 %v2034_v51, %v2033_v2 }
 0x2db   : > { %v1885_v40 = vmul.f32 %v2522_v39, %v1884_v23  ;;  %v2036_v6 = vmul.f32 0.5, %v2035_v14 }
 0x2dd   : > { %v2041_v0 = vmul.f32 %v2524_v41, %v2036_v6  ;;  %v1886_v38 = vadd.f32 %v1885_v40, %v3867_v5 }
 0x2df   : > { %v2042_v45 = vmul.f32 %v2524_v41, %v2041_v0 }
 0x2e1   : > { %v2043_v24 = vadd.f32 %v2042_v45, %v1886_v38 }
 0x2e3   : > { %2045 = vst.msk [vmem:[%s248_s29] sm:$0x1] %vm2044_vm3, %v2043_v24 }
 0x2e4 PF: > { %s13_s14 = sadd.s32 1, %s2547_s14   ;;  %s4093_s12 = smov %s2543_s13 }
 0x2e5   : > { %p10_p5 = scmp.ge.s32.totalorder %s13_s14, 4   ;;  %s4094_s13 = smov %s4096_s15 }
 0x2e7   :  { %12 = sbr.rel (!%p10_p5) target bundleno = 2 (0x2), region = 79 }

</bundles_post_ra>
